<compile_context>
chip_gen: v6e
topology: v6e:2x2x1
jax: 0.10.0
libtpu: 0.0.40
codegen_flags: <defaults>
</compile_context>

<pallas_src>
import jax
import jax.numpy as jnp
from jax.experimental import pallas as pl
from jax.experimental.pallas import tpu as pltpu


# ----------------------------------------------------------------------------
# Pallas kernels
# ----------------------------------------------------------------------------
def conv_pool_kernel(pt_ref, wt_ref, b_ref, o_ref):
    """Fused conv GEMM (transposed) + bias + ReLU + 2x2 max-pool.

    pt_ref: (4, K, tm) bf16  patch columns, grouped by pool quadrant (dh*2+dw)
    wt_ref: (Co, K)    bf16  transposed conv weights
    b_ref : (Co, 1)    f32   bias (broadcast along lanes)
    o_ref : (Co, tm)   bf16  pooled, activated output (lane-dense)
    """
    w = wt_ref[...]
    y = jnp.dot(w, pt_ref[0], preferred_element_type=jnp.float32)
    y = jnp.maximum(y, jnp.dot(w, pt_ref[1], preferred_element_type=jnp.float32))
    y = jnp.maximum(y, jnp.dot(w, pt_ref[2], preferred_element_type=jnp.float32))
    y = jnp.maximum(y, jnp.dot(w, pt_ref[3], preferred_element_type=jnp.float32))
    # pool(relu(conv + b)) == relu(max_quadrant(conv) + b): bias/ReLU commute with max
    o_ref[...] = jnp.maximum(y + b_ref[...], 0.0).astype(o_ref.dtype)


def fc_fused_kernel(x_ref, w1_ref, b1_ref, w2_ref, b2_ref, o_ref, acc_ref):
    """fc1 (bf16 K-pipelined stream, f32 VMEM accumulator) + ReLU + fc2 epilogue."""
    k = pl.program_id(0)

    @pl.when(k == 0)
    def _():
        acc_ref[...] = jnp.zeros_like(acc_ref)

    acc_ref[...] += jnp.dot(x_ref[...], w1_ref[...],
                            preferred_element_type=jnp.float32)

    @pl.when(k == pl.num_programs(0) - 1)
    def _():
        h1 = jnp.maximum(acc_ref[...] + b1_ref[...], 0.0)
        o_ref[...] = (jnp.dot(h1, w2_ref[...],
                              preferred_element_type=jnp.float32)
                      + b2_ref[...]).astype(o_ref.dtype)


# ----------------------------------------------------------------------------
# Tiling helpers
# ----------------------------------------------------------------------------
def _largest_aligned_divisor(dim, max_tile):
    """Largest multiple-of-128 divisor of `dim` that is <= max_tile (else dim)."""
    best = None
    t = 128
    while t <= min(dim, max_tile):
        if dim % t == 0:
            best = t
        t += 128
    return best if best is not None else dim


def _conv_m_tile(cout, mp, *, acc_budget_bytes=72 << 10):
    """Cap the live running-max (Cout, m_tile) f32 at ~72 KB so the 64-vreg
    file does not spill; this also yields >=3 parallel grid steps for the
    first two conv layers (keeps a v7x second TensorCore busy)."""
    m_cap = max(128, acc_budget_bytes // (4 * cout))
    return _largest_aligned_divisor(mp, m_cap)


# ----------------------------------------------------------------------------
# Layer wrappers
# ----------------------------------------------------------------------------
def conv3x3_relu_pool_T(a_t, wt, b):
    """Input a_t: (Cin, N, H, W).  Output: (Cout, N, H//2, W//2) in bf16.

    conv(3x3, pad=1) + bias + ReLU + maxpool(2,2) fused in one pallas_call.
    wt: (Cout, 9*Cin) bf16 prepared weights; b: (Cout, 1) f32 bias.
    """
    cin, n, h, w = a_t.shape
    cout, k = wt.shape
    ho, wo = h // 2, w // 2
    mp = n * ho * wo

    # --- glue: quadrant-grouped, transposed bf16 patch tensor (4, K, Mp) -----
    # TODO(synk): fold this im2col into the kernel (see header) to remove the
    # patch-tensor HBM round trip entirely.
    ap = jnp.pad(a_t, ((0, 0), (0, 0), (1, 1), (1, 1))).astype(jnp.bfloat16)
    taps = jnp.stack([ap[:, :, kh:kh + h, kw:kw + w]
                      for kh in range(3) for kw in range(3)], axis=0)
    taps = taps.reshape(9, cin, n, ho, 2, wo, 2)        # split pool quadrants
    pt = jnp.transpose(taps, (4, 6, 0, 1, 2, 3, 5)).reshape(4, k, mp)

    m_tile = _conv_m_tile(cout, mp)
    grid = (mp // m_tile,)

    flops = 2 * k * cout * 4 * mp
    bytes_accessed = pt.size * 2 + wt.size * 2 + b.size * 4 + cout * mp * 2

    out = pl.pallas_call(
        conv_pool_kernel,
        out_shape=jax.ShapeDtypeStruct((cout, mp), jnp.bfloat16),
        grid=grid,
        in_specs=[
            pl.BlockSpec((4, k, m_tile), lambda m: (0, 0, m)),
            pl.BlockSpec((cout, k), lambda m: (0, 0)),   # resident: DMA'd once
            pl.BlockSpec((cout, 1), lambda m: (0, 0)),
        ],
        out_specs=pl.BlockSpec((cout, m_tile), lambda m: (0, m)),
        compiler_params=pltpu.CompilerParams(
            dimension_semantics=("parallel",)),
        cost_estimate=pl.CostEstimate(flops=flops, transcendentals=0,
                                      bytes_accessed=bytes_accessed),
    )(pt, wt, b)
    return out.reshape(cout, n, ho, wo)


def fc_head(feat, w1, b1, w2, b2):
    """out = relu(feat @ w1 + b1) @ w2 + b2, one pallas_call.

    feat (M, K) bf16, w1 (K, N1) bf16, b1 (1, N1) f32, w2 (N1, N2) f32.
    """
    m, kdim = feat.shape
    n1 = w1.shape[1]
    n2 = w2.shape[1]
    # K tile: ~2.25 MB bf16 weight blocks -> 3 K-steps; double-buffered peak
    # ~4.6 MB, inside default scoped VMEM on v5e/v6e/v7x.
    tk = _largest_aligned_divisor(
        kdim, max(128, (5 << 20) // (2 * n1 * w1.dtype.itemsize)))
    nk = kdim // tk

    flops = 2 * m * kdim * n1 + 2 * m * n1 * n2
    bytes_accessed = (feat.size * feat.dtype.itemsize
                      + w1.size * w1.dtype.itemsize
                      + b1.size * 4 + w2.size * 4 + b2.size * 4 + m * n2 * 4)

    return pl.pallas_call(
        fc_fused_kernel,
        out_shape=jax.ShapeDtypeStruct((m, n2), jnp.float32),
        grid=(nk,),
        in_specs=[
            pl.BlockSpec((m, tk), lambda kk: (0, kk)),
            pl.BlockSpec((tk, n1), lambda kk: (kk, 0)),
            pl.BlockSpec((1, n1), lambda kk: (0, 0)),
            pl.BlockSpec((n1, n2), lambda kk: (0, 0)),
            pl.BlockSpec((1, n2), lambda kk: (0, 0)),
        ],
        out_specs=pl.BlockSpec((m, n2), lambda kk: (0, 0)),
        scratch_shapes=[pltpu.VMEM((m, n1), jnp.float32)],
        compiler_params=pltpu.CompilerParams(
            dimension_semantics=("arbitrary",)),
        cost_estimate=pl.CostEstimate(flops=flops, transcendentals=0,
                                      bytes_accessed=bytes_accessed),
    )(feat, w1, b1, w2, b2)


def simple_cnn_forward(x_nchw, params):
    # channels-on-sublanes / flattened-spatial-on-lanes layout for all convs
    a = jnp.transpose(x_nchw, (1, 0, 2, 3))                       # (Cin, N, H, W)
    a = conv3x3_relu_pool_T(a, params["w1"], params["b1"])        # (16, N, 48, 48)
    a = conv3x3_relu_pool_T(a, params["w2"], params["b2"])        # (32, N, 24, 24)
    a = conv3x3_relu_pool_T(a, params["w3"], params["b3"])        # (48, N, 12, 12)
    n = x_nchw.shape[0]
    # PyTorch flattens from NCHW: feature order is (c, h, w)
    feat = jnp.transpose(a, (1, 0, 2, 3)).reshape(n, 48 * 12 * 12)   # bf16
    return fc_head(feat, params["wfc1"], params["bfc1"],
                   params["wfc2"], params["bfc2"])                # (N, 2) f32


# ----------------------------------------------------------------------------
# Parameter init (raw, PyTorch-like layouts) + one-time prep (casts/transposes)
# ----------------------------------------------------------------------------
def init_params(key):
    ks = jax.random.split(key, 10)
    s = 0.05
    return {
        "w1": jax.random.normal(ks[0], (3, 3, 3, 16), jnp.float32) * s,
        "b1": jax.random.normal(ks[1], (16,), jnp.float32) * s,
        "w2": jax.random.normal(ks[2], (3, 3, 16, 32), jnp.float32) * s,
        "b2": jax.random.normal(ks[3], (32,), jnp.float32) * s,
        "w3": jax.random.normal(ks[4], (3, 3, 32, 48), jnp.float32) * s,
        "b3": jax.random.normal(ks[5], (48,), jnp.float32) * s,
        "wfc1": jax.random.normal(ks[6], (48 * 12 * 12, 512), jnp.float32) * s,
        "bfc1": jax.random.normal(ks[7], (512,), jnp.float32) * s,
        "wfc2": jax.random.normal(ks[8], (512, 2), jnp.float32) * s,
        "bfc2": jax.random.normal(ks[9], (2,), jnp.float32) * s,
    }


def prepare_params(raw):
    """One-time (outside the hot path): transpose conv weights to (Cout, K) and
    cast the streamed GEMM operands (conv weights, fc1 weight) to bf16."""
    def conv_wt(w_hwio):
        kh, kw, cin, cout = w_hwio.shape
        return jnp.transpose(w_hwio.reshape(kh * kw * cin, cout)).astype(jnp.bfloat16)

    return {
        "w1": conv_wt(raw["w1"]), "b1": raw["b1"].reshape(-1, 1).astype(jnp.float32),
        "w2": conv_wt(raw["w2"]), "b2": raw["b2"].reshape(-1, 1).astype(jnp.float32),
        "w3": conv_wt(raw["w3"]), "b3": raw["b3"].reshape(-1, 1).astype(jnp.float32),
        "wfc1": raw["wfc1"].astype(jnp.bfloat16),
        "bfc1": raw["bfc1"].reshape(1, -1).astype(jnp.float32),
        "wfc2": raw["wfc2"].astype(jnp.float32),
        "bfc2": raw["bfc2"].reshape(1, -1).astype(jnp.float32),
    }


if __name__ == "__main__":
    key = jax.random.PRNGKey(0)
    k_x, k_p = jax.random.split(key)
    # 96x96 input: 96 -> 48 -> 24 -> 12 after three 2x2 pools (matches fc1 = 48*12*12)
    x = jax.random.normal(k_x, (2, 3, 96, 96), jnp.float32)
    params = prepare_params(init_params(k_p))   # bf16 casts done once, off hot path

    fwd = jax.jit(simple_cnn_forward)
    out = jax.block_until_ready(fwd(x, params))
    assert out.shape == (2, 2), out.shape
    assert out.dtype == jnp.float32
    print("KERNEL_OK")
</pallas_src>

<mosaic_0001>
module attributes {stable_mosaic.version = 11 : i64} {
  func.func @conv_pool_kernel(%arg0: i32, %arg1: memref<4x27x1152xbf16, #tpu.memory_space<vmem>>, %arg2: memref<16x27xbf16, #tpu.memory_space<vmem>>, %arg3: memref<16x1xf32, #tpu.memory_space<vmem>>, %arg4: memref<16x1152xbf16, #tpu.memory_space<vmem>>) attributes {dimension_semantics = [#tpu.dimension_semantics<parallel>], iteration_bounds = array<i64: 4>, scalar_prefetch = 0 : i64, scratch_operands = 0 : i64, tpu.core_type = #tpu.core_type<tc>, window_params = [{transform_indices = @transform_0, window_bounds = array<i64: 4, 27, 1152>}, {pipeline_mode = #tpu.pipeline_mode<synchronous>, transform_indices = @transform_1, window_bounds = array<i64: 16, 27>}, {pipeline_mode = #tpu.pipeline_mode<synchronous>, transform_indices = @transform_2, window_bounds = array<i64: 16, 1>}, {transform_indices = @transform_3, window_bounds = array<i64: 16, 1152>}]} {
    %c0 = arith.constant 0 : index
    %c0_0 = arith.constant 0 : index
    %0 = vector.load %arg2[%c0, %c0_0] : memref<16x27xbf16, #tpu.memory_space<vmem>>, vector<16x27xbf16>
    %c0_1 = arith.constant 0 : index
    %c0_2 = arith.constant 0 : index
    %c0_3 = arith.constant 0 : index
    %1 = vector.load %arg1[%c0_1, %c0_2, %c0_3] : memref<4x27x1152xbf16, #tpu.memory_space<vmem>>, vector<1x27x1152xbf16>
    %2 = vector.shape_cast %1 : vector<1x27x1152xbf16> to vector<27x1152xbf16>
    %cst = arith.constant dense<0.000000e+00> : vector<16x1152xf32>
    %3 = tpu.matmul %0, %2, %cst {dimension_numbers = #tpu.dot_dimension_numbers<[1], [0], [0], [1], [0, 0, 1, 1], [], []>} : vector<16x27xbf16>, vector<27x1152xbf16>, vector<16x1152xf32> -> vector<16x1152xf32>
    %c1 = arith.constant 1 : index
    %c0_4 = arith.constant 0 : index
    %c0_5 = arith.constant 0 : index
    %4 = vector.load %arg1[%c1, %c0_4, %c0_5] : memref<4x27x1152xbf16, #tpu.memory_space<vmem>>, vector<1x27x1152xbf16>
    %5 = vector.shape_cast %4 : vector<1x27x1152xbf16> to vector<27x1152xbf16>
    %cst_6 = arith.constant dense<0.000000e+00> : vector<16x1152xf32>
    %6 = tpu.matmul %0, %5, %cst_6 {dimension_numbers = #tpu.dot_dimension_numbers<[1], [0], [0], [1], [0, 0, 1, 1], [], []>} : vector<16x27xbf16>, vector<27x1152xbf16>, vector<16x1152xf32> -> vector<16x1152xf32>
    %7 = arith.maximumf %3, %6 : vector<16x1152xf32>
    %c2 = arith.constant 2 : index
    %c0_7 = arith.constant 0 : index
    %c0_8 = arith.constant 0 : index
    %8 = vector.load %arg1[%c2, %c0_7, %c0_8] : memref<4x27x1152xbf16, #tpu.memory_space<vmem>>, vector<1x27x1152xbf16>
    %9 = vector.shape_cast %8 : vector<1x27x1152xbf16> to vector<27x1152xbf16>
    %cst_9 = arith.constant dense<0.000000e+00> : vector<16x1152xf32>
    %10 = tpu.matmul %0, %9, %cst_9 {dimension_numbers = #tpu.dot_dimension_numbers<[1], [0], [0], [1], [0, 0, 1, 1], [], []>} : vector<16x27xbf16>, vector<27x1152xbf16>, vector<16x1152xf32> -> vector<16x1152xf32>
    %11 = arith.maximumf %7, %10 : vector<16x1152xf32>
    %c3 = arith.constant 3 : index
    %c0_10 = arith.constant 0 : index
    %c0_11 = arith.constant 0 : index
    %12 = vector.load %arg1[%c3, %c0_10, %c0_11] : memref<4x27x1152xbf16, #tpu.memory_space<vmem>>, vector<1x27x1152xbf16>
    %13 = vector.shape_cast %12 : vector<1x27x1152xbf16> to vector<27x1152xbf16>
    %cst_12 = arith.constant dense<0.000000e+00> : vector<16x1152xf32>
    %14 = tpu.matmul %0, %13, %cst_12 {dimension_numbers = #tpu.dot_dimension_numbers<[1], [0], [0], [1], [0, 0, 1, 1], [], []>} : vector<16x27xbf16>, vector<27x1152xbf16>, vector<16x1152xf32> -> vector<16x1152xf32>
    %15 = arith.maximumf %11, %14 : vector<16x1152xf32>
    %c0_13 = arith.constant 0 : index
    %c0_14 = arith.constant 0 : index
    %16 = vector.load %arg3[%c0_13, %c0_14] : memref<16x1xf32, #tpu.memory_space<vmem>>, vector<16x1xf32>
    %17 = vector.broadcast %16 : vector<16x1xf32> to vector<16x1152xf32>
    %18 = arith.addf %15, %17 : vector<16x1152xf32>
    %cst_15 = arith.constant 0.000000e+00 : f32
    %19 = vector.broadcast %cst_15 : f32 to vector<16x1152xf32>
    %20 = arith.maximumf %18, %19 : vector<16x1152xf32>
    %21 = arith.truncf %20 : vector<16x1152xf32> to vector<16x1152xbf16>
    %c0_16 = arith.constant 0 : index
    %c0_17 = arith.constant 0 : index
    %22 = vector.load %arg4[%c0_16, %c0_17] : memref<16x1152xbf16, #tpu.memory_space<vmem>>, vector<16x1152xbf16>
    tpu.vector_store %arg4[%c0_16, %c0_17], %21 {strides = array<i32>} : memref<16x1152xbf16, #tpu.memory_space<vmem>>, vector<16x1152xbf16>,
    return
  }
  func.func @transform_0(%arg0: i32) -> (i32, i32, i32) {
    %c0_i32 = arith.constant 0 : i32
    %c0_i32_0 = arith.constant 0 : i32
    %c0_i32_1 = arith.constant 0 : i32
    return %c0_i32, %c0_i32_0, %arg0 : i32, i32, i32
  }
  func.func @transform_1(%arg0: i32) -> (i32, i32) {
    %c0_i32 = arith.constant 0 : i32
    %c0_i32_0 = arith.constant 0 : i32
    %c0_i32_1 = arith.constant 0 : i32
    return %c0_i32, %c0_i32_0 : i32, i32
  }
  func.func @transform_2(%arg0: i32) -> (i32, i32) {
    %c0_i32 = arith.constant 0 : i32
    %c0_i32_0 = arith.constant 0 : i32
    %c0_i32_1 = arith.constant 0 : i32
    return %c0_i32, %c0_i32_0 : i32, i32
  }
  func.func @transform_3(%arg0: i32) -> (i32, i32) {
    %c0_i32 = arith.constant 0 : i32
    %c0_i32_0 = arith.constant 0 : i32
    return %c0_i32, %arg0 : i32, i32
  }
}

module attributes {stable_mosaic.version = 11 : i64} {
  func.func @conv_pool_kernel(%arg0: i32, %arg1: memref<4x144x384xbf16, #tpu.memory_space<vmem>>, %arg2: memref<32x144xbf16, #tpu.memory_space<vmem>>, %arg3: memref<32x1xf32, #tpu.memory_space<vmem>>, %arg4: memref<32x384xbf16, #tpu.memory_space<vmem>>) attributes {dimension_semantics = [#tpu.dimension_semantics<parallel>], iteration_bounds = array<i64: 3>, scalar_prefetch = 0 : i64, scratch_operands = 0 : i64, tpu.core_type = #tpu.core_type<tc>, window_params = [{transform_indices = @transform_0, window_bounds = array<i64: 4, 144, 384>}, {pipeline_mode = #tpu.pipeline_mode<synchronous>, transform_indices = @transform_1, window_bounds = array<i64: 32, 144>}, {pipeline_mode = #tpu.pipeline_mode<synchronous>, transform_indices = @transform_2, window_bounds = array<i64: 32, 1>}, {transform_indices = @transform_3, window_bounds = array<i64: 32, 384>}]} {
    %c0 = arith.constant 0 : index
    %c0_0 = arith.constant 0 : index
    %0 = vector.load %arg2[%c0, %c0_0] : memref<32x144xbf16, #tpu.memory_space<vmem>>, vector<32x144xbf16>
    %c0_1 = arith.constant 0 : index
    %c0_2 = arith.constant 0 : index
    %c0_3 = arith.constant 0 : index
    %1 = vector.load %arg1[%c0_1, %c0_2, %c0_3] : memref<4x144x384xbf16, #tpu.memory_space<vmem>>, vector<1x144x384xbf16>
    %2 = vector.shape_cast %1 : vector<1x144x384xbf16> to vector<144x384xbf16>
    %cst = arith.constant dense<0.000000e+00> : vector<32x384xf32>
    %3 = tpu.matmul %0, %2, %cst {dimension_numbers = #tpu.dot_dimension_numbers<[1], [0], [0], [1], [0, 0, 1, 1], [], []>} : vector<32x144xbf16>, vector<144x384xbf16>, vector<32x384xf32> -> vector<32x384xf32>
    %c1 = arith.constant 1 : index
    %c0_4 = arith.constant 0 : index
    %c0_5 = arith.constant 0 : index
    %4 = vector.load %arg1[%c1, %c0_4, %c0_5] : memref<4x144x384xbf16, #tpu.memory_space<vmem>>, vector<1x144x384xbf16>
    %5 = vector.shape_cast %4 : vector<1x144x384xbf16> to vector<144x384xbf16>
    %cst_6 = arith.constant dense<0.000000e+00> : vector<32x384xf32>
    %6 = tpu.matmul %0, %5, %cst_6 {dimension_numbers = #tpu.dot_dimension_numbers<[1], [0], [0], [1], [0, 0, 1, 1], [], []>} : vector<32x144xbf16>, vector<144x384xbf16>, vector<32x384xf32> -> vector<32x384xf32>
    %7 = arith.maximumf %3, %6 : vector<32x384xf32>
    %c2 = arith.constant 2 : index
    %c0_7 = arith.constant 0 : index
    %c0_8 = arith.constant 0 : index
    %8 = vector.load %arg1[%c2, %c0_7, %c0_8] : memref<4x144x384xbf16, #tpu.memory_space<vmem>>, vector<1x144x384xbf16>
    %9 = vector.shape_cast %8 : vector<1x144x384xbf16> to vector<144x384xbf16>
    %cst_9 = arith.constant dense<0.000000e+00> : vector<32x384xf32>
    %10 = tpu.matmul %0, %9, %cst_9 {dimension_numbers = #tpu.dot_dimension_numbers<[1], [0], [0], [1], [0, 0, 1, 1], [], []>} : vector<32x144xbf16>, vector<144x384xbf16>, vector<32x384xf32> -> vector<32x384xf32>
    %11 = arith.maximumf %7, %10 : vector<32x384xf32>
    %c3 = arith.constant 3 : index
    %c0_10 = arith.constant 0 : index
    %c0_11 = arith.constant 0 : index
    %12 = vector.load %arg1[%c3, %c0_10, %c0_11] : memref<4x144x384xbf16, #tpu.memory_space<vmem>>, vector<1x144x384xbf16>
    %13 = vector.shape_cast %12 : vector<1x144x384xbf16> to vector<144x384xbf16>
    %cst_12 = arith.constant dense<0.000000e+00> : vector<32x384xf32>
    %14 = tpu.matmul %0, %13, %cst_12 {dimension_numbers = #tpu.dot_dimension_numbers<[1], [0], [0], [1], [0, 0, 1, 1], [], []>} : vector<32x144xbf16>, vector<144x384xbf16>, vector<32x384xf32> -> vector<32x384xf32>
    %15 = arith.maximumf %11, %14 : vector<32x384xf32>
    %c0_13 = arith.constant 0 : index
    %c0_14 = arith.constant 0 : index
    %16 = vector.load %arg3[%c0_13, %c0_14] : memref<32x1xf32, #tpu.memory_space<vmem>>, vector<32x1xf32>
    %17 = vector.broadcast %16 : vector<32x1xf32> to vector<32x384xf32>
    %18 = arith.addf %15, %17 : vector<32x384xf32>
    %cst_15 = arith.constant 0.000000e+00 : f32
    %19 = vector.broadcast %cst_15 : f32 to vector<32x384xf32>
    %20 = arith.maximumf %18, %19 : vector<32x384xf32>
    %21 = arith.truncf %20 : vector<32x384xf32> to vector<32x384xbf16>
    %c0_16 = arith.constant 0 : index
    %c0_17 = arith.constant 0 : index
    %22 = vector.load %arg4[%c0_16, %c0_17] : memref<32x384xbf16, #tpu.memory_space<vmem>>, vector<32x384xbf16>
    tpu.vector_store %arg4[%c0_16, %c0_17], %21 {strides = array<i32>} : memref<32x384xbf16, #tpu.memory_space<vmem>>, vector<32x384xbf16>,
    return
  }
  func.func @transform_0(%arg0: i32) -> (i32, i32, i32) {
    %c0_i32 = arith.constant 0 : i32
    %c0_i32_0 = arith.constant 0 : i32
    %c0_i32_1 = arith.constant 0 : i32
    return %c0_i32, %c0_i32_0, %arg0 : i32, i32, i32
  }
  func.func @transform_1(%arg0: i32) -> (i32, i32) {
    %c0_i32 = arith.constant 0 : i32
    %c0_i32_0 = arith.constant 0 : i32
    %c0_i32_1 = arith.constant 0 : i32
    return %c0_i32, %c0_i32_0 : i32, i32
  }
  func.func @transform_2(%arg0: i32) -> (i32, i32) {
    %c0_i32 = arith.constant 0 : i32
    %c0_i32_0 = arith.constant 0 : i32
    %c0_i32_1 = arith.constant 0 : i32
    return %c0_i32, %c0_i32_0 : i32, i32
  }
  func.func @transform_3(%arg0: i32) -> (i32, i32) {
    %c0_i32 = arith.constant 0 : i32
    %c0_i32_0 = arith.constant 0 : i32
    return %c0_i32, %arg0 : i32, i32
  }
}

module attributes {stable_mosaic.version = 11 : i64} {
  func.func @conv_pool_kernel(%arg0: i32, %arg1: memref<4x288x288xbf16, #tpu.memory_space<vmem>>, %arg2: memref<48x288xbf16, #tpu.memory_space<vmem>>, %arg3: memref<48x1xf32, #tpu.memory_space<vmem>>, %arg4: memref<48x288xbf16, #tpu.memory_space<vmem>>) attributes {dimension_semantics = [#tpu.dimension_semantics<parallel>], iteration_bounds = array<i64: 1>, scalar_prefetch = 0 : i64, scratch_operands = 0 : i64, tpu.core_type = #tpu.core_type<tc>, window_params = [{transform_indices = @transform_0, window_bounds = array<i64: 4, 288, 288>}, {pipeline_mode = #tpu.pipeline_mode<synchronous>, transform_indices = @transform_1, window_bounds = array<i64: 48, 288>}, {pipeline_mode = #tpu.pipeline_mode<synchronous>, transform_indices = @transform_2, window_bounds = array<i64: 48, 1>}, {transform_indices = @transform_3, window_bounds = array<i64: 48, 288>}]} {
    %c0 = arith.constant 0 : index
    %c0_0 = arith.constant 0 : index
    %0 = vector.load %arg2[%c0, %c0_0] : memref<48x288xbf16, #tpu.memory_space<vmem>>, vector<48x288xbf16>
    %c0_1 = arith.constant 0 : index
    %c0_2 = arith.constant 0 : index
    %c0_3 = arith.constant 0 : index
    %1 = vector.load %arg1[%c0_1, %c0_2, %c0_3] : memref<4x288x288xbf16, #tpu.memory_space<vmem>>, vector<1x288x288xbf16>
    %2 = vector.shape_cast %1 : vector<1x288x288xbf16> to vector<288x288xbf16>
    %cst = arith.constant dense<0.000000e+00> : vector<48x288xf32>
    %3 = tpu.matmul %0, %2, %cst {dimension_numbers = #tpu.dot_dimension_numbers<[1], [0], [0], [1], [0, 0, 1, 1], [], []>} : vector<48x288xbf16>, vector<288x288xbf16>, vector<48x288xf32> -> vector<48x288xf32>
    %c1 = arith.constant 1 : index
    %c0_4 = arith.constant 0 : index
    %c0_5 = arith.constant 0 : index
    %4 = vector.load %arg1[%c1, %c0_4, %c0_5] : memref<4x288x288xbf16, #tpu.memory_space<vmem>>, vector<1x288x288xbf16>
    %5 = vector.shape_cast %4 : vector<1x288x288xbf16> to vector<288x288xbf16>
    %cst_6 = arith.constant dense<0.000000e+00> : vector<48x288xf32>
    %6 = tpu.matmul %0, %5, %cst_6 {dimension_numbers = #tpu.dot_dimension_numbers<[1], [0], [0], [1], [0, 0, 1, 1], [], []>} : vector<48x288xbf16>, vector<288x288xbf16>, vector<48x288xf32> -> vector<48x288xf32>
    %7 = arith.maximumf %3, %6 : vector<48x288xf32>
    %c2 = arith.constant 2 : index
    %c0_7 = arith.constant 0 : index
    %c0_8 = arith.constant 0 : index
    %8 = vector.load %arg1[%c2, %c0_7, %c0_8] : memref<4x288x288xbf16, #tpu.memory_space<vmem>>, vector<1x288x288xbf16>
    %9 = vector.shape_cast %8 : vector<1x288x288xbf16> to vector<288x288xbf16>
    %cst_9 = arith.constant dense<0.000000e+00> : vector<48x288xf32>
    %10 = tpu.matmul %0, %9, %cst_9 {dimension_numbers = #tpu.dot_dimension_numbers<[1], [0], [0], [1], [0, 0, 1, 1], [], []>} : vector<48x288xbf16>, vector<288x288xbf16>, vector<48x288xf32> -> vector<48x288xf32>
    %11 = arith.maximumf %7, %10 : vector<48x288xf32>
    %c3 = arith.constant 3 : index
    %c0_10 = arith.constant 0 : index
    %c0_11 = arith.constant 0 : index
    %12 = vector.load %arg1[%c3, %c0_10, %c0_11] : memref<4x288x288xbf16, #tpu.memory_space<vmem>>, vector<1x288x288xbf16>
    %13 = vector.shape_cast %12 : vector<1x288x288xbf16> to vector<288x288xbf16>
    %cst_12 = arith.constant dense<0.000000e+00> : vector<48x288xf32>
    %14 = tpu.matmul %0, %13, %cst_12 {dimension_numbers = #tpu.dot_dimension_numbers<[1], [0], [0], [1], [0, 0, 1, 1], [], []>} : vector<48x288xbf16>, vector<288x288xbf16>, vector<48x288xf32> -> vector<48x288xf32>
    %15 = arith.maximumf %11, %14 : vector<48x288xf32>
    %c0_13 = arith.constant 0 : index
    %c0_14 = arith.constant 0 : index
    %16 = vector.load %arg3[%c0_13, %c0_14] : memref<48x1xf32, #tpu.memory_space<vmem>>, vector<48x1xf32>
    %17 = vector.broadcast %16 : vector<48x1xf32> to vector<48x288xf32>
    %18 = arith.addf %15, %17 : vector<48x288xf32>
    %cst_15 = arith.constant 0.000000e+00 : f32
    %19 = vector.broadcast %cst_15 : f32 to vector<48x288xf32>
    %20 = arith.maximumf %18, %19 : vector<48x288xf32>
    %21 = arith.truncf %20 : vector<48x288xf32> to vector<48x288xbf16>
    %c0_16 = arith.constant 0 : index
    %c0_17 = arith.constant 0 : index
    %22 = vector.load %arg4[%c0_16, %c0_17] : memref<48x288xbf16, #tpu.memory_space<vmem>>, vector<48x288xbf16>
    tpu.vector_store %arg4[%c0_16, %c0_17], %21 {strides = array<i32>} : memref<48x288xbf16, #tpu.memory_space<vmem>>, vector<48x288xbf16>,
    return
  }
  func.func @transform_0(%arg0: i32) -> (i32, i32, i32) {
    %c0_i32 = arith.constant 0 : i32
    %c0_i32_0 = arith.constant 0 : i32
    %c0_i32_1 = arith.constant 0 : i32
    return %c0_i32, %c0_i32_0, %arg0 : i32, i32, i32
  }
  func.func @transform_1(%arg0: i32) -> (i32, i32) {
    %c0_i32 = arith.constant 0 : i32
    %c0_i32_0 = arith.constant 0 : i32
    %c0_i32_1 = arith.constant 0 : i32
    return %c0_i32, %c0_i32_0 : i32, i32
  }
  func.func @transform_2(%arg0: i32) -> (i32, i32) {
    %c0_i32 = arith.constant 0 : i32
    %c0_i32_0 = arith.constant 0 : i32
    %c0_i32_1 = arith.constant 0 : i32
    return %c0_i32, %c0_i32_0 : i32, i32
  }
  func.func @transform_3(%arg0: i32) -> (i32, i32) {
    %c0_i32 = arith.constant 0 : i32
    %c0_i32_0 = arith.constant 0 : i32
    return %c0_i32, %arg0 : i32, i32
  }
}

module attributes {stable_mosaic.version = 11 : i64} {
  func.func @fc_fused_kernel(%arg0: i32, %arg1: memref<2x2304xbf16, #tpu.memory_space<vmem>>, %arg2: memref<2304x512xbf16, #tpu.memory_space<vmem>>, %arg3: memref<1x512xf32, #tpu.memory_space<vmem>>, %arg4: memref<512x2xf32, #tpu.memory_space<vmem>>, %arg5: memref<1x2xf32, #tpu.memory_space<vmem>>, %arg6: memref<2x2xf32, #tpu.memory_space<vmem>>, %arg7: memref<2x512xf32, #tpu.memory_space<vmem>>) attributes {dimension_semantics = [#tpu.dimension_semantics<arbitrary>], iteration_bounds = array<i64: 3>, scalar_prefetch = 0 : i64, scratch_operands = 1 : i64, tpu.core_type = #tpu.core_type<tc>, window_params = [{transform_indices = @transform_0, window_bounds = array<i64: 2, 2304>}, {transform_indices = @transform_1, window_bounds = array<i64: 2304, 512>}, {pipeline_mode = #tpu.pipeline_mode<synchronous>, transform_indices = @transform_2, window_bounds = array<i64: 1, 512>}, {pipeline_mode = #tpu.pipeline_mode<synchronous>, transform_indices = @transform_3, window_bounds = array<i64: 512, 2>}, {pipeline_mode = #tpu.pipeline_mode<synchronous>, transform_indices = @transform_4, window_bounds = array<i64: 1, 2>}, {pipeline_mode = #tpu.pipeline_mode<synchronous>, transform_indices = @transform_5, window_bounds = array<i64: 2, 2>}]} {
    %c0_i32 = arith.constant 0 : i32
    %0 = arith.cmpi eq, %arg0, %c0_i32 : i32
    %1 = arith.extui %0 : i1 to i32
    %c0_i32_0 = arith.constant 0 : i32
    %2 = arith.cmpi ne, %1, %c0_i32_0 : i32
    scf.if %2 {
      %cst_9 = arith.constant 0.000000e+00 : f32
      %12 = vector.broadcast %cst_9 : f32 to vector<2x512xf32>
      %c0_10 = arith.constant 0 : index
      %c0_11 = arith.constant 0 : index
      %13 = vector.load %arg7[%c0_10, %c0_11] : memref<2x512xf32, #tpu.memory_space<vmem>>, vector<2x512xf32>
      tpu.vector_store %arg7[%c0_10, %c0_11], %12 {strides = array<i32>} : memref<2x512xf32, #tpu.memory_space<vmem>>, vector<2x512xf32>,
    } else {
    }
    %c0 = arith.constant 0 : index
    %c0_1 = arith.constant 0 : index
    %3 = vector.load %arg7[%c0, %c0_1] : memref<2x512xf32, #tpu.memory_space<vmem>>, vector<2x512xf32>
    %c0_2 = arith.constant 0 : index
    %c0_3 = arith.constant 0 : index
    %4 = vector.load %arg1[%c0_2, %c0_3] : memref<2x2304xbf16, #tpu.memory_space<vmem>>, vector<2x2304xbf16>
    %c0_4 = arith.constant 0 : index
    %c0_5 = arith.constant 0 : index
    %5 = vector.load %arg2[%c0_4, %c0_5] : memref<2304x512xbf16, #tpu.memory_space<vmem>>, vector<2304x512xbf16>
    %cst = arith.constant dense<0.000000e+00> : vector<2x512xf32>
    %6 = tpu.matmul %4, %5, %cst {dimension_numbers = #tpu.dot_dimension_numbers<[1], [0], [0], [1], [0, 0, 1, 1], [], []>} : vector<2x2304xbf16>, vector<2304x512xbf16>, vector<2x512xf32> -> vector<2x512xf32>
    %7 = arith.addf %3, %6 : vector<2x512xf32>
    %c0_6 = arith.constant 0 : index
    %c0_7 = arith.constant 0 : index
    %8 = vector.load %arg7[%c0_6, %c0_7] : memref<2x512xf32, #tpu.memory_space<vmem>>, vector<2x512xf32>
    tpu.vector_store %arg7[%c0_6, %c0_7], %7 {strides = array<i32>} : memref<2x512xf32, #tpu.memory_space<vmem>>, vector<2x512xf32>,
    %c2_i32 = arith.constant 2 : i32
    %9 = arith.cmpi eq, %arg0, %c2_i32 : i32
    %10 = arith.extui %9 : i1 to i32
    %c0_i32_8 = arith.constant 0 : i32
    %11 = arith.cmpi ne, %10, %c0_i32_8 : i32
    scf.if %11 {
      %c0_9 = arith.constant 0 : index
      %c0_10 = arith.constant 0 : index
      %12 = vector.load %arg7[%c0_9, %c0_10] : memref<2x512xf32, #tpu.memory_space<vmem>>, vector<2x512xf32>
      %c0_11 = arith.constant 0 : index
      %c0_12 = arith.constant 0 : index
      %13 = vector.load %arg3[%c0_11, %c0_12] : memref<1x512xf32, #tpu.memory_space<vmem>>, vector<1x512xf32>
      %14 = vector.broadcast %13 : vector<1x512xf32> to vector<2x512xf32>
      %15 = arith.addf %12, %14 : vector<2x512xf32>
      %cst_13 = arith.constant 0.000000e+00 : f32
      %16 = vector.broadcast %cst_13 : f32 to vector<2x512xf32>
      %17 = arith.maximumf %15, %16 : vector<2x512xf32>
      %c0_14 = arith.constant 0 : index
      %c0_15 = arith.constant 0 : index
      %18 = vector.load %arg4[%c0_14, %c0_15] : memref<512x2xf32, #tpu.memory_space<vmem>>, vector<512x2xf32>
      %cst_16 = arith.constant dense<0.000000e+00> : vector<2x2xf32>
      %19 = tpu.matmul %17, %18, %cst_16 {dimension_numbers = #tpu.dot_dimension_numbers<[1], [0], [0], [1], [0, 0, 1, 1], [], []>} : vector<2x512xf32>, vector<512x2xf32>, vector<2x2xf32> -> vector<2x2xf32>
      %c0_17 = arith.constant 0 : index
      %c0_18 = arith.constant 0 : index
      %20 = vector.load %arg5[%c0_17, %c0_18] : memref<1x2xf32, #tpu.memory_space<vmem>>, vector<1x2xf32>
      %21 = vector.broadcast %20 : vector<1x2xf32> to vector<2x2xf32>
      %22 = arith.addf %19, %21 : vector<2x2xf32>
      %c0_19 = arith.constant 0 : index
      %c0_20 = arith.constant 0 : index
      %23 = vector.load %arg6[%c0_19, %c0_20] : memref<2x2xf32, #tpu.memory_space<vmem>>, vector<2x2xf32>
      tpu.vector_store %arg6[%c0_19, %c0_20], %22 {strides = array<i32>} : memref<2x2xf32, #tpu.memory_space<vmem>>, vector<2x2xf32>,
    } else {
    }
    return
  }
  func.func @transform_0(%arg0: i32) -> (i32, i32) {
    %c0_i32 = arith.constant 0 : i32
    %c0_i32_0 = arith.constant 0 : i32
    return %c0_i32, %arg0 : i32, i32
  }
  func.func @transform_1(%arg0: i32) -> (i32, i32) {
    %c0_i32 = arith.constant 0 : i32
    %c0_i32_0 = arith.constant 0 : i32
    return %arg0, %c0_i32 : i32, i32
  }
  func.func @transform_2(%arg0: i32) -> (i32, i32) {
    %c0_i32 = arith.constant 0 : i32
    %c0_i32_0 = arith.constant 0 : i32
    %c0_i32_1 = arith.constant 0 : i32
    return %c0_i32, %c0_i32_0 : i32, i32
  }
  func.func @transform_3(%arg0: i32) -> (i32, i32) {
    %c0_i32 = arith.constant 0 : i32
    %c0_i32_0 = arith.constant 0 : i32
    %c0_i32_1 = arith.constant 0 : i32
    return %c0_i32, %c0_i32_0 : i32, i32
  }
  func.func @transform_4(%arg0: i32) -> (i32, i32) {
    %c0_i32 = arith.constant 0 : i32
    %c0_i32_0 = arith.constant 0 : i32
    %c0_i32_1 = arith.constant 0 : i32
    return %c0_i32, %c0_i32_0 : i32, i32
  }
  func.func @transform_5(%arg0: i32) -> (i32, i32) {
    %c0_i32 = arith.constant 0 : i32
    %c0_i32_0 = arith.constant 0 : i32
    %c0_i32_1 = arith.constant 0 : i32
    return %c0_i32, %c0_i32_0 : i32, i32
  }
}

</mosaic_0001>

<bundles_post_ra>
// kernel: simple_cnn_forward.4
= control target key start
LH: loop header
LB: loop body
LE: loop exit
PB: predicated region body
PF: predicated region fallthrough
CT: control target
= control target key end

     0   :  { %s2482_s12 = smov 0   ;;  %s2484_s13 = smov 0   ;;  %s3088_s0 = inlined_call_operand.vmem [shape: bf16[4,27,4608], index: 0, kind: input, shape index: {}]   ;;  %s3089_s1 = inlined_call_operand.vmem [shape: bf16[16,27], index: 1, kind: input, shape index: {}]   ;;  %s3090_s2 = inlined_call_operand.vmem [shape: f32[16,1], index: 2, kind: input, shape index: {}]   ;;  %s3091_s3 = inlined_call_operand.vmem [shape: bf16[16,4608], index: 3, kind: output, shape index: {}]  }
   0x1   :  { %s2486_s14 = smov 0  }
   0x2 LB: > { %s2033_s15 = sadd.s32 4294967295, %s2456_s14   ;;  %s2499_s16 = sadd.s32 1, %s2456_s14   ;;  %s2456_s14 = sphi %s2486_s14, %s3095_s14   ;;  %s2452_s13 = sphi %s2484_s13, %s3094_s13   ;;  %s2448_s12 = sphi %s2482_s12, %s3093_s12  }
   0x3   : > { %s17_s17 = ssub.s32 %s2456_s14, %s2499_s16  ;;  %s20_s18 = sadd.s32 1, %s2452_s13 }
   0x4   : > { %p18_p0 = scmp.eq.s32.totalorder %s17_s17, 0  ;;  %p27_p1 = scmp.ne.s32.totalorder %s2452_s13, %s2448_s12 }
   0x5   : > { %p28_p2 = scmp.eq.s32.totalorder %s2456_s14, 0  ;;  %p99_p3 = scmp.eq.s32.totalorder %s2033_s15, 3 }
   0x6   : > { %s2510_s19 = scalar_select %p18_p0, %s2452_s13, %s20_s18  }
   0x7   : > { %p29_p4 = por %p28_p2, %p27_p1  ;;  %p2512_p5 = por %p99_p3, %p27_p1 }
   0x8   : > { %p2036_p6 = scmp.ge.s32.totalorder %s2456_s14, 4 }
   0xa   : > { %127 = sbr.rel (%p2036_p6) target bundleno = 62 (0x3e), region = 24 }
   0xf   : > { %130 = sbr.rel (!%p29_p4) target bundleno = 62 (0x3e), region = 28  ;;  %s132_s21 = sand.u32 (%p29_p4), 1, %s2452_s13  }
  0x10   : > { %s2241_s22 = smul.u32 (%p29_p4), 36, %s2456_s14 }
  0x11   : > { %s2297_s23 = smul.u32 (%p29_p4), 576, %s132_s21 }
  0x12   : > { %s2522_s26 = scalar_lea.vmem (%p29_p4), %s3088_s0, %s2241_s22 }
  0x13   : > { %v152_v0 = vld [vmem:[%s2522_s26] sm:$0xff] (%p29_p4)  ;;  %v154_v1 = vld [vmem:[%s2522_s26 + $0x8] sm:$0xff] (%p29_p4)  ;;  %v156_v2 = vld [vmem:[%s2522_s26 + $0x10] sm:$0xff] (%p29_p4)  ;;  %s2527_s27 = scalar_lea.vmem (%p29_p4), [#allocation2], %s2297_s23 }
  0x14   : > { %153 = vst [vmem:[%s2527_s27] sm:$0xff] %v152_v0  ;;  %155 = vst [vmem:[%s2527_s27 + $0x8] sm:$0xff] %v154_v1  ;;  %v158_v3 = vld [vmem:[%s2522_s26 + $0x18] sm:$0xff]  ;;  %v160_v4 = vld [vmem:[%s2522_s26 + $0x90] sm:$0xff] }
  0x15   : > { %157 = vst [vmem:[%s2527_s27 + $0x10] sm:$0xff] %v156_v2  ;;  %v162_v5 = vld [vmem:[%s2522_s26 + $0x98] sm:$0xff]  ;;  %159 = vst [vmem:[%s2527_s27 + $0x18] sm:$0xff] %v158_v3  ;;  %v164_v6 = vld [vmem:[%s2522_s26 + $0xa0] sm:$0xff] }
  0x16   : > { %161 = vst [vmem:[%s2527_s27 + $0x24] sm:$0xff] %v160_v4  ;;  %163 = vst [vmem:[%s2527_s27 + $0x2c] sm:$0xff] %v162_v5  ;;  %v166_v7 = vld [vmem:[%s2522_s26 + $0xa8] sm:$0xff]  ;;  %v168_v8 = vld [vmem:[%s2522_s26 + $0x120] sm:$0xff] }
  0x17   : > { %165 = vst [vmem:[%s2527_s27 + $0x34] sm:$0xff] %v164_v6  ;;  %167 = vst [vmem:[%s2527_s27 + $0x3c] sm:$0xff] %v166_v7  ;;  %v170_v9 = vld [vmem:[%s2522_s26 + $0x128] sm:$0xff]  ;;  %v172_v10 = vld [vmem:[%s2522_s26 + $0x130] sm:$0xff] }
  0x18   : > { %169 = vst [vmem:[%s2527_s27 + $0x48] sm:$0xff] %v168_v8  ;;  %v174_v11 = vld [vmem:[%s2522_s26 + $0x138] sm:$0xff]  ;;  %171 = vst [vmem:[%s2527_s27 + $0x50] sm:$0xff] %v170_v9  ;;  %v176_v12 = vld [vmem:[%s2522_s26 + $0x1b0] sm:$0xff] }
  0x19   : > { %173 = vst [vmem:[%s2527_s27 + $0x58] sm:$0xff] %v172_v10  ;;  %175 = vst [vmem:[%s2527_s27 + $0x60] sm:$0xff] %v174_v11  ;;  %v178_v13 = vld [vmem:[%s2522_s26 + $0x1b8] sm:$0xff]  ;;  %v180_v14 = vld [vmem:[%s2522_s26 + $0x1c0] sm:$0xff] }
  0x1a   : > { %177 = vst [vmem:[%s2527_s27 + $0x6c] sm:$0xff] %v176_v12  ;;  %179 = vst [vmem:[%s2527_s27 + $0x74] sm:$0xff] %v178_v13  ;;  %v182_v15 = vld [vmem:[%s2522_s26 + $0x1c8] sm:$0xff]  ;;  %v184_v16 = vld [vmem:[%s2522_s26 + $0x240] sm:$0xff] }
  0x1b   : > { %181 = vst [vmem:[%s2527_s27 + $0x7c] sm:$0xff] %v180_v14  ;;  %v186_v17 = vld [vmem:[%s2522_s26 + $0x248] sm:$0xff]  ;;  %183 = vst [vmem:[%s2527_s27 + $0x84] sm:$0xff] %v182_v15  ;;  %v188_v18 = vld [vmem:[%s2522_s26 + $0x250] sm:$0xff] }
  0x1c   : > { %185 = vst [vmem:[%s2527_s27 + $0x90] sm:$0xff] %v184_v16  ;;  %187 = vst [vmem:[%s2527_s27 + $0x98] sm:$0xff] %v186_v17  ;;  %v190_v19 = vld [vmem:[%s2522_s26 + $0x258] sm:$0xff]  ;;  %v192_v20 = vld [vmem:[%s2522_s26 + $0x2d0] sm:$0xff] }
  0x1d   : > { %189 = vst [vmem:[%s2527_s27 + $0xa0] sm:$0xff] %v188_v18  ;;  %191 = vst [vmem:[%s2527_s27 + $0xa8] sm:$0xff] %v190_v19  ;;  %v194_v21 = vld [vmem:[%s2522_s26 + $0x2d8] sm:$0xff]  ;;  %v196_v22 = vld [vmem:[%s2522_s26 + $0x2e0] sm:$0xff] }
  0x1e   : > { %193 = vst [vmem:[%s2527_s27 + $0xb4] sm:$0xff] %v192_v20  ;;  %v198_v23 = vld [vmem:[%s2522_s26 + $0x2e8] sm:$0xff]  ;;  %195 = vst [vmem:[%s2527_s27 + $0xbc] sm:$0xff] %v194_v21  ;;  %v200_v24 = vld [vmem:[%s2522_s26 + $0x360] sm:$0xff] }
  0x1f   : > { %197 = vst [vmem:[%s2527_s27 + $0xc4] sm:$0xff] %v196_v22  ;;  %199 = vst [vmem:[%s2527_s27 + $0xcc] sm:$0xff] %v198_v23  ;;  %v202_v25 = vld [vmem:[%s2522_s26 + $0x368] sm:$0xff]  ;;  %v204_v26 = vld [vmem:[%s2522_s26 + $0x370] sm:$0xff] }
  0x20   : > { %201 = vst [vmem:[%s2527_s27 + $0xd8] sm:$0xff] %v200_v24  ;;  %203 = vst [vmem:[%s2527_s27 + $0xe0] sm:$0xff] %v202_v25  ;;  %v206_v27 = vld [vmem:[%s2522_s26 + $0x378] sm:$0xff]  ;;  %v208_v28 = vld [vmem:[%s2522_s26 + $0x3f0] sm:$0xff] }
  0x21   : > { %205 = vst [vmem:[%s2527_s27 + $0xe8] sm:$0xff] %v204_v26  ;;  %v210_v29 = vld [vmem:[%s2522_s26 + $0x3f8] sm:$0xff]  ;;  %207 = vst [vmem:[%s2527_s27 + $0xf0] sm:$0xff] %v206_v27  ;;  %v212_v30 = vld [vmem:[%s2522_s26 + $0x400] sm:$0xff] }
  0x22   : > { %209 = vst [vmem:[%s2527_s27 + $0xfc] sm:$0xff] %v208_v28  ;;  %211 = vst [vmem:[%s2527_s27 + $0x104] sm:$0xff] %v210_v29  ;;  %v214_v31 = vld [vmem:[%s2522_s26 + $0x408] sm:$0xff]  ;;  %v216_v32 = vld [vmem:[%s2522_s26 + $0x480] sm:$0xff] }
  0x23   : > { %213 = vst [vmem:[%s2527_s27 + $0x10c] sm:$0xff] %v212_v30  ;;  %215 = vst [vmem:[%s2527_s27 + $0x114] sm:$0xff] %v214_v31  ;;  %v218_v33 = vld [vmem:[%s2522_s26 + $0x488] sm:$0xff]  ;;  %v220_v34 = vld [vmem:[%s2522_s26 + $0x490] sm:$0xff] }
  0x24   : > { %217 = vst [vmem:[%s2527_s27 + $0x120] sm:$0xff] %v216_v32  ;;  %v222_v35 = vld [vmem:[%s2522_s26 + $0x498] sm:$0xff]  ;;  %219 = vst [vmem:[%s2527_s27 + $0x128] sm:$0xff] %v218_v33  ;;  %v224_v36 = vld [vmem:[%s2522_s26 + $0x510] sm:$0xff] }
  0x25   : > { %221 = vst [vmem:[%s2527_s27 + $0x130] sm:$0xff] %v220_v34  ;;  %223 = vst [vmem:[%s2527_s27 + $0x138] sm:$0xff] %v222_v35  ;;  %v226_v37 = vld [vmem:[%s2522_s26 + $0x518] sm:$0xff]  ;;  %v228_v38 = vld [vmem:[%s2522_s26 + $0x520] sm:$0xff] }
  0x26   : > { %225 = vst [vmem:[%s2527_s27 + $0x144] sm:$0xff] %v224_v36  ;;  %227 = vst [vmem:[%s2527_s27 + $0x14c] sm:$0xff] %v226_v37  ;;  %v230_v39 = vld [vmem:[%s2522_s26 + $0x528] sm:$0xff]  ;;  %v232_v40 = vld [vmem:[%s2522_s26 + $0x5a0] sm:$0xff] }
  0x27   : > { %229 = vst [vmem:[%s2527_s27 + $0x154] sm:$0xff] %v228_v38  ;;  %v234_v41 = vld [vmem:[%s2522_s26 + $0x5a8] sm:$0xff]  ;;  %231 = vst [vmem:[%s2527_s27 + $0x15c] sm:$0xff] %v230_v39  ;;  %v236_v42 = vld [vmem:[%s2522_s26 + $0x5b0] sm:$0xff] }
  0x28   : > { %233 = vst [vmem:[%s2527_s27 + $0x168] sm:$0xff] %v232_v40  ;;  %235 = vst [vmem:[%s2527_s27 + $0x170] sm:$0xff] %v234_v41  ;;  %v238_v43 = vld [vmem:[%s2522_s26 + $0x5b8] sm:$0xff]  ;;  %v240_v44 = vld [vmem:[%s2522_s26 + $0x630] sm:$0xff] }
  0x29   : > { %237 = vst [vmem:[%s2527_s27 + $0x178] sm:$0xff] %v236_v42  ;;  %239 = vst [vmem:[%s2527_s27 + $0x180] sm:$0xff] %v238_v43  ;;  %v242_v45 = vld [vmem:[%s2522_s26 + $0x638] sm:$0xff]  ;;  %v244_v46 = vld [vmem:[%s2522_s26 + $0x640] sm:$0xff] }
  0x2a   : > { %241 = vst [vmem:[%s2527_s27 + $0x18c] sm:$0xff] %v240_v44  ;;  %v246_v47 = vld [vmem:[%s2522_s26 + $0x648] sm:$0xff]  ;;  %243 = vst [vmem:[%s2527_s27 + $0x194] sm:$0xff] %v242_v45  ;;  %v248_v48 = vld [vmem:[%s2522_s26 + $0x6c0] sm:$0xff] }
  0x2b   : > { %245 = vst [vmem:[%s2527_s27 + $0x19c] sm:$0xff] %v244_v46  ;;  %247 = vst [vmem:[%s2527_s27 + $0x1a4] sm:$0xff] %v246_v47  ;;  %v250_v49 = vld [vmem:[%s2522_s26 + $0x6c8] sm:$0xff]  ;;  %v252_v50 = vld [vmem:[%s2522_s26 + $0x6d0] sm:$0xff] }
  0x2c   : > { %249 = vst [vmem:[%s2527_s27 + $0x1b0] sm:$0xff] %v248_v48  ;;  %251 = vst [vmem:[%s2527_s27 + $0x1b8] sm:$0xff] %v250_v49  ;;  %v254_v51 = vld [vmem:[%s2522_s26 + $0x6d8] sm:$0xff]  ;;  %v256_v52 = vld [vmem:[%s2522_s26 + $0x750] sm:$0xff] }
  0x2d   : > { %253 = vst [vmem:[%s2527_s27 + $0x1c0] sm:$0xff] %v252_v50  ;;  %v258_v53 = vld [vmem:[%s2522_s26 + $0x758] sm:$0xff]  ;;  %255 = vst [vmem:[%s2527_s27 + $0x1c8] sm:$0xff] %v254_v51  ;;  %v260_v54 = vld [vmem:[%s2522_s26 + $0x760] sm:$0xff] }
  0x2e   : > { %257 = vst [vmem:[%s2527_s27 + $0x1d4] sm:$0xff] %v256_v52  ;;  %259 = vst [vmem:[%s2527_s27 + $0x1dc] sm:$0xff] %v258_v53  ;;  %v262_v55 = vld [vmem:[%s2522_s26 + $0x768] sm:$0xff]  ;;  %v264_v56 = vld [vmem:[%s2522_s26 + $0x7e0] sm:$0xff] }
  0x2f   : > { %261 = vst [vmem:[%s2527_s27 + $0x1e4] sm:$0xff] %v260_v54  ;;  %263 = vst [vmem:[%s2527_s27 + $0x1ec] sm:$0xff] %v262_v55  ;;  %v266_v57 = vld [vmem:[%s2522_s26 + $0x7e8] sm:$0xff]  ;;  %v268_v58 = vld [vmem:[%s2522_s26 + $0x7f0] sm:$0xff] }
  0x30   : > { %265 = vst [vmem:[%s2527_s27 + $0x1f8] sm:$0xff] %v264_v56  ;;  %v270_v59 = vld [vmem:[%s2522_s26 + $0x7f8] sm:$0xff]  ;;  %267 = vst [vmem:[%s2527_s27 + $0x200] sm:$0xff] %v266_v57  ;;  %v272_v60 = vld [vmem:[%s2522_s26 + $0x870] sm:$0xff] }
  0x31   : > { %269 = vst [vmem:[%s2527_s27 + $0x208] sm:$0xff] %v268_v58  ;;  %271 = vst [vmem:[%s2527_s27 + $0x210] sm:$0xff] %v270_v59  ;;  %v274_v61 = vld [vmem:[%s2522_s26 + $0x878] sm:$0xff]  ;;  %v276_v62 = vld [vmem:[%s2522_s26 + $0x880] sm:$0xff] }
  0x32   : > { %273 = vst [vmem:[%s2527_s27 + $0x21c] sm:$0xff] %v272_v60  ;;  %275 = vst [vmem:[%s2527_s27 + $0x224] sm:$0xff] %v274_v61  ;;  %v278_v63 = vld [vmem:[%s2522_s26 + $0x888] sm:$0xff]  ;;  %v2038_v0 = vld [vmem:[%s2522_s26 + $0x20] sm:$0xf] }
  0x33   : > { %277 = vst [vmem:[%s2527_s27 + $0x22c] sm:$0xff] %v276_v62  ;;  %v2040_v1 = vld [vmem:[%s2522_s26 + $0xb0] sm:$0xf]  ;;  %279 = vst [vmem:[%s2527_s27 + $0x234] sm:$0xff] %v278_v63  ;;  %v2042_v2 = vld [vmem:[%s2522_s26 + $0x140] sm:$0xf] }
  0x34   : > { %2039 = vst [vmem:[%s2527_s27 + $0x20] sm:$0xf] %v2038_v0  ;;  %2041 = vst [vmem:[%s2527_s27 + $0x44] sm:$0xf] %v2040_v1  ;;  %v2044_v3 = vld [vmem:[%s2522_s26 + $0x1d0] sm:$0xf] }
  0x35   : > { %v2046_v4 = vld [vmem:[%s2522_s26 + $0x260] sm:$0xf]  ;;  %2043 = vst [vmem:[%s2527_s27 + $0x68] sm:$0xf] %v2042_v2  ;;  %2045 = vst [vmem:[%s2527_s27 + $0x8c] sm:$0xf] %v2044_v3 }
  0x36   : > { %2047 = vst [vmem:[%s2527_s27 + $0xb0] sm:$0xf] %v2046_v4  ;;  %v2048_v5 = vld [vmem:[%s2522_s26 + $0x2f0] sm:$0xf]  ;;  %v2050_v6 = vld [vmem:[%s2522_s26 + $0x380] sm:$0xf] }
  0x37   : > { %v2052_v7 = vld [vmem:[%s2522_s26 + $0x410] sm:$0xf]  ;;  %2049 = vst [vmem:[%s2527_s27 + $0xd4] sm:$0xf] %v2048_v5  ;;  %2051 = vst [vmem:[%s2527_s27 + $0xf8] sm:$0xf] %v2050_v6 }
  0x38   : > { %2053 = vst [vmem:[%s2527_s27 + $0x11c] sm:$0xf] %v2052_v7  ;;  %v2054_v8 = vld [vmem:[%s2522_s26 + $0x4a0] sm:$0xf]  ;;  %v2056_v9 = vld [vmem:[%s2522_s26 + $0x530] sm:$0xf] }
  0x39   : > { %v2058_v10 = vld [vmem:[%s2522_s26 + $0x5c0] sm:$0xf]  ;;  %2055 = vst [vmem:[%s2527_s27 + $0x140] sm:$0xf] %v2054_v8  ;;  %2057 = vst [vmem:[%s2527_s27 + $0x164] sm:$0xf] %v2056_v9 }
  0x3a   : > { %2059 = vst [vmem:[%s2527_s27 + $0x188] sm:$0xf] %v2058_v10  ;;  %v2060_v11 = vld [vmem:[%s2522_s26 + $0x650] sm:$0xf]  ;;  %v2062_v12 = vld [vmem:[%s2522_s26 + $0x6e0] sm:$0xf] }
  0x3b   : > { %v2064_v13 = vld [vmem:[%s2522_s26 + $0x770] sm:$0xf]  ;;  %2061 = vst [vmem:[%s2527_s27 + $0x1ac] sm:$0xf] %v2060_v11  ;;  %2063 = vst [vmem:[%s2527_s27 + $0x1d0] sm:$0xf] %v2062_v12 }
  0x3c   : > { %2065 = vst [vmem:[%s2527_s27 + $0x1f4] sm:$0xf] %v2064_v13  ;;  %v2066_v14 = vld [vmem:[%s2522_s26 + $0x800] sm:$0xf]  ;;  %v2068_v15 = vld [vmem:[%s2522_s26 + $0x890] sm:$0xf] }
  0x3d   : > { %2067 = vst [vmem:[%s2527_s27 + $0x218] sm:$0xf] %v2066_v14  ;;  %2069 = vst [vmem:[%s2527_s27 + $0x23c] sm:$0xf] %v2068_v15 }
  0x3e PF: > { %p2070_p7 = scmp.ge.s32.totalorder %s2456_s14, 1  ;;  %p324_p8 = scmp.lt.s32.totalorder %s2456_s14, 5 }
  0x40   : > { %p325_p9 = pnand %p2070_p7, %p324_p8 }
  0x41   : > { %s331_s28 = sand.u32 (!%p325_p9), 1, %s2448_s12  }
  0x42   : > { %328 = sbr.rel (%p325_p9) target bundleno = 372 (0x174), region = 54 }
  0x43   : > { %s2298_s29 = smul.u32 (!%p325_p9), 576, %s331_s28 }
  0x44   : > { %s3001_s10 = smul.u32 (!%p325_p9), 72, %s331_s28 }
  0x45   : > { %s2702_s7 = scalar_lea.vmem (!%p325_p9), [#allocation2], %s2298_s29 }
  0x46   : > { %s3023_s11 = scalar_lea.vmem (!%p325_p9), [#allocation3], %s3001_s10 }
  0x47   : > { %vm470_vm0 = vcmask 1044480   ;;  %vm471_vm1 = vcmask 1045504   ;;  %v2458_v16 = vmov 65535   ;;  %v2459_v18 = vmov 0   ;;  %v1800_v19 = vld [vmem:[%s3090_s2] sm:$0xff]  ;;  %v1801_v21 = vld [vmem:[%s3090_s2 + $0x8] sm:$0xff] }
  0x48   : > { %v472_v17 = vsel %vm470_vm0, 4294967295, %v2458_v16  ;;  %533 = vmatprep.mubr.bf16.mxu0 %v2459_v18  ;;  %576 = vmatprep.mubr.bf16.mxu1 %v2459_v18  ;;  %v2329_v22 = vld [vmem:[%s2702_s7 + $0x4c] ss:$36 sps:$4 sm:$0x3f]   ;;  %v2335_v28 = vld [vmem:[%s2702_s7 + $0x4] ss:$36 sps:$4 sm:$0xff]  }
  0x49   : > { %2328 = vset.pattern.permute.xlu0 %v2459_v18  ;;  %v2697_v20 = vsel %vm471_vm1, %v472_v17, 0  ;;  %v2331_v23 = vld [vmem:[%s2702_s7 + $0x54] ss:$36 sps:$4 sm:$0x3f]   ;;  %v2337_v31 = vld [vmem:[%s2702_s7 + $0xc] ss:$36 sps:$4 sm:$0xff]  }
  0x4a   : > { %1804 = vperm.xlu0 %2328, %v1800_v19   ;;  %v478_v24 = vand.u32 %v2329_v22, %v2697_v20  ;;  %v2333_v25 = vld [vmem:[%s2702_s7 + $0x48] ss:$36 sps:$4 sm:$0x3f]   ;;  %v2334_v26 = vld [vmem:[%s2702_s7 + $0x50] ss:$36 sps:$4 sm:$0x3f]   ;;  %v484_v27 = vand.u32 %v2331_v23, %v2697_v20 }
  0x4b   : > { %v475_v29 = vand.u32 %v2333_v25, %v2697_v20  ;;  %v481_v30 = vand.u32 %v2334_v26, %v2697_v20  ;;  %v2339_v32 = vld [vmem:[%s2702_s7] ss:$36 sps:$4 sm:$0xff]   ;;  %v2340_v33 = vld [vmem:[%s2702_s7 + $0x8] ss:$36 sps:$4 sm:$0xff]   ;;  %vm466_vm2 = vcmask 220160   ;;  %v2460_v55 = vmov 0.0  }
  0x4c   : > { %513 = vmatprep.subr.bf16.mxu0 %v478_v24  ;;  %556 = vmatprep.subr.bf16.mxu1 %v484_v27  ;;  %v2342_v34 = vld [vmem:[%s2702_s7 + $0x58] ss:$36 sps:$4 sm:$0x3f]   ;;  %v2345_v36 = vld [vmem:[%s2702_s7 + $0x60] ss:$36 sps:$4 sm:$0x3f]  }
  0x4d   : > { %514 = vmatpush1.bf16.msra.mxu0 %v475_v29  ;;  %557 = vmatpush1.bf16.msra.mxu1 %v481_v30  ;;  %v2344_v35 = vld [vmem:[%s2702_s7 + $0x5c] ss:$36 sps:$4 sm:$0x3f]   ;;  %v2347_v37 = vld [vmem:[%s2702_s7 + $0x64] ss:$36 sps:$4 sm:$0x3f]   ;;  %v487_v41 = vand.u32 %v2342_v34, %v2697_v20  ;;  %v493_v42 = vand.u32 %v2345_v36, %v2697_v20 }
  0x4e   : > { %1809 = vperm.xlu0 %2328, %v1801_v21   ;;  %515 = vmatprep.subr.bf16.mxu0 %v2335_v28  ;;  %v2723_v38 = vld [vmem:[%s3089_s1] sm:$0xff]   ;;  %v490_v39 = vand.u32 %v2344_v35, %v2697_v20  ;;  %v496_v40 = vand.u32 %v2347_v37, %v2697_v20  ;;  %v2350_v43 = vld [vmem:[%s2702_s7 + $0x14] ss:$36 sps:$4 sm:$0xff]   ;;  %v2357_v49 = vld [vmem:[%s2702_s7 + $0x68] ss:$36 sps:$4 sm:$0x3f]  }
  0x4f   : > { %558 = vmatprep.subr.bf16.mxu1 %v2337_v31  ;;  %v2353_v44 = vld [vmem:[%s2702_s7 + $0x1c] ss:$36 sps:$4 sm:$0xff]   ;;  %v2348_v45 = vld [vmem:[%s2702_s7 + $0x10] ss:$36 sps:$4 sm:$0xff]   ;;  %v499_v52 = vand.u32 %v2357_v49, %v2697_v20  ;;  %vm2461_vm3 = vmmov 0   ;;  %s2252_s12 = smul.u32 (%p2512_p5), 36, %s2033_s15 }
  0x50   : > { %v2354_v46 = vld [vmem:[%s2702_s7 + $0xd8] ss:$36 sps:$4 sm:$0x3f]   ;;  %v2364_v54 = vld [vmem:[%s2702_s7 + $0xe4] ss:$36 sps:$4 sm:$0x3f]  }
  0x51   : > { %516 = vmatpush1.bf16.msra.mxu0 %v2339_v32  ;;  %559 = vmatpush1.bf16.msra.mxu1 %v2340_v33  ;;  %v2356_v47 = vld [vmem:[%s2702_s7 + $0xdc] ss:$36 sps:$4 sm:$0x3f]   ;;  %v2360_v51 = vld [vmem:[%s2702_s7 + $0x94] ss:$36 sps:$4 sm:$0xff]   ;;  %v819_v53 = vand.u32 %v2354_v46, %v2697_v20  ;;  %v828_v61 = vand.u32 %v2364_v54, %v2697_v20  ;;  %s1923_s14 = scalar_lea.vmem (%p2512_p5), %s3091_s3, %s2252_s12 }
  0x52   : > { %599 = vmatprep.subr.bf16.mxu0 %v490_v39  ;;  %642 = vmatprep.subr.bf16.mxu1 %v496_v40  ;;  %v2351_v48 = vld [vmem:[%s2702_s7 + $0x18] ss:$36 sps:$4 sm:$0xff]   ;;  %v822_v50 = vand.u32 %v2356_v47, %v2697_v20  ;;  %v2367_v56 = vld [vmem:[%s2702_s7 + $0xec] ss:$36 sps:$4 sm:$0x3f]  }
  0x53   : > { %v2358_v57 = vld [vmem:[%s2702_s7 + $0x90] ss:$36 sps:$4 sm:$0xff]   ;;  %v2361_v58 = vld [vmem:[%s2702_s7 + $0x20] ss:$36 sps:$4 sm:$0xff]   ;;  %v834_v62 = vand.u32 %v2367_v56, %v2697_v20  ;;  %v2368_v4 = vld [vmem:[%s2702_s7 + $0x98] ss:$36 sps:$4 sm:$0xff]  }
  0x54   : > { %2090 = vmatmul.mubr.msk.bf16.vlgmr.msra.gmra.mxu0 %vm466_vm2, %v2723_v38  ;;  %2091 = vmatmul.mubr.msk.bf16.vlgmr.msra.gmra.mxu1 %vm466_vm2, %v2723_v38  ;;  %v2362_v59 = vld [vmem:[%s2702_s7 + $0xe0] ss:$36 sps:$4 sm:$0x3f]   ;;  %v2365_v60 = vld [vmem:[%s2702_s7 + $0xe8] ss:$36 sps:$4 sm:$0x3f]  }
  0x55   : > { %600 = vmatpush1.bf16.msra.mxu0 %v487_v41  ;;  %643 = vmatpush1.bf16.msra.mxu1 %v493_v42  ;;  %v2370_v63 = vld [vmem:[%s2702_s7 + $0x9c] ss:$36 sps:$4 sm:$0xff]   ;;  %v825_v0 = vand.u32 %v2362_v59, %v2697_v20  ;;  %v831_v1 = vand.u32 %v2365_v60, %v2697_v20  ;;  %v2373_v2 = vld [vmem:[%s2702_s7 + $0xa4] ss:$36 sps:$4 sm:$0xff]   ;;  %v2380_v9 = vld [vmem:[%s2702_s7 + $0xac] ss:$36 sps:$4 sm:$0xff]  }
  0x56   : > { %601 = vmatprep.subr.bf16.mxu0 %v2350_v43  ;;  %644 = vmatprep.subr.bf16.mxu1 %v2353_v44  ;;  %v2376_v3 = vld [vmem:[%s2702_s7 + $0xf4] ss:$36 sps:$4 sm:$0x3f]   ;;  %v2371_v6 = vld [vmem:[%s2702_s7 + $0xa0] ss:$36 sps:$4 sm:$0xff]  }
  0x57   : > { %619 = vmatprep.mubr.bf16.mxu0 %v2459_v18  ;;  %662 = vmatprep.mubr.bf16.mxu1 %v2459_v18  ;;  %v2374_v5 = vld [vmem:[%s2702_s7 + $0xf0] ss:$36 sps:$4 sm:$0x3f]   ;;  %v2377_v7 = vld [vmem:[%s2702_s7 + $0xf8] ss:$36 sps:$4 sm:$0x3f]   ;;  %v840_v8 = vand.u32 %v2376_v3, %v2697_v20 }
  0x58   : > { %v837_v10 = vand.u32 %v2374_v5, %v2697_v20  ;;  %v843_v11 = vand.u32 %v2377_v7, %v2697_v20  ;;  %v2384_v12 = vld [vmem:[%s2702_s7 + $0x16c] ss:$36 sps:$4 sm:$0x3f]   ;;  %v2387_v13 = vld [vmem:[%s2702_s7 + $0x174] ss:$36 sps:$4 sm:$0x3f]  }
  0x59   : > { %602 = vmatpush1.bf16.msra.mxu0 %v2348_v45  ;;  %645 = vmatpush1.bf16.msra.mxu1 %v2351_v48  ;;  %v2378_v14 = vld [vmem:[%s2702_s7 + $0xa8] ss:$36 sps:$4 sm:$0xff]   ;;  %v2381_v15 = vld [vmem:[%s2702_s7 + $0xb0] ss:$36 sps:$4 sm:$0xff]   ;;  %v1184_v19 = vand.u32 %v2384_v12, %v2697_v20  ;;  %v1190_v21 = vand.u32 %v2387_v13, %v2697_v20  ;;  %v2388_v29 = vld [vmem:[%s2702_s7 + $0x120] ss:$36 sps:$4 sm:$0xff]  }
  0x5a   : > { %2265 = vmatprep.subr.bf16.mxu0 %v2460_v55  ;;  %857 = vmatprep.subr.bf16.mxu1 %v822_v50  ;;  %v2382_v16 = vld [vmem:[%s2702_s7 + $0x168] ss:$36 sps:$4 sm:$0x3f]   ;;  %v2385_v17 = vld [vmem:[%s2702_s7 + $0x170] ss:$36 sps:$4 sm:$0x3f]  }
  0x5b   : > { %v2390_v22 = vld [vmem:[%s2702_s7 + $0x124] ss:$36 sps:$4 sm:$0xff]   ;;  %v2393_v23 = vld [vmem:[%s2702_s7 + $0x12c] ss:$36 sps:$4 sm:$0xff]   ;;  %v1181_v25 = vand.u32 %v2382_v16, %v2697_v20  ;;  %v1187_v26 = vand.u32 %v2385_v17, %v2697_v20  ;;  %v2402_v39 = vld [vmem:[%s2702_s7 + $0x134] ss:$36 sps:$4 sm:$0xff]  }
  0x5c   : > { %2092 = vmatmul.mubr.msk.bf16.vlgmr.msra.gmra.mxu0 %vm466_vm2, %v2723_v38  ;;  %2093 = vmatmul.mubr.msk.bf16.vlgmr.msra.gmra.mxu1 %vm466_vm2, %v2723_v38  ;;  %v2396_v24 = vld [vmem:[%s2702_s7 + $0x17c] ss:$36 sps:$4 sm:$0x3f]   ;;  %v2399_v27 = vld [vmem:[%s2702_s7 + $0x184] ss:$36 sps:$4 sm:$0x3f]  }
  0x5d   : > { %2266 = vmatpush3.bf16.msra.mxu0 %v499_v52  ;;  %858 = vmatpush1.bf16.msra.mxu1 %v819_v53  ;;  %v2806_v28 = vld [vmem:[%s2702_s7 + $0x200] ss:$36 sps:$4 sm:$0x3f]   ;;  %v2394_v30 = vld [vmem:[%s2702_s7 + $0x178] ss:$36 sps:$4 sm:$0x3f]   ;;  %v1196_v35 = vand.u32 %v2396_v24, %v2697_v20  ;;  %v1202_v36 = vand.u32 %v2399_v27, %v2697_v20 }
  0x5e   : > { %2267 = vmatprep.subr.bf16.mxu0 %v2460_v55  ;;  %859 = vmatprep.subr.bf16.mxu1 %v2360_v51  ;;  %v2815_v31 = vld [vmem:[%s2702_s7 + $0x208] ss:$36 sps:$4 sm:$0x3f]   ;;  %v1549_v32 = vand.u32 %v2806_v28, %v2697_v20  ;;  %v2397_v34 = vld [vmem:[%s2702_s7 + $0x180] ss:$36 sps:$4 sm:$0x3f]   ;;  %v1193_v43 = vand.u32 %v2394_v30, %v2697_v20 }
  0x5f   : > { %2269 = vmatprep.mubr.msk.bf16.mxu0 %vm2461_vm3, %v2460_v55  ;;  %877 = vmatprep.mubr.bf16.mxu1 %v2459_v18  ;;  %v2391_v33 = vld [vmem:[%s2702_s7 + $0x128] ss:$36 sps:$4 sm:$0xff]   ;;  %v1555_v37 = vand.u32 %v2815_v31, %v2697_v20  ;;  %v2408_v40 = vld [vmem:[%s2702_s7 + $0x1fc] ss:$36 sps:$4 sm:$0x3f]   ;;  %v1199_v44 = vand.u32 %v2397_v34, %v2697_v20 }
  0x60   : > { %v2830_v41 = vld [vmem:[%s2702_s7 + $0x210] ss:$36 sps:$4 sm:$0x3f]   ;;  %v2405_v45 = vld [vmem:[%s2702_s7 + $0x13c] ss:$36 sps:$4 sm:$0xff]   ;;  %v1546_v54 = vand.u32 %v2408_v40, %v2697_v20 }
  0x61   : > { %2268 = vmatpush3.bf16.msra.mxu0 %v2361_v58  ;;  %860 = vmatpush1.bf16.msra.mxu1 %v2358_v57  ;;  %v2833_v42 = vld [vmem:[%s2702_s7 + $0x214] ss:$36 sps:$4 sm:$0x3f]   ;;  %v1561_v47 = vand.u32 %v2830_v41, %v2697_v20  ;;  %v2409_v53 = vld [vmem:[%s2702_s7 + $0x188] ss:$36 sps:$4 sm:$0x3f]  }
  0x62   : > { %900 = vmatprep.subr.bf16.mxu0 %v828_v61  ;;  %943 = vmatprep.subr.bf16.mxu1 %v834_v62  ;;  %v1564_v46 = vand.u32 %v2833_v42, %v2697_v20  ;;  %v2429_v48 = vld [vmem:[%s2702_s7 + $0x218] ss:$36 sps:$4 sm:$0x3f]   ;;  %v2400_v49 = vld [vmem:[%s2702_s7 + $0x130] ss:$36 sps:$4 sm:$0xff]   ;;  %v1205_v56 = vand.u32 %v2409_v53, %v2697_v20 }
  0x63   : > { %v2403_v50 = vld [vmem:[%s2702_s7 + $0x138] ss:$36 sps:$4 sm:$0xff]   ;;  %v1567_v51 = vand.u32 %v2429_v48, %v2697_v20  ;;  %v2416_v59 = vld [vmem:[%s2702_s7 + $0x204] ss:$36 sps:$4 sm:$0x3f]  }
  0x64   : > { %2270 = vmatmul.mubr.msk.bf16.vlgmr.msra.gmra.mxu0 %vm466_vm2, %v2723_v38  ;;  %2133 = vmatmul.mubr.msk.bf16.vlgmr.msra.gmra.mxu1 %vm466_vm2, %v2723_v38  ;;  %v2406_v52 = vld [vmem:[%s2702_s7 + $0x1f8] ss:$36 sps:$4 sm:$0x3f]   ;;  %v2419_v60 = vld [vmem:[%s2702_s7 + $0x20c] ss:$36 sps:$4 sm:$0x3f]  }
  0x65   : > { %901 = vmatpush1.bf16.msra.mxu0 %v825_v0  ;;  %944 = vmatpush1.bf16.msra.mxu1 %v831_v1  ;;  %v1543_v57 = vand.u32 %v2406_v52, %v2697_v20  ;;  %v2412_v58 = vld [vmem:[%s2702_s7 + $0x1b4] ss:$36 sps:$4 sm:$0xff]   ;;  %v2413_v62 = vld [vmem:[%s2702_s7 + $0x140] ss:$36 sps:$4 sm:$0xff]   ;;  %v1558_v0 = vand.u32 %v2419_v60, %v2697_v20  ;;  %v2432_v5 = vld [vmem:[%s2702_s7 + $0x1cc] ss:$36 sps:$4 sm:$0xff]  }
  0x66   : > { %902 = vmatprep.subr.bf16.mxu0 %v2370_v63  ;;  %945 = vmatprep.subr.bf16.mxu1 %v2373_v2  ;;  %v2410_v61 = vld [vmem:[%s2702_s7 + $0x1b0] ss:$36 sps:$4 sm:$0xff]   ;;  %v1552_v63 = vand.u32 %v2416_v59, %v2697_v20  ;;  %v2422_v1 = vld [vmem:[%s2702_s7 + $0x1bc] ss:$36 sps:$4 sm:$0xff]   ;;  %v2425_v2 = vld [vmem:[%s2702_s7 + $0x1c4] ss:$36 sps:$4 sm:$0xff]  }
  0x67   : > { %920 = vmatprep.mubr.bf16.mxu0 %v2459_v18  ;;  %963 = vmatprep.mubr.bf16.mxu1 %v2459_v18  ;;  %v2420_v3 = vld [vmem:[%s2702_s7 + $0x1b8] ss:$36 sps:$4 sm:$0xff]   ;;  %v2430_v20 = vld [vmem:[%s2702_s7 + $0x1c8] ss:$36 sps:$4 sm:$0xff]  }
  0x69   : > { %903 = vmatpush1.bf16.msra.mxu0 %v2368_v4  ;;  %946 = vmatpush1.bf16.msra.mxu1 %v2371_v6  ;;  %v2423_v4 = vld [vmem:[%s2702_s7 + $0x1c0] ss:$36 sps:$4 sm:$0xff]   ;;  %v2433_v6 = vld [vmem:[%s2702_s7 + $0x1d0] ss:$36 sps:$4 sm:$0xff]  }
  0x6a   : > { %986 = vmatprep.subr.bf16.mxu0 %v840_v8  ;;  %2273 = vmatprep.subr.bf16.mxu1 %v2460_v55 }
  0x6c   : > { %2134 = vmatmul.mubr.msk.bf16.vlgmr.msra.gmra.mxu0 %vm466_vm2, %v2723_v38  ;;  %2135 = vmatmul.mubr.msk.bf16.vlgmr.msra.gmra.mxu1 %vm466_vm2, %v2723_v38 }
  0x6d   : > { %987 = vmatpush1.bf16.msra.mxu0 %v837_v10  ;;  %2274 = vmatpush3.bf16.msra.mxu1 %v843_v11 }
  0x6e   : > { %988 = vmatprep.subr.bf16.mxu0 %v2380_v9  ;;  %2275 = vmatprep.subr.bf16.mxu1 %v2460_v55 }
  0x6f   : > { %1006 = vmatprep.mubr.bf16.mxu0 %v2459_v18  ;;  %2277 = vmatprep.mubr.msk.bf16.mxu1 %vm2461_vm3, %v2460_v55 }
  0x71   : > { %989 = vmatpush1.bf16.msra.mxu0 %v2378_v14  ;;  %2276 = vmatpush3.bf16.msra.mxu1 %v2381_v15 }
  0x72   : > { %1219 = vmatprep.subr.bf16.mxu0 %v1184_v19  ;;  %1262 = vmatprep.subr.bf16.mxu1 %v1190_v21 }
  0x74   : > { %2136 = vmatmul.mubr.msk.bf16.vlgmr.msra.gmra.mxu0 %vm466_vm2, %v2723_v38  ;;  %2278 = vmatmul.mubr.msk.bf16.vlgmr.msra.gmra.mxu1 %vm466_vm2, %v2723_v38 }
  0x75   : > { %1220 = vmatpush1.bf16.msra.mxu0 %v1181_v25  ;;  %1263 = vmatpush1.bf16.msra.mxu1 %v1187_v26 }
  0x76   : > { %1221 = vmatprep.subr.bf16.mxu0 %v2390_v22  ;;  %1264 = vmatprep.subr.bf16.mxu1 %v2393_v23 }
  0x77   : > { %1239 = vmatprep.mubr.bf16.mxu0 %v2459_v18  ;;  %1282 = vmatprep.mubr.bf16.mxu1 %v2459_v18 }
  0x79   : > { %1222 = vmatpush1.bf16.msra.mxu0 %v2388_v29  ;;  %1265 = vmatpush1.bf16.msra.mxu1 %v2391_v33 }
  0x7a   : > { %1305 = vmatprep.subr.bf16.mxu0 %v1196_v35  ;;  %1348 = vmatprep.subr.bf16.mxu1 %v1202_v36 }
  0x7c   : > { %2176 = vmatmul.mubr.msk.bf16.vlgmr.msra.gmra.mxu0 %vm466_vm2, %v2723_v38  ;;  %2177 = vmatmul.mubr.msk.bf16.vlgmr.msra.gmra.mxu1 %vm466_vm2, %v2723_v38 }
  0x7d   : > { %1306 = vmatpush1.bf16.msra.mxu0 %v1193_v43  ;;  %1349 = vmatpush1.bf16.msra.mxu1 %v1199_v44 }
  0x7e   : > { %1307 = vmatprep.subr.bf16.mxu0 %v2402_v39  ;;  %1350 = vmatprep.subr.bf16.mxu1 %v2405_v45 }
  0x7f   : > { %1325 = vmatprep.mubr.bf16.mxu0 %v2459_v18  ;;  %1368 = vmatprep.mubr.bf16.mxu1 %v2459_v18 }
  0x81   : > { %1308 = vmatpush1.bf16.msra.mxu0 %v2400_v49  ;;  %1351 = vmatpush1.bf16.msra.mxu1 %v2403_v50 }
  0x82   : > { %2281 = vmatprep.subr.bf16.mxu0 %v2460_v55  ;;  %1581 = vmatprep.subr.bf16.mxu1 %v1546_v54 }
  0x84   : > { %2178 = vmatmul.mubr.msk.bf16.vlgmr.msra.gmra.mxu0 %vm466_vm2, %v2723_v38  ;;  %2179 = vmatmul.mubr.msk.bf16.vlgmr.msra.gmra.mxu1 %vm466_vm2, %v2723_v38 }
  0x85   : > { %2282 = vmatpush3.bf16.msra.mxu0 %v1205_v56  ;;  %1582 = vmatpush1.bf16.msra.mxu1 %v1543_v57 }
  0x86   : > { %2283 = vmatprep.subr.bf16.mxu0 %v2460_v55  ;;  %1583 = vmatprep.subr.bf16.mxu1 %v2412_v58 }
  0x87   : > { %2285 = vmatprep.mubr.msk.bf16.mxu0 %vm2461_vm3, %v2460_v55  ;;  %1601 = vmatprep.mubr.bf16.mxu1 %v2459_v18 }
  0x89   : > { %2284 = vmatpush3.bf16.msra.mxu0 %v2413_v62  ;;  %1584 = vmatpush1.bf16.msra.mxu1 %v2410_v61 }
  0x8a   : > { %1624 = vmatprep.subr.bf16.mxu0 %v1552_v63  ;;  %1667 = vmatprep.subr.bf16.mxu1 %v1558_v0 }
  0x8c   : > { %2286 = vmatmul.mubr.msk.bf16.vlgmr.msra.gmra.mxu0 %vm466_vm2, %v2723_v38  ;;  %2219 = vmatmul.mubr.msk.bf16.vlgmr.msra.gmra.mxu1 %vm466_vm2, %v2723_v38 }
  0x8d   : > { %1625 = vmatpush1.bf16.msra.mxu0 %v1549_v32  ;;  %1668 = vmatpush1.bf16.msra.mxu1 %v1555_v37 }
  0x8e   : > { %1626 = vmatprep.subr.bf16.mxu0 %v2422_v1  ;;  %1669 = vmatprep.subr.bf16.mxu1 %v2425_v2 }
  0x8f   : > { %1644 = vmatprep.mubr.bf16.mxu0 %v2459_v18  ;;  %1687 = vmatprep.mubr.bf16.mxu1 %v2459_v18 }
  0x91   : > { %1627 = vmatpush1.bf16.msra.mxu0 %v2420_v3  ;;  %1670 = vmatpush1.bf16.msra.mxu1 %v2423_v4 }
  0x92   : > { %1710 = vmatprep.subr.bf16.mxu0 %v1564_v46  ;;  %2289 = vmatprep.subr.bf16.mxu1 %v2460_v55 }
  0x94   : > { %2220 = vmatmul.mubr.msk.bf16.vlgmr.msra.gmra.mxu0 %vm466_vm2, %v2723_v38  ;;  %2221 = vmatmul.mubr.msk.bf16.vlgmr.msra.gmra.mxu1 %vm466_vm2, %v2723_v38 }
  0x95   : > { %1711 = vmatpush1.bf16.msra.mxu0 %v1561_v47  ;;  %2290 = vmatpush3.bf16.msra.mxu1 %v1567_v51 }
  0x96   : > { %1712 = vmatprep.subr.bf16.mxu0 %v2432_v5  ;;  %2291 = vmatprep.subr.bf16.mxu1 %v2460_v55 }
  0x97   : > { %1730 = vmatprep.mubr.bf16.mxu0 %v2459_v18  ;;  %2293 = vmatprep.mubr.msk.bf16.mxu1 %vm2461_vm3, %v2460_v55 }
  0x99   : > { %1713 = vmatpush1.bf16.msra.mxu0 %v2430_v20  ;;  %2292 = vmatpush3.bf16.msra.mxu1 %v2433_v6 }
  0x9c   : > { %2222 = vmatmul.mubr.msk.bf16.vlgmr.msra.gmra.mxu0 %vm466_vm2, %v2723_v38  ;;  %2294 = vmatmul.mubr.msk.bf16.vlgmr.msra.gmra.mxu1 %vm466_vm2, %v2723_v38 }
  0xc5   : > { %v2972_v63 = vpop.permute.xlu0 %1804 }
 0x114   : > { %v535_v7 = vpop.f32.mrf.mxu0  ;;  %v2902_v8 = vpop.f32.mrf.mxu1 }
 0x116   : > { %v537_v9 = vpop.f32.mrf.mxu0  ;;  %v2904_v10 = vpop.f32.mrf.mxu1 }
 0x118   : > { %v2906_v11 = vpop.f32.mrf.mxu0  ;;  %v2908_v18 = vpop.f32.mrf.mxu1 }
 0x11a   : > { %v2910_v12 = vpop.f32.mrf.mxu0  ;;  %v2912_v55 = vpop.f32.mrf.mxu1 }
 0x11c   : > { %v2914_v13 = vpop.f32.mrf.mxu0  ;;  %v2916_v14 = vpop.f32.mrf.mxu1 }
 0x11e   : > { %v2918_v15 = vpop.f32.mrf.mxu0  ;;  %v2920_v38 = vpop.f32.mrf.mxu1 }
 0x120   : > { %v2922_v16 = vpop.f32.mrf.mxu0  ;;  %v2924_v17 = vpop.f32.mrf.mxu1 }
 0x122   : > { %v2926_v19 = vpop.f32.mrf.mxu0  ;;  %v2928_v21 = vpop.f32.mrf.mxu1 }
 0x124   : > { %v2930_v22 = vpop.f32.mrf.mxu0  ;;  %v879_v23 = vpop.f32.mrf.mxu1 }
 0x125   : > { %v1058_v62 = vmax.f32 %v535_v7, %v879_v23 }
 0x126   : > { %v2271_v24 = vpop.f32.mrf.mxu0  ;;  %v881_v25 = vpop.f32.mrf.mxu1 }
 0x127   : > { %v1059_v2 = vmax.f32 %v537_v9, %v881_v25 }
 0x128   : > { %v2932_v26 = vpop.f32.mrf.mxu0  ;;  %v883_v27 = vpop.f32.mrf.mxu1 }
 0x129   : > { %v1067_v20 = vmax.f32 %v2906_v11, %v883_v27  ;;  %v2989_v27 = vpop.permute.xlu0 %1809 }
 0x12a   : > { %v2272_v28 = vpop.f32.mrf.mxu0  ;;  %v885_v29 = vpop.f32.mrf.mxu1 }
 0x12b   : > { %v1068_v28 = vmax.f32 %v2910_v12, %v885_v29 }
 0x12c   : > { %v2934_v30 = vpop.f32.mrf.mxu0  ;;  %v2936_v31 = vpop.f32.mrf.mxu1 }
 0x12d   : > { %v1060_v7 = vmax.f32 %v2902_v8, %v2934_v30  ;;  %v1062_v23 = vmax.f32 %v2914_v13, %v2936_v31 }
 0x12e   : > { %v2938_v32 = vpop.f32.mrf.mxu0  ;;  %v2940_v33 = vpop.f32.mrf.mxu1 }
 0x12f   : > { %v1061_v9 = vmax.f32 %v2904_v10, %v2938_v32  ;;  %v1063_v12 = vmax.f32 %v2918_v15, %v2940_v33 }
 0x130   : > { %v2942_v34 = vpop.f32.mrf.mxu0  ;;  %v2944_v35 = vpop.f32.mrf.mxu1 }
 0x131   : > { %v1069_v8 = vmax.f32 %v2908_v18, %v2942_v34  ;;  %v1071_v13 = vmax.f32 %v2922_v16, %v2944_v35 }
 0x132   : > { %v2946_v36 = vpop.f32.mrf.mxu0  ;;  %v2948_v37 = vpop.f32.mrf.mxu1 }
 0x133   : > { %v1070_v29 = vmax.f32 %v2912_v55, %v2946_v36  ;;  %v1072_v31 = vmax.f32 %v2926_v19, %v2948_v37 }
 0x134   : > { %v2950_v39 = vpop.f32.mrf.mxu0  ;;  %v2952_v40 = vpop.f32.mrf.mxu1 }
 0x135   : > { %v1064_v18 = vmax.f32 %v2916_v14, %v2950_v39  ;;  %v1066_v16 = vmax.f32 %v2930_v22, %v2952_v40 }
 0x136   : > { %v2954_v41 = vpop.f32.mrf.mxu0  ;;  %v2279_v42 = vpop.f32.mrf.mxu1 }
 0x137   : > { %v1065_v55 = vmax.f32 %v2920_v38, %v2954_v41 }
 0x138   : > { %v2956_v43 = vpop.f32.mrf.mxu0  ;;  %v2958_v44 = vpop.f32.mrf.mxu1 }
 0x139   : > { %v1073_v37 = vmax.f32 %v2924_v17, %v2956_v43  ;;  %v1075_v14 = vmax.f32 %v2932_v26, %v2958_v44 }
 0x13a   : > { %v2960_v45 = vpop.f32.mrf.mxu0  ;;  %v2280_v46 = vpop.f32.mrf.mxu1 }
 0x13c   : > { %v1241_v47 = vpop.f32.mrf.mxu0  ;;  %v1284_v48 = vpop.f32.mrf.mxu1 }
 0x13d   : > { %v1420_v3 = vmax.f32 %v1058_v62, %v1241_v47  ;;  %v1422_v34 = vmax.f32 %v1060_v7, %v1284_v48 }
 0x13e   : > { %v1243_v49 = vpop.f32.mrf.mxu0  ;;  %v1286_v50 = vpop.f32.mrf.mxu1 }
 0x13f   : > { %v1421_v6 = vmax.f32 %v1059_v2, %v1243_v49  ;;  %v1423_v39 = vmax.f32 %v1061_v9, %v1286_v50 }
 0x140   : > { %v1245_v51 = vpop.f32.mrf.mxu0  ;;  %v1288_v52 = vpop.f32.mrf.mxu1 }
 0x141   : > { %v1429_v25 = vmax.f32 %v1067_v20, %v1245_v51 }
 0x142   : > { %v1247_v53 = vpop.f32.mrf.mxu0  ;;  %v2962_v54 = vpop.f32.mrf.mxu1 }
 0x143   : > { %v1430_v32 = vmax.f32 %v1068_v28, %v1247_v53  ;;  %v1432_v28 = vmax.f32 %v1070_v29, %v2962_v54 }
 0x144   : > { %v1327_v56 = vpop.f32.mrf.mxu0  ;;  %v2964_v57 = vpop.f32.mrf.mxu1 }
 0x145   : > { %v1424_v22 = vmax.f32 %v1062_v23, %v1327_v56  ;;  %v1426_v7 = vmax.f32 %v1064_v18, %v2964_v57 }
 0x146   : > { %v1329_v58 = vpop.f32.mrf.mxu0  ;;  %v2966_v59 = vpop.f32.mrf.mxu1 }
 0x147   : > { %v1425_v38 = vmax.f32 %v1063_v12, %v1329_v58 }
 0x148   : > { %v2968_v60 = vpop.f32.mrf.mxu0  ;;  %v2970_v61 = vpop.f32.mrf.mxu1 }
 0x14a   : > { %v2974_v0 = vpop.f32.mrf.mxu0  ;;  %v2976_v1 = vpop.f32.mrf.mxu1 }
 0x14c   : > { %v2978_v4 = vpop.f32.mrf.mxu0  ;;  %v1603_v5 = vpop.f32.mrf.mxu1 }
 0x14d   : > { %v1782_v24 = vmax.f32 %v1420_v3, %v1603_v5  ;;  %v1074_v3 = vmax.f32 %v2928_v21, %v2960_v45  ;;  %v1431_v5 = vmax.f32 %v1069_v8, %v1288_v52  ;;  %v1433_v21 = vmax.f32 %v1071_v13, %v2968_v60 }
 0x14e   : > { %v2287_v42 = vpop.f32.mrf.mxu0  ;;  %v1605_v46 = vpop.f32.mrf.mxu1 }
 0x14f   : > { %v1783_v47 = vmax.f32 %v1421_v6, %v1605_v46  ;;  %v1812_v11 = vadd.f32 %v2972_v63, %v1782_v24  ;;  %v1434_v42 = vmax.f32 %v1072_v31, %v2974_v0  ;;  %v1428_v0 = vmax.f32 %v1066_v16, %v2978_v4 }
 0x150   : > { %v3003_v10 = vpop.f32.mrf.mxu0  ;;  %v1607_v30 = vpop.f32.mrf.mxu1 }
 0x151   : > { %v1813_v15 = vadd.f32 %v2972_v63, %v1783_v47  ;;  %v1791_v33 = vmax.f32 %v1429_v25, %v1607_v30  ;;  %v1830_v49 = vmax.f32 %v1812_v11, 0.0 }
 0x152   : > { %v2288_v35 = vpop.f32.mrf.mxu0  ;;  %v1609_v36 = vpop.f32.mrf.mxu1 }
 0x153   : > { %v1831_v51 = vmax.f32 %v1813_v15, 0.0  ;;  %v1792_v62 = vmax.f32 %v1430_v32, %v1609_v36  ;;  %v1821_v19 = vadd.f32 %v2989_v27, %v1791_v33  ;;  %v1427_v32 = vmax.f32 %v1065_v55, %v2966_v59 }
 0x154   : > { %v1646_v40 = vpop.f32.mrf.mxu0  ;;  %v1689_v53 = vpop.f32.mrf.mxu1 }
 0x155   : > { %v2242_v41 = vpack.c.bf16 %v1831_v51, %v1830_v49  ;;  %v1822_v48 = vadd.f32 %v2989_v27, %v1792_v62  ;;  %v1784_v2 = vmax.f32 %v1422_v34, %v1646_v40  ;;  %v1839_v20 = vmax.f32 %v1821_v19, 0.0 }
 0x156   : > { %v1786_v6 = vmax.f32 %v1424_v22, %v1689_v53  ;;  %v1648_v17 = vpop.f32.mrf.mxu0  ;;  %v1691_v43 = vpop.f32.mrf.mxu1  ;;  %v1435_v51 = vmax.f32 %v1073_v37, %v2970_v61  ;;  %v1436_v53 = vmax.f32 %v1074_v3, %v2976_v1  ;;  %v1437_v61 = vmax.f32 %v1075_v14, %v3003_v10 }
 0x157   : > { %1904 = vst [vmem:[%s3023_s11] sm:$0xff] %v2242_v41  ;;  %v1840_v50 = vmax.f32 %v1822_v48, 0.0  ;;  %v1814_v56 = vadd.f32 %v2972_v63, %v1784_v2  ;;  %v1785_v58 = vmax.f32 %v1423_v39, %v1648_v17  ;;  %v1787_v24 = vmax.f32 %v1425_v38, %v1691_v43 }
 0x158   : > { %v1816_v45 = vadd.f32 %v2972_v63, %v1786_v6  ;;  %v1650_v52 = vpop.f32.mrf.mxu0  ;;  %v1693_v23 = vpop.f32.mrf.mxu1 }
 0x159   : > { %v2247_v46 = vpack.c.bf16 %v1840_v50, %v1839_v20  ;;  %v1815_v9 = vadd.f32 %v2972_v63, %v1785_v58  ;;  %v1817_v25 = vadd.f32 %v2972_v63, %v1787_v24  ;;  %v1832_v47 = vmax.f32 %v1814_v56, 0.0 }
 0x15a   : > { %v1834_v11 = vmax.f32 %v1816_v45, 0.0  ;;  %v1793_v12 = vmax.f32 %v1431_v5, %v1650_v52  ;;  %v1795_v54 = vmax.f32 %v1433_v21, %v1693_v23  ;;  %v1652_v8 = vpop.f32.mrf.mxu0  ;;  %v1695_v29 = vpop.f32.mrf.mxu1 }
 0x15b   : > { %1909 = vst [vmem:[%s3023_s11 + $0x24] sm:$0xff] %v2247_v46  ;;  %v1833_v57 = vmax.f32 %v1815_v9, 0.0  ;;  %v1835_v60 = vmax.f32 %v1817_v25, 0.0  ;;  %v1794_v13 = vmax.f32 %v1432_v28, %v1652_v8  ;;  %v1796_v30 = vmax.f32 %v1434_v42, %v1695_v29 }
 0x15c   : > { %v1823_v31 = vadd.f32 %v2989_v27, %v1793_v12  ;;  %v1825_v15 = vadd.f32 %v2989_v27, %v1795_v54  ;;  %v1732_v33 = vpop.f32.mrf.mxu0  ;;  %v1775_v18 = vpop.f32.mrf.mxu1 }
 0x15d   : > { %v2243_v34 = vpack.c.bf16 %v1833_v57, %v1832_v47  ;;  %v2244_v35 = vpack.c.bf16 %v1835_v60, %v1834_v11  ;;  %v1824_v36 = vadd.f32 %v2989_v27, %v1794_v13  ;;  %v1826_v49 = vadd.f32 %v2989_v27, %v1796_v30 }
 0x15e   : > { %v1841_v62 = vmax.f32 %v1823_v31, 0.0  ;;  %v1788_v59 = vmax.f32 %v1426_v7, %v1732_v33  ;;  %v1790_v55 = vmax.f32 %v1428_v0, %v1775_v18  ;;  %v1734_v19 = vpop.f32.mrf.mxu0  ;;  %v2295_v4 = vpop.f32.mrf.mxu1  ;;  %v1843_v16 = vmax.f32 %v1825_v15, 0.0 }
 0x15f   : > { %1905 = vst [vmem:[%s3023_s11 + $0x8] sm:$0xff] %v2243_v34  ;;  %1906 = vst [vmem:[%s3023_s11 + $0x10] sm:$0xff] %v2244_v35  ;;  %v1842_v39 = vmax.f32 %v1824_v36, 0.0  ;;  %v1844_v22 = vmax.f32 %v1826_v49, 0.0  ;;  %v1789_v40 = vmax.f32 %v1427_v32, %v1734_v19 }
 0x160   : > { %v1818_v37 = vadd.f32 %v2972_v63, %v1788_v59  ;;  %v1820_v38 = vadd.f32 %v2972_v63, %v1790_v55  ;;  %v1736_v41 = vpop.f32.mrf.mxu0  ;;  %v1778_v48 = vpop.f32.mrf.mxu1 }
 0x161   : > { %v2248_v2 = vpack.c.bf16 %v1842_v39, %v1841_v62  ;;  %v2249_v5 = vpack.c.bf16 %v1844_v22, %v1843_v16  ;;  %v1819_v20 = vadd.f32 %v2972_v63, %v1789_v40  ;;  %v1797_v6 = vmax.f32 %v1435_v51, %v1736_v41 }
 0x162   : > { %v1838_v17 = vmax.f32 %v1820_v38, 0.0  ;;  %v1799_v1 = vmax.f32 %v1437_v61, %v1778_v48  ;;  %v1738_v3 = vpop.f32.mrf.mxu0  ;;  %v2296_v43 = vpop.f32.mrf.mxu1  ;;  %v1836_v26 = vmax.f32 %v1818_v37, 0.0  ;;  %v1946_v46 = vld [vmem:[%s3023_s11 + $0x24] sm:$0xff] (%p2512_p5) }
 0x163   : > { %1910 = vst [vmem:[%s3023_s11 + $0x2c] sm:$0xff] %v2248_v2  ;;  %1911 = vst [vmem:[%s3023_s11 + $0x34] sm:$0xff] %v2249_v5  ;;  %v1837_v44 = vmax.f32 %v1819_v20, 0.0  ;;  %v1827_v10 = vadd.f32 %v2989_v27, %v1797_v6  ;;  %v1798_v14 = vmax.f32 %v1436_v53, %v1738_v3 }
 0x164   : > { %v2246_v50 = vpack.c.bf16 %v1838_v17, %v1838_v17  ;;  %v1829_v56 = vadd.f32 %v2989_v27, %v1799_v1  ;;  %1947 = vst [vmem:[%s1923_s14 + $0x90] sm:$0xff] (%p2512_p5), %v1946_v46 }
 0x165   : > { %v2245_v63 = vpack.c.bf16 %v1837_v44, %v1836_v26  ;;  %v1828_v58 = vadd.f32 %v2989_v27, %v1798_v14  ;;  %v1845_v28 = vmax.f32 %v1827_v10, 0.0  ;;  %v1938_v27 = vld [vmem:[%s3023_s11] sm:$0xff] (%p2512_p5) }
 0x166   : > { %1908 = vst [vmem:[%s3023_s11 + $0x20] sm:$0xf] %v2246_v50  ;;  %v1847_v24 = vmax.f32 %v1829_v56, 0.0  ;;  %v1940_v52 = vld [vmem:[%s3023_s11 + $0x8] sm:$0xff] (%p2512_p5)  ;;  %v1942_v23 = vld [vmem:[%s3023_s11 + $0x10] sm:$0xff] (%p2512_p5)  ;;  %1939 = vst [vmem:[%s1923_s14] sm:$0xff] (%p2512_p5), %v1938_v27 }
 0x167   : > { %1907 = vst [vmem:[%s3023_s11 + $0x18] sm:$0xff] %v2245_v63  ;;  %v1846_v7 = vmax.f32 %v1828_v58, 0.0  ;;  %1920 = sbr.rel (!%p2512_p5) target bundleno = 372 (0x174), region = 62  ;;  %1941 = vst [vmem:[%s1923_s14 + $0x8] sm:$0xff] (%p2512_p5), %v1940_v52 }
 0x168   : > { %v2251_v21 = vpack.c.bf16 %v1847_v24, %v1847_v24  ;;  %1943 = vst [vmem:[%s1923_s14 + $0x10] sm:$0xff] (%p2512_p5), %v1942_v23 }
 0x169   : > { %v2250_v45 = vpack.c.bf16 %v1846_v7, %v1845_v28 }
 0x16a   : > { %1913 = vst [vmem:[%s3023_s11 + $0x44] sm:$0xf] %v2251_v21  ;;  %v1948_v9 = vld [vmem:[%s3023_s11 + $0x2c] sm:$0xff] (%p2512_p5)  ;;  %v1950_v25 = vld [vmem:[%s3023_s11 + $0x34] sm:$0xff] (%p2512_p5) }
 0x16b   : > { %1912 = vst [vmem:[%s3023_s11 + $0x3c] sm:$0xff] %v2250_v45  ;;  %1949 = vst [vmem:[%s1923_s14 + $0x98] sm:$0xff] (%p2512_p5), %v1948_v9 }
 0x16c   : > { %1951 = vst [vmem:[%s1923_s14 + $0xa0] sm:$0xff] %v1950_v25 }
 0x16d   : > { %v2235_v11 = vld [vmem:[%s3023_s11 + $0x20] sm:$0xf] }
 0x16e   : > { %v1944_v42 = vld [vmem:[%s3023_s11 + $0x18] sm:$0xff]  ;;  %2236 = vst [vmem:[%s1923_s14 + $0x20] sm:$0xf] %v2235_v11 }
 0x16f   : > { %1945 = vst [vmem:[%s1923_s14 + $0x18] sm:$0xff] %v1944_v42 }
 0x171   : > { %v2237_v12 = vld [vmem:[%s3023_s11 + $0x44] sm:$0xf] }
 0x172   : > { %v1952_v47 = vld [vmem:[%s3023_s11 + $0x3c] sm:$0xff]  ;;  %2238 = vst [vmem:[%s1923_s14 + $0xb0] sm:$0xf] %v2237_v12 }
 0x173   : > { %1953 = vst [vmem:[%s1923_s14 + $0xa8] sm:$0xff] %v1952_v47 }
 0x174 PF: > { %p10_p10 = scmp.ge.s32.totalorder %s2499_s16, 6   ;;  %s3093_s12 = smov %s2452_s13 }
 0x175   : > { %s3094_s13 = smov %s2510_s19  ;;  %s3095_s14 = smov %s2499_s16 }
 0x176   :  { %12 = sbr.rel (!%p10_p10) target bundleno = 2 (0x2), region = 134 }

// kernel: simple_cnn_forward.5
= control target key start
LH: loop header
LB: loop body
LE: loop exit
PB: predicated region body
PF: predicated region fallthrough
CT: control target
= control target key end

     0   :  { %s2531_s12 = smov 0   ;;  %s2533_s13 = smov 0   ;;  %s3181_s0 = inlined_call_operand.vmem [shape: bf16[4,144,1152], index: 0, kind: input, shape index: {}]   ;;  %s3182_s1 = inlined_call_operand.vmem [shape: bf16[32,144], index: 1, kind: input, shape index: {}]   ;;  %s3183_s2 = inlined_call_operand.vmem [shape: f32[32,1], index: 2, kind: input, shape index: {}]   ;;  %s3184_s3 = inlined_call_operand.vmem [shape: bf16[32,1152], index: 3, kind: output, shape index: {}]  }
   0x1   :  { %s2535_s14 = smov 0  }
   0x2 LB: > { %s1891_s15 = sadd.s32 4294967295, %s2508_s14   ;;  %s2548_s16 = sadd.s32 1, %s2508_s14   ;;  %s2508_s14 = sphi %s2535_s14, %s3188_s14   ;;  %s2504_s13 = sphi %s2533_s13, %s3187_s13   ;;  %s2500_s12 = sphi %s2531_s12, %s3186_s12  }
   0x3   : > { %s17_s17 = ssub.s32 %s2508_s14, %s2548_s16  ;;  %s20_s18 = sadd.s32 1, %s2504_s13 }
   0x4   : > { %p18_p0 = scmp.eq.s32.totalorder %s17_s17, 0  ;;  %p27_p1 = scmp.ne.s32.totalorder %s2504_s13, %s2500_s12 }
   0x5   : > { %p28_p2 = scmp.eq.s32.totalorder %s2508_s14, 0  ;;  %p99_p3 = scmp.eq.s32.totalorder %s1891_s15, 2 }
   0x6   : > { %s2559_s19 = scalar_select %p18_p0, %s2504_s13, %s20_s18  }
   0x7   : > { %p29_p4 = por %p28_p2, %p27_p1  ;;  %p2561_p5 = por %p99_p3, %p27_p1 }
   0x8   : > { %p1894_p6 = scmp.ge.s32.totalorder %s2508_s14, 3 }
   0xa   : > { %127 = sbr.rel (%p1894_p6) target bundleno = 104 (0x68), region = 24 }
   0xf   : > { %130 = sbr.rel (!%p29_p4) target bundleno = 104 (0x68), region = 28  ;;  %s132_s21 = sand.u32 (%p29_p4), 1, %s2504_s13  }
  0x10   : > { %s2296_s22 = smul.u32 (%p29_p4), 12, %s2508_s14 }
  0x11   : > { %s2306_s23 = smul.u32 (%p29_p4), 864, %s132_s21 }
  0x12   : > { %s2571_s26 = scalar_lea.vmem (%p29_p4), %s3181_s0, %s2296_s22 }
  0x13   : > { %v152_v0 = vld [vmem:[%s2571_s26] sm:$0xff] (%p29_p4)  ;;  %v156_v2 = vld [vmem:[%s2571_s26 + $0x48] sm:$0xff] (%p29_p4)  ;;  %s2576_s27 = scalar_lea.vmem (%p29_p4), [#allocation2], %s2306_s23  ;;  %v160_v4 = vld [vmem:[%s2571_s26 + $0x90] sm:$0xff] (%p29_p4) }
  0x14   : > { %v154_v1 = vld [vmem:[%s2571_s26 + $0x24] sm:$0xff]  ;;  %153 = vst [vmem:[%s2576_s27] sm:$0xff] %v152_v0  ;;  %157 = vst [vmem:[%s2576_s27 + $0x18] sm:$0xff] %v156_v2  ;;  %v158_v3 = vld [vmem:[%s2571_s26 + $0x6c] sm:$0xff] }
  0x15   : > { %155 = vst [vmem:[%s2576_s27 + $0xc] sm:$0xff] %v154_v1  ;;  %v162_v5 = vld [vmem:[%s2571_s26 + $0xb4] sm:$0xff]  ;;  %159 = vst [vmem:[%s2576_s27 + $0x24] sm:$0xff] %v158_v3  ;;  %v166_v7 = vld [vmem:[%s2571_s26 + $0xfc] sm:$0xff] }
  0x16   : > { %161 = vst [vmem:[%s2576_s27 + $0x30] sm:$0xff] %v160_v4  ;;  %163 = vst [vmem:[%s2576_s27 + $0x3c] sm:$0xff] %v162_v5  ;;  %v164_v6 = vld [vmem:[%s2571_s26 + $0xd8] sm:$0xff]  ;;  %v168_v8 = vld [vmem:[%s2571_s26 + $0x120] sm:$0xff] }
  0x17   : > { %165 = vst [vmem:[%s2576_s27 + $0x48] sm:$0xff] %v164_v6  ;;  %167 = vst [vmem:[%s2576_s27 + $0x54] sm:$0xff] %v166_v7  ;;  %v170_v9 = vld [vmem:[%s2571_s26 + $0x144] sm:$0xff]  ;;  %v174_v11 = vld [vmem:[%s2571_s26 + $0x18c] sm:$0xff] }
  0x18   : > { %169 = vst [vmem:[%s2576_s27 + $0x60] sm:$0xff] %v168_v8  ;;  %v172_v10 = vld [vmem:[%s2571_s26 + $0x168] sm:$0xff]  ;;  %171 = vst [vmem:[%s2576_s27 + $0x6c] sm:$0xff] %v170_v9  ;;  %v176_v12 = vld [vmem:[%s2571_s26 + $0x1b0] sm:$0xff] }
  0x19   : > { %173 = vst [vmem:[%s2576_s27 + $0x78] sm:$0xff] %v172_v10  ;;  %175 = vst [vmem:[%s2576_s27 + $0x84] sm:$0xff] %v174_v11  ;;  %v178_v13 = vld [vmem:[%s2571_s26 + $0x1d4] sm:$0xff]  ;;  %v182_v15 = vld [vmem:[%s2571_s26 + $0x21c] sm:$0xff] }
  0x1a   : > { %v180_v14 = vld [vmem:[%s2571_s26 + $0x1f8] sm:$0xff]  ;;  %177 = vst [vmem:[%s2576_s27 + $0x90] sm:$0xff] %v176_v12  ;;  %179 = vst [vmem:[%s2576_s27 + $0x9c] sm:$0xff] %v178_v13  ;;  %v184_v16 = vld [vmem:[%s2571_s26 + $0x240] sm:$0xff] }
  0x1b   : > { %181 = vst [vmem:[%s2576_s27 + $0xa8] sm:$0xff] %v180_v14  ;;  %v186_v17 = vld [vmem:[%s2571_s26 + $0x264] sm:$0xff]  ;;  %183 = vst [vmem:[%s2576_s27 + $0xb4] sm:$0xff] %v182_v15  ;;  %v190_v19 = vld [vmem:[%s2571_s26 + $0x2ac] sm:$0xff] }
  0x1c   : > { %185 = vst [vmem:[%s2576_s27 + $0xc0] sm:$0xff] %v184_v16  ;;  %187 = vst [vmem:[%s2576_s27 + $0xcc] sm:$0xff] %v186_v17  ;;  %v188_v18 = vld [vmem:[%s2571_s26 + $0x288] sm:$0xff]  ;;  %v192_v20 = vld [vmem:[%s2571_s26 + $0x2d0] sm:$0xff] }
  0x1d   : > { %189 = vst [vmem:[%s2576_s27 + $0xd8] sm:$0xff] %v188_v18  ;;  %191 = vst [vmem:[%s2576_s27 + $0xe4] sm:$0xff] %v190_v19  ;;  %v194_v21 = vld [vmem:[%s2571_s26 + $0x2f4] sm:$0xff]  ;;  %v198_v23 = vld [vmem:[%s2571_s26 + $0x33c] sm:$0xff] }
  0x1e   : > { %193 = vst [vmem:[%s2576_s27 + $0xf0] sm:$0xff] %v192_v20  ;;  %v196_v22 = vld [vmem:[%s2571_s26 + $0x318] sm:$0xff]  ;;  %195 = vst [vmem:[%s2576_s27 + $0xfc] sm:$0xff] %v194_v21  ;;  %v200_v24 = vld [vmem:[%s2571_s26 + $0x360] sm:$0xff] }
  0x1f   : > { %197 = vst [vmem:[%s2576_s27 + $0x108] sm:$0xff] %v196_v22  ;;  %199 = vst [vmem:[%s2576_s27 + $0x114] sm:$0xff] %v198_v23  ;;  %v202_v25 = vld [vmem:[%s2571_s26 + $0x384] sm:$0xff]  ;;  %v206_v27 = vld [vmem:[%s2571_s26 + $0x3cc] sm:$0xff] }
  0x20   : > { %v204_v26 = vld [vmem:[%s2571_s26 + $0x3a8] sm:$0xff]  ;;  %201 = vst [vmem:[%s2576_s27 + $0x120] sm:$0xff] %v200_v24  ;;  %203 = vst [vmem:[%s2576_s27 + $0x12c] sm:$0xff] %v202_v25  ;;  %v208_v28 = vld [vmem:[%s2571_s26 + $0x3f0] sm:$0xff] }
  0x21   : > { %205 = vst [vmem:[%s2576_s27 + $0x138] sm:$0xff] %v204_v26  ;;  %v210_v29 = vld [vmem:[%s2571_s26 + $0x414] sm:$0xff]  ;;  %207 = vst [vmem:[%s2576_s27 + $0x144] sm:$0xff] %v206_v27  ;;  %v214_v31 = vld [vmem:[%s2571_s26 + $0x45c] sm:$0xff] }
  0x22   : > { %209 = vst [vmem:[%s2576_s27 + $0x150] sm:$0xff] %v208_v28  ;;  %211 = vst [vmem:[%s2576_s27 + $0x15c] sm:$0xff] %v210_v29  ;;  %v212_v30 = vld [vmem:[%s2571_s26 + $0x438] sm:$0xff]  ;;  %v216_v32 = vld [vmem:[%s2571_s26 + $0x480] sm:$0xff] }
  0x23   : > { %213 = vst [vmem:[%s2576_s27 + $0x168] sm:$0xff] %v212_v30  ;;  %215 = vst [vmem:[%s2576_s27 + $0x174] sm:$0xff] %v214_v31  ;;  %v218_v33 = vld [vmem:[%s2571_s26 + $0x4a4] sm:$0xff]  ;;  %v222_v35 = vld [vmem:[%s2571_s26 + $0x4ec] sm:$0xff] }
  0x24   : > { %217 = vst [vmem:[%s2576_s27 + $0x180] sm:$0xff] %v216_v32  ;;  %v220_v34 = vld [vmem:[%s2571_s26 + $0x4c8] sm:$0xff]  ;;  %219 = vst [vmem:[%s2576_s27 + $0x18c] sm:$0xff] %v218_v33  ;;  %v224_v36 = vld [vmem:[%s2571_s26 + $0x510] sm:$0xff] }
  0x25   : > { %221 = vst [vmem:[%s2576_s27 + $0x198] sm:$0xff] %v220_v34  ;;  %223 = vst [vmem:[%s2576_s27 + $0x1a4] sm:$0xff] %v222_v35  ;;  %v226_v37 = vld [vmem:[%s2571_s26 + $0x534] sm:$0xff]  ;;  %v230_v39 = vld [vmem:[%s2571_s26 + $0x57c] sm:$0xff] }
  0x26   : > { %v228_v38 = vld [vmem:[%s2571_s26 + $0x558] sm:$0xff]  ;;  %225 = vst [vmem:[%s2576_s27 + $0x1b0] sm:$0xff] %v224_v36  ;;  %227 = vst [vmem:[%s2576_s27 + $0x1bc] sm:$0xff] %v226_v37  ;;  %v232_v40 = vld [vmem:[%s2571_s26 + $0x5a0] sm:$0xff] }
  0x27   : > { %229 = vst [vmem:[%s2576_s27 + $0x1c8] sm:$0xff] %v228_v38  ;;  %v234_v41 = vld [vmem:[%s2571_s26 + $0x5c4] sm:$0xff]  ;;  %231 = vst [vmem:[%s2576_s27 + $0x1d4] sm:$0xff] %v230_v39  ;;  %v238_v43 = vld [vmem:[%s2571_s26 + $0x60c] sm:$0xff] }
  0x28   : > { %233 = vst [vmem:[%s2576_s27 + $0x1e0] sm:$0xff] %v232_v40  ;;  %235 = vst [vmem:[%s2576_s27 + $0x1ec] sm:$0xff] %v234_v41  ;;  %v236_v42 = vld [vmem:[%s2571_s26 + $0x5e8] sm:$0xff]  ;;  %v240_v44 = vld [vmem:[%s2571_s26 + $0x630] sm:$0xff] }
  0x29   : > { %237 = vst [vmem:[%s2576_s27 + $0x1f8] sm:$0xff] %v236_v42  ;;  %239 = vst [vmem:[%s2576_s27 + $0x204] sm:$0xff] %v238_v43  ;;  %v242_v45 = vld [vmem:[%s2571_s26 + $0x654] sm:$0xff]  ;;  %v246_v47 = vld [vmem:[%s2571_s26 + $0x69c] sm:$0xff] }
  0x2a   : > { %241 = vst [vmem:[%s2576_s27 + $0x210] sm:$0xff] %v240_v44  ;;  %v244_v46 = vld [vmem:[%s2571_s26 + $0x678] sm:$0xff]  ;;  %243 = vst [vmem:[%s2576_s27 + $0x21c] sm:$0xff] %v242_v45  ;;  %v248_v48 = vld [vmem:[%s2571_s26 + $0x6c0] sm:$0xff] }
  0x2b   : > { %245 = vst [vmem:[%s2576_s27 + $0x228] sm:$0xff] %v244_v46  ;;  %247 = vst [vmem:[%s2576_s27 + $0x234] sm:$0xff] %v246_v47  ;;  %v250_v49 = vld [vmem:[%s2571_s26 + $0x6e4] sm:$0xff]  ;;  %v254_v51 = vld [vmem:[%s2571_s26 + $0x72c] sm:$0xff] }
  0x2c   : > { %v252_v50 = vld [vmem:[%s2571_s26 + $0x708] sm:$0xff]  ;;  %249 = vst [vmem:[%s2576_s27 + $0x240] sm:$0xff] %v248_v48  ;;  %251 = vst [vmem:[%s2576_s27 + $0x24c] sm:$0xff] %v250_v49  ;;  %v256_v52 = vld [vmem:[%s2571_s26 + $0x750] sm:$0xff] }
  0x2d   : > { %253 = vst [vmem:[%s2576_s27 + $0x258] sm:$0xff] %v252_v50  ;;  %v258_v53 = vld [vmem:[%s2571_s26 + $0x774] sm:$0xff]  ;;  %255 = vst [vmem:[%s2576_s27 + $0x264] sm:$0xff] %v254_v51  ;;  %v262_v55 = vld [vmem:[%s2571_s26 + $0x7bc] sm:$0xff] }
  0x2e   : > { %257 = vst [vmem:[%s2576_s27 + $0x270] sm:$0xff] %v256_v52  ;;  %259 = vst [vmem:[%s2576_s27 + $0x27c] sm:$0xff] %v258_v53  ;;  %v260_v54 = vld [vmem:[%s2571_s26 + $0x798] sm:$0xff]  ;;  %v264_v56 = vld [vmem:[%s2571_s26 + $0x7e0] sm:$0xff] }
  0x2f   : > { %261 = vst [vmem:[%s2576_s27 + $0x288] sm:$0xff] %v260_v54  ;;  %263 = vst [vmem:[%s2576_s27 + $0x294] sm:$0xff] %v262_v55  ;;  %v266_v57 = vld [vmem:[%s2571_s26 + $0x804] sm:$0xff]  ;;  %v270_v59 = vld [vmem:[%s2571_s26 + $0x84c] sm:$0xff] }
  0x30   : > { %265 = vst [vmem:[%s2576_s27 + $0x2a0] sm:$0xff] %v264_v56  ;;  %v268_v58 = vld [vmem:[%s2571_s26 + $0x828] sm:$0xff]  ;;  %267 = vst [vmem:[%s2576_s27 + $0x2ac] sm:$0xff] %v266_v57  ;;  %v272_v60 = vld [vmem:[%s2571_s26 + $0x870] sm:$0xff] }
  0x31   : > { %269 = vst [vmem:[%s2576_s27 + $0x2b8] sm:$0xff] %v268_v58  ;;  %271 = vst [vmem:[%s2576_s27 + $0x2c4] sm:$0xff] %v270_v59  ;;  %v274_v61 = vld [vmem:[%s2571_s26 + $0x894] sm:$0xff]  ;;  %v278_v63 = vld [vmem:[%s2571_s26 + $0x8dc] sm:$0xff] }
  0x32   : > { %v276_v62 = vld [vmem:[%s2571_s26 + $0x8b8] sm:$0xff]  ;;  %273 = vst [vmem:[%s2576_s27 + $0x2d0] sm:$0xff] %v272_v60  ;;  %275 = vst [vmem:[%s2576_s27 + $0x2dc] sm:$0xff] %v274_v61  ;;  %v280_v0 = vld [vmem:[%s2571_s26 + $0x900] sm:$0xff] }
  0x33   : > { %277 = vst [vmem:[%s2576_s27 + $0x2e8] sm:$0xff] %v276_v62  ;;  %v282_v1 = vld [vmem:[%s2571_s26 + $0x924] sm:$0xff]  ;;  %279 = vst [vmem:[%s2576_s27 + $0x2f4] sm:$0xff] %v278_v63  ;;  %v286_v3 = vld [vmem:[%s2571_s26 + $0x96c] sm:$0xff] }
  0x34   : > { %281 = vst [vmem:[%s2576_s27 + $0x300] sm:$0xff] %v280_v0  ;;  %283 = vst [vmem:[%s2576_s27 + $0x30c] sm:$0xff] %v282_v1  ;;  %v284_v2 = vld [vmem:[%s2571_s26 + $0x948] sm:$0xff]  ;;  %v288_v4 = vld [vmem:[%s2571_s26 + $0x990] sm:$0xff] }
  0x35   : > { %285 = vst [vmem:[%s2576_s27 + $0x318] sm:$0xff] %v284_v2  ;;  %287 = vst [vmem:[%s2576_s27 + $0x324] sm:$0xff] %v286_v3  ;;  %v290_v5 = vld [vmem:[%s2571_s26 + $0x9b4] sm:$0xff]  ;;  %v294_v7 = vld [vmem:[%s2571_s26 + $0x9fc] sm:$0xff] }
  0x36   : > { %289 = vst [vmem:[%s2576_s27 + $0x330] sm:$0xff] %v288_v4  ;;  %v292_v6 = vld [vmem:[%s2571_s26 + $0x9d8] sm:$0xff]  ;;  %291 = vst [vmem:[%s2576_s27 + $0x33c] sm:$0xff] %v290_v5  ;;  %v1896_v8 = vld [vmem:[%s2571_s26 + $0x8] sm:$0xf] }
  0x37   : > { %293 = vst [vmem:[%s2576_s27 + $0x348] sm:$0xff] %v292_v6  ;;  %295 = vst [vmem:[%s2576_s27 + $0x354] sm:$0xff] %v294_v7  ;;  %v1898_v9 = vld [vmem:[%s2571_s26 + $0x2c] sm:$0xf]  ;;  %v1900_v10 = vld [vmem:[%s2571_s26 + $0x50] sm:$0xf] }
  0x38   : > { %1897 = vst [vmem:[%s2576_s27 + $0x8] sm:$0xf] %v1896_v8  ;;  %1899 = vst [vmem:[%s2576_s27 + $0x14] sm:$0xf] %v1898_v9  ;;  %v1902_v11 = vld [vmem:[%s2571_s26 + $0x74] sm:$0xf] }
  0x39   : > { %1901 = vst [vmem:[%s2576_s27 + $0x20] sm:$0xf] %v1900_v10  ;;  %v1904_v12 = vld [vmem:[%s2571_s26 + $0x98] sm:$0xf]  ;;  %v1906_v13 = vld [vmem:[%s2571_s26 + $0xbc] sm:$0xf] }
  0x3a   : > { %1903 = vst [vmem:[%s2576_s27 + $0x2c] sm:$0xf] %v1902_v11  ;;  %1905 = vst [vmem:[%s2576_s27 + $0x38] sm:$0xf] %v1904_v12  ;;  %v1908_v14 = vld [vmem:[%s2571_s26 + $0xe0] sm:$0xf] }
  0x3b   : > { %1907 = vst [vmem:[%s2576_s27 + $0x44] sm:$0xf] %v1906_v13  ;;  %v1910_v15 = vld [vmem:[%s2571_s26 + $0x104] sm:$0xf]  ;;  %v1912_v16 = vld [vmem:[%s2571_s26 + $0x128] sm:$0xf] }
  0x3c   : > { %1909 = vst [vmem:[%s2576_s27 + $0x50] sm:$0xf] %v1908_v14  ;;  %1911 = vst [vmem:[%s2576_s27 + $0x5c] sm:$0xf] %v1910_v15  ;;  %v1914_v17 = vld [vmem:[%s2571_s26 + $0x14c] sm:$0xf] }
  0x3d   : > { %1913 = vst [vmem:[%s2576_s27 + $0x68] sm:$0xf] %v1912_v16  ;;  %v1916_v18 = vld [vmem:[%s2571_s26 + $0x170] sm:$0xf]  ;;  %v1918_v19 = vld [vmem:[%s2571_s26 + $0x194] sm:$0xf] }
  0x3e   : > { %1915 = vst [vmem:[%s2576_s27 + $0x74] sm:$0xf] %v1914_v17  ;;  %1917 = vst [vmem:[%s2576_s27 + $0x80] sm:$0xf] %v1916_v18  ;;  %v1920_v20 = vld [vmem:[%s2571_s26 + $0x1b8] sm:$0xf] }
  0x3f   : > { %1919 = vst [vmem:[%s2576_s27 + $0x8c] sm:$0xf] %v1918_v19  ;;  %v1922_v21 = vld [vmem:[%s2571_s26 + $0x1dc] sm:$0xf]  ;;  %v1924_v22 = vld [vmem:[%s2571_s26 + $0x200] sm:$0xf] }
  0x40   : > { %1921 = vst [vmem:[%s2576_s27 + $0x98] sm:$0xf] %v1920_v20  ;;  %1923 = vst [vmem:[%s2576_s27 + $0xa4] sm:$0xf] %v1922_v21  ;;  %v1926_v23 = vld [vmem:[%s2571_s26 + $0x224] sm:$0xf] }
  0x41   : > { %1925 = vst [vmem:[%s2576_s27 + $0xb0] sm:$0xf] %v1924_v22  ;;  %v1928_v24 = vld [vmem:[%s2571_s26 + $0x248] sm:$0xf]  ;;  %v1930_v25 = vld [vmem:[%s2571_s26 + $0x26c] sm:$0xf] }
  0x42   : > { %1927 = vst [vmem:[%s2576_s27 + $0xbc] sm:$0xf] %v1926_v23  ;;  %1929 = vst [vmem:[%s2576_s27 + $0xc8] sm:$0xf] %v1928_v24  ;;  %v1932_v26 = vld [vmem:[%s2571_s26 + $0x290] sm:$0xf] }
  0x43   : > { %1931 = vst [vmem:[%s2576_s27 + $0xd4] sm:$0xf] %v1930_v25  ;;  %v1934_v27 = vld [vmem:[%s2571_s26 + $0x2b4] sm:$0xf]  ;;  %v1936_v28 = vld [vmem:[%s2571_s26 + $0x2d8] sm:$0xf] }
  0x44   : > { %1933 = vst [vmem:[%s2576_s27 + $0xe0] sm:$0xf] %v1932_v26  ;;  %1935 = vst [vmem:[%s2576_s27 + $0xec] sm:$0xf] %v1934_v27  ;;  %v1938_v29 = vld [vmem:[%s2571_s26 + $0x2fc] sm:$0xf] }
  0x45   : > { %1937 = vst [vmem:[%s2576_s27 + $0xf8] sm:$0xf] %v1936_v28  ;;  %v1940_v30 = vld [vmem:[%s2571_s26 + $0x320] sm:$0xf]  ;;  %v1942_v31 = vld [vmem:[%s2571_s26 + $0x344] sm:$0xf] }
  0x46   : > { %1939 = vst [vmem:[%s2576_s27 + $0x104] sm:$0xf] %v1938_v29  ;;  %1941 = vst [vmem:[%s2576_s27 + $0x110] sm:$0xf] %v1940_v30  ;;  %v1944_v32 = vld [vmem:[%s2571_s26 + $0x368] sm:$0xf] }
  0x47   : > { %1943 = vst [vmem:[%s2576_s27 + $0x11c] sm:$0xf] %v1942_v31  ;;  %v1946_v33 = vld [vmem:[%s2571_s26 + $0x38c] sm:$0xf]  ;;  %v1948_v34 = vld [vmem:[%s2571_s26 + $0x3b0] sm:$0xf] }
  0x48   : > { %1945 = vst [vmem:[%s2576_s27 + $0x128] sm:$0xf] %v1944_v32  ;;  %1947 = vst [vmem:[%s2576_s27 + $0x134] sm:$0xf] %v1946_v33  ;;  %v1950_v35 = vld [vmem:[%s2571_s26 + $0x3d4] sm:$0xf] }
  0x49   : > { %1949 = vst [vmem:[%s2576_s27 + $0x140] sm:$0xf] %v1948_v34  ;;  %v1952_v36 = vld [vmem:[%s2571_s26 + $0x3f8] sm:$0xf]  ;;  %v1954_v37 = vld [vmem:[%s2571_s26 + $0x41c] sm:$0xf] }
  0x4a   : > { %1951 = vst [vmem:[%s2576_s27 + $0x14c] sm:$0xf] %v1950_v35  ;;  %1953 = vst [vmem:[%s2576_s27 + $0x158] sm:$0xf] %v1952_v36  ;;  %v1956_v38 = vld [vmem:[%s2571_s26 + $0x440] sm:$0xf] }
  0x4b   : > { %1955 = vst [vmem:[%s2576_s27 + $0x164] sm:$0xf] %v1954_v37  ;;  %v1958_v39 = vld [vmem:[%s2571_s26 + $0x464] sm:$0xf]  ;;  %v1960_v40 = vld [vmem:[%s2571_s26 + $0x488] sm:$0xf] }
  0x4c   : > { %1957 = vst [vmem:[%s2576_s27 + $0x170] sm:$0xf] %v1956_v38  ;;  %1959 = vst [vmem:[%s2576_s27 + $0x17c] sm:$0xf] %v1958_v39  ;;  %v1962_v41 = vld [vmem:[%s2571_s26 + $0x4ac] sm:$0xf] }
  0x4d   : > { %1961 = vst [vmem:[%s2576_s27 + $0x188] sm:$0xf] %v1960_v40  ;;  %v1964_v42 = vld [vmem:[%s2571_s26 + $0x4d0] sm:$0xf]  ;;  %v1966_v43 = vld [vmem:[%s2571_s26 + $0x4f4] sm:$0xf] }
  0x4e   : > { %1963 = vst [vmem:[%s2576_s27 + $0x194] sm:$0xf] %v1962_v41  ;;  %1965 = vst [vmem:[%s2576_s27 + $0x1a0] sm:$0xf] %v1964_v42  ;;  %v1968_v44 = vld [vmem:[%s2571_s26 + $0x518] sm:$0xf] }
  0x4f   : > { %1967 = vst [vmem:[%s2576_s27 + $0x1ac] sm:$0xf] %v1966_v43  ;;  %v1970_v45 = vld [vmem:[%s2571_s26 + $0x53c] sm:$0xf]  ;;  %v1972_v46 = vld [vmem:[%s2571_s26 + $0x560] sm:$0xf] }
  0x50   : > { %1969 = vst [vmem:[%s2576_s27 + $0x1b8] sm:$0xf] %v1968_v44  ;;  %1971 = vst [vmem:[%s2576_s27 + $0x1c4] sm:$0xf] %v1970_v45  ;;  %v1974_v47 = vld [vmem:[%s2571_s26 + $0x584] sm:$0xf] }
  0x51   : > { %1973 = vst [vmem:[%s2576_s27 + $0x1d0] sm:$0xf] %v1972_v46  ;;  %v1976_v48 = vld [vmem:[%s2571_s26 + $0x5a8] sm:$0xf]  ;;  %v1978_v49 = vld [vmem:[%s2571_s26 + $0x5cc] sm:$0xf] }
  0x52   : > { %1975 = vst [vmem:[%s2576_s27 + $0x1dc] sm:$0xf] %v1974_v47  ;;  %1977 = vst [vmem:[%s2576_s27 + $0x1e8] sm:$0xf] %v1976_v48  ;;  %v1980_v50 = vld [vmem:[%s2571_s26 + $0x5f0] sm:$0xf] }
  0x53   : > { %1979 = vst [vmem:[%s2576_s27 + $0x1f4] sm:$0xf] %v1978_v49  ;;  %v1982_v51 = vld [vmem:[%s2571_s26 + $0x614] sm:$0xf]  ;;  %v1984_v52 = vld [vmem:[%s2571_s26 + $0x638] sm:$0xf] }
  0x54   : > { %1981 = vst [vmem:[%s2576_s27 + $0x200] sm:$0xf] %v1980_v50  ;;  %1983 = vst [vmem:[%s2576_s27 + $0x20c] sm:$0xf] %v1982_v51  ;;  %v1986_v53 = vld [vmem:[%s2571_s26 + $0x65c] sm:$0xf] }
  0x55   : > { %1985 = vst [vmem:[%s2576_s27 + $0x218] sm:$0xf] %v1984_v52  ;;  %v1988_v54 = vld [vmem:[%s2571_s26 + $0x680] sm:$0xf]  ;;  %v1990_v55 = vld [vmem:[%s2571_s26 + $0x6a4] sm:$0xf] }
  0x56   : > { %1987 = vst [vmem:[%s2576_s27 + $0x224] sm:$0xf] %v1986_v53  ;;  %1989 = vst [vmem:[%s2576_s27 + $0x230] sm:$0xf] %v1988_v54  ;;  %v1992_v56 = vld [vmem:[%s2571_s26 + $0x6c8] sm:$0xf] }
  0x57   : > { %1991 = vst [vmem:[%s2576_s27 + $0x23c] sm:$0xf] %v1990_v55  ;;  %v1994_v57 = vld [vmem:[%s2571_s26 + $0x6ec] sm:$0xf]  ;;  %v1996_v58 = vld [vmem:[%s2571_s26 + $0x710] sm:$0xf] }
  0x58   : > { %1993 = vst [vmem:[%s2576_s27 + $0x248] sm:$0xf] %v1992_v56  ;;  %1995 = vst [vmem:[%s2576_s27 + $0x254] sm:$0xf] %v1994_v57  ;;  %v1998_v59 = vld [vmem:[%s2571_s26 + $0x734] sm:$0xf] }
  0x59   : > { %1997 = vst [vmem:[%s2576_s27 + $0x260] sm:$0xf] %v1996_v58  ;;  %v2000_v60 = vld [vmem:[%s2571_s26 + $0x758] sm:$0xf]  ;;  %v2002_v61 = vld [vmem:[%s2571_s26 + $0x77c] sm:$0xf] }
  0x5a   : > { %1999 = vst [vmem:[%s2576_s27 + $0x26c] sm:$0xf] %v1998_v59  ;;  %2001 = vst [vmem:[%s2576_s27 + $0x278] sm:$0xf] %v2000_v60  ;;  %v2004_v62 = vld [vmem:[%s2571_s26 + $0x7a0] sm:$0xf] }
  0x5b   : > { %2003 = vst [vmem:[%s2576_s27 + $0x284] sm:$0xf] %v2002_v61  ;;  %v2006_v63 = vld [vmem:[%s2571_s26 + $0x7c4] sm:$0xf]  ;;  %v2008_v0 = vld [vmem:[%s2571_s26 + $0x7e8] sm:$0xf] }
  0x5c   : > { %2005 = vst [vmem:[%s2576_s27 + $0x290] sm:$0xf] %v2004_v62  ;;  %2007 = vst [vmem:[%s2576_s27 + $0x29c] sm:$0xf] %v2006_v63  ;;  %v2010_v1 = vld [vmem:[%s2571_s26 + $0x80c] sm:$0xf] }
  0x5d   : > { %2009 = vst [vmem:[%s2576_s27 + $0x2a8] sm:$0xf] %v2008_v0  ;;  %v2012_v2 = vld [vmem:[%s2571_s26 + $0x830] sm:$0xf]  ;;  %v2014_v3 = vld [vmem:[%s2571_s26 + $0x854] sm:$0xf] }
  0x5e   : > { %2011 = vst [vmem:[%s2576_s27 + $0x2b4] sm:$0xf] %v2010_v1  ;;  %2013 = vst [vmem:[%s2576_s27 + $0x2c0] sm:$0xf] %v2012_v2  ;;  %v2016_v4 = vld [vmem:[%s2571_s26 + $0x878] sm:$0xf] }
  0x5f   : > { %2015 = vst [vmem:[%s2576_s27 + $0x2cc] sm:$0xf] %v2014_v3  ;;  %v2018_v5 = vld [vmem:[%s2571_s26 + $0x89c] sm:$0xf]  ;;  %v2020_v6 = vld [vmem:[%s2571_s26 + $0x8c0] sm:$0xf] }
  0x60   : > { %2017 = vst [vmem:[%s2576_s27 + $0x2d8] sm:$0xf] %v2016_v4  ;;  %2019 = vst [vmem:[%s2576_s27 + $0x2e4] sm:$0xf] %v2018_v5  ;;  %v2022_v7 = vld [vmem:[%s2571_s26 + $0x8e4] sm:$0xf] }
  0x61   : > { %2021 = vst [vmem:[%s2576_s27 + $0x2f0] sm:$0xf] %v2020_v6  ;;  %v2024_v8 = vld [vmem:[%s2571_s26 + $0x908] sm:$0xf]  ;;  %v2026_v9 = vld [vmem:[%s2571_s26 + $0x92c] sm:$0xf] }
  0x62   : > { %2023 = vst [vmem:[%s2576_s27 + $0x2fc] sm:$0xf] %v2022_v7  ;;  %2025 = vst [vmem:[%s2576_s27 + $0x308] sm:$0xf] %v2024_v8  ;;  %v2028_v10 = vld [vmem:[%s2571_s26 + $0x950] sm:$0xf] }
  0x63   : > { %2027 = vst [vmem:[%s2576_s27 + $0x314] sm:$0xf] %v2026_v9  ;;  %v2030_v11 = vld [vmem:[%s2571_s26 + $0x974] sm:$0xf]  ;;  %v2032_v12 = vld [vmem:[%s2571_s26 + $0x998] sm:$0xf] }
  0x64   : > { %2029 = vst [vmem:[%s2576_s27 + $0x320] sm:$0xf] %v2028_v10  ;;  %2031 = vst [vmem:[%s2576_s27 + $0x32c] sm:$0xf] %v2030_v11  ;;  %v2034_v13 = vld [vmem:[%s2571_s26 + $0x9bc] sm:$0xf] }
  0x65   : > { %2033 = vst [vmem:[%s2576_s27 + $0x338] sm:$0xf] %v2032_v12  ;;  %v2036_v14 = vld [vmem:[%s2571_s26 + $0x9e0] sm:$0xf]  ;;  %v2038_v15 = vld [vmem:[%s2571_s26 + $0xa04] sm:$0xf] }
  0x66   : > { %2035 = vst [vmem:[%s2576_s27 + $0x344] sm:$0xf] %v2034_v13  ;;  %2037 = vst [vmem:[%s2576_s27 + $0x350] sm:$0xf] %v2036_v14 }
  0x67   : > { %2039 = vst [vmem:[%s2576_s27 + $0x35c] sm:$0xf] %v2038_v15 }
  0x68 PF: > { %p2040_p7 = scmp.ge.s32.totalorder %s2508_s14, 1  ;;  %p452_p8 = scmp.lt.s32.totalorder %s2508_s14, 4 }
  0x6a   : > { %p453_p9 = pnand %p2040_p7, %p452_p8 }
  0x6b   : > { %s459_s28 = sand.u32 (!%p453_p9), 1, %s2500_s12  }
  0x6c   : > { %456 = sbr.rel (%p453_p9) target bundleno = 485 (0x1e5), region = 54 }
  0x6d   : > { %s2307_s4 = smul.u32 (!%p453_p9), 864, %s459_s28 }
  0x6e   : > { %s3131_s27 = smul.u32 (!%p453_p9), 48, %s459_s28 }
  0x6f   : > { %s2880_s5 = scalar_lea.vmem (!%p453_p9), [#allocation2], %s2307_s4 }
  0x70   : > { %s3142_s12 = scalar_lea.vmem (!%p453_p9), [#allocation3], %s3131_s27 }
  0x71   : > { %v2869_v16 = vld [vmem:[%s3182_s1 + $0x4] ss:$8 sps:$4 sm:$0xff]   ;;  %v2510_v17 = vmov 0   ;;  %vm686_vm0 = vcmask 130048   ;;  %v2338_v19 = vld [vmem:[%s2880_s5 + $0xb0] ss:$12 sps:$4 sm:$0xff]  }
  0x72   : > { %746 = vmatprep.subr.bf16.mxu1 %v2510_v17  ;;  %2334 = vset.pattern.permute.xlu0 %v2510_v17  ;;  %v2336_v18 = vld [vmem:[%s2880_s5 + $0xac] ss:$12 sps:$4 sm:$0xff]   ;;  %v2339_v20 = vld [vmem:[%s2880_s5 + $0xa8] ss:$12 sps:$4 sm:$0xff]   ;;  %v2343_v23 = vld [vmem:[%s2880_s5 + $0x90] ss:$12 sps:$4 sm:$0xff]  }
  0x73   : > { %2074 = vmatprep.mubr.msk.bf16.mxu1 %vm686_vm0, %v2869_v16  ;;  %2072 = vmatprep.mubr.msk.bf16.mxu0 %vm686_vm0, %v2869_v16  ;;  %v2340_v21 = vld [vmem:[%s2880_s5 + $0x94] ss:$12 sps:$4 sm:$0xff]   ;;  %v2342_v22 = vld [vmem:[%s2880_s5 + $0x98] ss:$12 sps:$4 sm:$0xff]   ;;  %v2344_v24 = vld [vmem:[%s2880_s5 + $0x7c] ss:$12 sps:$4 sm:$0xff]  }
  0x74   : > { %2335 = vset.pattern.permute.xlu1 %v2510_v17  ;;  %693 = vmatprep.subr.bf16.mxu0 %v2336_v18  ;;  %v2346_v25 = vld [vmem:[%s2880_s5 + $0x80] ss:$12 sps:$4 sm:$0xff]   ;;  %v2347_v26 = vld [vmem:[%s2880_s5 + $0x78] ss:$12 sps:$4 sm:$0xff]   ;;  %v2350_v28 = vld [vmem:[%s2880_s5 + $0x68] ss:$12 sps:$4 sm:$0xff]  }
  0x75   : > { %747 = vmatpush1.bf16.msra.mxu1 %v2338_v19  ;;  %694 = vmatpush1.bf16.msra.mxu0 %v2339_v20  ;;  %v2348_v27 = vld [vmem:[%s2880_s5 + $0x64] ss:$12 sps:$4 sm:$0xff]   ;;  %v2351_v29 = vld [vmem:[%s2880_s5 + $0x60] ss:$12 sps:$4 sm:$0xff]   ;;  %v2355_v32 = vld [vmem:[%s2880_s5 + $0x48] ss:$12 sps:$4 sm:$0xff]  }
  0x76   : > { %748 = vmatprep.subr.bf16.mxu1 %v2510_v17  ;;  %695 = vmatprep.subr.bf16.mxu0 %v2340_v21  ;;  %v2352_v30 = vld [vmem:[%s2880_s5 + $0x4c] ss:$12 sps:$4 sm:$0xff]   ;;  %v2354_v31 = vld [vmem:[%s2880_s5 + $0x50] ss:$12 sps:$4 sm:$0xff]   ;;  %v2356_v33 = vld [vmem:[%s2880_s5 + $0x34] ss:$12 sps:$4 sm:$0xff]  }
  0x77   : > { %v2358_v34 = vld [vmem:[%s2880_s5 + $0x38] ss:$12 sps:$4 sm:$0xff]   ;;  %v2359_v35 = vld [vmem:[%s2880_s5 + $0x30] ss:$12 sps:$4 sm:$0xff]   ;;  %v2362_v37 = vld [vmem:[%s2880_s5 + $0x20] ss:$12 sps:$4 sm:$0xff]  }
  0x78   : > { %v2360_v36 = vld [vmem:[%s2880_s5 + $0x1c] ss:$12 sps:$4 sm:$0xff]   ;;  %v2363_v38 = vld [vmem:[%s2880_s5 + $0x18] ss:$12 sps:$4 sm:$0xff]   ;;  %v2367_v41 = vld [vmem:[%s2880_s5] ss:$12 sps:$4 sm:$0xff]  }
  0x79   : > { %749 = vmatpush1.bf16.msra.mxu1 %v2342_v22  ;;  %696 = vmatpush1.bf16.msra.mxu0 %v2343_v23  ;;  %v2364_v39 = vld [vmem:[%s2880_s5 + $0x4] ss:$12 sps:$4 sm:$0xff]   ;;  %v2366_v40 = vld [vmem:[%s2880_s5 + $0x8] ss:$12 sps:$4 sm:$0xff]   ;;  %v2371_v44 = vld [vmem:[%s2880_s5 + $0xc0] ss:$12 sps:$4 sm:$0xff]  }
  0x7a   : > { %750 = vmatprep.subr.bf16.mxu1 %v2510_v17  ;;  %697 = vmatprep.subr.bf16.mxu0 %v2344_v24  ;;  %v2368_v42 = vld [vmem:[%s2880_s5 + $0xc4] ss:$12 sps:$4 sm:$0xff]   ;;  %v2370_v43 = vld [vmem:[%s2880_s5 + $0xc8] ss:$12 sps:$4 sm:$0xff]   ;;  %v2375_v49 = vld [vmem:[%s2880_s5 + $0x180] ss:$12 sps:$4 sm:$0xff]  }
  0x7b   : > { %v2377_v45 = vld [vmem:[%s2880_s5 + $0x184] ss:$12 sps:$4 sm:$0xff]   ;;  %v2921_v46 = vld [vmem:[%s3182_s1] ss:$8 sps:$4 sm:$0xff]   ;;  %v2927_v48 = vld [vmem:[%s3182_s1 + $0x14] ss:$8 sps:$4 sm:$0xff]  }
  0x7c   : > { %v2378_v47 = vld [vmem:[%s2880_s5 + $0x188] ss:$12 sps:$4 sm:$0xff]   ;;  %v2381_v50 = vld [vmem:[%s2880_s5 + $0x16c] ss:$12 sps:$4 sm:$0xff]   ;;  %v2382_v51 = vld [vmem:[%s2880_s5 + $0x170] ss:$12 sps:$4 sm:$0xff]  }
  0x7d   : > { %751 = vmatpush1.bf16.msra.mxu1 %v2346_v25  ;;  %698 = vmatpush1.bf16.msra.mxu0 %v2347_v26  ;;  %v2379_v52 = vld [vmem:[%s2880_s5 + $0x168] ss:$12 sps:$4 sm:$0xff]   ;;  %v2943_v54 = vld [vmem:[%s3182_s1 + $0x10] ss:$8 sps:$4 sm:$0xff]   ;;  %v2390_v58 = vld [vmem:[%s2880_s5 + $0x140] ss:$12 sps:$4 sm:$0xff]  }
  0x7e   : > { %752 = vmatprep.subr.bf16.mxu1 %v2510_v17  ;;  %699 = vmatprep.subr.bf16.mxu0 %v2348_v27  ;;  %v2385_v53 = vld [vmem:[%s2880_s5 + $0x154] ss:$12 sps:$4 sm:$0xff]   ;;  %v2386_v55 = vld [vmem:[%s2880_s5 + $0x158] ss:$12 sps:$4 sm:$0xff]   ;;  %v2383_v56 = vld [vmem:[%s2880_s5 + $0x150] ss:$12 sps:$4 sm:$0xff]  }
  0x7f   : > { %v2389_v57 = vld [vmem:[%s2880_s5 + $0x13c] ss:$12 sps:$4 sm:$0xff]   ;;  %v2387_v59 = vld [vmem:[%s2880_s5 + $0x138] ss:$12 sps:$4 sm:$0xff]   ;;  %v2391_v62 = vld [vmem:[%s2880_s5 + $0x120] ss:$12 sps:$4 sm:$0xff]  }
  0x80   : > { %v2393_v60 = vld [vmem:[%s2880_s5 + $0x124] ss:$12 sps:$4 sm:$0xff]   ;;  %v2394_v61 = vld [vmem:[%s2880_s5 + $0x128] ss:$12 sps:$4 sm:$0xff]   ;;  %v2397_v63 = vld [vmem:[%s2880_s5 + $0x10c] ss:$12 sps:$4 sm:$0xff]  }
  0x81   : > { %753 = vmatpush1.bf16.msra.mxu1 %v2350_v28  ;;  %700 = vmatpush1.bf16.msra.mxu0 %v2351_v29  ;;  %v2398_v0 = vld [vmem:[%s2880_s5 + $0x110] ss:$12 sps:$4 sm:$0xff]   ;;  %v2395_v1 = vld [vmem:[%s2880_s5 + $0x108] ss:$12 sps:$4 sm:$0xff]   ;;  %v2405_v3 = vld [vmem:[%s2880_s5 + $0xf8] ss:$12 sps:$4 sm:$0xff]  }
  0x82   : > { %754 = vmatprep.subr.bf16.mxu1 %v2510_v17  ;;  %701 = vmatprep.subr.bf16.mxu0 %v2352_v30  ;;  %v2404_v2 = vld [vmem:[%s2880_s5 + $0xf4] ss:$12 sps:$4 sm:$0xff]   ;;  %v2402_v4 = vld [vmem:[%s2880_s5 + $0xf0] ss:$12 sps:$4 sm:$0xff]   ;;  %v2406_v7 = vld [vmem:[%s2880_s5 + $0xd8] ss:$12 sps:$4 sm:$0xff]  }
  0x83   : > { %v2408_v5 = vld [vmem:[%s2880_s5 + $0xdc] ss:$12 sps:$4 sm:$0xff]   ;;  %v2409_v6 = vld [vmem:[%s2880_s5 + $0xe0] ss:$12 sps:$4 sm:$0xff]   ;;  %v2410_v10 = vld [vmem:[%s2880_s5 + $0x198] ss:$12 sps:$4 sm:$0xff]  }
  0x84   : > { %v2412_v8 = vld [vmem:[%s2880_s5 + $0x19c] ss:$12 sps:$4 sm:$0xff]   ;;  %v2413_v9 = vld [vmem:[%s2880_s5 + $0x1a0] ss:$12 sps:$4 sm:$0xff]   ;;  %v2414_v13 = vld [vmem:[%s2880_s5 + $0x258] ss:$12 sps:$4 sm:$0xff]  }
  0x85   : > { %755 = vmatpush1.bf16.msra.mxu1 %v2354_v31  ;;  %702 = vmatpush1.bf16.msra.mxu0 %v2355_v32  ;;  %v2416_v11 = vld [vmem:[%s2880_s5 + $0x25c] ss:$12 sps:$4 sm:$0xff]   ;;  %v2417_v12 = vld [vmem:[%s2880_s5 + $0x260] ss:$12 sps:$4 sm:$0xff]   ;;  %v2420_v14 = vld [vmem:[%s2880_s5 + $0x244] ss:$12 sps:$4 sm:$0xff]  }
  0x86   : > { %756 = vmatprep.subr.bf16.mxu1 %v2510_v17  ;;  %703 = vmatprep.subr.bf16.mxu0 %v2356_v33  ;;  %v2421_v15 = vld [vmem:[%s2880_s5 + $0x248] ss:$12 sps:$4 sm:$0xff]   ;;  %v2418_v18 = vld [vmem:[%s2880_s5 + $0x240] ss:$12 sps:$4 sm:$0xff]   ;;  %v2425_v20 = vld [vmem:[%s2880_s5 + $0x230] ss:$12 sps:$4 sm:$0xff]  }
  0x87   : > { %v2424_v19 = vld [vmem:[%s2880_s5 + $0x22c] ss:$12 sps:$4 sm:$0xff]   ;;  %v2422_v21 = vld [vmem:[%s2880_s5 + $0x228] ss:$12 sps:$4 sm:$0xff]   ;;  %v2426_v24 = vld [vmem:[%s2880_s5 + $0x210] ss:$12 sps:$4 sm:$0xff]  }
  0x88   : > { %v2428_v22 = vld [vmem:[%s2880_s5 + $0x214] ss:$12 sps:$4 sm:$0xff]   ;;  %v2429_v23 = vld [vmem:[%s2880_s5 + $0x218] ss:$12 sps:$4 sm:$0xff]   ;;  %v2432_v27 = vld [vmem:[%s2880_s5 + $0x1fc] ss:$12 sps:$4 sm:$0xff]  }
  0x89   : > { %757 = vmatpush1.bf16.msra.mxu1 %v2358_v34  ;;  %704 = vmatpush1.bf16.msra.mxu0 %v2359_v35  ;;  %v1680_v25 = vld [vmem:[%s3183_s2] sm:$0xff]  ;;  %v1682_v26 = vld [vmem:[%s3183_s2 + $0x10] sm:$0xff]  ;;  %v1681_v29 = vld [vmem:[%s3183_s2 + $0x8] sm:$0xff]  ;;  %s2305_s28 = smul.u32 (%p2561_p5), 12, %s1891_s15 }
  0x8a   : > { %758 = vmatprep.subr.bf16.mxu1 %v2510_v17  ;;  %705 = vmatprep.subr.bf16.mxu0 %v2360_v36  ;;  %v2433_v28 = vld [vmem:[%s2880_s5 + $0x200] ss:$12 sps:$4 sm:$0xff]   ;;  %v2430_v30 = vld [vmem:[%s2880_s5 + $0x1f8] ss:$12 sps:$4 sm:$0xff]   ;;  %v2437_v33 = vld [vmem:[%s2880_s5 + $0x1e8] ss:$12 sps:$4 sm:$0xff]  }
  0x8b   : > { %1686 = vperm.xlu0 %2334, %v1680_v25   ;;  %1696 = vperm.xlu1 %2335, %v1682_v26   ;;  %v1683_v31 = vld [vmem:[%s3183_s2 + $0x18] sm:$0xff]  ;;  %v2436_v32 = vld [vmem:[%s2880_s5 + $0x1e4] ss:$12 sps:$4 sm:$0xff]   ;;  %v2434_v34 = vld [vmem:[%s2880_s5 + $0x1e0] ss:$12 sps:$4 sm:$0xff]   ;;  %s1785_s30 = scalar_lea.vmem (%p2561_p5), %s3184_s3, %s2305_s28 }
  0x8c   : > { %v2440_v35 = vld [vmem:[%s2880_s5 + $0x1cc] ss:$12 sps:$4 sm:$0xff]   ;;  %v2441_v36 = vld [vmem:[%s2880_s5 + $0x1d0] ss:$12 sps:$4 sm:$0xff]  }
  0x8d   : > { %759 = vmatpush1.bf16.msra.mxu1 %v2362_v37  ;;  %706 = vmatpush1.bf16.msra.mxu0 %v2363_v38  ;;  %v2438_v37 = vld [vmem:[%s2880_s5 + $0x1c8] ss:$12 sps:$4 sm:$0xff]  }
  0x8e   : > { %760 = vmatprep.subr.bf16.mxu1 %v2510_v17  ;;  %707 = vmatprep.subr.bf16.mxu0 %v2364_v39  ;;  %v2444_v38 = vld [vmem:[%s2880_s5 + $0x1b4] ss:$12 sps:$4 sm:$0xff]   ;;  %v2445_v39 = vld [vmem:[%s2880_s5 + $0x1b8] ss:$12 sps:$4 sm:$0xff]  }
  0x8f   : > { %1691 = vperm.xlu0 %2334, %v1681_v29   ;;  %1701 = vperm.xlu1 %2335, %v1683_v31  }
  0x91   : > { %761 = vmatpush1.bf16.msra.mxu1 %v2366_v40  ;;  %708 = vmatpush1.bf16.msra.mxu0 %v2367_v41  ;;  %v2442_v40 = vld [vmem:[%s2880_s5 + $0x1b0] ss:$12 sps:$4 sm:$0xff]   ;;  %v2448_v41 = vld [vmem:[%s2880_s5 + $0x274] ss:$12 sps:$4 sm:$0xff]  }
  0x92   : > { %776 = vmatprep.subr.bf16.mxu1 %v2510_v17  ;;  %723 = vmatprep.subr.bf16.mxu0 %v2368_v42  ;;  %v2449_v42 = vld [vmem:[%s2880_s5 + $0x278] ss:$12 sps:$4 sm:$0xff]  }
  0x95   : > { %777 = vmatpush2.bf16.msra.mxu1 %v2370_v43  ;;  %724 = vmatpush2.bf16.msra.mxu0 %v2371_v44  ;;  %v2446_v43 = vld [vmem:[%s2880_s5 + $0x270] ss:$12 sps:$4 sm:$0xff]   ;;  %v2452_v44 = vld [vmem:[%s2880_s5 + $0x334] ss:$12 sps:$4 sm:$0xff]  }
  0x96   : > { %1029 = vmatprep.subr.bf16.mxu1 %v2510_v17  ;;  %976 = vmatprep.subr.bf16.mxu0 %v2377_v45  ;;  %v2453_v45 = vld [vmem:[%s2880_s5 + $0x338] ss:$12 sps:$4 sm:$0xff]  }
  0x98   : > { %779 = vmatmul.mubr.bf16.vlgmr.msra.gmra.mxu1 %v2921_v46  ;;  %726 = vmatmul.mubr.bf16.vlgmr.msra.gmra.mxu0 %v2921_v46 }
  0x99   : > { %1030 = vmatpush1.bf16.msra.mxu1 %v2378_v47  ;;  %977 = vmatpush1.bf16.msra.mxu0 %v2375_v49  ;;  %v2450_v47 = vld [vmem:[%s2880_s5 + $0x330] ss:$12 sps:$4 sm:$0xff]  }
  0x9a   : > { %1031 = vmatprep.subr.bf16.mxu1 %v2510_v17  ;;  %978 = vmatprep.subr.bf16.mxu0 %v2381_v50  ;;  %v2456_v49 = vld [vmem:[%s2880_s5 + $0x31c] ss:$12 sps:$4 sm:$0xff]   ;;  %v2457_v50 = vld [vmem:[%s2880_s5 + $0x320] ss:$12 sps:$4 sm:$0xff]  }
  0x9b   : > { %2073 = vmatprep.mubr.msk.bf16.mxu0 %vm686_vm0, %v2927_v48  ;;  %2075 = vmatprep.mubr.msk.bf16.mxu1 %vm686_vm0, %v2927_v48 }
  0x9d   : > { %1032 = vmatpush1.bf16.msra.mxu1 %v2382_v51  ;;  %979 = vmatpush1.bf16.msra.mxu0 %v2379_v52  ;;  %v2454_v51 = vld [vmem:[%s2880_s5 + $0x318] ss:$12 sps:$4 sm:$0xff]  }
  0x9e   : > { %1033 = vmatprep.subr.bf16.mxu1 %v2510_v17  ;;  %980 = vmatprep.subr.bf16.mxu0 %v2385_v53  ;;  %v2460_v52 = vld [vmem:[%s2880_s5 + $0x304] ss:$12 sps:$4 sm:$0xff]   ;;  %v2461_v53 = vld [vmem:[%s2880_s5 + $0x308] ss:$12 sps:$4 sm:$0xff]  }
  0xa0   : > { %787 = vmatmul.mubr.bf16.gmra.mxu1 %v2943_v54  ;;  %736 = vmatmul.mubr.bf16.gmra.mxu0 %v2943_v54 }
  0xa1   : > { %1034 = vmatpush1.bf16.msra.mxu1 %v2386_v55  ;;  %981 = vmatpush1.bf16.msra.mxu0 %v2383_v56  ;;  %v2458_v55 = vld [vmem:[%s2880_s5 + $0x300] ss:$12 sps:$4 sm:$0xff]  }
  0xa2   : > { %1035 = vmatprep.subr.bf16.mxu1 %v2510_v17  ;;  %982 = vmatprep.subr.bf16.mxu0 %v2389_v57  ;;  %v2464_v56 = vld [vmem:[%s2880_s5 + $0x2ec] ss:$12 sps:$4 sm:$0xff]   ;;  %v2465_v57 = vld [vmem:[%s2880_s5 + $0x2f0] ss:$12 sps:$4 sm:$0xff]  }
  0xa3   : > { %2141 = vmatprep.mubr.msk.bf16.mxu1 %vm686_vm0, %v2869_v16  ;;  %2139 = vmatprep.mubr.msk.bf16.mxu0 %vm686_vm0, %v2869_v16 }
  0xa5   : > { %1036 = vmatpush1.bf16.msra.mxu1 %v2390_v58  ;;  %983 = vmatpush1.bf16.msra.mxu0 %v2387_v59  ;;  %v2462_v58 = vld [vmem:[%s2880_s5 + $0x2e8] ss:$12 sps:$4 sm:$0xff]  }
  0xa6   : > { %1037 = vmatprep.subr.bf16.mxu1 %v2510_v17  ;;  %984 = vmatprep.subr.bf16.mxu0 %v2393_v60  ;;  %v2468_v59 = vld [vmem:[%s2880_s5 + $0x2d4] ss:$12 sps:$4 sm:$0xff]   ;;  %v2469_v60 = vld [vmem:[%s2880_s5 + $0x2d8] ss:$12 sps:$4 sm:$0xff]  }
  0xa9   : > { %1038 = vmatpush1.bf16.msra.mxu1 %v2394_v61  ;;  %985 = vmatpush1.bf16.msra.mxu0 %v2391_v62  ;;  %v2466_v61 = vld [vmem:[%s2880_s5 + $0x2d0] ss:$12 sps:$4 sm:$0xff]  }
  0xaa   : > { %1039 = vmatprep.subr.bf16.mxu1 %v2510_v17  ;;  %986 = vmatprep.subr.bf16.mxu0 %v2397_v63  ;;  %v2472_v62 = vld [vmem:[%s2880_s5 + $0x2bc] ss:$12 sps:$4 sm:$0xff]   ;;  %v2473_v63 = vld [vmem:[%s2880_s5 + $0x2c0] ss:$12 sps:$4 sm:$0xff]  }
  0xad   : > { %1040 = vmatpush1.bf16.msra.mxu1 %v2398_v0  ;;  %987 = vmatpush1.bf16.msra.mxu0 %v2395_v1  ;;  %v2470_v0 = vld [vmem:[%s2880_s5 + $0x2b8] ss:$12 sps:$4 sm:$0xff]   ;;  %v2477_v1 = vld [vmem:[%s2880_s5 + $0x2a8] ss:$12 sps:$4 sm:$0xff]  }
  0xae   : > { %1041 = vmatprep.subr.bf16.mxu1 %v2510_v17  ;;  %988 = vmatprep.subr.bf16.mxu0 %v2404_v2  ;;  %v2474_v2 = vld [vmem:[%s2880_s5 + $0x2a0] ss:$12 sps:$4 sm:$0xff]  }
  0xb1   : > { %1042 = vmatpush1.bf16.msra.mxu1 %v2405_v3  ;;  %989 = vmatpush1.bf16.msra.mxu0 %v2402_v4  ;;  %v2480_v3 = vld [vmem:[%s2880_s5 + $0x28c] ss:$12 sps:$4 sm:$0xff]   ;;  %v2481_v4 = vld [vmem:[%s2880_s5 + $0x290] ss:$12 sps:$4 sm:$0xff]  }
  0xb2   : > { %1043 = vmatprep.subr.bf16.mxu1 %v2510_v17  ;;  %990 = vmatprep.subr.bf16.mxu0 %v2408_v5  ;;  %v2478_v5 = vld [vmem:[%s2880_s5 + $0x288] ss:$12 sps:$4 sm:$0xff]  }
  0xb5   : > { %1044 = vmatpush1.bf16.msra.mxu1 %v2409_v6  ;;  %991 = vmatpush1.bf16.msra.mxu0 %v2406_v7  ;;  %v2484_v6 = vld [vmem:[%s2880_s5 + $0x34c] ss:$12 sps:$4 sm:$0xff]   ;;  %v2485_v7 = vld [vmem:[%s2880_s5 + $0x350] ss:$12 sps:$4 sm:$0xff]  }
  0xb6   : > { %1059 = vmatprep.subr.bf16.mxu1 %v2510_v17  ;;  %1006 = vmatprep.subr.bf16.mxu0 %v2412_v8  ;;  %v2482_v8 = vld [vmem:[%s2880_s5 + $0x348] ss:$12 sps:$4 sm:$0xff]  }
  0xb9   : > { %1060 = vmatpush2.bf16.msra.mxu1 %v2413_v9  ;;  %1007 = vmatpush2.bf16.msra.mxu0 %v2410_v10 }
  0xba   : > { %1324 = vmatprep.subr.bf16.mxu1 %v2510_v17  ;;  %1271 = vmatprep.subr.bf16.mxu0 %v2416_v11 }
  0xbc   : > { %1062 = vmatmul.mubr.bf16.vlgmr.msra.gmra.mxu1 %v2921_v46  ;;  %1009 = vmatmul.mubr.bf16.vlgmr.msra.gmra.mxu0 %v2921_v46 }
  0xbd   : > { %1325 = vmatpush1.bf16.msra.mxu1 %v2417_v12  ;;  %1272 = vmatpush1.bf16.msra.mxu0 %v2414_v13 }
  0xbe   : > { %1326 = vmatprep.subr.bf16.mxu1 %v2510_v17  ;;  %1273 = vmatprep.subr.bf16.mxu0 %v2420_v14 }
  0xbf   : > { %2142 = vmatprep.mubr.msk.bf16.mxu1 %vm686_vm0, %v2927_v48  ;;  %2140 = vmatprep.mubr.msk.bf16.mxu0 %vm686_vm0, %v2927_v48 }
  0xc1   : > { %1327 = vmatpush1.bf16.msra.mxu1 %v2421_v15  ;;  %1274 = vmatpush1.bf16.msra.mxu0 %v2418_v18 }
  0xc2   : > { %1328 = vmatprep.subr.bf16.mxu1 %v2510_v17  ;;  %1275 = vmatprep.subr.bf16.mxu0 %v2424_v19 }
  0xc4   : > { %1070 = vmatmul.mubr.bf16.gmra.mxu1 %v2943_v54  ;;  %1019 = vmatmul.mubr.bf16.gmra.mxu0 %v2943_v54 }
  0xc5   : > { %1329 = vmatpush1.bf16.msra.mxu1 %v2425_v20  ;;  %1276 = vmatpush1.bf16.msra.mxu0 %v2422_v21 }
  0xc6   : > { %1330 = vmatprep.subr.bf16.mxu1 %v2510_v17  ;;  %1277 = vmatprep.subr.bf16.mxu0 %v2428_v22 }
  0xc7   : > { %2208 = vmatprep.mubr.msk.bf16.mxu1 %vm686_vm0, %v2869_v16  ;;  %2206 = vmatprep.mubr.msk.bf16.mxu0 %vm686_vm0, %v2869_v16 }
  0xc9   : > { %1331 = vmatpush1.bf16.msra.mxu1 %v2429_v23  ;;  %1278 = vmatpush1.bf16.msra.mxu0 %v2426_v24 }
  0xca   : > { %1332 = vmatprep.subr.bf16.mxu1 %v2510_v17  ;;  %1279 = vmatprep.subr.bf16.mxu0 %v2432_v27 }
  0xcd   : > { %1333 = vmatpush1.bf16.msra.mxu1 %v2433_v28  ;;  %1280 = vmatpush1.bf16.msra.mxu0 %v2430_v30 }
  0xce   : > { %1334 = vmatprep.subr.bf16.mxu1 %v2510_v17  ;;  %1281 = vmatprep.subr.bf16.mxu0 %v2436_v32 }
  0xd1   : > { %1335 = vmatpush1.bf16.msra.mxu1 %v2437_v33  ;;  %1282 = vmatpush1.bf16.msra.mxu0 %v2434_v34 }
  0xd2   : > { %1336 = vmatprep.subr.bf16.mxu1 %v2510_v17  ;;  %1283 = vmatprep.subr.bf16.mxu0 %v2440_v35 }
  0xd5   : > { %1337 = vmatpush1.bf16.msra.mxu1 %v2441_v36  ;;  %1284 = vmatpush1.bf16.msra.mxu0 %v2438_v37 }
  0xd6   : > { %1338 = vmatprep.subr.bf16.mxu1 %v2510_v17  ;;  %1285 = vmatprep.subr.bf16.mxu0 %v2444_v38 }
  0xd9   : > { %1339 = vmatpush1.bf16.msra.mxu1 %v2445_v39  ;;  %1286 = vmatpush1.bf16.msra.mxu0 %v2442_v40 }
  0xda   : > { %1354 = vmatprep.subr.bf16.mxu1 %v2510_v17  ;;  %1301 = vmatprep.subr.bf16.mxu0 %v2448_v41 }
  0xdd   : > { %1355 = vmatpush2.bf16.msra.mxu1 %v2449_v42  ;;  %1302 = vmatpush2.bf16.msra.mxu0 %v2446_v43 }
  0xde   : > { %1619 = vmatprep.subr.bf16.mxu1 %v2510_v17  ;;  %1566 = vmatprep.subr.bf16.mxu0 %v2452_v44 }
  0xe0   : > { %1357 = vmatmul.mubr.bf16.vlgmr.msra.gmra.mxu1 %v2921_v46  ;;  %1304 = vmatmul.mubr.bf16.vlgmr.msra.gmra.mxu0 %v2921_v46 }
  0xe1   : > { %1620 = vmatpush1.bf16.msra.mxu1 %v2453_v45  ;;  %1567 = vmatpush1.bf16.msra.mxu0 %v2450_v47 }
  0xe2   : > { %1621 = vmatprep.subr.bf16.mxu1 %v2510_v17  ;;  %1568 = vmatprep.subr.bf16.mxu0 %v2456_v49 }
  0xe3   : > { %2209 = vmatprep.mubr.msk.bf16.mxu1 %vm686_vm0, %v2927_v48  ;;  %2207 = vmatprep.mubr.msk.bf16.mxu0 %vm686_vm0, %v2927_v48 }
  0xe5   : > { %1622 = vmatpush1.bf16.msra.mxu1 %v2457_v50  ;;  %1569 = vmatpush1.bf16.msra.mxu0 %v2454_v51 }
  0xe6   : > { %1623 = vmatprep.subr.bf16.mxu1 %v2510_v17  ;;  %1570 = vmatprep.subr.bf16.mxu0 %v2460_v52 }
  0xe8   : > { %1365 = vmatmul.mubr.bf16.gmra.mxu1 %v2943_v54  ;;  %1314 = vmatmul.mubr.bf16.gmra.mxu0 %v2943_v54 }
  0xe9   : > { %1624 = vmatpush1.bf16.msra.mxu1 %v2461_v53  ;;  %1571 = vmatpush1.bf16.msra.mxu0 %v2458_v55 }
  0xea   : > { %1625 = vmatprep.subr.bf16.mxu1 %v2510_v17  ;;  %1572 = vmatprep.subr.bf16.mxu0 %v2464_v56 }
  0xeb   : > { %2275 = vmatprep.mubr.msk.bf16.mxu1 %vm686_vm0, %v2869_v16  ;;  %2273 = vmatprep.mubr.msk.bf16.mxu0 %vm686_vm0, %v2869_v16  ;;  %v2476_v16 = vld [vmem:[%s2880_s5 + $0x2a4] ss:$12 sps:$4 sm:$0xff]  }
  0xed   : > { %1626 = vmatpush1.bf16.msra.mxu1 %v2465_v57  ;;  %1573 = vmatpush1.bf16.msra.mxu0 %v2462_v58 }
  0xee   : > { %1627 = vmatprep.subr.bf16.mxu1 %v2510_v17  ;;  %1574 = vmatprep.subr.bf16.mxu0 %v2468_v59 }
  0xf1   : > { %1628 = vmatpush1.bf16.msra.mxu1 %v2469_v60  ;;  %1575 = vmatpush1.bf16.msra.mxu0 %v2466_v61 }
  0xf2   : > { %1629 = vmatprep.subr.bf16.mxu1 %v2510_v17  ;;  %1576 = vmatprep.subr.bf16.mxu0 %v2472_v62 }
  0xf5   : > { %1630 = vmatpush1.bf16.msra.mxu1 %v2473_v63  ;;  %1577 = vmatpush1.bf16.msra.mxu0 %v2470_v0 }
  0xf6   : > { %1631 = vmatprep.subr.bf16.mxu1 %v2510_v17  ;;  %1578 = vmatprep.subr.bf16.mxu0 %v2476_v16 }
  0xf9   : > { %1632 = vmatpush1.bf16.msra.mxu1 %v2477_v1  ;;  %1579 = vmatpush1.bf16.msra.mxu0 %v2474_v2 }
  0xfa   : > { %1633 = vmatprep.subr.bf16.mxu1 %v2510_v17  ;;  %1580 = vmatprep.subr.bf16.mxu0 %v2480_v3 }
  0xfd   : > { %1634 = vmatpush1.bf16.msra.mxu1 %v2481_v4  ;;  %1581 = vmatpush1.bf16.msra.mxu0 %v2478_v5 }
  0xfe   : > { %1649 = vmatprep.subr.bf16.mxu1 %v2510_v17  ;;  %1596 = vmatprep.subr.bf16.mxu0 %v2484_v6 }
 0x101   : > { %1650 = vmatpush2.bf16.msra.mxu1 %v2485_v7  ;;  %1597 = vmatpush2.bf16.msra.mxu0 %v2482_v8 }
 0x104   : > { %1652 = vmatmul.mubr.bf16.vlgmr.msra.gmra.mxu1 %v2921_v46  ;;  %1599 = vmatmul.mubr.bf16.vlgmr.msra.gmra.mxu0 %v2921_v46 }
 0x105   : > { %2276 = vmatprep.mubr.msk.bf16.mxu1 %vm686_vm0, %v2927_v48  ;;  %2274 = vmatprep.mubr.msk.bf16.mxu0 %vm686_vm0, %v2927_v48 }
 0x106   : > { %v1687_v62 = vpop.permute.xlu0 %1686 }
 0x10c   : > { %1660 = vmatmul.mubr.bf16.gmra.mxu1 %v2943_v54  ;;  %1609 = vmatmul.mubr.bf16.gmra.mxu0 %v2943_v54 }
 0x158   : > { %v780_v9 = vpop.f32.mrf.mxu1  ;;  %v727_v15 = vpop.f32.mrf.mxu0 }
 0x15a   : > { %v782_v17 = vpop.f32.mrf.mxu1  ;;  %v729_v18 = vpop.f32.mrf.mxu0 }
 0x15c   : > { %v3096_v10 = vpop.f32.mrf.mxu1  ;;  %v731_v19 = vpop.f32.mrf.mxu0 }
 0x15e   : > { %v785_v11 = vpop.f32.mrf.mxu1  ;;  %v3102_v20 = vpop.f32.mrf.mxu0 }
 0x160   : > { %v3098_v12 = vpop.f32.mrf.mxu1  ;;  %v3104_v48 = vpop.f32.mrf.mxu0 }
 0x162   : > { %v790_v13 = vpop.f32.mrf.mxu1  ;;  %v3106_v23 = vpop.f32.mrf.mxu0 }
 0x164   : > { %v3100_v14 = vpop.f32.mrf.mxu1  ;;  %v3109_v27 = vpop.f32.mrf.mxu0 }
 0x166   : > { %v793_v46 = vpop.f32.mrf.mxu1  ;;  %v3115_v31 = vpop.f32.mrf.mxu0 }
 0x17c   : > { %v1063_v21 = vpop.f32.mrf.mxu1  ;;  %v1010_v33 = vpop.f32.mrf.mxu0 }
 0x17d   : > { %v1080_v54 = vmax.f32 %v780_v9, %v1063_v21  ;;  %v1078_v61 = vmax.f32 %v727_v15, %v1010_v33  ;;  %v1697_v33 = vpop.permute.xlu1 %1696 }
 0x17e   : > { %v1065_v22 = vpop.f32.mrf.mxu1  ;;  %v1012_v36 = vpop.f32.mrf.mxu0 }
 0x17f   : > { %v1079_v16 = vmax.f32 %v729_v18, %v1012_v36  ;;  %v1692_v18 = vpop.permute.xlu0 %1691 }
 0x180   : > { %v1066_v24 = vpop.f32.mrf.mxu1  ;;  %v1014_v37 = vpop.f32.mrf.mxu0 }
 0x181   : > { %v1083_v25 = vmax.f32 %v3096_v10, %v1066_v24  ;;  %v1081_v5 = vmax.f32 %v731_v19, %v1014_v37 }
 0x182   : > { %v1068_v26 = vpop.f32.mrf.mxu1  ;;  %v1016_v38 = vpop.f32.mrf.mxu0 }
 0x183   : > { %v1082_v11 = vmax.f32 %v3102_v20, %v1016_v38 }
 0x184   : > { %v3111_v28 = vpop.f32.mrf.mxu1  ;;  %v1020_v39 = vpop.f32.mrf.mxu0 }
 0x185   : > { %v1086_v29 = vmax.f32 %v3098_v12, %v3111_v28  ;;  %v1084_v21 = vmax.f32 %v3104_v48, %v1020_v39 }
 0x186   : > { %v1073_v30 = vpop.f32.mrf.mxu1  ;;  %v3121_v40 = vpop.f32.mrf.mxu0 }
 0x187   : > { %v1085_v24 = vmax.f32 %v3106_v23, %v3121_v40 }
 0x188   : > { %v3117_v32 = vpop.f32.mrf.mxu1  ;;  %v3123_v42 = vpop.f32.mrf.mxu0 }
 0x189   : > { %v1089_v34 = vmax.f32 %v3100_v14, %v3117_v32 }
 0x18a   : > { %v1076_v35 = vpop.f32.mrf.mxu1  ;;  %v3125_v45 = vpop.f32.mrf.mxu0 }
 0x18b   : > { %v1088_v23 = vmax.f32 %v3115_v31, %v3125_v45 }
 0x1a0   : > { %v1358_v41 = vpop.f32.mrf.mxu1  ;;  %v1305_v49 = vpop.f32.mrf.mxu0 }
 0x1a1   : > { %v1375_v63 = vmax.f32 %v1080_v54, %v1358_v41  ;;  %v1373_v1 = vmax.f32 %v1078_v61, %v1305_v49 }
 0x1a2   : > { %v1360_v43 = vpop.f32.mrf.mxu1  ;;  %v1307_v52 = vpop.f32.mrf.mxu0 }
 0x1a3   : > { %v1374_v6 = vmax.f32 %v1079_v16, %v1307_v52  ;;  %v1702_v16 = vpop.permute.xlu1 %1701 }
 0x1a4   : > { %v1361_v44 = vpop.f32.mrf.mxu1  ;;  %v1309_v56 = vpop.f32.mrf.mxu0 }
 0x1a5   : > { %v1378_v9 = vmax.f32 %v1083_v25, %v1361_v44  ;;  %v1376_v12 = vmax.f32 %v1081_v5, %v1309_v56 }
 0x1a6   : > { %v1363_v47 = vpop.f32.mrf.mxu1  ;;  %v1311_v57 = vpop.f32.mrf.mxu0 }
 0x1a7   : > { %v1377_v26 = vmax.f32 %v1082_v11, %v1311_v57  ;;  %v1087_v47 = vmax.f32 %v3109_v27, %v3123_v42 }
 0x1a8   : > { %v1366_v50 = vpop.f32.mrf.mxu1  ;;  %v1315_v58 = vpop.f32.mrf.mxu0 }
 0x1a9   : > { %v1381_v20 = vmax.f32 %v1086_v29, %v1366_v50  ;;  %v1379_v35 = vmax.f32 %v1084_v21, %v1315_v58 }
 0x1aa   : > { %v1368_v51 = vpop.f32.mrf.mxu1  ;;  %v1317_v59 = vpop.f32.mrf.mxu0 }
 0x1ab   : > { %v1380_v50 = vmax.f32 %v1085_v24, %v1317_v59 }
 0x1ac   : > { %v1369_v53 = vpop.f32.mrf.mxu1  ;;  %v1319_v60 = vpop.f32.mrf.mxu0 }
 0x1ad   : > { %v1384_v27 = vmax.f32 %v1089_v34, %v1369_v53  ;;  %v1382_v42 = vmax.f32 %v1087_v47, %v1319_v60 }
 0x1ae   : > { %v1371_v55 = vpop.f32.mrf.mxu1  ;;  %v3127_v0 = vpop.f32.mrf.mxu0 }
 0x1af   : > { %v1383_v14 = vmax.f32 %v1088_v23, %v3127_v0 }
 0x1c4   : > { %v1653_v2 = vpop.f32.mrf.mxu1  ;;  %v1600_v4 = vpop.f32.mrf.mxu0 }
 0x1c5   : > { %v1670_v3 = vmax.f32 %v1375_v63, %v1653_v2  ;;  %v1668_v7 = vmax.f32 %v1373_v1, %v1600_v4 }
 0x1c6   : > { %v1655_v8 = vpop.f32.mrf.mxu1  ;;  %v1602_v10 = vpop.f32.mrf.mxu0 }
 0x1c7   : > { %v1706_v17 = vadd.f32 %v1687_v62, %v1670_v3  ;;  %v1704_v13 = vadd.f32 %v1687_v62, %v1668_v7  ;;  %v1669_v46 = vmax.f32 %v1374_v6, %v1602_v10 }
 0x1c8   : > { %v1656_v15 = vpop.f32.mrf.mxu1  ;;  %v1604_v22 = vpop.f32.mrf.mxu0 }
 0x1c9   : > { %v1718_v54 = vmax.f32 %v1706_v17, 0.0  ;;  %v1673_v19 = vmax.f32 %v1378_v9, %v1656_v15  ;;  %v1705_v28 = vadd.f32 %v1687_v62, %v1669_v46  ;;  %v1671_v25 = vmax.f32 %v1376_v12, %v1604_v22 }
 0x1ca   : > { %v1658_v30 = vpop.f32.mrf.mxu1  ;;  %v1606_v38 = vpop.f32.mrf.mxu0  ;;  %v1716_v41 = vmax.f32 %v1704_v13, 0.0 }
 0x1cb   : > { %v2298_v36 = vpack.c.bf16 %v1718_v54, %v1718_v54  ;;  %v1709_v37 = vadd.f32 %v1692_v18, %v1673_v19  ;;  %v1717_v43 = vmax.f32 %v1705_v28, 0.0  ;;  %v1707_v48 = vadd.f32 %v1692_v18, %v1671_v25 }
 0x1cc   : > { %v1672_v39 = vmax.f32 %v1377_v26, %v1606_v38  ;;  %v1661_v44 = vpop.f32.mrf.mxu1  ;;  %v1610_v49 = vpop.f32.mrf.mxu0 }
 0x1cd   : > { %1769 = vst [vmem:[%s3142_s12 + $0x8] sm:$0xf] %v2298_v36  ;;  %v1721_v29 = vmax.f32 %v1709_v37, 0.0  ;;  %v1676_v40 = vmax.f32 %v1381_v20, %v1661_v44  ;;  %v2297_v51 = vpack.c.bf16 %v1717_v43, %v1716_v41  ;;  %v1674_v55 = vmax.f32 %v1379_v35, %v1610_v49 }
 0x1ce   : > { %v1708_v52 = vadd.f32 %v1692_v18, %v1672_v39  ;;  %v1663_v56 = vpop.f32.mrf.mxu1  ;;  %v1612_v57 = vpop.f32.mrf.mxu0  ;;  %v1719_v58 = vmax.f32 %v1707_v48, 0.0 }
 0x1cf   : > { %v2300_v31 = vpack.c.bf16 %v1721_v29, %v1721_v29  ;;  %v1712_v45 = vadd.f32 %v1697_v33, %v1676_v40  ;;  %1768 = vst [vmem:[%s3142_s12] sm:$0xff] %v2297_v51  ;;  %v1710_v62 = vadd.f32 %v1697_v33, %v1674_v55  ;;  %v1675_v63 = vmax.f32 %v1380_v50, %v1612_v57 }
 0x1d0   : > { %v1720_v61 = vmax.f32 %v1708_v52, 0.0  ;;  %v1664_v59 = vpop.f32.mrf.mxu1  ;;  %v1614_v3 = vpop.f32.mrf.mxu0 }
 0x1d1   : > { %1771 = vst [vmem:[%s3142_s12 + $0x14] sm:$0xf] %v2300_v31  ;;  %v1724_v1 = vmax.f32 %v1712_v45, 0.0  ;;  %v1679_v2 = vmax.f32 %v1384_v27, %v1664_v59  ;;  %v1711_v34 = vadd.f32 %v1697_v33, %v1675_v63  ;;  %v1677_v53 = vmax.f32 %v1382_v42, %v1614_v3 }
 0x1d2   : > { %v2299_v32 = vpack.c.bf16 %v1720_v61, %v1719_v58  ;;  %v1666_v60 = vpop.f32.mrf.mxu1  ;;  %v1616_v6 = vpop.f32.mrf.mxu0  ;;  %v1722_v7 = vmax.f32 %v1710_v62, 0.0 }
 0x1d3   : > { %v2302_v4 = vpack.c.bf16 %v1724_v1, %v1724_v1  ;;  %v1715_v5 = vadd.f32 %v1702_v16, %v1679_v2  ;;  %v1723_v8 = vmax.f32 %v1711_v34, 0.0  ;;  %v1713_v9 = vadd.f32 %v1702_v16, %v1677_v53 }
 0x1d4   : > { %1770 = vst [vmem:[%s3142_s12 + $0xc] sm:$0xff] %v2299_v32  ;;  %v1678_v17 = vmax.f32 %v1383_v14, %v1616_v6  ;;  %v2286_v22 = vld [vmem:[%s3142_s12 + $0x8] sm:$0xf] (%p2561_p5) }
 0x1d5   : > { %1773 = vst [vmem:[%s3142_s12 + $0x20] sm:$0xf] %v2302_v4  ;;  %v1727_v10 = vmax.f32 %v1715_v5, 0.0  ;;  %v2301_v11 = vpack.c.bf16 %v1723_v8, %v1722_v7  ;;  %v1725_v13 = vmax.f32 %v1713_v9, 0.0  ;;  %2287 = vst [vmem:[%s1785_s30 + $0x8] sm:$0xf] (%p2561_p5), %v2286_v22 }
 0x1d6   : > { %v1714_v12 = vadd.f32 %v1702_v16, %v1678_v17  ;;  %v1800_v18 = vld [vmem:[%s3142_s12] sm:$0xff] (%p2561_p5) }
 0x1d7   : > { %v2304_v0 = vpack.c.bf16 %v1727_v10, %v1727_v10  ;;  %1772 = vst [vmem:[%s3142_s12 + $0x18] sm:$0xff] %v2301_v11  ;;  %1801 = vst [vmem:[%s1785_s30] sm:$0xff] (%p2561_p5), %v1800_v18 }
 0x1d8   : > { %v1726_v46 = vmax.f32 %v1714_v12, 0.0  ;;  %1782 = sbr.rel (!%p2561_p5) target bundleno = 485 (0x1e5), region = 62  ;;  %v2288_v24 = vld [vmem:[%s3142_s12 + $0x14] sm:$0xf] (%p2561_p5) }
 0x1d9   : > { %1775 = vst [vmem:[%s3142_s12 + $0x2c] sm:$0xf] %v2304_v0  ;;  %2289 = vst [vmem:[%s1785_s30 + $0x2c] sm:$0xf] (%p2561_p5), %v2288_v24 }
 0x1da   : > { %v2303_v15 = vpack.c.bf16 %v1726_v46, %v1725_v13 }
 0x1db   : > { %v1802_v21 = vld [vmem:[%s3142_s12 + $0xc] sm:$0xff] (%p2561_p5) }
 0x1dc   : > { %1774 = vst [vmem:[%s3142_s12 + $0x24] sm:$0xff] %v2303_v15  ;;  %v2290_v26 = vld [vmem:[%s3142_s12 + $0x20] sm:$0xf] (%p2561_p5)  ;;  %1803 = vst [vmem:[%s1785_s30 + $0x24] sm:$0xff] (%p2561_p5), %v1802_v21 }
 0x1dd   : > { %2291 = vst [vmem:[%s1785_s30 + $0x50] sm:$0xf] %v2290_v26 }
 0x1de   : > { %v1804_v54 = vld [vmem:[%s3142_s12 + $0x18] sm:$0xff] }
 0x1df   : > { %1805 = vst [vmem:[%s1785_s30 + $0x48] sm:$0xff] %v1804_v54 }
 0x1e0   : > { %v2292_v28 = vld [vmem:[%s3142_s12 + $0x2c] sm:$0xf] }
 0x1e1   : > { %2293 = vst [vmem:[%s1785_s30 + $0x74] sm:$0xf] %v2292_v28 }
 0x1e3   : > { %v1806_v19 = vld [vmem:[%s3142_s12 + $0x24] sm:$0xff] }
 0x1e4   : > { %1807 = vst [vmem:[%s1785_s30 + $0x6c] sm:$0xff] %v1806_v19 }
 0x1e5 PF: > { %p10_p10 = scmp.ge.s32.totalorder %s2548_s16, 5   ;;  %s3186_s12 = smov %s2504_s13 }
 0x1e6   : > { %s3187_s13 = smov %s2559_s19  ;;  %s3188_s14 = smov %s2548_s16 }
 0x1e7   :  { %12 = sbr.rel (!%p10_p10) target bundleno = 2 (0x2), region = 134 }

// kernel: simple_cnn_forward.6
= control target key start
LH: loop header
LB: loop body
LE: loop exit
PB: predicated region body
PF: predicated region fallthrough
CT: control target
= control target key end

     0   :  { %v3715_v1 = vmov 0   ;;  %vm432_vm0 = vcmask 261120   ;;  %v3716_v50 = vmov 0.0   ;;  %vm3717_vm1 = vmmov 0   ;;  %s5025_s0 = inlined_call_operand.vmem [shape: bf16[4,288,288], index: 0, kind: input, shape index: {}]   ;;  %s5026_s1 = inlined_call_operand.vmem [shape: bf16[48,288], index: 1, kind: input, shape index: {}]   ;;  %s5027_s2 = inlined_call_operand.vmem [shape: f32[48,1], index: 2, kind: input, shape index: {}]   ;;  %s5028_s3 = inlined_call_operand.vmem [shape: bf16[48,288], index: 3, kind: output, shape index: {}]  }
   0x1   :  { %v3406_v0 = vld [vmem:[%s5025_s0 + $0xac] ss:$12 sps:$4 sm:$0xff]   ;;  %537 = vmatprep.mubr.bf16.mxu1 %v3715_v1  ;;  %3404 = vset.pattern.permute.xlu0 %v3715_v1  ;;  %v3408_v2 = vld [vmem:[%s5025_s0 + $0x19c] ss:$12 sps:$4 sm:$0xff]   ;;  %v3412_v5 = vld [vmem:[%s5025_s0 + $0x94] ss:$12 sps:$4 sm:$0xff]  }
   0x2   :  { %3405 = vset.pattern.permute.xlu1 %v3715_v1  ;;  %442 = vmatprep.subr.bf16.mxu0 %v3406_v0  ;;  %v3410_v3 = vld [vmem:[%s5025_s0 + $0xa8] ss:$12 sps:$4 sm:$0xff]   ;;  %v3411_v4 = vld [vmem:[%s5025_s0 + $0x198] ss:$12 sps:$4 sm:$0xff]   ;;  %v3416_v7 = vld [vmem:[%s5025_s0 + $0x90] ss:$12 sps:$4 sm:$0xff]  }
   0x3   :  { %517 = vmatprep.subr.bf16.mxu1 %v3408_v2  ;;  %443 = vmatpush1.bf16.msra.mxu0 %v3410_v3  ;;  %v3414_v6 = vld [vmem:[%s5025_s0 + $0x184] ss:$12 sps:$4 sm:$0xff]   ;;  %v3417_v8 = vld [vmem:[%s5025_s0 + $0x180] ss:$12 sps:$4 sm:$0xff]   ;;  %v3418_v9 = vld [vmem:[%s5025_s0 + $0x7c] ss:$12 sps:$4 sm:$0xff]  }
   0x4   :  { %518 = vmatpush1.bf16.msra.mxu1 %v3411_v4  ;;  %444 = vmatprep.subr.bf16.mxu0 %v3412_v5  ;;  %v3771_v10 = vld [vmem:[%s5026_s1 + $0x8] ss:$12 sps:$4 sm:$0xff]   ;;  %v3421_v11 = vld [vmem:[%s5025_s0 + $0x170] ss:$12 sps:$4 sm:$0xff]   ;;  %v3422_v12 = vld [vmem:[%s5025_s0 + $0x78] ss:$12 sps:$4 sm:$0xff]  }
   0x5   :  { %519 = vmatprep.subr.bf16.mxu1 %v3414_v6  ;;  %v3423_v13 = vld [vmem:[%s5025_s0 + $0xb0] ss:$12 sps:$4 sm:$0xff]   ;;  %v3426_v15 = vld [vmem:[%s5025_s0 + $0x158] ss:$12 sps:$4 sm:$0xff]   ;;  %v3427_v16 = vld [vmem:[%s5025_s0 + $0x60] ss:$12 sps:$4 sm:$0xff]  }
   0x6   :  { %v3424_v14 = vld [vmem:[%s5025_s0 + $0x64] ss:$12 sps:$4 sm:$0xff]   ;;  %v3429_v18 = vld [vmem:[%s5025_s0 + $0x4c] ss:$12 sps:$4 sm:$0xff]   ;;  %v3432_v20 = vld [vmem:[%s5025_s0 + $0x48] ss:$12 sps:$4 sm:$0xff]  }
   0x7   :  { %445 = vmatpush1.bf16.msra.mxu0 %v3416_v7  ;;  %v3428_v17 = vld [vmem:[%s5025_s0 + $0x98] ss:$12 sps:$4 sm:$0xff]   ;;  %v3431_v19 = vld [vmem:[%s5025_s0 + $0x140] ss:$12 sps:$4 sm:$0xff]   ;;  %v3437_v24 = vld [vmem:[%s5025_s0 + $0x128] ss:$12 sps:$4 sm:$0xff]  }
   0x8   :  { %520 = vmatpush1.bf16.msra.mxu1 %v3417_v8  ;;  %446 = vmatprep.subr.bf16.mxu0 %v3418_v9  ;;  %v3433_v21 = vld [vmem:[%s5025_s0 + $0x80] ss:$12 sps:$4 sm:$0xff]   ;;  %v3438_v25 = vld [vmem:[%s5025_s0 + $0x30] ss:$12 sps:$4 sm:$0xff]   ;;  %v3439_v26 = vld [vmem:[%s5025_s0 + $0x68] ss:$12 sps:$4 sm:$0xff]  }
   0x9   :  { %3177 = vmatprep.subr.bf16.mxu1 %v3421_v11  ;;  %v3812_v22 = vld [vmem:[%s5026_s1 + $0x20] ss:$12 sps:$4 sm:$0xff]   ;;  %v3440_v27 = vld [vmem:[%s5025_s0 + $0x1c] ss:$12 sps:$4 sm:$0xff]   ;;  %v3443_v29 = vld [vmem:[%s5025_s0 + $0x18] ss:$12 sps:$4 sm:$0xff]  }
   0xa   :  { %v3435_v23 = vld [vmem:[%s5025_s0 + $0x34] ss:$12 sps:$4 sm:$0xff]   ;;  %v3442_v28 = vld [vmem:[%s5025_s0 + $0x110] ss:$12 sps:$4 sm:$0xff]   ;;  %v3844_v31 = vld [vmem:[%s5026_s1 + $0x38] ss:$12 sps:$4 sm:$0xff]  }
   0xb   :  { %2751 = vmatmul.mubr.msk.bf16.vlgmr.msra.gmra.mxu1 %vm432_vm0, %v3771_v10  ;;  %447 = vmatpush1.bf16.msra.mxu0 %v3422_v12  ;;  %v3444_v30 = vld [vmem:[%s5025_s0 + $0x50] ss:$12 sps:$4 sm:$0xff]   ;;  %v3448_v33 = vld [vmem:[%s5025_s0 + $0xf8] ss:$12 sps:$4 sm:$0xff]   ;;  %v3449_v34 = vld [vmem:[%s5025_s0] ss:$12 sps:$4 sm:$0xff]  }
   0xc   :  { %3178 = vmatpush3.bf16.msra.mxu1 %v3423_v13  ;;  %448 = vmatprep.subr.bf16.mxu0 %v3424_v14  ;;  %v3446_v32 = vld [vmem:[%s5025_s0 + $0x4] ss:$12 sps:$4 sm:$0xff]   ;;  %v3451_v36 = vld [vmem:[%s5025_s0 + $0x16c] ss:$12 sps:$4 sm:$0xff]   ;;  %v3454_v38 = vld [vmem:[%s5025_s0 + $0x168] ss:$12 sps:$4 sm:$0xff]  }
   0xd   :  { %3179 = vmatprep.subr.bf16.mxu1 %v3426_v15  ;;  %547 = vmatprep.mubr.bf16.mxu1 %v3715_v1  ;;  %v3450_v35 = vld [vmem:[%s5025_s0 + $0x38] ss:$12 sps:$4 sm:$0xff]   ;;  %v3453_v37 = vld [vmem:[%s5025_s0 + $0xe0] ss:$12 sps:$4 sm:$0xff]   ;;  %v3458_v41 = vld [vmem:[%s5025_s0 + $0xc8] ss:$12 sps:$4 sm:$0xff]  }
   0xe   :  { %v3455_v39 = vld [vmem:[%s5025_s0 + $0x20] ss:$12 sps:$4 sm:$0xff]   ;;  %v3459_v42 = vld [vmem:[%s5025_s0 + $0x150] ss:$12 sps:$4 sm:$0xff]   ;;  %v3460_v44 = vld [vmem:[%s5025_s0 + $0x8] ss:$12 sps:$4 sm:$0xff]  }
   0xf   :  { %449 = vmatpush1.bf16.msra.mxu0 %v3427_v16  ;;  %v3456_v40 = vld [vmem:[%s5025_s0 + $0x154] ss:$12 sps:$4 sm:$0xff]   ;;  %v3884_v43 = vld [vmem:[%s5026_s1 + $0x4] ss:$12 sps:$4 sm:$0xff]   ;;  %v3463_v45 = vld [vmem:[%s5025_s0 + $0x13c] ss:$12 sps:$4 sm:$0xff]  }
  0x10   :  { %3180 = vmatpush3.bf16.msra.mxu1 %v3428_v17  ;;  %450 = vmatprep.subr.bf16.mxu0 %v3429_v18  ;;  %v3896_v46 = vld [vmem:[%s5026_s1] ss:$12 sps:$4 sm:$0xff]   ;;  %v3466_v47 = vld [vmem:[%s5025_s0 + $0x138] ss:$12 sps:$4 sm:$0xff]   ;;  %v3912_v51 = vld [vmem:[%s5026_s1 + $0x1c] ss:$12 sps:$4 sm:$0xff]  }
  0x11   :  { %3181 = vmatprep.subr.bf16.mxu1 %v3431_v19  ;;  %474 = vmatprep.mubr.bf16.mxu0 %v3884_v43  ;;  %v3467_v48 = vld [vmem:[%s5025_s0 + $0x1a0] ss:$12 sps:$4 sm:$0xff]   ;;  %v3468_v49 = vld [vmem:[%s5025_s0 + $0x124] ss:$12 sps:$4 sm:$0xff]   ;;  %v3480_v53 = vld [vmem:[%s5025_s0 + $0x188] ss:$12 sps:$4 sm:$0xff]  }
  0x12   :  { %v3470_v52 = vld [vmem:[%s5025_s0 + $0x120] ss:$12 sps:$4 sm:$0xff]   ;;  %v3929_v55 = vld [vmem:[%s5026_s1 + $0x18] ss:$12 sps:$4 sm:$0xff]   ;;  %v3476_v56 = vld [vmem:[%s5025_s0 + $0x108] ss:$12 sps:$4 sm:$0xff]  }
  0x13   :  { %2752 = vmatmul.mubr.msk.bf16.gmra.mxu1 %vm432_vm0, %v3812_v22  ;;  %451 = vmatpush1.bf16.msra.mxu0 %v3432_v20  ;;  %v3473_v54 = vld [vmem:[%s5025_s0 + $0x10c] ss:$12 sps:$4 sm:$0xff]   ;;  %v3937_v57 = vld [vmem:[%s5026_s1 + $0x34] ss:$12 sps:$4 sm:$0xff]   ;;  %v3479_v60 = vld [vmem:[%s5025_s0 + $0xf0] ss:$12 sps:$4 sm:$0xff]  }
  0x14   :  { %3182 = vmatpush3.bf16.msra.mxu1 %v3433_v21  ;;  %452 = vmatprep.subr.bf16.mxu0 %v3435_v23  ;;  %v3477_v58 = vld [vmem:[%s5025_s0 + $0xf4] ss:$12 sps:$4 sm:$0xff]   ;;  %v3495_v59 = vld [vmem:[%s5025_s0 + $0x34c] ss:$12 sps:$4 sm:$0xff]   ;;  %v3483_v61 = vld [vmem:[%s5025_s0 + $0xdc] ss:$12 sps:$4 sm:$0xff]  }
  0x15   :  { %3183 = vmatprep.subr.bf16.mxu1 %v3437_v24  ;;  %557 = vmatprep.mubr.bf16.mxu1 %v3715_v1  ;;  %v3956_v62 = vld [vmem:[%s5026_s1 + $0x30] ss:$12 sps:$4 sm:$0xff]   ;;  %v3486_v63 = vld [vmem:[%s5025_s0 + $0xd8] ss:$12 sps:$4 sm:$0xff]   ;;  %v3489_v2 = vld [vmem:[%s5025_s0 + $0xc0] ss:$12 sps:$4 sm:$0xff]  }
  0x16   :  { %v3487_v0 = vld [vmem:[%s5025_s0 + $0xc4] ss:$12 sps:$4 sm:$0xff]   ;;  %v3492_v3 = vld [vmem:[%s5025_s0 + $0x25c] ss:$12 sps:$4 sm:$0xff]   ;;  %v3507_v7 = vld [vmem:[%s5025_s0 + $0x334] ss:$12 sps:$4 sm:$0xff]  }
  0x17   :  { %453 = vmatpush1.bf16.msra.mxu0 %v3438_v25  ;;  %v3490_v4 = vld [vmem:[%s5025_s0 + $0x258] ss:$12 sps:$4 sm:$0xff]   ;;  %v3493_v5 = vld [vmem:[%s5025_s0 + $0x348] ss:$12 sps:$4 sm:$0xff]   ;;  %v3496_v8 = vld [vmem:[%s5025_s0 + $0x240] ss:$12 sps:$4 sm:$0xff]  }
  0x18   :  { %3184 = vmatpush3.bf16.msra.mxu1 %v3439_v26  ;;  %454 = vmatprep.subr.bf16.mxu0 %v3440_v27  ;;  %v3498_v6 = vld [vmem:[%s5025_s0 + $0x244] ss:$12 sps:$4 sm:$0xff]   ;;  %v3501_v9 = vld [vmem:[%s5025_s0 + $0x22c] ss:$12 sps:$4 sm:$0xff]   ;;  %v3499_v13 = vld [vmem:[%s5025_s0 + $0x228] ss:$12 sps:$4 sm:$0xff]  }
  0x19   :  { %3185 = vmatprep.subr.bf16.mxu1 %v3442_v28  ;;  %v3505_v11 = vld [vmem:[%s5025_s0 + $0x330] ss:$12 sps:$4 sm:$0xff]   ;;  %v3514_v12 = vld [vmem:[%s5025_s0 + $0x320] ss:$12 sps:$4 sm:$0xff]   ;;  %v3508_v17 = vld [vmem:[%s5025_s0 + $0x1f8] ss:$12 sps:$4 sm:$0xff]  }
  0x1a   :  { %v3504_v14 = vld [vmem:[%s5025_s0 + $0x214] ss:$12 sps:$4 sm:$0xff]   ;;  %v3502_v15 = vld [vmem:[%s5025_s0 + $0x210] ss:$12 sps:$4 sm:$0xff]   ;;  %v3517_v20 = vld [vmem:[%s5025_s0 + $0x1cc] ss:$12 sps:$4 sm:$0xff]  }
  0x1b   :  { %2753 = vmatmul.mubr.msk.bf16.gmra.mxu1 %vm432_vm0, %v3844_v31  ;;  %455 = vmatpush1.bf16.msra.mxu0 %v3443_v29  ;;  %v3510_v16 = vld [vmem:[%s5025_s0 + $0x1fc] ss:$12 sps:$4 sm:$0xff]   ;;  %v3513_v18 = vld [vmem:[%s5025_s0 + $0x1e4] ss:$12 sps:$4 sm:$0xff]   ;;  %v3511_v19 = vld [vmem:[%s5025_s0 + $0x1e0] ss:$12 sps:$4 sm:$0xff]  }
  0x1c   :  { %3186 = vmatpush3.bf16.msra.mxu1 %v3444_v30  ;;  %456 = vmatprep.subr.bf16.mxu0 %v3446_v32  ;;  %v3515_v21 = vld [vmem:[%s5025_s0 + $0x1c8] ss:$12 sps:$4 sm:$0xff]   ;;  %v3518_v23 = vld [vmem:[%s5025_s0 + $0x260] ss:$12 sps:$4 sm:$0xff]   ;;  %v3520_v26 = vld [vmem:[%s5025_s0 + $0x1b0] ss:$12 sps:$4 sm:$0xff]  }
  0x1d   :  { %3187 = vmatprep.subr.bf16.mxu1 %v3448_v33  ;;  %600 = vmatprep.mubr.bf16.mxu1 %v3884_v43  ;;  %v3519_v24 = vld [vmem:[%s5025_s0 + $0x308] ss:$12 sps:$4 sm:$0xff]   ;;  %v3524_v28 = vld [vmem:[%s5025_s0 + $0x2f0] ss:$12 sps:$4 sm:$0xff]   ;;  %v3525_v29 = vld [vmem:[%s5025_s0 + $0x318] ss:$12 sps:$4 sm:$0xff]  }
  0x1e   :  { %v3522_v25 = vld [vmem:[%s5025_s0 + $0x1b4] ss:$12 sps:$4 sm:$0xff]   ;;  %v3528_v30 = vld [vmem:[%s5025_s0 + $0x230] ss:$12 sps:$4 sm:$0xff]   ;;  %v3529_v32 = vld [vmem:[%s5025_s0 + $0x2d8] ss:$12 sps:$4 sm:$0xff]  }
  0x1f   :  { %457 = vmatpush1.bf16.msra.mxu0 %v3449_v34  ;;  %v3523_v27 = vld [vmem:[%s5025_s0 + $0x248] ss:$12 sps:$4 sm:$0xff]   ;;  %v3532_v33 = vld [vmem:[%s5025_s0 + $0x304] ss:$12 sps:$4 sm:$0xff]   ;;  %v3530_v34 = vld [vmem:[%s5025_s0 + $0x300] ss:$12 sps:$4 sm:$0xff]  }
  0x20   :  { %3188 = vmatpush3.bf16.msra.mxu1 %v3450_v35  ;;  %458 = vmatprep.subr.bf16.mxu0 %v3451_v36  ;;  %v3533_v35 = vld [vmem:[%s5025_s0 + $0x218] ss:$12 sps:$4 sm:$0xff]   ;;  %v3534_v36 = vld [vmem:[%s5025_s0 + $0x2c0] ss:$12 sps:$4 sm:$0xff]   ;;  %vm2672_vm2 = vcmask 257024  }
  0x21   :  { %3189 = vmatprep.subr.bf16.mxu1 %v3453_v37  ;;  %v3537_v37 = vld [vmem:[%s5025_s0 + $0x2ec] ss:$12 sps:$4 sm:$0xff]  }
  0x23   :  { %459 = vmatpush2.bf16.msra.mxu0 %v3454_v38  ;;  %v3535_v38 = vld [vmem:[%s5025_s0 + $0x2e8] ss:$12 sps:$4 sm:$0xff]  }
  0x24   :  { %3190 = vmatpush3.bf16.msra.mxu1 %v3455_v39  ;;  %460 = vmatprep.subr.bf16.mxu0 %v3456_v40  ;;  %v3538_v39 = vld [vmem:[%s5025_s0 + $0x200] ss:$12 sps:$4 sm:$0xff]   ;;  %v3539_v40 = vld [vmem:[%s5025_s0 + $0x2a8] ss:$12 sps:$4 sm:$0xff]  }
  0x25   :  { %3191 = vmatprep.subr.bf16.mxu1 %v3458_v41  ;;  %v3542_v41 = vld [vmem:[%s5025_s0 + $0x2d4] ss:$12 sps:$4 sm:$0xff]  }
  0x27   :  { %461 = vmatpush2.bf16.msra.mxu0 %v3459_v42  ;;  %v3540_v42 = vld [vmem:[%s5025_s0 + $0x2d0] ss:$12 sps:$4 sm:$0xff]  }
  0x28   :  { %3192 = vmatpush3.bf16.msra.mxu1 %v3460_v44  ;;  %462 = vmatprep.subr.bf16.mxu0 %v3463_v45  ;;  %v3543_v44 = vld [vmem:[%s5025_s0 + $0x1e8] ss:$12 sps:$4 sm:$0xff]   ;;  %v3544_v45 = vld [vmem:[%s5025_s0 + $0x290] ss:$12 sps:$4 sm:$0xff]  }
  0x29   :  { %3333 = vmatprep.subr.bf16.mxu1 %v3716_v50 }
  0x2b   :  { %601 = vmatmul.mubr.bf16.vlgmr.msra.gmra.mxu1 %v3896_v46  ;;  %463 = vmatpush2.bf16.msra.mxu0 %v3466_v47  ;;  %v3547_v47 = vld [vmem:[%s5025_s0 + $0x2bc] ss:$12 sps:$4 sm:$0xff]  }
  0x2c   :  { %3334 = vmatpush3.bf16.msra.mxu1 %v3467_v48  ;;  %464 = vmatprep.subr.bf16.mxu0 %v3468_v49  ;;  %v3545_v48 = vld [vmem:[%s5025_s0 + $0x2b8] ss:$12 sps:$4 sm:$0xff]   ;;  %v3548_v49 = vld [vmem:[%s5025_s0 + $0x1d0] ss:$12 sps:$4 sm:$0xff]  }
  0x2d   :  { %608 = vmatprep.mubr.bf16.mxu1 %v3912_v51  ;;  %3335 = vmatprep.subr.bf16.mxu1 %v3716_v50 }
  0x2f   :  { %465 = vmatpush2.bf16.msra.mxu0 %v3470_v52  ;;  %v3549_v52 = vld [vmem:[%s5025_s0 + $0x278] ss:$12 sps:$4 sm:$0xff]  }
  0x30   :  { %3336 = vmatpush3.bf16.msra.mxu1 %v3480_v53  ;;  %466 = vmatprep.subr.bf16.mxu0 %v3473_v54  ;;  %v3552_v53 = vld [vmem:[%s5025_s0 + $0x2a4] ss:$12 sps:$4 sm:$0xff]   ;;  %v3550_v54 = vld [vmem:[%s5025_s0 + $0x2a0] ss:$12 sps:$4 sm:$0xff]  }
  0x31   :  { %1118 = vmatprep.subr.bf16.mxu1 %v3495_v59  ;;  %v3554_v59 = vld [vmem:[%s5025_s0 + $0x288] ss:$12 sps:$4 sm:$0xff]  }
  0x33   :  { %609 = vmatmul.mubr.bf16.gmra.mxu1 %v3929_v55  ;;  %467 = vmatpush2.bf16.msra.mxu0 %v3476_v56  ;;  %v3553_v56 = vld [vmem:[%s5025_s0 + $0x1b8] ss:$12 sps:$4 sm:$0xff]  }
  0x34   :  { %616 = vmatprep.mubr.bf16.mxu1 %v3937_v57  ;;  %468 = vmatprep.subr.bf16.mxu0 %v3477_v58  ;;  %v3556_v58 = vld [vmem:[%s5025_s0 + $0x28c] ss:$12 sps:$4 sm:$0xff]  }
  0x37   :  { %469 = vmatpush2.bf16.msra.mxu0 %v3479_v60  ;;  %v3557_v60 = vld [vmem:[%s5025_s0 + $0x350] ss:$12 sps:$4 sm:$0xff]  }
  0x38   :  { %470 = vmatprep.subr.bf16.mxu0 %v3483_v61  ;;  %v3560_v61 = vld [vmem:[%s5025_s0 + $0x274] ss:$12 sps:$4 sm:$0xff]  }
  0x3b   :  { %617 = vmatmul.mubr.bf16.gmra.mxu1 %v3956_v62  ;;  %471 = vmatpush2.bf16.msra.mxu0 %v3486_v63  ;;  %v3558_v63 = vld [vmem:[%s5025_s0 + $0x270] ss:$12 sps:$4 sm:$0xff]  }
  0x3c   :  { %3337 = vmatprep.mubr.msk.bf16.mxu1 %vm3717_vm1, %v3716_v50  ;;  %472 = vmatprep.subr.bf16.mxu0 %v3487_v0  ;;  %v3563_v0 = vld [vmem:[%s5025_s0 + $0x40c] ss:$12 sps:$4 sm:$0xff]  }
  0x3f   :  { %473 = vmatpush2.bf16.msra.mxu0 %v3489_v2  ;;  %v3567_v2 = vld [vmem:[%s5025_s0 + $0x338] ss:$12 sps:$4 sm:$0xff]  }
  0x40   :  { %1043 = vmatprep.subr.bf16.mxu0 %v3492_v3  ;;  %v3579_v3 = vld [vmem:[%s5025_s0 + $0x4fc] ss:$12 sps:$4 sm:$0xff]  }
  0x42   :  { %475 = vmatmul.mubr.bf16.vlgmr.msra.gmra.mxu0 %v3896_v46 }
  0x43   :  { %3338 = vmatmul.mubr.msk.bf16.vlgmr.msra.gmra.mxu1 %vm432_vm0, %v3771_v10  ;;  %1044 = vmatpush1.bf16.msra.mxu0 %v3490_v4  ;;  %v3561_v4 = vld [vmem:[%s5025_s0 + $0x408] ss:$12 sps:$4 sm:$0xff]  }
  0x44   :  { %1119 = vmatpush1.bf16.msra.mxu1 %v3493_v5  ;;  %1045 = vmatprep.subr.bf16.mxu0 %v3498_v6  ;;  %v3566_v5 = vld [vmem:[%s5025_s0 + $0x3f4] ss:$12 sps:$4 sm:$0xff]   ;;  %v3564_v6 = vld [vmem:[%s5025_s0 + $0x3f0] ss:$12 sps:$4 sm:$0xff]  }
  0x45   :  { %484 = vmatprep.mubr.bf16.mxu0 %v3912_v51  ;;  %3341 = vmatprep.mubr.msk.bf16.mxu1 %vm3717_vm1, %v3716_v50 }
  0x46   :  { %1120 = vmatprep.subr.bf16.mxu1 %v3507_v7  ;;  %v3570_v7 = vld [vmem:[%s5025_s0 + $0x3dc] ss:$12 sps:$4 sm:$0xff]  }
  0x47   :  { %1046 = vmatpush1.bf16.msra.mxu0 %v3496_v8  ;;  %v3568_v8 = vld [vmem:[%s5025_s0 + $0x3d8] ss:$12 sps:$4 sm:$0xff]  }
  0x48   :  { %1121 = vmatpush1.bf16.msra.mxu1 %v3505_v11  ;;  %1047 = vmatprep.subr.bf16.mxu0 %v3501_v9  ;;  %v3576_v9 = vld [vmem:[%s5025_s0 + $0x3ac] ss:$12 sps:$4 sm:$0xff]  }
  0x49   :  { %3216 = vmatprep.subr.bf16.mxu1 %v3514_v12  ;;  %v3577_v11 = vld [vmem:[%s5025_s0 + $0x4f8] ss:$12 sps:$4 sm:$0xff]   ;;  %v3582_v12 = vld [vmem:[%s5025_s0 + $0x394] ss:$12 sps:$4 sm:$0xff]  }
  0x4a   :  { %485 = vmatmul.mubr.bf16.gmra.mxu0 %v3929_v55 }
  0x4b   :  { %3342 = vmatmul.mubr.msk.bf16.gmra.mxu1 %vm432_vm0, %v3812_v22  ;;  %1048 = vmatpush1.bf16.msra.mxu0 %v3499_v13  ;;  %v4213_v13 = vld [vmem:[%s5026_s1 + $0x8] ss:$12 sps:$4 sm:$0xff]  }
  0x4c   :  { %494 = vmatprep.mubr.bf16.mxu0 %v3937_v57  ;;  %1049 = vmatprep.subr.bf16.mxu0 %v3504_v14  ;;  %v3580_v14 = vld [vmem:[%s5025_s0 + $0x390] ss:$12 sps:$4 sm:$0xff]  }
  0x4d   :  { %3345 = vmatprep.mubr.msk.bf16.mxu1 %vm3717_vm1, %v3716_v50 }
  0x4f   :  { %1050 = vmatpush1.bf16.msra.mxu0 %v3502_v15  ;;  %v3585_v15 = vld [vmem:[%s5025_s0 + $0x37c] ss:$12 sps:$4 sm:$0xff]  }
  0x50   :  { %1051 = vmatprep.subr.bf16.mxu0 %v3510_v16  ;;  %v3589_v16 = vld [vmem:[%s5025_s0 + $0x4e0] ss:$12 sps:$4 sm:$0xff]  }
  0x52   :  { %495 = vmatmul.mubr.bf16.gmra.mxu0 %v3956_v62 }
  0x53   :  { %3346 = vmatmul.mubr.msk.bf16.gmra.mxu1 %vm432_vm0, %v3844_v31  ;;  %1052 = vmatpush1.bf16.msra.mxu0 %v3508_v17  ;;  %v3598_v17 = vld [vmem:[%s5025_s0 + $0x4d0] ss:$12 sps:$4 sm:$0xff]  }
  0x54   :  { %1138 = vmatprep.mubr.bf16.mxu1 %v3715_v1  ;;  %1053 = vmatprep.subr.bf16.mxu0 %v3513_v18  ;;  %v3583_v18 = vld [vmem:[%s5025_s0 + $0x378] ss:$12 sps:$4 sm:$0xff]  }
  0x55   :  { %1075 = vmatprep.mubr.bf16.mxu0 %v3884_v43 }
  0x57   :  { %1054 = vmatpush1.bf16.msra.mxu0 %v3511_v19  ;;  %v3588_v19 = vld [vmem:[%s5025_s0 + $0x364] ss:$12 sps:$4 sm:$0xff]  }
  0x58   :  { %1055 = vmatprep.subr.bf16.mxu0 %v3517_v20  ;;  %v3594_v20 = vld [vmem:[%s5025_s0 + $0x4cc] ss:$12 sps:$4 sm:$0xff]  }
  0x5b   :  { %2883 = vmatmul.mubr.msk.bf16.vlgmr.msra.gmra.mxu1 %vm432_vm0, %v3771_v10  ;;  %1056 = vmatpush1.bf16.msra.mxu0 %v3515_v21  ;;  %v3527_v10 = vld [vmem:[%s5025_s0 + $0x31c] ss:$12 sps:$4 sm:$0xff]  }
  0x5c   :  { %3217 = vmatpush3.bf16.msra.mxu1 %v3518_v23  ;;  %1057 = vmatprep.subr.bf16.mxu0 %v3522_v25  ;;  %v3592_v21 = vld [vmem:[%s5025_s0 + $0x4c8] ss:$12 sps:$4 sm:$0xff]   ;;  %v3595_v23 = vld [vmem:[%s5025_s0 + $0x4b0] ss:$12 sps:$4 sm:$0xff]  }
  0x5d   :  { %3218 = vmatprep.subr.bf16.mxu1 %v3519_v24  ;;  %1148 = vmatprep.mubr.bf16.mxu1 %v3715_v1  ;;  %v3602_v24 = vld [vmem:[%s5025_s0 + $0x49c] ss:$12 sps:$4 sm:$0xff]  }
  0x5e   :  { %v3599_v25 = vld [vmem:[%s5025_s0 + $0x410] ss:$12 sps:$4 sm:$0xff]  }
  0x5f   :  { %1058 = vmatpush1.bf16.msra.mxu0 %v3520_v26  ;;  %v3603_v26 = vld [vmem:[%s5025_s0 + $0x4b8] ss:$12 sps:$4 sm:$0xff]  }
  0x60   :  { %3219 = vmatpush3.bf16.msra.mxu1 %v3523_v27  ;;  %1059 = vmatprep.subr.bf16.mxu0 %v3527_v10  ;;  %v3607_v27 = vld [vmem:[%s5025_s0 + $0x484] ss:$12 sps:$4 sm:$0xff]   ;;  %v3605_v10 = vld [vmem:[%s5025_s0 + $0x480] ss:$12 sps:$4 sm:$0xff]  }
  0x61   :  { %3220 = vmatprep.subr.bf16.mxu1 %v3524_v28  ;;  %v3604_v28 = vld [vmem:[%s5025_s0 + $0x3f8] ss:$12 sps:$4 sm:$0xff]  }
  0x63   :  { %2884 = vmatmul.mubr.msk.bf16.gmra.mxu1 %vm432_vm0, %v3812_v22  ;;  %1060 = vmatpush2.bf16.msra.mxu0 %v3525_v29  ;;  %v3608_v29 = vld [vmem:[%s5025_s0 + $0x4a0] ss:$12 sps:$4 sm:$0xff]  }
  0x64   :  { %3221 = vmatpush3.bf16.msra.mxu1 %v3528_v30  ;;  %1061 = vmatprep.subr.bf16.mxu0 %v3532_v33  ;;  %v3612_v30 = vld [vmem:[%s5025_s0 + $0x46c] ss:$12 sps:$4 sm:$0xff]   ;;  %v3610_v33 = vld [vmem:[%s5025_s0 + $0x468] ss:$12 sps:$4 sm:$0xff]  }
  0x65   :  { %3222 = vmatprep.subr.bf16.mxu1 %v3529_v32  ;;  %1158 = vmatprep.mubr.bf16.mxu1 %v3715_v1  ;;  %v3609_v32 = vld [vmem:[%s5025_s0 + $0x3e0] ss:$12 sps:$4 sm:$0xff]  }
  0x67   :  { %1062 = vmatpush2.bf16.msra.mxu0 %v3530_v34  ;;  %v3613_v34 = vld [vmem:[%s5025_s0 + $0x488] ss:$12 sps:$4 sm:$0xff]  }
  0x68   :  { %3223 = vmatpush3.bf16.msra.mxu1 %v3533_v35  ;;  %1063 = vmatprep.subr.bf16.mxu0 %v3537_v37  ;;  %v3617_v35 = vld [vmem:[%s5025_s0 + $0x454] ss:$12 sps:$4 sm:$0xff]  }
  0x69   :  { %3224 = vmatprep.subr.bf16.mxu1 %v3534_v36  ;;  %v4306_v36 = vld [vmem:[%s5026_s1 + $0x20] ss:$12 sps:$4 sm:$0xff]   ;;  %v3614_v37 = vld [vmem:[%s5025_s0 + $0x3c8] ss:$12 sps:$4 sm:$0xff]  }
  0x6b   :  { %2885 = vmatmul.mubr.msk.bf16.gmra.mxu1 %vm432_vm0, %v3844_v31  ;;  %1064 = vmatpush2.bf16.msra.mxu0 %v3535_v38  ;;  %v3615_v38 = vld [vmem:[%s5025_s0 + $0x450] ss:$12 sps:$4 sm:$0xff]  }
  0x6c   :  { %3225 = vmatpush3.bf16.msra.mxu1 %v3538_v39  ;;  %1065 = vmatprep.subr.bf16.mxu0 %v3542_v41  ;;  %v3618_v39 = vld [vmem:[%s5025_s0 + $0x470] ss:$12 sps:$4 sm:$0xff]  }
  0x6d   :  { %3226 = vmatprep.subr.bf16.mxu1 %v3539_v40  ;;  %1201 = vmatprep.mubr.bf16.mxu1 %v3884_v43  ;;  %v3622_v40 = vld [vmem:[%s5025_s0 + $0x43c] ss:$12 sps:$4 sm:$0xff]  }
  0x6e   :  { %v3619_v41 = vld [vmem:[%s5025_s0 + $0x3b0] ss:$12 sps:$4 sm:$0xff]  }
  0x6f   :  { %1066 = vmatpush2.bf16.msra.mxu0 %v3540_v42  ;;  %v3620_v42 = vld [vmem:[%s5025_s0 + $0x438] ss:$12 sps:$4 sm:$0xff]  }
  0x70   :  { %3227 = vmatpush3.bf16.msra.mxu1 %v3543_v44  ;;  %1067 = vmatprep.subr.bf16.mxu0 %v3547_v47  ;;  %v3623_v44 = vld [vmem:[%s5025_s0 + $0x458] ss:$12 sps:$4 sm:$0xff]  }
  0x71   :  { %3228 = vmatprep.subr.bf16.mxu1 %v3544_v45  ;;  %v3627_v45 = vld [vmem:[%s5025_s0 + $0x424] ss:$12 sps:$4 sm:$0xff]  }
  0x72   :  { %v4338_v47 = vld [vmem:[%s5026_s1 + $0x38] ss:$12 sps:$4 sm:$0xff]  }
  0x73   :  { %1068 = vmatpush2.bf16.msra.mxu0 %v3545_v48  ;;  %v3624_v48 = vld [vmem:[%s5025_s0 + $0x398] ss:$12 sps:$4 sm:$0xff]  }
  0x74   :  { %3229 = vmatpush3.bf16.msra.mxu1 %v3548_v49  ;;  %1069 = vmatprep.subr.bf16.mxu0 %v3552_v53  ;;  %v3625_v49 = vld [vmem:[%s5025_s0 + $0x420] ss:$12 sps:$4 sm:$0xff]   ;;  %v4354_v53 = vld [vmem:[%s5026_s1 + $0x4] ss:$12 sps:$4 sm:$0xff]  }
  0x75   :  { %3230 = vmatprep.subr.bf16.mxu1 %v3549_v52  ;;  %v3628_v52 = vld [vmem:[%s5025_s0 + $0x440] ss:$12 sps:$4 sm:$0xff]  }
  0x77   :  { %1070 = vmatpush2.bf16.msra.mxu0 %v3550_v54  ;;  %v3629_v54 = vld [vmem:[%s5025_s0 + $0x380] ss:$12 sps:$4 sm:$0xff]  }
  0x78   :  { %3231 = vmatpush3.bf16.msra.mxu1 %v3553_v56  ;;  %1071 = vmatprep.subr.bf16.mxu0 %v3556_v58  ;;  %v3630_v56 = vld [vmem:[%s5025_s0 + $0x500] ss:$12 sps:$4 sm:$0xff]   ;;  %v3631_v58 = vld [vmem:[%s5025_s0 + $0x428] ss:$12 sps:$4 sm:$0xff]  }
  0x79   :  { %3349 = vmatprep.subr.bf16.mxu1 %v3716_v50 }
  0x7b   :  { %1202 = vmatmul.mubr.bf16.vlgmr.msra.gmra.mxu1 %v3896_v46  ;;  %1072 = vmatpush2.bf16.msra.mxu0 %v3554_v59  ;;  %v4370_v59 = vld [vmem:[%s5026_s1] ss:$12 sps:$4 sm:$0xff]  }
  0x7c   :  { %3350 = vmatpush3.bf16.msra.mxu1 %v3557_v60  ;;  %1073 = vmatprep.subr.bf16.mxu0 %v3560_v61  ;;  %v3632_v60 = vld [vmem:[%s5025_s0 + $0x368] ss:$12 sps:$4 sm:$0xff]  }
  0x7d   :  { %1209 = vmatprep.mubr.bf16.mxu1 %v3912_v51  ;;  %3351 = vmatprep.subr.bf16.mxu1 %v3716_v50  ;;  %v3639_v61 = vld [vmem:[%s5025_s0 + $0x4e8] ss:$12 sps:$4 sm:$0xff]  }
  0x7f   :  { %1074 = vmatpush2.bf16.msra.mxu0 %v3558_v63  ;;  %v3635_v63 = vld [vmem:[%s5025_s0 + $0x5bc] ss:$12 sps:$4 sm:$0xff]  }
  0x80   :  { %3352 = vmatpush3.bf16.msra.mxu1 %v3567_v2  ;;  %1662 = vmatprep.subr.bf16.mxu0 %v3563_v0  ;;  %v4385_v0 = vld [vmem:[%s5026_s1 + $0x1c] ss:$12 sps:$4 sm:$0xff]   ;;  %v3651_v2 = vld [vmem:[%s5025_s0 + $0x6ac] ss:$12 sps:$4 sm:$0xff]  }
  0x81   :  { %1737 = vmatprep.subr.bf16.mxu1 %v3579_v3  ;;  %v3633_v3 = vld [vmem:[%s5025_s0 + $0x5b8] ss:$12 sps:$4 sm:$0xff]  }
  0x82   :  { %1076 = vmatmul.mubr.bf16.vlgmr.msra.gmra.mxu0 %v3896_v46  ;;  %v3573_v46 = vld [vmem:[%s5025_s0 + $0x3c4] ss:$12 sps:$4 sm:$0xff]  }
  0x83   :  { %1210 = vmatmul.mubr.bf16.gmra.mxu1 %v3929_v55  ;;  %1663 = vmatpush1.bf16.msra.mxu0 %v3561_v4  ;;  %v3638_v4 = vld [vmem:[%s5025_s0 + $0x5a4] ss:$12 sps:$4 sm:$0xff]  }
  0x84   :  { %1217 = vmatprep.mubr.bf16.mxu1 %v3937_v57  ;;  %1664 = vmatprep.subr.bf16.mxu0 %v3566_v5 }
  0x85   :  { %1085 = vmatprep.mubr.bf16.mxu0 %v3912_v51  ;;  %v3571_v51 = vld [vmem:[%s5025_s0 + $0x3c0] ss:$12 sps:$4 sm:$0xff]  }
  0x87   :  { %1665 = vmatpush1.bf16.msra.mxu0 %v3564_v6  ;;  %v4404_v6 = vld [vmem:[%s5026_s1 + $0x18] ss:$12 sps:$4 sm:$0xff]  }
  0x88   :  { %1666 = vmatprep.subr.bf16.mxu0 %v3570_v7  ;;  %v3636_v7 = vld [vmem:[%s5025_s0 + $0x5a0] ss:$12 sps:$4 sm:$0xff]  }
  0x8a   :  { %1086 = vmatmul.mubr.bf16.gmra.mxu0 %v3929_v55  ;;  %v3574_v55 = vld [vmem:[%s5025_s0 + $0x3a8] ss:$12 sps:$4 sm:$0xff]  }
  0x8b   :  { %1218 = vmatmul.mubr.bf16.gmra.mxu1 %v3956_v62  ;;  %1667 = vmatpush1.bf16.msra.mxu0 %v3568_v8  ;;  %v4413_v8 = vld [vmem:[%s5026_s1 + $0x34] ss:$12 sps:$4 sm:$0xff]  }
  0x8c   :  { %3353 = vmatprep.mubr.msk.bf16.mxu1 %vm3717_vm1, %v3716_v50  ;;  %1668 = vmatprep.subr.bf16.mxu0 %v3573_v46 }
  0x8d   :  { %1095 = vmatprep.mubr.bf16.mxu0 %v3937_v57  ;;  %v3591_v57 = vld [vmem:[%s5025_s0 + $0x4e4] ss:$12 sps:$4 sm:$0xff]  }
  0x8f   :  { %1669 = vmatpush1.bf16.msra.mxu0 %v3571_v51  ;;  %v3642_v51 = vld [vmem:[%s5025_s0 + $0x58c] ss:$12 sps:$4 sm:$0xff]  }
  0x90   :  { %1670 = vmatprep.subr.bf16.mxu0 %v3576_v9 }
  0x92   :  { %1096 = vmatmul.mubr.bf16.gmra.mxu0 %v3956_v62 }
  0x93   :  { %3354 = vmatmul.mubr.msk.bf16.vlgmr.msra.gmra.mxu1 %vm432_vm0, %v4213_v13  ;;  %1671 = vmatpush1.bf16.msra.mxu0 %v3574_v55  ;;  %v3640_v55 = vld [vmem:[%s5025_s0 + $0x588] ss:$12 sps:$4 sm:$0xff]  }
  0x94   :  { %1738 = vmatpush1.bf16.msra.mxu1 %v3577_v11  ;;  %1672 = vmatprep.subr.bf16.mxu0 %v3582_v12  ;;  %v3645_v12 = vld [vmem:[%s5025_s0 + $0x574] ss:$12 sps:$4 sm:$0xff]  }
  0x95   :  { %3357 = vmatprep.mubr.msk.bf16.mxu1 %vm3717_vm1, %v3716_v50  ;;  %1739 = vmatprep.subr.bf16.mxu1 %v3591_v57 }
  0x96   :  { %1694 = vmatprep.mubr.bf16.mxu0 %v3884_v43  ;;  %v3586_v43 = vld [vmem:[%s5025_s0 + $0x360] ss:$12 sps:$4 sm:$0xff]  }
  0x97   :  { %1673 = vmatpush1.bf16.msra.mxu0 %v3580_v14  ;;  %v2539_v14 = vld [vmem:[%s5027_s2] sm:$0xff] }
  0x98   :  { %1740 = vmatpush1.bf16.msra.mxu1 %v3589_v16  ;;  %1674 = vmatprep.subr.bf16.mxu0 %v3585_v15  ;;  %v3643_v15 = vld [vmem:[%s5025_s0 + $0x570] ss:$12 sps:$4 sm:$0xff]  }
  0x99   :  { %3255 = vmatprep.subr.bf16.mxu1 %v3598_v17  ;;  %2547 = vperm.xlu0 %3404, %v2539_v14  }
  0x9b   :  { %3358 = vmatmul.mubr.msk.bf16.gmra.mxu1 %vm432_vm0, %v3812_v22  ;;  %1675 = vmatpush1.bf16.msra.mxu0 %v3583_v18  ;;  %v3597_v22 = vld [vmem:[%s5025_s0 + $0x4b4] ss:$12 sps:$4 sm:$0xff]   ;;  %v2540_v18 = vld [vmem:[%s5027_s2 + $0x8] sm:$0xff] }
  0x9c   :  { %3361 = vmatprep.mubr.msk.bf16.mxu1 %vm3717_vm1, %v3716_v50  ;;  %1676 = vmatprep.subr.bf16.mxu0 %v3588_v19  ;;  %v3646_v19 = vld [vmem:[%s5025_s0 + $0x558] ss:$12 sps:$4 sm:$0xff]  }
  0x9d   :  { %2552 = vperm.xlu0 %3404, %v2540_v18  }
  0x9f   :  { %1677 = vmatpush1.bf16.msra.mxu0 %v3586_v43  ;;  %v3649_v43 = vld [vmem:[%s5025_s0 + $0x6a8] ss:$12 sps:$4 sm:$0xff]  }
  0xa0   :  { %1678 = vmatprep.subr.bf16.mxu0 %v3594_v20 }
  0xa3   :  { %3362 = vmatmul.mubr.msk.bf16.gmra.mxu1 %vm432_vm0, %v3844_v31  ;;  %1679 = vmatpush2.bf16.msra.mxu0 %v3592_v21  ;;  %v3600_v31 = vld [vmem:[%s5025_s0 + $0x498] ss:$12 sps:$4 sm:$0xff]  }
  0xa4   :  { %1757 = vmatprep.mubr.bf16.mxu1 %v3715_v1  ;;  %1680 = vmatprep.subr.bf16.mxu0 %v3597_v22  ;;  %v3654_v21 = vld [vmem:[%s5025_s0 + $0x544] ss:$12 sps:$4 sm:$0xff]   ;;  %v3663_v22 = vld [vmem:[%s5025_s0 + $0x694] ss:$12 sps:$4 sm:$0xff]  }
  0xa7   :  { %1681 = vmatpush2.bf16.msra.mxu0 %v3595_v23  ;;  %v4474_v23 = vld [vmem:[%s5026_s1 + $0x30] ss:$12 sps:$4 sm:$0xff]  }
  0xa8   :  { %1682 = vmatprep.subr.bf16.mxu0 %v3602_v24  ;;  %v3652_v24 = vld [vmem:[%s5025_s0 + $0x540] ss:$12 sps:$4 sm:$0xff]  }
  0xab   :  { %3015 = vmatmul.mubr.msk.bf16.vlgmr.msra.gmra.mxu1 %vm432_vm0, %v4213_v13  ;;  %1683 = vmatpush2.bf16.msra.mxu0 %v3600_v31  ;;  %v2541_v31 = vld [vmem:[%s5027_s2 + $0x10] sm:$0xff] }
  0xac   :  { %3256 = vmatpush3.bf16.msra.mxu1 %v3599_v25  ;;  %1684 = vmatprep.subr.bf16.mxu0 %v3607_v27  ;;  %v3661_v25 = vld [vmem:[%s5025_s0 + $0x690] ss:$12 sps:$4 sm:$0xff]   ;;  %v3657_v27 = vld [vmem:[%s5025_s0 + $0x52c] ss:$12 sps:$4 sm:$0xff]  }
  0xad   :  { %3257 = vmatprep.subr.bf16.mxu1 %v3603_v26  ;;  %1767 = vmatprep.mubr.bf16.mxu1 %v3715_v1 }
  0xae   :  { %2557 = vperm.xlu1 %3405, %v2541_v31  }
  0xaf   :  { %1685 = vmatpush2.bf16.msra.mxu0 %v3605_v10  ;;  %v3655_v10 = vld [vmem:[%s5025_s0 + $0x528] ss:$12 sps:$4 sm:$0xff]  }
  0xb0   :  { %3258 = vmatpush3.bf16.msra.mxu1 %v3604_v28  ;;  %1686 = vmatprep.subr.bf16.mxu0 %v3612_v30  ;;  %v3673_v28 = vld [vmem:[%s5025_s0 + $0x680] ss:$12 sps:$4 sm:$0xff]  }
  0xb1   :  { %3259 = vmatprep.subr.bf16.mxu1 %v3608_v29  ;;  %v2542_v29 = vld [vmem:[%s5027_s2 + $0x18] sm:$0xff] }
  0xb2   :  { %2562 = vperm.xlu1 %3405, %v2542_v29  }
  0xb3   :  { %3016 = vmatmul.mubr.msk.bf16.gmra.mxu1 %vm432_vm0, %v4306_v36  ;;  %1687 = vmatpush2.bf16.msra.mxu0 %v3610_v33  ;;  %v2543_v33 = vld [vmem:[%s5027_s2 + $0x20] sm:$0xff] }
  0xb4   :  { %3260 = vmatpush3.bf16.msra.mxu1 %v3609_v32  ;;  %1688 = vmatprep.subr.bf16.mxu0 %v3617_v35  ;;  %v3660_v32 = vld [vmem:[%s5025_s0 + $0x514] ss:$12 sps:$4 sm:$0xff]  }
  0xb5   :  { %3261 = vmatprep.subr.bf16.mxu1 %v3613_v34  ;;  %1777 = vmatprep.mubr.bf16.mxu1 %v3715_v1  ;;  %v3658_v34 = vld [vmem:[%s5025_s0 + $0x510] ss:$12 sps:$4 sm:$0xff]  }
  0xb6   :  { %2567 = vperm.xlu0 %3404, %v2543_v33   ;;  %v3694_v33 = vld [vmem:[%s5025_s0 + $0x560] ss:$12 sps:$4 sm:$0xff]  }
  0xb7   :  { %1689 = vmatpush2.bf16.msra.mxu0 %v3615_v38  ;;  %v2544_v38 = vld [vmem:[%s5027_s2 + $0x28] sm:$0xff] }
  0xb8   :  { %3262 = vmatpush3.bf16.msra.mxu1 %v3614_v37  ;;  %1690 = vmatprep.subr.bf16.mxu0 %v3622_v40  ;;  %v3666_v37 = vld [vmem:[%s5025_s0 + $0x67c] ss:$12 sps:$4 sm:$0xff]  }
  0xb9   :  { %3263 = vmatprep.subr.bf16.mxu1 %v3618_v39  ;;  %2572 = vperm.xlu1 %3405, %v2544_v38   ;;  %v3664_v39 = vld [vmem:[%s5025_s0 + $0x678] ss:$12 sps:$4 sm:$0xff]  }
  0xbb   :  { %3017 = vmatmul.mubr.msk.bf16.gmra.mxu1 %vm432_vm0, %v4338_v47  ;;  %1691 = vmatpush2.bf16.msra.mxu0 %v3620_v42 }
  0xbc   :  { %3264 = vmatpush3.bf16.msra.mxu1 %v3619_v41  ;;  %1692 = vmatprep.subr.bf16.mxu0 %v3627_v45  ;;  %v3669_v41 = vld [vmem:[%s5025_s0 + $0x664] ss:$12 sps:$4 sm:$0xff]  }
  0xbd   :  { %3265 = vmatprep.subr.bf16.mxu1 %v3623_v44  ;;  %1820 = vmatprep.mubr.bf16.mxu1 %v4354_v53  ;;  %v3667_v44 = vld [vmem:[%s5025_s0 + $0x660] ss:$12 sps:$4 sm:$0xff]  }
  0xbf   :  { %1693 = vmatpush2.bf16.msra.mxu0 %v3625_v49 }
  0xc0   :  { %3266 = vmatpush3.bf16.msra.mxu1 %v3624_v48  ;;  %3365 = vmatprep.subr.bf16.mxu0 %v3716_v50  ;;  %v3672_v48 = vld [vmem:[%s5025_s0 + $0x64c] ss:$12 sps:$4 sm:$0xff]  }
  0xc1   :  { %3267 = vmatprep.subr.bf16.mxu1 %v3628_v52 }
  0xc2   :  { %1695 = vmatmul.mubr.bf16.vlgmr.msra.gmra.mxu0 %v4370_v59 }
  0xc3   :  { %3366 = vmatpush3.bf16.msra.mxu0 %v3630_v56  ;;  %1704 = vmatprep.mubr.bf16.mxu0 %v4385_v0  ;;  %v3674_v56 = vld [vmem:[%s5025_s0 + $0x5c0] ss:$12 sps:$4 sm:$0xff]  }
  0xc4   :  { %3268 = vmatpush3.bf16.msra.mxu1 %v3629_v54  ;;  %3367 = vmatprep.subr.bf16.mxu0 %v3716_v50  ;;  %v3670_v54 = vld [vmem:[%s5025_s0 + $0x648] ss:$12 sps:$4 sm:$0xff]  }
  0xc5   :  { %3269 = vmatprep.subr.bf16.mxu1 %v3631_v58 }
  0xc7   :  { %3368 = vmatpush3.bf16.msra.mxu0 %v3639_v61  ;;  %v3678_v61 = vld [vmem:[%s5025_s0 + $0x668] ss:$12 sps:$4 sm:$0xff]  }
  0xc8   :  { %3270 = vmatpush3.bf16.msra.mxu1 %v3632_v60  ;;  %2356 = vmatprep.subr.bf16.mxu0 %v3651_v2  ;;  %v3677_v60 = vld [vmem:[%s5025_s0 + $0x634] ss:$12 sps:$4 sm:$0xff]  }
  0xc9   :  { %2281 = vmatprep.subr.bf16.mxu1 %v3635_v63 }
  0xca   :  { %1705 = vmatmul.mubr.bf16.gmra.mxu0 %v4404_v6 }
  0xcb   :  { %1821 = vmatmul.mubr.bf16.vlgmr.msra.gmra.mxu1 %v4370_v59  ;;  %v4399_v5 = vpop.f32.mrf.mxu1  ;;  %1714 = vmatprep.mubr.bf16.mxu0 %v4413_v8 }
  0xcc   :  { %2282 = vmatpush1.bf16.msra.mxu1 %v3633_v3  ;;  %1828 = vmatprep.mubr.bf16.mxu1 %v4385_v0  ;;  %v3675_v3 = vld [vmem:[%s5025_s0 + $0x630] ss:$12 sps:$4 sm:$0xff]  }
  0xcd   :  { %v4416_v46 = vpop.f32.mrf.mxu1  ;;  %2283 = vmatprep.subr.bf16.mxu1 %v3638_v4  ;;  %v3679_v4 = vld [vmem:[%s5025_s0 + $0x5a8] ss:$12 sps:$4 sm:$0xff]  }
  0xcf   :  { %v4422_v9 = vpop.f32.mrf.mxu1 }
  0xd0   :  { %2284 = vmatpush1.bf16.msra.mxu1 %v3636_v7 }
  0xd1   :  { %v4427_v11 = vpop.f32.mrf.mxu1  ;;  %2285 = vmatprep.subr.bf16.mxu1 %v3642_v51  ;;  %v3682_v51 = vld [vmem:[%s5025_s0 + $0x61c] ss:$12 sps:$4 sm:$0xff]  }
  0xd2   :  { %1715 = vmatmul.mubr.bf16.gmra.mxu0 %v3956_v62  ;;  %v3648_v62 = vld [vmem:[%s5025_s0 + $0x55c] ss:$12 sps:$4 sm:$0xff]  }
  0xd3   :  { %v4433_v57 = vpop.f32.mrf.mxu1  ;;  %1829 = vmatmul.mubr.bf16.gmra.mxu1 %v4404_v6  ;;  %3369 = vmatprep.mubr.msk.bf16.mxu0 %vm3717_vm1, %v3716_v50 }
  0xd4   :  { %2286 = vmatpush1.bf16.msra.mxu1 %v3640_v55  ;;  %1836 = vmatprep.mubr.bf16.mxu1 %v4413_v8  ;;  %v3683_v55 = vld [vmem:[%s5025_s0 + $0x650] ss:$12 sps:$4 sm:$0xff]  }
  0xd5   :  { %2287 = vmatprep.subr.bf16.mxu1 %v3645_v12  ;;  %v4444_v16 = vpop.f32.mrf.mxu1 }
  0xd7   :  { %v4450_v17 = vpop.f32.mrf.mxu1 }
  0xd8   :  { %2288 = vmatpush1.bf16.msra.mxu1 %v3643_v15  ;;  %v3680_v15 = vld [vmem:[%s5025_s0 + $0x618] ss:$12 sps:$4 sm:$0xff]  }
  0xd9   :  { %2289 = vmatprep.subr.bf16.mxu1 %v3648_v62  ;;  %v4461_v20 = vpop.f32.mrf.mxu1  ;;  %v3684_v62 = vld [vmem:[%s5025_s0 + $0x590] ss:$12 sps:$4 sm:$0xff]  }
  0xda   :  { %3370 = vmatmul.mubr.msk.bf16.vlgmr.msra.gmra.mxu0 %vm432_vm0, %v4213_v13 }
  0xdb   :  { %1837 = vmatmul.mubr.bf16.gmra.mxu1 %v4474_v23  ;;  %2357 = vmatpush1.bf16.msra.mxu0 %v3649_v43  ;;  %v4486_v26 = vpop.f32.mrf.mxu1  ;;  %v3688_v43 = vld [vmem:[%s5025_s0 + $0x638] ss:$12 sps:$4 sm:$0xff]  }
  0xdc   :  { %2290 = vmatpush1.bf16.msra.mxu1 %v3646_v19  ;;  %3373 = vmatprep.mubr.msk.bf16.mxu0 %vm3717_vm1, %v3716_v50  ;;  %v3687_v19 = vld [vmem:[%s5025_s0 + $0x604] ss:$12 sps:$4 sm:$0xff]  }
  0xdd   :  { %2291 = vmatprep.subr.bf16.mxu1 %v3654_v21  ;;  %2358 = vmatprep.subr.bf16.mxu0 %v3663_v22  ;;  %v4503_v30 = vpop.f32.mrf.mxu1 }
  0xde   :  { %2313 = vmatprep.mubr.bf16.mxu1 %v4354_v53 }
  0xdf   :  { %2359 = vmatpush1.bf16.msra.mxu0 %v3661_v25  ;;  %v4518_v35 = vpop.f32.mrf.mxu1  ;;  %v3689_v25 = vld [vmem:[%s5025_s0 + $0x578] ss:$12 sps:$4 sm:$0xff]  }
  0xe0   :  { %2292 = vmatpush1.bf16.msra.mxu1 %v3652_v24  ;;  %3294 = vmatprep.subr.bf16.mxu0 %v3673_v28  ;;  %v3685_v24 = vld [vmem:[%s5025_s0 + $0x600] ss:$12 sps:$4 sm:$0xff]  }
  0xe1   :  { %2293 = vmatprep.subr.bf16.mxu1 %v3657_v27  ;;  %v4529_v40 = vpop.f32.mrf.mxu1  ;;  %v3692_v27 = vld [vmem:[%s5025_s0 + $0x5ec] ss:$12 sps:$4 sm:$0xff]  }
  0xe2   :  { %3374 = vmatmul.mubr.msk.bf16.gmra.mxu0 %vm432_vm0, %v4306_v36  ;;  %v3693_v28 = vld [vmem:[%s5025_s0 + $0x620] ss:$12 sps:$4 sm:$0xff]  }
  0xe3   :  { %3377 = vmatprep.mubr.msk.bf16.mxu0 %vm3717_vm1, %v3716_v50 }
  0xe4   :  { %2294 = vmatpush1.bf16.msra.mxu1 %v3655_v10 }
  0xe5   :  { %2295 = vmatprep.subr.bf16.mxu1 %v3660_v32  ;;  %v3690_v32 = vld [vmem:[%s5025_s0 + $0x5e8] ss:$12 sps:$4 sm:$0xff]  }
  0xe8   :  { %2296 = vmatpush1.bf16.msra.mxu1 %v3658_v34 }
  0xe9   :  { %2297 = vmatprep.subr.bf16.mxu1 %v3666_v37  ;;  %v3697_v37 = vld [vmem:[%s5025_s0 + $0x5d4] ss:$12 sps:$4 sm:$0xff]  }
  0xea   :  { %3378 = vmatmul.mubr.msk.bf16.gmra.mxu0 %vm432_vm0, %v4338_v47 }
  0xeb   :  { %v3193_v42 = vpop.f32.mrf.mxu1  ;;  %2376 = vmatprep.mubr.bf16.mxu0 %v3715_v1 }
  0xec   :  { %2298 = vmatpush2.bf16.msra.mxu1 %v3664_v39 }
  0xed   :  { %v3194_v45 = vpop.f32.mrf.mxu1  ;;  %2299 = vmatprep.subr.bf16.mxu1 %v3669_v41 }
  0xee   :  { %v4543_v49 = vadd.f32 %v3194_v45, %v3193_v42  ;;  %v3695_v45 = vld [vmem:[%s5025_s0 + $0x5d0] ss:$12 sps:$4 sm:$0xff]  }
  0xef   :  { %v3196_v52 = vpop.f32.mrf.mxu1 }
  0xf0   :  { %2300 = vmatpush2.bf16.msra.mxu1 %v3667_v44 }
  0xf1   :  { %v3197_v58 = vpop.f32.mrf.mxu1  ;;  %2301 = vmatprep.subr.bf16.mxu1 %v3672_v48  ;;  %v3699_v48 = vld [vmem:[%s5025_s0 + $0x548] ss:$12 sps:$4 sm:$0xff]  }
  0xf2   :  { %v4557_v63 = vadd.f32 %v3197_v58, %v3196_v52  ;;  %3147 = vmatmul.mubr.msk.bf16.vlgmr.msra.gmra.mxu0 %vm432_vm0, %v4213_v13 }
  0xf3   :  { %v3199_v2 = vpop.f32.mrf.mxu1  ;;  %3295 = vmatpush3.bf16.msra.mxu0 %v3674_v56  ;;  %2386 = vmatprep.mubr.bf16.mxu0 %v3715_v1 }
  0xf4   :  { %2302 = vmatpush2.bf16.msra.mxu1 %v3670_v54  ;;  %3296 = vmatprep.subr.bf16.mxu0 %v3678_v61 }
  0xf5   :  { %v3200_v7 = vpop.f32.mrf.mxu1  ;;  %2303 = vmatprep.subr.bf16.mxu1 %v3677_v60 }
  0xf6   :  { %v4573_v12 = vadd.f32 %v3200_v7, %v3199_v2  ;;  %v3701_v2 = vld [vmem:[%s5025_s0 + $0x530] ss:$12 sps:$4 sm:$0xff]  }
  0xf7   :  { %v3202_v14 = vpop.f32.mrf.mxu1  ;;  %3297 = vmatpush3.bf16.msra.mxu0 %v3679_v4 }
  0xf8   :  { %2304 = vmatpush2.bf16.msra.mxu1 %v3675_v3  ;;  %3298 = vmatprep.subr.bf16.mxu0 %v3683_v55  ;;  %v3704_v55 = vld [vmem:[%s5025_s0 + $0x518] ss:$12 sps:$4 sm:$0xff]  }
  0xf9   :  { %v3203_v18 = vpop.f32.mrf.mxu1  ;;  %2305 = vmatprep.subr.bf16.mxu1 %v3682_v51 }
  0xfa   :  { %v4588_v21 = vadd.f32 %v3203_v18, %v3202_v14  ;;  %3148 = vmatmul.mubr.msk.bf16.gmra.mxu0 %vm432_vm0, %v4306_v36  ;;  %v3705_v14 = vld [vmem:[%s5025_s0 + $0x698] ss:$12 sps:$4 sm:$0xff]  }
  0xfb   :  { %v3205_v22 = vpop.f32.mrf.mxu1  ;;  %3299 = vmatpush3.bf16.msra.mxu0 %v3684_v62  ;;  %2396 = vmatprep.mubr.bf16.mxu0 %v3715_v1  ;;  %v3698_v1 = vld [vmem:[%s5025_s0 + $0x608] ss:$12 sps:$4 sm:$0xff]  }
  0xfc   :  { %2306 = vmatpush2.bf16.msra.mxu1 %v3680_v15  ;;  %3300 = vmatprep.subr.bf16.mxu0 %v3688_v43 }
  0xfd   :  { %v3206_v31 = vpop.f32.mrf.mxu1  ;;  %2307 = vmatprep.subr.bf16.mxu1 %v3687_v19 }
  0xfe   :  { %v4604_v10 = vadd.f32 %v3206_v31, %v3205_v22 }
  0xff   :  { %v3208_v29 = vpop.f32.mrf.mxu1  ;;  %3301 = vmatpush3.bf16.msra.mxu0 %v3689_v25 }
 0x100   :  { %2308 = vmatpush2.bf16.msra.mxu1 %v3685_v24  ;;  %3302 = vmatprep.subr.bf16.mxu0 %v3693_v28 }
 0x101   :  { %v3209_v34 = vpop.f32.mrf.mxu1  ;;  %2309 = vmatprep.subr.bf16.mxu1 %v3692_v27 }
 0x102   :  { %v4619_v38 = vadd.f32 %v3209_v34, %v3208_v29  ;;  %v476_v39 = vpop.f32.mrf.mxu0  ;;  %3149 = vmatmul.mubr.msk.bf16.gmra.mxu0 %vm432_vm0, %v4338_v47 }
 0x103   :  { %v659_v41 = vpop.f32.mrf.mxu1  ;;  %v4624_v42 = vadd.f32 %v4399_v5, %v476_v39  ;;  %3303 = vmatpush3.bf16.msra.mxu0 %v3694_v33  ;;  %v3700_v5 = vld [vmem:[%s5025_s0 + $0x5f0] ss:$12 sps:$4 sm:$0xff]   ;;  %2439 = vmatprep.mubr.bf16.mxu0 %v4354_v53 }
 0x104   :  { %2310 = vmatpush2.bf16.msra.mxu1 %v3690_v32  ;;  %v4627_v44 = vadd.f32 %v4543_v49, %v659_v41  ;;  %v478_v52 = vpop.f32.mrf.mxu0  ;;  %3304 = vmatprep.subr.bf16.mxu0 %v3698_v1 }
 0x105   :  { %v3339_v54 = vpop.f32.mrf.mxu1  ;;  %2311 = vmatprep.subr.bf16.mxu1 %v3697_v37  ;;  %v4639_v49 = vadd.f32 %v4416_v46, %v478_v52  ;;  %v3702_v46 = vld [vmem:[%s5025_s0 + $0x6b0] ss:$12 sps:$4 sm:$0xff]  }
 0x106   :  { %v480_v56 = vpop.f32.mrf.mxu0 }
 0x107   :  { %v662_v58 = vpop.f32.mrf.mxu1  ;;  %v4643_v60 = vadd.f32 %v4422_v9, %v480_v56  ;;  %3305 = vmatpush3.bf16.msra.mxu0 %v3699_v48  ;;  %v3703_v9 = vld [vmem:[%s5025_s0 + $0x5d8] ss:$12 sps:$4 sm:$0xff]  }
 0x108   :  { %2312 = vmatpush2.bf16.msra.mxu1 %v3695_v45  ;;  %v4646_v61 = vadd.f32 %v4557_v63, %v662_v58  ;;  %v4654_v3 = vpop.f32.mrf.mxu0  ;;  %3306 = vmatprep.subr.bf16.mxu0 %v3700_v5 }
 0x109   :  { %v3340_v53 = vpop.f32.mrf.mxu1  ;;  %3397 = vmatprep.subr.bf16.mxu1 %v3716_v50 }
 0x10a   :  { %v486_v63 = vpop.f32.mrf.mxu0 }
 0x10b   :  { %2314 = vmatmul.mubr.bf16.vlgmr.msra.gmra.mxu1 %v4370_v59  ;;  %v667_v4 = vpop.f32.mrf.mxu1  ;;  %v4662_v7 = vadd.f32 %v4433_v57, %v486_v63  ;;  %3307 = vmatpush3.bf16.msra.mxu0 %v3701_v2 }
 0x10c   :  { %v4665_v51 = vadd.f32 %v4573_v12, %v667_v4  ;;  %3399 = vmatpush3.bf16.msra.mxu1 %v3702_v46  ;;  %v488_v15 = vpop.f32.mrf.mxu0  ;;  %3308 = vmatprep.subr.bf16.mxu0 %v3703_v9 }
 0x10d   :  { %v3343_v62 = vpop.f32.mrf.mxu1  ;;  %2323 = vmatprep.mubr.bf16.mxu1 %v4385_v0  ;;  %v4675_v57 = vadd.f32 %v4444_v16, %v488_v15  ;;  %3398 = vmatprep.subr.bf16.mxu1 %v3716_v50 }
 0x10e   :  { %v490_v12 = vpop.f32.mrf.mxu0  ;;  %v4739_v62 = vadd.f32 %v4427_v11, %v4654_v3 }
 0x10f   :  { %v670_v18 = vpop.f32.mrf.mxu1  ;;  %v4679_v19 = vadd.f32 %v4450_v17, %v490_v12  ;;  %3309 = vmatpush3.bf16.msra.mxu0 %v3704_v55 }
 0x110   :  { %v4682_v43 = vadd.f32 %v4588_v21, %v670_v18  ;;  %3400 = vmatpush3.bf16.msra.mxu1 %v3705_v14  ;;  %v492_v22 = vpop.f32.mrf.mxu0  ;;  %3381 = vmatprep.subr.bf16.mxu0 %v3716_v50 }
 0x111   :  { %v3344_v24 = vpop.f32.mrf.mxu1  ;;  %v4686_v25 = vadd.f32 %v4461_v20, %v492_v22 }
 0x112   :  { %2440 = vmatmul.mubr.bf16.vlgmr.msra.gmra.mxu0 %v4370_v59  ;;  %v496_v16 = vpop.f32.mrf.mxu0 }
 0x113   :  { %2324 = vmatmul.mubr.bf16.gmra.mxu1 %v4404_v6  ;;  %v675_v31 = vpop.f32.mrf.mxu1  ;;  %v4691_v17 = vadd.f32 %v4486_v26, %v496_v16  ;;  %3382 = vmatpush3.bf16.msra.mxu0 %v3702_v46 }
 0x114   :  { %v4694_v21 = vadd.f32 %v4604_v10, %v675_v31  ;;  %2333 = vmatprep.mubr.bf16.mxu1 %v4413_v8  ;;  %v498_v27 = vpop.f32.mrf.mxu0  ;;  %2447 = vmatprep.mubr.bf16.mxu0 %v4385_v0 }
 0x115   :  { %v3347_v28 = vpop.f32.mrf.mxu1  ;;  %3383 = vmatprep.subr.bf16.mxu0 %v3716_v50  ;;  %v4700_v20 = vadd.f32 %v4503_v30, %v498_v27 }
 0x116   :  { %v500_v59 = vpop.f32.mrf.mxu0 }
 0x117   :  { %v678_v29 = vpop.f32.mrf.mxu1  ;;  %v4703_v26 = vadd.f32 %v4518_v35, %v500_v59  ;;  %3384 = vmatpush3.bf16.msra.mxu0 %v3705_v14 }
 0x118   :  { %v4706_v10 = vadd.f32 %v4619_v38, %v678_v29  ;;  %v502_v32 = vpop.f32.mrf.mxu0 }
 0x119   :  { %v3348_v33 = vpop.f32.mrf.mxu1  ;;  %v4709_v34 = vadd.f32 %v4529_v40, %v502_v32 }
 0x11a   :  { %2448 = vmatmul.mubr.bf16.gmra.mxu0 %v4404_v6 }
 0x11b   :  { %2334 = vmatmul.mubr.bf16.gmra.mxu1 %v4474_v23  ;;  %v1140_v0 = vpop.f32.mrf.mxu1  ;;  %2455 = vmatprep.mubr.bf16.mxu0 %v4413_v8 }
 0x11c   :  { %3389 = vmatprep.mubr.msk.bf16.mxu1 %vm3717_vm1, %v3716_v50 }
 0x11d   :  { %v1142_v30 = vpop.f32.mrf.mxu1 }
 0x11f   :  { %v1144_v35 = vpop.f32.mrf.mxu1 }
 0x121   :  { %v1146_v37 = vpop.f32.mrf.mxu1 }
 0x122   :  { %2456 = vmatmul.mubr.bf16.gmra.mxu0 %v4474_v23 }
 0x123   :  { %3390 = vmatmul.mubr.msk.bf16.vlgmr.msra.gmra.mxu1 %vm432_vm0, %v4306_v36  ;;  %v1150_v40 = vpop.f32.mrf.mxu1  ;;  %3385 = vmatprep.mubr.msk.bf16.mxu0 %vm3717_vm1, %v3716_v50 }
 0x124   :  { %3393 = vmatprep.mubr.msk.bf16.mxu1 %vm3717_vm1, %v3716_v50 }
 0x125   :  { %v1152_v6 = vpop.f32.mrf.mxu1 }
 0x127   :  { %v1154_v1 = vpop.f32.mrf.mxu1 }
 0x129   :  { %v1156_v38 = vpop.f32.mrf.mxu1 }
 0x12a   :  { %3386 = vmatmul.mubr.msk.bf16.vlgmr.msra.gmra.mxu0 %vm432_vm0, %v4213_v13 }
 0x12b   :  { %3394 = vmatmul.mubr.msk.bf16.gmra.mxu1 %vm432_vm0, %v4338_v47  ;;  %v1160_v8 = vpop.f32.mrf.mxu1 }
 0x12d   :  { %v1162_v36 = vpop.f32.mrf.mxu1 }
 0x12f   :  { %v1164_v39 = vpop.f32.mrf.mxu1 }
 0x131   :  { %v1166_v23 = vpop.f32.mrf.mxu1 }
 0x13b   :  { %v3232_v41 = vpop.f32.mrf.mxu1 }
 0x13d   :  { %v3233_v45 = vpop.f32.mrf.mxu1 }
 0x13e   :  { %v3234_v48 = vadd.f32 %v3233_v45, %v3232_v41 }
 0x13f   :  { %v3235_v52 = vpop.f32.mrf.mxu1 }
 0x141   :  { %v3236_v54 = vpop.f32.mrf.mxu1 }
 0x142   :  { %v3237_v5 = vadd.f32 %v3236_v54, %v3235_v52  ;;  %v1077_v56 = vpop.f32.mrf.mxu0 }
 0x143   :  { %v3238_v50 = vpop.f32.mrf.mxu1  ;;  %v4727_v58 = vadd.f32 %v1140_v0, %v1077_v56 }
 0x144   :  { %v1079_v46 = vpop.f32.mrf.mxu0 }
 0x145   :  { %v3239_v2 = vpop.f32.mrf.mxu1  ;;  %v1283_v47 = vmax.f32 %v4624_v42, %v4727_v58  ;;  %v4731_v53 = vadd.f32 %v1142_v30, %v1079_v46 }
 0x146   :  { %v3240_v13 = vadd.f32 %v3239_v2, %v3238_v50  ;;  %v1081_v63 = vpop.f32.mrf.mxu0 }
 0x147   :  { %v3241_v9 = vpop.f32.mrf.mxu1  ;;  %v1284_v4 = vmax.f32 %v4639_v49, %v4731_v53  ;;  %v4735_v55 = vadd.f32 %v1144_v35, %v1081_v63 }
 0x148   :  { %v1083_v15 = vpop.f32.mrf.mxu0 }
 0x149   :  { %v3242_v14 = vpop.f32.mrf.mxu1  ;;  %v1286_v12 = vmax.f32 %v4643_v60, %v4735_v55  ;;  %v4743_v22 = vadd.f32 %v1146_v37, %v1083_v15 }
 0x14a   :  { %v3243_v18 = vadd.f32 %v3242_v14, %v3241_v9  ;;  %v1087_v16 = vpop.f32.mrf.mxu0 }
 0x14b   :  { %v3244_v24 = vpop.f32.mrf.mxu1  ;;  %v1287_v31 = vmax.f32 %v4739_v62, %v4743_v22  ;;  %v4747_v27 = vadd.f32 %v1150_v40, %v1087_v16 }
 0x14c   :  { %v1089_v59 = vpop.f32.mrf.mxu0 }
 0x14d   :  { %v3245_v28 = vpop.f32.mrf.mxu1  ;;  %v1289_v29 = vmax.f32 %v4662_v7, %v4747_v27  ;;  %v4751_v3 = vadd.f32 %v1152_v6, %v1089_v59 }
 0x14e   :  { %v3246_v11 = vadd.f32 %v3245_v28, %v3244_v24  ;;  %v1091_v33 = vpop.f32.mrf.mxu0 }
 0x14f   :  { %v3247_v32 = vpop.f32.mrf.mxu1  ;;  %v1290_v0 = vmax.f32 %v4675_v57, %v4751_v3  ;;  %v4755_v30 = vadd.f32 %v1154_v1, %v1091_v33 }
 0x150   :  { %v1093_v37 = vpop.f32.mrf.mxu0 }
 0x151   :  { %v3248_v35 = vpop.f32.mrf.mxu1  ;;  %v1292_v40 = vmax.f32 %v4679_v19, %v4755_v30  ;;  %v4759_v45 = vadd.f32 %v1156_v38, %v1093_v37 }
 0x152   :  { %v3249_v41 = vadd.f32 %v3248_v35, %v3247_v32  ;;  %v1097_v54 = vpop.f32.mrf.mxu0 }
 0x153   :  { %v1260_v52 = vpop.f32.mrf.mxu1  ;;  %v4765_v56 = vadd.f32 %v1160_v8, %v1097_v54  ;;  %v5029_v27 = vmax.f32 %v4686_v25, %v4759_v45 }
 0x154   :  { %v4763_v50 = vadd.f32 %v3234_v48, %v1260_v52  ;;  %v1099_v1 = vpop.f32.mrf.mxu0 }
 0x155   :  { %v3355_v2 = vpop.f32.mrf.mxu1  ;;  %v4771_v63 = vadd.f32 %v1162_v36, %v1099_v1  ;;  %v5030_v57 = vmax.f32 %v4691_v17, %v4765_v56 }
 0x156   :  { %v1101_v14 = vpop.f32.mrf.mxu0 }
 0x157   :  { %v1263_v38 = vpop.f32.mrf.mxu1  ;;  %v4777_v48 = vadd.f32 %v1164_v39, %v1101_v14  ;;  %v5031_v30 = vmax.f32 %v4700_v20, %v4771_v63 }
 0x158   :  { %v4775_v24 = vadd.f32 %v3237_v5, %v1263_v38  ;;  %v1103_v16 = vpop.f32.mrf.mxu0 }
 0x159   :  { %v3356_v8 = vpop.f32.mrf.mxu1  ;;  %v4783_v32 = vadd.f32 %v1166_v23, %v1103_v16  ;;  %v5032_v45 = vmax.f32 %v4703_v26, %v4777_v48 }
 0x15b   :  { %v1268_v36 = vpop.f32.mrf.mxu1 }
 0x15c   :  { %v4787_v35 = vadd.f32 %v3240_v13, %v1268_v36 }
 0x15d   :  { %v3359_v5 = vpop.f32.mrf.mxu1 }
 0x15f   :  { %v1271_v37 = vpop.f32.mrf.mxu1 }
 0x160   :  { %v4791_v52 = vadd.f32 %v3243_v18, %v1271_v37 }
 0x161   :  { %v3360_v54 = vpop.f32.mrf.mxu1 }
 0x163   :  { %v1276_v1 = vpop.f32.mrf.mxu1 }
 0x164   :  { %v4795_v23 = vadd.f32 %v3246_v11, %v1276_v1 }
 0x165   :  { %v3363_v38 = vpop.f32.mrf.mxu1 }
 0x167   :  { %v1279_v13 = vpop.f32.mrf.mxu1 }
 0x168   :  { %v4799_v8 = vadd.f32 %v3249_v41, %v1279_v13 }
 0x169   :  { %v3364_v16 = vpop.f32.mrf.mxu1 }
 0x16b   :  { %v1759_v18 = vpop.f32.mrf.mxu1 }
 0x16d   :  { %v1761_v5 = vpop.f32.mrf.mxu1 }
 0x16f   :  { %v1763_v37 = vpop.f32.mrf.mxu1 }
 0x171   :  { %v1765_v54 = vpop.f32.mrf.mxu1 }
 0x173   :  { %v1769_v39 = vpop.f32.mrf.mxu1 }
 0x175   :  { %v1771_v2 = vpop.f32.mrf.mxu1 }
 0x177   :  { %v1773_v28 = vpop.f32.mrf.mxu1 }
 0x179   :  { %v1775_v11 = vpop.f32.mrf.mxu1 }
 0x17b   :  { %v1779_v1 = vpop.f32.mrf.mxu1 }
 0x17d   :  { %v1781_v33 = vpop.f32.mrf.mxu1 }
 0x17f   :  { %v1783_v15 = vpop.f32.mrf.mxu1 }
 0x182   :  { %v1696_v38 = vpop.f32.mrf.mxu0 }
 0x183   :  { %v1760_v46 = vadd.f32 %v1759_v18, %v1696_v38 }
 0x184   :  { %v1698_v14 = vpop.f32.mrf.mxu0 }
 0x185   :  { %v4806_v41 = vmax.f32 %v1283_v47, %v1760_v46  ;;  %v1762_v13 = vadd.f32 %v1761_v5, %v1698_v14  ;;  %v1785_v47 = vpop.f32.mrf.mxu1 }
 0x186   :  { %v1700_v16 = vpop.f32.mrf.mxu0 }
 0x187   :  { %v4811_v36 = vmax.f32 %v1284_v4, %v1762_v13  ;;  %v1764_v59 = vadd.f32 %v1763_v37, %v1700_v16  ;;  %v5035_v13 = vmax.f32 %v4646_v61, %v4775_v24 }
 0x188   :  { %v1702_v9 = vpop.f32.mrf.mxu0 }
 0x189   :  { %v4816_v18 = vmax.f32 %v1286_v12, %v1764_v59  ;;  %v1766_v38 = vadd.f32 %v1765_v54, %v1702_v9 }
 0x18a   :  { %v1706_v6 = vpop.f32.mrf.mxu0 }
 0x18b   :  { %v4821_v42 = vmax.f32 %v1287_v31, %v1766_v38  ;;  %v1770_v58 = vadd.f32 %v1769_v39, %v1706_v6  ;;  %v3271_v46 = vpop.f32.mrf.mxu1 }
 0x18c   :  { %v1708_v49 = vpop.f32.mrf.mxu0 }
 0x18d   :  { %v4826_v53 = vmax.f32 %v1289_v29, %v1770_v58  ;;  %v1772_v4 = vadd.f32 %v1771_v2, %v1708_v49  ;;  %v3272_v6 = vpop.f32.mrf.mxu1 }
 0x18e   :  { %v1710_v60 = vpop.f32.mrf.mxu0  ;;  %v3273_v25 = vadd.f32 %v3272_v6, %v3271_v46 }
 0x18f   :  { %v4831_v55 = vmax.f32 %v1290_v0, %v1772_v4  ;;  %v1774_v12 = vadd.f32 %v1773_v28, %v1710_v60  ;;  %v3274_v28 = vpop.f32.mrf.mxu1 }
 0x190   :  { %v1712_v62 = vpop.f32.mrf.mxu0 }
 0x191   :  { %v4836_v22 = vmax.f32 %v1292_v40, %v1774_v12  ;;  %v1776_v31 = vadd.f32 %v1775_v11, %v1712_v62  ;;  %v3275_v17 = vpop.f32.mrf.mxu1 }
 0x192   :  { %v1716_v7 = vpop.f32.mrf.mxu0  ;;  %v3276_v63 = vadd.f32 %v3275_v17, %v3274_v28 }
 0x193   :  { %v4841_v29 = vmax.f32 %v5029_v27, %v1776_v31  ;;  %v1780_v9 = vadd.f32 %v1779_v1, %v1716_v7  ;;  %v4879_v49 = vpop.f32.mrf.mxu1 }
 0x194   :  { %v1718_v59 = vpop.f32.mrf.mxu0 }
 0x195   :  { %v4846_v3 = vmax.f32 %v5030_v57, %v1780_v9  ;;  %v1782_v0 = vadd.f32 %v1781_v33, %v1718_v59  ;;  %v5033_v33 = vmax.f32 %v4709_v34, %v4783_v32  ;;  %v4883_v4 = vpop.f32.mrf.mxu1 }
 0x196   :  { %v1720_v19 = vpop.f32.mrf.mxu0 }
 0x197   :  { %v4851_v40 = vmax.f32 %v5031_v30, %v1782_v0  ;;  %v1784_v39 = vadd.f32 %v1783_v15, %v1720_v19  ;;  %v5034_v15 = vmax.f32 %v4627_v44, %v4763_v50  ;;  %v4885_v61 = vpop.f32.mrf.mxu1 }
 0x198   :  { %v1722_v2 = vpop.f32.mrf.mxu0 }
 0x199   :  { %v4856_v14 = vmax.f32 %v5032_v45, %v1784_v39  ;;  %v1786_v5 = vadd.f32 %v1785_v47, %v1722_v2  ;;  %v4887_v62 = vpop.f32.mrf.mxu1  ;;  %v4897_v39 = vpop.permute.xlu0 %2547 }
 0x19a   :  { %v1879_v56 = vpop.f32.mrf.mxu0 }
 0x19b   :  { %v4861_v37 = vmax.f32 %v5033_v33, %v1786_v5  ;;  %v1880_v54 = vadd.f32 %v3273_v25, %v1879_v56  ;;  %v4889_v7 = vpop.f32.mrf.mxu1 }
 0x19c   :  { %v3371_v20 = vpop.f32.mrf.mxu0 }
 0x19d   :  { %v4866_v11 = vmax.f32 %v5034_v15, %v1880_v54  ;;  %v4891_v59 = vpop.f32.mrf.mxu1  ;;  %v4904_v15 = vpop.permute.xlu0 %2552 }
 0x19e   :  { %v1882_v1 = vpop.f32.mrf.mxu0 }
 0x19f   :  { %v1883_v26 = vadd.f32 %v3276_v63, %v1882_v1  ;;  %v4893_v0 = vpop.f32.mrf.mxu1 }
 0x1a0   :  { %v3372_v48 = vpop.f32.mrf.mxu0 }
 0x1a1   :  { %v4871_v16 = vmax.f32 %v5035_v13, %v1883_v26  ;;  %v4895_v19 = vpop.f32.mrf.mxu1 }
 0x1a2   :  { %v4873_v38 = vpop.f32.mrf.mxu0 }
 0x1a4   :  { %v3375_v34 = vpop.f32.mrf.mxu0 }
 0x1a6   :  { %v4875_v32 = vpop.f32.mrf.mxu0 }
 0x1a8   :  { %v3376_v58 = vpop.f32.mrf.mxu0 }
 0x1a9   :  { %v4910_v58 = vpop.permute.xlu1 %2557 }
 0x1aa   :  { %v4877_v47 = vpop.f32.mrf.mxu0 }
 0x1ac   :  { %v3379_v44 = vpop.f32.mrf.mxu0 }
 0x1ae   :  { %v4881_v50 = vpop.f32.mrf.mxu0 }
 0x1b0   :  { %v3380_v46 = vpop.f32.mrf.mxu0 }
 0x1b2   :  { %v2378_v60 = vpop.f32.mrf.mxu0 }
 0x1b4   :  { %v2380_v24 = vpop.f32.mrf.mxu0 }
 0x1b6   :  { %v2382_v12 = vpop.f32.mrf.mxu0 }
 0x1b8   :  { %v2384_v31 = vpop.f32.mrf.mxu0 }
 0x1ba   :  { %v2388_v6 = vpop.f32.mrf.mxu0 }
 0x1bc   :  { %v2390_v27 = vpop.f32.mrf.mxu0 }
 0x1be   :  { %v2392_v9 = vpop.f32.mrf.mxu0 }
 0x1c0   :  { %v2394_v57 = vpop.f32.mrf.mxu0 }
 0x1c2   :  { %v2398_v28 = vpop.f32.mrf.mxu0 }
 0x1c4   :  { %v2400_v30 = vpop.f32.mrf.mxu0 }
 0x1c6   :  { %v4899_v45 = vpop.f32.mrf.mxu0 }
 0x1c8   :  { %v4906_v1 = vpop.f32.mrf.mxu0 }
 0x1cb   :  { %v2315_v2 = vpop.f32.mrf.mxu1 }
 0x1cc   :  { %v2379_v25 = vadd.f32 %v2378_v60, %v2315_v2 }
 0x1cd   :  { %v2317_v5 = vpop.f32.mrf.mxu1 }
 0x1ce   :  { %v2521_v17 = vmax.f32 %v4806_v41, %v2379_v25  ;;  %v2381_v56 = vadd.f32 %v2380_v24, %v2317_v5 }
 0x1cf   :  { %v2319_v33 = vpop.f32.mrf.mxu1 }
 0x1d0   :  { %v2522_v54 = vmax.f32 %v4811_v36, %v2381_v56  ;;  %v2575_v20 = vadd.f32 %v4897_v39, %v2521_v17  ;;  %v2383_v63 = vadd.f32 %v2382_v12, %v2319_v33 }
 0x1d1   :  { %v2321_v26 = vpop.f32.mrf.mxu1 }
 0x1d2   :  { %v2576_v48 = vadd.f32 %v4897_v39, %v2522_v54  ;;  %v2524_v13 = vmax.f32 %v4816_v18, %v2383_v63  ;;  %v2385_v34 = vadd.f32 %v2384_v31, %v2321_v26  ;;  %v2593_v41 = vmax.f32 %v2575_v20, 0.0  ;;  %v4912_v46 = vpop.f32.mrf.mxu0 }
 0x1d3   :  { %v2325_v44 = vpop.f32.mrf.mxu1 }
 0x1d4   :  { %v2594_v36 = vmax.f32 %v2576_v48, 0.0  ;;  %v2525_v60 = vmax.f32 %v4821_v42, %v2385_v34  ;;  %v2578_v24 = vadd.f32 %v4904_v15, %v2524_v13  ;;  %v2389_v12 = vadd.f32 %v2388_v6, %v2325_v44  ;;  %v4916_v25 = vpop.f32.mrf.mxu0  ;;  %v4925_v6 = vpop.permute.xlu1 %2562 }
 0x1d5   :  { %v2327_v2 = vpop.f32.mrf.mxu1 }
 0x1d6   :  { %v3165_v5 = vpack.c.bf16 %v2594_v36, %v2593_v41  ;;  %v2579_v17 = vadd.f32 %v4904_v15, %v2525_v60  ;;  %v2527_v18 = vmax.f32 %v4826_v53, %v2389_v12  ;;  %v2391_v31 = vadd.f32 %v2390_v27, %v2327_v2  ;;  %v4920_v33 = vpop.f32.mrf.mxu0  ;;  %v4940_v12 = vpop.permute.xlu0 %2567 }
 0x1d7   :  { %v2329_v56 = vpop.f32.mrf.mxu1  ;;  %v2596_v42 = vmax.f32 %v2578_v24, 0.0  ;;  %v3279_v41 = vadd.f32 %v4883_v4, %v4879_v49 }
 0x1d8   :  { %2671 = vst [vmem:[%s5028_s3] sm:$0xff] %v3165_v5  ;;  %v2597_v54 = vmax.f32 %v2579_v17, 0.0  ;;  %v2393_v20 = vadd.f32 %v2392_v9, %v2329_v56  ;;  %v2528_v63 = vmax.f32 %v4831_v55, %v2391_v31  ;;  %v2581_v26 = vadd.f32 %v4910_v58, %v2527_v18  ;;  %v4929_v13 = vpop.f32.mrf.mxu0 }
 0x1d9   :  { %v2331_v48 = vpop.f32.mrf.mxu1  ;;  %v1888_v18 = vadd.f32 %v3279_v41, %v4873_v38  ;;  %v3282_v31 = vadd.f32 %v4887_v62, %v4885_v61 }
 0x1da   :  { %v3167_v53 = vpack.c.bf16 %v2597_v54, %v2596_v42  ;;  %v2530_v27 = vmax.f32 %v4836_v22, %v2393_v20  ;;  %v2395_v34 = vadd.f32 %v2394_v57, %v2331_v48  ;;  %v2582_v44 = vadd.f32 %v4910_v58, %v2528_v63  ;;  %v3316_v9 = vpop.f32.mrf.mxu0 }
 0x1db   :  { %v2335_v36 = vpop.f32.mrf.mxu1  ;;  %v2599_v22 = vmax.f32 %v2581_v26, 0.0 }
 0x1dc   :  { %2674 = vst [vmem:[%s5028_s3 + $0xc] sm:$0xff] %v3167_v53  ;;  %v2531_v55 = vmax.f32 %v4841_v29, %v2395_v34  ;;  %v2584_v60 = vadd.f32 %v4925_v6, %v2530_v27  ;;  %v2399_v24 = vadd.f32 %v2398_v28, %v2335_v36  ;;  %v2600_v57 = vmax.f32 %v2582_v44, 0.0  ;;  %v3317_v5 = vpop.f32.mrf.mxu0  ;;  %v4955_v53 = vpop.permute.xlu1 %2572 }
 0x1dd   :  { %v2337_v2 = vpop.f32.mrf.mxu1  ;;  %v3318_v48 = vadd.f32 %v3317_v5, %v3316_v9  ;;  %v1891_v36 = vadd.f32 %v3282_v31, %v4875_v32  ;;  %v3288_v32 = vadd.f32 %v4895_v19, %v4893_v0  ;;  %v3312_v0 = vadd.f32 %v4916_v25, %v4912_v46 }
 0x1de   :  { %v2585_v49 = vadd.f32 %v4925_v6, %v2531_v55  ;;  %v2533_v4 = vmax.f32 %v4846_v3, %v2399_v24  ;;  %v2401_v17 = vadd.f32 %v2400_v30, %v2337_v2  ;;  %v3169_v29 = vpack.c.bf16 %v2600_v57, %v2599_v22  ;;  %v3319_v28 = vpop.f32.mrf.mxu0 }
 0x1df   :  { %v2602_v56 = vmax.f32 %v2584_v60, 0.0  ;;  %v2339_v42 = vpop.f32.mrf.mxu1 }
 0x1e0   :  { %v2603_v54 = vmax.f32 %v2585_v49, 0.0  ;;  %v2534_v20 = vmax.f32 %v4851_v40, %v2401_v17  ;;  %v2587_v63 = vadd.f32 %v4940_v12, %v2533_v4  ;;  %v2403_v26 = vadd.f32 %v4899_v45, %v2339_v42  ;;  %2676 = vst [vmem:[%s5028_s3 + $0x18] sm:$0xff] %v3169_v29  ;;  %v3320_v38 = vpop.f32.mrf.mxu0 }
 0x1e1   :  { %v2341_v3 = vpop.f32.mrf.mxu1  ;;  %v5036_v40 = vmax.f32 %v4665_v51, %v4787_v35  ;;  %v3285_v45 = vadd.f32 %v4891_v59, %v4889_v7  ;;  %v3321_v59 = vadd.f32 %v3320_v38, %v3319_v28  ;;  %v5037_v49 = vmax.f32 %v4682_v43, %v4791_v52 }
 0x1e2   :  { %v3171_v30 = vpack.c.bf16 %v2603_v54, %v2602_v56  ;;  %v2588_v61 = vadd.f32 %v4940_v12, %v2534_v20  ;;  %v2536_v62 = vmax.f32 %v4856_v14, %v2403_v26  ;;  %v2405_v34 = vadd.f32 %v4906_v1, %v2341_v3  ;;  %v3322_v44 = vpop.f32.mrf.mxu0 }
 0x1e3   :  { %v1910_v27 = vmax.f32 %v5036_v40, %v1888_v18  ;;  %v2506_v41 = vpop.f32.mrf.mxu1  ;;  %v2605_v14 = vmax.f32 %v2587_v63, 0.0  ;;  %v1896_v22 = vadd.f32 %v3285_v45, %v4877_v47  ;;  %v5038_v43 = vmax.f32 %v4694_v21, %v4795_v23 }
 0x1e4   :  { %2678 = vst [vmem:[%s5028_s3 + $0x24] sm:$0xff] %v3171_v30  ;;  %v2606_v9 = vmax.f32 %v2588_v61, 0.0  ;;  %v2507_v55 = vadd.f32 %v3318_v48, %v2506_v41  ;;  %v2537_v60 = vmax.f32 %v4861_v37, %v2405_v34  ;;  %v2590_v51 = vadd.f32 %v4955_v53, %v2536_v62  ;;  %v3323_v24 = vpop.f32.mrf.mxu0 }
 0x1e5   :  { %v3391_v35 = vpop.f32.mrf.mxu1  ;;  %v1913_v37 = vmax.f32 %v5037_v49, %v1891_v36  ;;  %v3324_v56 = vadd.f32 %v3323_v24, %v3322_v44  ;;  %v1916_v52 = vmax.f32 %v5038_v43, %v1896_v22  ;;  %v1899_v28 = vadd.f32 %v3288_v32, %v4881_v50 }
 0x1e6   :  { %v3173_v7 = vpack.c.bf16 %v2606_v9, %v2605_v14  ;;  %v2529_v1 = vmax.f32 %v1910_v27, %v2507_v55  ;;  %v2591_v57 = vadd.f32 %v4955_v53, %v2537_v60  ;;  %v3325_v5 = vpop.f32.mrf.mxu0  ;;  %v2608_v18 = vmax.f32 %v2590_v51, 0.0 }
 0x1e7   :  { %v2509_v2 = vpop.f32.mrf.mxu1  ;;  %v3315_v61 = vadd.f32 %v4929_v13, %v4920_v33 }
 0x1e8   :  { %2680 = vst [vmem:[%s5028_s3 + $0x30] sm:$0xff] %v3173_v7  ;;  %v2583_v4 = vadd.f32 %v4910_v58, %v2529_v1  ;;  %v2510_v17 = vadd.f32 %v3321_v59, %v2509_v2  ;;  %v2609_v47 = vmax.f32 %v2591_v57, 0.0  ;;  %v3326_v29 = vpop.f32.mrf.mxu0 }
 0x1e9   :  { %v3392_v31 = vpop.f32.mrf.mxu1  ;;  %v3327_v23 = vadd.f32 %v3326_v29, %v3325_v5 }
 0x1ea   :  { %v2601_v19 = vmax.f32 %v2583_v4, 0.0  ;;  %v2532_v42 = vmax.f32 %v1913_v37, %v2510_v17  ;;  %v3175_v54 = vpack.c.bf16 %v2609_v47, %v2608_v18  ;;  %v2498_v20 = vpop.f32.mrf.mxu0 }
 0x1eb   :  { %v2514_v58 = vpop.f32.mrf.mxu1  ;;  %v2499_v38 = vadd.f32 %v3312_v0, %v2498_v20 }
 0x1ec   :  { %v3170_v63 = vpack.c.bf16 %v2601_v19, %v2601_v19  ;;  %v2586_v26 = vadd.f32 %v4925_v6, %v2532_v42  ;;  %v2515_v3 = vadd.f32 %v3324_v56, %v2514_v58  ;;  %2682 = vst [vmem:[%s5028_s3 + $0x3c] sm:$0xff] %v3175_v54  ;;  %v3387_v25 = vpop.f32.mrf.mxu0  ;;  %v5039_v6 = vmax.f32 %v4706_v10, %v4799_v8 }
 0x1ed   :  { %v3395_v46 = vpop.f32.mrf.mxu1  ;;  %v2523_v30 = vmax.f32 %v4866_v11, %v2499_v38 }
 0x1ee   :  { %2677 = vst.msk [vmem:[%s5028_s3 + $0x20] sm:$0xf] %vm2672_vm2, %v3170_v63  ;;  %v2604_v21 = vmax.f32 %v2586_v26, 0.0  ;;  %v2535_v50 = vmax.f32 %v1916_v52, %v2515_v3  ;;  %v1919_v48 = vmax.f32 %v5039_v6, %v1899_v28  ;;  %v2501_v40 = vpop.f32.mrf.mxu0 }
 0x1ef   :  { %v2517_v62 = vpop.f32.mrf.mxu1  ;;  %v2577_v34 = vadd.f32 %v4897_v39, %v2523_v30  ;;  %v2502_v44 = vadd.f32 %v3315_v61, %v2501_v40 }
 0x1f0   :  { %v3172_v27 = vpack.c.bf16 %v2604_v21, %v2604_v21  ;;  %v2589_v45 = vadd.f32 %v4940_v12, %v2535_v50  ;;  %v2518_v41 = vadd.f32 %v3327_v23, %v2517_v62  ;;  %v3388_v14 = vpop.f32.mrf.mxu0 }
 0x1f1   :  { %v3396_v36 = vpop.f32.mrf.mxu1  ;;  %v2595_v8 = vmax.f32 %v2577_v34, 0.0  ;;  %v2526_v33 = vmax.f32 %v4871_v16, %v2502_v44 }
 0x1f2   :  { %2679 = vst.msk [vmem:[%s5028_s3 + $0x2c] sm:$0xf] %vm2672_vm2, %v3172_v27  ;;  %v2607_v10 = vmax.f32 %v2589_v45, 0.0  ;;  %v2538_v11 = vmax.f32 %v1919_v48, %v2518_v41 }
 0x1f3   :  { %v3166_v9 = vpack.c.bf16 %v2595_v8, %v2595_v8  ;;  %v2580_v39 = vadd.f32 %v4904_v15, %v2526_v33 }
 0x1f4   :  { %v3174_v13 = vpack.c.bf16 %v2607_v10, %v2607_v10  ;;  %v2592_v12 = vadd.f32 %v4955_v53, %v2538_v11 }
 0x1f5   :  { %2673 = vst.msk [vmem:[%s5028_s3 + $0x8] sm:$0xf] %vm2672_vm2, %v3166_v9  ;;  %v2598_v60 = vmax.f32 %v2580_v39, 0.0 }
 0x1f6   :  { %2681 = vst.msk [vmem:[%s5028_s3 + $0x38] sm:$0xf] %vm2672_vm2, %v3174_v13  ;;  %v2610_v55 = vmax.f32 %v2592_v12, 0.0 }
 0x1f7   :  { %v3168_v16 = vpack.c.bf16 %v2598_v60, %v2598_v60 }
 0x1f8   :  { %v3176_v51 = vpack.c.bf16 %v2610_v55, %v2610_v55 }
 0x1f9   :  { %2675 = vst.msk [vmem:[%s5028_s3 + $0x14] sm:$0xf] %vm2672_vm2, %v3168_v16 }
 0x1fa   :  { %2683 = vst.msk [vmem:[%s5028_s3 + $0x44] sm:$0xf] %vm2672_vm2, %v3176_v51 }

// kernel: simple_cnn_forward.7
= control target key start
LH: loop header
LB: loop body
LE: loop exit
PB: predicated region body
PF: predicated region fallthrough
CT: control target
= control target key end

     0   :  { %10 = vsyncpa [#allocation4], 0  ;;  %s6551_s18 = smov 0   ;;  %s7551_s0 = inlined_call_operand.vmem [shape: bf16[2,6912], index: 0, kind: input, shape index: {}]   ;;  %s7552_s1 = inlined_call_operand.vmem [shape: bf16[6912,512], index: 1, kind: input, shape index: {}]   ;;  %s7553_s2 = inlined_call_operand.vmem [shape: f32[1,512], index: 2, kind: input, shape index: {}]   ;;  %s7554_s3 = inlined_call_operand.vmem [shape: f32[512,2], index: 3, kind: input, shape index: {}]   ;;  %s7555_s4 = inlined_call_operand.vmem [shape: f32[1,2], index: 4, kind: input, shape index: {}]   ;;  %s7556_s5 = inlined_call_operand.hbm [shape: f32[2,2], index: 5, kind: output, shape index: {}]  }
   0x1 LB: > { %s6557_s19 = sadd.s32 4294967295, %s6515_s18   ;;  %p4939_p0 = scmp.ge.s32.totalorder %s6515_s18, 1  ;;  %s6515_s18 = sphi %s6551_s18, %s16_s18  }
   0x2   : > { %p195_p1 = scmp.lt.s32.totalorder %s6515_s18, 4 }
   0x4   : > { %p196_p2 = pnand %p4939_p0, %p195_p1 }
   0x5   : > { %s223_s20 = smul.u32 (!%p196_p2), 18, %s6557_s19  ;;  %p4942_p5 = scmp.ne.s32.totalorder (!%p196_p2), %s6557_s19, 0 }
   0x6   : > { %199 = sbr.rel (%p196_p2) target bundleno = 1057 (0x421), region = 40 }
   0x7   : > { %s228_s21 = smul.u32 (!%p196_p2), 288, %s6557_s19  ;;  %p224_p3 = scmp.lt.s32.totalorder (!%p196_p2), %s223_s20, 53 }
   0x9   : > { %p229_p4 = scmp.lt.s32.totalorder (!%p196_p2), %s228_s21, 863 }
   0xb   : > { %s7558_s20 = smov (!%p224_p3, %s223_s20), 53  ;;  %s7560_s21 = smov (!%p229_p4, %s228_s21), 863 }
   0xc   : > { %s6566_s24 = scalar_lea.vmem %s7551_s0, %s7558_s20  ;;  %s5526_s25 = sshll.u32 %s7560_s21, 4 }
   0xd   : > { %s6571_s28 = scalar_lea.vmem %s7552_s1, %s5526_s25  ;;  %238 = sbr.rel (%p4942_p5) target bundleno = 20 (0x14), region = 44 }
  0x12   : > { %v6517_v0 = vmov 0.0  }
  0x13   : > { %239 = vst [vmem:[#allocation2] sm:$0xff] %v6517_v0 }
  0x14 PF: > { %v5615_v1 = vld [vmem:[%s6571_s28 + $0xe4] ss:$16 sps:$4 sm:$0xff]   ;;  %v5619_v3 = vld [vmem:[%s6571_s28 + $0xe0] ss:$16 sps:$4 sm:$0xff]   ;;  %v6518_v37 = vmov 1966171168   ;;  %v827_v39 = vlaneseq }
  0x15   : > { %v5617_v2 = vld [vmem:[%s6571_s28 + $0x2e4] ss:$16 sps:$4 sm:$0xff]   ;;  %3841 = vmatprep.subr.bf16.mxu0 %v5615_v1  ;;  %v5620_v4 = vld [vmem:[%s6571_s28 + $0x2e0] ss:$16 sps:$4 sm:$0xff]   ;;  %v825_v38 = vunpack.c.l.s4 %v6518_v37  ;;  %p5520_p6 = scmp.ne.s32.totalorder %s6557_s19, 2 }
  0x16   : > { %3882 = vmatprep.subr.bf16.mxu1 %v5617_v2  ;;  %v5621_v5 = vld [vmem:[%s6571_s28 + $0xc4] ss:$16 sps:$4 sm:$0xff]   ;;  %3842 = vmatpush1.bf16.msra.mxu0 %v5619_v3  ;;  %v5625_v7 = vld [vmem:[%s6571_s28 + $0xc0] ss:$16 sps:$4 sm:$0xff]   ;;  %v6613_v44 = vshrl.u32 %v827_v39, 7 }
  0x17   : > { %3883 = vmatpush1.bf16.msra.mxu1 %v5620_v4  ;;  %v5623_v6 = vld [vmem:[%s6571_s28 + $0x2c4] ss:$16 sps:$4 sm:$0xff]   ;;  %3843 = vmatprep.subr.bf16.mxu0 %v5621_v5  ;;  %v5626_v8 = vld [vmem:[%s6571_s28 + $0x2c0] ss:$16 sps:$4 sm:$0xff]   ;;  %v826_v43 = vunpack.c.0.s8 %v825_v38 }
  0x18   : > { %3884 = vmatprep.subr.bf16.mxu1 %v5623_v6  ;;  %v5627_v9 = vld [vmem:[%s6571_s28 + $0xa4] ss:$16 sps:$4 sm:$0xff]   ;;  %v5631_v11 = vld [vmem:[%s6571_s28 + $0xa0] ss:$16 sps:$4 sm:$0xff]  }
  0x19   : > { %v5629_v10 = vld [vmem:[%s6571_s28 + $0x2a4] ss:$16 sps:$4 sm:$0xff]   ;;  %v5632_v12 = vld [vmem:[%s6571_s28 + $0x2a0] ss:$16 sps:$4 sm:$0xff]   ;;  %v6621_v50 = vsub.s32 %v826_v43, %v6613_v44 }
  0x1a   : > { %3844 = vmatpush1.bf16.msra.mxu0 %v5625_v7  ;;  %v5633_v13 = vld [vmem:[%s6571_s28 + $0x84] ss:$16 sps:$4 sm:$0xff]   ;;  %v5637_v15 = vld [vmem:[%s6571_s28 + $0x80] ss:$16 sps:$4 sm:$0xff]  }
  0x1b   : > { %3885 = vmatpush1.bf16.msra.mxu1 %v5626_v8  ;;  %3845 = vmatprep.subr.bf16.mxu0 %v5627_v9  ;;  %v5635_v14 = vld [vmem:[%s6571_s28 + $0x284] ss:$16 sps:$4 sm:$0xff]   ;;  %v5638_v16 = vld [vmem:[%s6571_s28 + $0x280] ss:$16 sps:$4 sm:$0xff]  }
  0x1c   : > { %3886 = vmatprep.subr.bf16.mxu1 %v5629_v10  ;;  %v5639_v17 = vld [vmem:[%s6571_s28 + $0x64] ss:$16 sps:$4 sm:$0xff]   ;;  %v5643_v19 = vld [vmem:[%s6571_s28 + $0x60] ss:$16 sps:$4 sm:$0xff]  }
  0x1d   : > { %v5641_v18 = vld [vmem:[%s6571_s28 + $0x264] ss:$16 sps:$4 sm:$0xff]   ;;  %v5644_v20 = vld [vmem:[%s6571_s28 + $0x260] ss:$16 sps:$4 sm:$0xff]  }
  0x1e   : > { %3846 = vmatpush1.bf16.msra.mxu0 %v5631_v11  ;;  %v5645_v21 = vld [vmem:[%s6571_s28 + $0x44] ss:$16 sps:$4 sm:$0xff]   ;;  %v5649_v23 = vld [vmem:[%s6571_s28 + $0x40] ss:$16 sps:$4 sm:$0xff]  }
  0x1f   : > { %3887 = vmatpush1.bf16.msra.mxu1 %v5632_v12  ;;  %3847 = vmatprep.subr.bf16.mxu0 %v5633_v13  ;;  %v5647_v22 = vld [vmem:[%s6571_s28 + $0x244] ss:$16 sps:$4 sm:$0xff]   ;;  %v5650_v24 = vld [vmem:[%s6571_s28 + $0x240] ss:$16 sps:$4 sm:$0xff]  }
  0x20   : > { %3888 = vmatprep.subr.bf16.mxu1 %v5635_v14  ;;  %v5651_v25 = vld [vmem:[%s6571_s28 + $0x24] ss:$16 sps:$4 sm:$0xff]   ;;  %v5655_v27 = vld [vmem:[%s6571_s28 + $0x20] ss:$16 sps:$4 sm:$0xff]  }
  0x21   : > { %v5653_v26 = vld [vmem:[%s6571_s28 + $0x224] ss:$16 sps:$4 sm:$0xff]   ;;  %v5656_v28 = vld [vmem:[%s6571_s28 + $0x220] ss:$16 sps:$4 sm:$0xff]  }
  0x22   : > { %3848 = vmatpush1.bf16.msra.mxu0 %v5637_v15  ;;  %v5657_v29 = vld [vmem:[%s6571_s28 + $0x4] ss:$16 sps:$4 sm:$0xff]   ;;  %v5661_v31 = vld [vmem:[%s6571_s28] ss:$16 sps:$4 sm:$0xff]  }
  0x23   : > { %3889 = vmatpush1.bf16.msra.mxu1 %v5638_v16  ;;  %3849 = vmatprep.subr.bf16.mxu0 %v5639_v17  ;;  %v5659_v30 = vld [vmem:[%s6571_s28 + $0x204] ss:$16 sps:$4 sm:$0xff]   ;;  %v5662_v32 = vld [vmem:[%s6571_s28 + $0x200] ss:$16 sps:$4 sm:$0xff]  }
  0x24   : > { %3890 = vmatprep.subr.bf16.mxu1 %v5641_v18  ;;  %v5663_v33 = vld [vmem:[%s6571_s28 + $0x1e4] ss:$16 sps:$4 sm:$0xff]   ;;  %v5667_v35 = vld [vmem:[%s6571_s28 + $0x1e0] ss:$16 sps:$4 sm:$0xff]  }
  0x25   : > { %v5665_v34 = vld [vmem:[%s6571_s28 + $0x3e4] ss:$16 sps:$4 sm:$0xff]   ;;  %v5668_v36 = vld [vmem:[%s6571_s28 + $0x3e0] ss:$16 sps:$4 sm:$0xff]  }
  0x26   : > { %3850 = vmatpush1.bf16.msra.mxu0 %v5643_v19  ;;  %v5669_v40 = vld [vmem:[%s6571_s28 + $0x1c4] ss:$16 sps:$4 sm:$0xff]   ;;  %v5673_v42 = vld [vmem:[%s6571_s28 + $0x1c0] ss:$16 sps:$4 sm:$0xff]  }
  0x27   : > { %3891 = vmatpush1.bf16.msra.mxu1 %v5644_v20  ;;  %3851 = vmatprep.subr.bf16.mxu0 %v5645_v21  ;;  %v5671_v41 = vld [vmem:[%s6571_s28 + $0x3c4] ss:$16 sps:$4 sm:$0xff]   ;;  %v5674_v45 = vld [vmem:[%s6571_s28 + $0x3c0] ss:$16 sps:$4 sm:$0xff]  }
  0x28   : > { %3892 = vmatprep.subr.bf16.mxu1 %v5647_v22  ;;  %v5675_v46 = vld [vmem:[%s6571_s28 + $0x1a4] ss:$16 sps:$4 sm:$0xff]   ;;  %v5679_v48 = vld [vmem:[%s6571_s28 + $0x1a0] ss:$16 sps:$4 sm:$0xff]  }
  0x29   : > { %v5677_v47 = vld [vmem:[%s6571_s28 + $0x3a4] ss:$16 sps:$4 sm:$0xff]   ;;  %v5680_v49 = vld [vmem:[%s6571_s28 + $0x3a0] ss:$16 sps:$4 sm:$0xff]  }
  0x2a   : > { %3852 = vmatpush1.bf16.msra.mxu0 %v5649_v23  ;;  %v5681_v51 = vld [vmem:[%s6571_s28 + $0x184] ss:$16 sps:$4 sm:$0xff]   ;;  %v5685_v54 = vld [vmem:[%s6571_s28 + $0x180] ss:$16 sps:$4 sm:$0xff]  }
  0x2b   : > { %3893 = vmatpush1.bf16.msra.mxu1 %v5650_v24  ;;  %3853 = vmatprep.subr.bf16.mxu0 %v5651_v25  ;;  %v5683_v52 = vld [vmem:[%s6571_s28 + $0x384] ss:$16 sps:$4 sm:$0xff]   ;;  %v5686_v56 = vld [vmem:[%s6571_s28 + $0x380] ss:$16 sps:$4 sm:$0xff]  }
  0x2c   : > { %3894 = vmatprep.subr.bf16.mxu1 %v5653_v26  ;;  %v241_v53 = vld [vmem:[%s6566_s24] sm:$0xff] }
  0x2d   : > { %v830_v55 = vrot.slane %v241_v53, %v6621_v50  ;;  %v5687_v57 = vld [vmem:[%s6571_s28 + $0x164] ss:$16 sps:$4 sm:$0xff]   ;;  %v5691_v60 = vld [vmem:[%s6571_s28 + $0x160] ss:$16 sps:$4 sm:$0xff]   ;;  %v823_v2 = vcombine.high %v241_v53, %v241_v53 }
  0x2e   : > { %3854 = vmatpush1.bf16.msra.mxu0 %v5655_v27  ;;  %v5689_v58 = vld [vmem:[%s6571_s28 + $0x364] ss:$16 sps:$4 sm:$0xff]   ;;  %v5692_v62 = vld [vmem:[%s6571_s28 + $0x360] ss:$16 sps:$4 sm:$0xff]  }
  0x2f   : > { %3895 = vmatpush1.bf16.msra.mxu1 %v5656_v28  ;;  %3855 = vmatprep.subr.bf16.mxu0 %v5657_v29  ;;  %v838_v59 = vcombine.high %v830_v55, %v830_v55  ;;  %v5693_v63 = vld [vmem:[%s6571_s28 + $0x144] ss:$16 sps:$4 sm:$0xff]   ;;  %v5697_v3 = vld [vmem:[%s6571_s28 + $0x140] ss:$16 sps:$4 sm:$0xff]   ;;  %v6649_v7 = vrot.slane %v823_v2, %v6621_v50  ;;  %v6659_v14 = vrot.slane %v830_v55, %v6621_v50 }
  0x30   : > { %3896 = vmatprep.subr.bf16.mxu1 %v5659_v30  ;;  %v5695_v0 = vld [vmem:[%s6571_s28 + $0x344] ss:$16 sps:$4 sm:$0xff]   ;;  %v5698_v4 = vld [vmem:[%s6571_s28 + $0x340] ss:$16 sps:$4 sm:$0xff]  }
  0x31   : > { %v6633_v61 = vrot.slane %v838_v59, %v6621_v50  ;;  %v5699_v5 = vld [vmem:[%s6571_s28 + $0x124] ss:$16 sps:$4 sm:$0xff]   ;;  %v5703_v8 = vld [vmem:[%s6571_s28 + $0x120] ss:$16 sps:$4 sm:$0xff]   ;;  %v839_v12 = vcombine.high %v6649_v7, %v6649_v7  ;;  %v6669_v19 = vcombine.high %v6659_v14, %v6659_v14 }
  0x32   : > { %3856 = vmatpush1.bf16.msra.mxu0 %v5661_v31  ;;  %v5701_v6 = vld [vmem:[%s6571_s28 + $0x324] ss:$16 sps:$4 sm:$0xff]   ;;  %v5704_v9 = vld [vmem:[%s6571_s28 + $0x320] ss:$16 sps:$4 sm:$0xff]  }
  0x33   : > { %3897 = vmatpush1.bf16.msra.mxu1 %v5662_v32  ;;  %3857 = vmatprep.subr.bf16.mxu0 %v5663_v33  ;;  %v6640_v1 = vcombine.high %v6633_v61, %v6633_v61  ;;  %v5705_v10 = vld [vmem:[%s6571_s28 + $0x104] ss:$16 sps:$4 sm:$0xff]   ;;  %v5709_v13 = vld [vmem:[%s6571_s28 + $0x100] ss:$16 sps:$4 sm:$0xff]   ;;  %v6665_v18 = vrot.slane %v839_v12, %v6621_v50 }
  0x34   : > { %3898 = vmatprep.subr.bf16.mxu1 %v5665_v34  ;;  %3873 = vmatprep.mubr.bf16.mxu0 %v6633_v61  ;;  %v5707_v11 = vld [vmem:[%s6571_s28 + $0x304] ss:$16 sps:$4 sm:$0xff]   ;;  %v5710_v15 = vld [vmem:[%s6571_s28 + $0x300] ss:$16 sps:$4 sm:$0xff]  }
  0x35   : > { %3914 = vmatprep.mubr.bf16.mxu1 %v6640_v1  ;;  %v5713_v16 = vld [vmem:[%s6571_s28 + $0x4e4] ss:$16 sps:$4 sm:$0xff]   ;;  %v5711_v20 = vld [vmem:[%s6571_s28 + $0x4e0] ss:$16 sps:$4 sm:$0xff]   ;;  %v6677_v24 = vcombine.high %v6665_v18, %v6665_v18 }
  0x36   : > { %3858 = vmatpush2.bf16.msra.mxu0 %v5667_v35  ;;  %v5716_v17 = vld [vmem:[%s6571_s28 + $0x6e4] ss:$16 sps:$4 sm:$0xff]   ;;  %v5714_v21 = vld [vmem:[%s6571_s28 + $0x6e0] ss:$16 sps:$4 sm:$0xff]  }
  0x37   : > { %3899 = vmatpush2.bf16.msra.mxu1 %v5668_v36  ;;  %3859 = vmatprep.subr.bf16.mxu0 %v5669_v40  ;;  %v5719_v22 = vld [vmem:[%s6571_s28 + $0x4c4] ss:$16 sps:$4 sm:$0xff]   ;;  %v5717_v25 = vld [vmem:[%s6571_s28 + $0x4c0] ss:$16 sps:$4 sm:$0xff]  }
  0x38   : > { %3900 = vmatprep.subr.bf16.mxu1 %v5671_v41  ;;  %v5722_v23 = vld [vmem:[%s6571_s28 + $0x6c4] ss:$16 sps:$4 sm:$0xff]   ;;  %v5720_v26 = vld [vmem:[%s6571_s28 + $0x6c0] ss:$16 sps:$4 sm:$0xff]  }
  0x39   : > { %v5725_v27 = vld [vmem:[%s6571_s28 + $0x4a4] ss:$16 sps:$4 sm:$0xff]   ;;  %v5723_v29 = vld [vmem:[%s6571_s28 + $0x4a0] ss:$16 sps:$4 sm:$0xff]  }
  0x3a   : > { %3860 = vmatpush2.bf16.msra.mxu0 %v5673_v42  ;;  %v5728_v28 = vld [vmem:[%s6571_s28 + $0x6a4] ss:$16 sps:$4 sm:$0xff]   ;;  %v5726_v30 = vld [vmem:[%s6571_s28 + $0x6a0] ss:$16 sps:$4 sm:$0xff]  }
  0x3b   : > { %3901 = vmatpush2.bf16.msra.mxu1 %v5674_v45  ;;  %3861 = vmatprep.subr.bf16.mxu0 %v5675_v46  ;;  %v5731_v31 = vld [vmem:[%s6571_s28 + $0x484] ss:$16 sps:$4 sm:$0xff]   ;;  %v5729_v33 = vld [vmem:[%s6571_s28 + $0x480] ss:$16 sps:$4 sm:$0xff]  }
  0x3c   : > { %3902 = vmatprep.subr.bf16.mxu1 %v5677_v47  ;;  %v5734_v32 = vld [vmem:[%s6571_s28 + $0x684] ss:$16 sps:$4 sm:$0xff]   ;;  %v5732_v34 = vld [vmem:[%s6571_s28 + $0x680] ss:$16 sps:$4 sm:$0xff]  }
  0x3d   : > { %v5737_v35 = vld [vmem:[%s6571_s28 + $0x464] ss:$16 sps:$4 sm:$0xff]   ;;  %v5735_v37 = vld [vmem:[%s6571_s28 + $0x460] ss:$16 sps:$4 sm:$0xff]  }
  0x3e   : > { %3862 = vmatpush2.bf16.msra.mxu0 %v5679_v48  ;;  %v5740_v36 = vld [vmem:[%s6571_s28 + $0x664] ss:$16 sps:$4 sm:$0xff]   ;;  %v5738_v38 = vld [vmem:[%s6571_s28 + $0x660] ss:$16 sps:$4 sm:$0xff]  }
  0x3f   : > { %3903 = vmatpush2.bf16.msra.mxu1 %v5680_v49  ;;  %3863 = vmatprep.subr.bf16.mxu0 %v5681_v51  ;;  %v5743_v39 = vld [vmem:[%s6571_s28 + $0x444] ss:$16 sps:$4 sm:$0xff]   ;;  %v5741_v41 = vld [vmem:[%s6571_s28 + $0x440] ss:$16 sps:$4 sm:$0xff]  }
  0x40   : > { %3904 = vmatprep.subr.bf16.mxu1 %v5683_v52  ;;  %v5746_v40 = vld [vmem:[%s6571_s28 + $0x644] ss:$16 sps:$4 sm:$0xff]   ;;  %v5744_v42 = vld [vmem:[%s6571_s28 + $0x640] ss:$16 sps:$4 sm:$0xff]  }
  0x41   : > { %v5749_v43 = vld [vmem:[%s6571_s28 + $0x424] ss:$16 sps:$4 sm:$0xff]   ;;  %v5747_v46 = vld [vmem:[%s6571_s28 + $0x420] ss:$16 sps:$4 sm:$0xff]  }
  0x42   : > { %3864 = vmatpush2.bf16.msra.mxu0 %v5685_v54  ;;  %v5752_v45 = vld [vmem:[%s6571_s28 + $0x624] ss:$16 sps:$4 sm:$0xff]   ;;  %v5750_v47 = vld [vmem:[%s6571_s28 + $0x620] ss:$16 sps:$4 sm:$0xff]  }
  0x43   : > { %3905 = vmatpush2.bf16.msra.mxu1 %v5686_v56  ;;  %3865 = vmatprep.subr.bf16.mxu0 %v5687_v57  ;;  %v5755_v48 = vld [vmem:[%s6571_s28 + $0x404] ss:$16 sps:$4 sm:$0xff]   ;;  %v5753_v51 = vld [vmem:[%s6571_s28 + $0x400] ss:$16 sps:$4 sm:$0xff]  }
  0x44   : > { %3906 = vmatprep.subr.bf16.mxu1 %v5689_v58  ;;  %v5758_v49 = vld [vmem:[%s6571_s28 + $0x604] ss:$16 sps:$4 sm:$0xff]   ;;  %v5756_v52 = vld [vmem:[%s6571_s28 + $0x600] ss:$16 sps:$4 sm:$0xff]  }
  0x45   : > { %v5761_v53 = vld [vmem:[%s6571_s28 + $0x5e4] ss:$16 sps:$4 sm:$0xff]   ;;  %v5759_v55 = vld [vmem:[%s6571_s28 + $0x5e0] ss:$16 sps:$4 sm:$0xff]  }
  0x46   : > { %3866 = vmatpush2.bf16.msra.mxu0 %v5691_v60  ;;  %v5764_v54 = vld [vmem:[%s6571_s28 + $0x7e4] ss:$16 sps:$4 sm:$0xff]   ;;  %v5762_v56 = vld [vmem:[%s6571_s28 + $0x7e0] ss:$16 sps:$4 sm:$0xff]  }
  0x47   : > { %3907 = vmatpush2.bf16.msra.mxu1 %v5692_v62  ;;  %3867 = vmatprep.subr.bf16.mxu0 %v5693_v63  ;;  %v5767_v57 = vld [vmem:[%s6571_s28 + $0x5c4] ss:$16 sps:$4 sm:$0xff]   ;;  %v5765_v59 = vld [vmem:[%s6571_s28 + $0x5c0] ss:$16 sps:$4 sm:$0xff]  }
  0x48   : > { %3908 = vmatprep.subr.bf16.mxu1 %v5695_v0  ;;  %v5770_v58 = vld [vmem:[%s6571_s28 + $0x7c4] ss:$16 sps:$4 sm:$0xff]   ;;  %v5768_v60 = vld [vmem:[%s6571_s28 + $0x7c0] ss:$16 sps:$4 sm:$0xff]  }
  0x49   : > { %v5773_v62 = vld [vmem:[%s6571_s28 + $0x5a4] ss:$16 sps:$4 sm:$0xff]   ;;  %v5771_v0 = vld [vmem:[%s6571_s28 + $0x5a0] ss:$16 sps:$4 sm:$0xff]  }
  0x4a   : > { %3868 = vmatpush2.bf16.msra.mxu0 %v5697_v3  ;;  %v5776_v63 = vld [vmem:[%s6571_s28 + $0x7a4] ss:$16 sps:$4 sm:$0xff]   ;;  %v5774_v2 = vld [vmem:[%s6571_s28 + $0x7a0] ss:$16 sps:$4 sm:$0xff]  }
  0x4b   : > { %3909 = vmatpush2.bf16.msra.mxu1 %v5698_v4  ;;  %3869 = vmatprep.subr.bf16.mxu0 %v5699_v5  ;;  %v5779_v3 = vld [vmem:[%s6571_s28 + $0x584] ss:$16 sps:$4 sm:$0xff]   ;;  %v5777_v5 = vld [vmem:[%s6571_s28 + $0x580] ss:$16 sps:$4 sm:$0xff]  }
  0x4c   : > { %3910 = vmatprep.subr.bf16.mxu1 %v5701_v6  ;;  %v5782_v4 = vld [vmem:[%s6571_s28 + $0x784] ss:$16 sps:$4 sm:$0xff]   ;;  %v5780_v6 = vld [vmem:[%s6571_s28 + $0x780] ss:$16 sps:$4 sm:$0xff]  }
  0x4d   : > { %v5791_v12 = vld [vmem:[%s6571_s28 + $0x544] ss:$16 sps:$4 sm:$0xff]  }
  0x4e   : > { %3870 = vmatpush2.bf16.msra.mxu0 %v5703_v8  ;;  %v5785_v8 = vld [vmem:[%s6571_s28 + $0x564] ss:$16 sps:$4 sm:$0xff]  }
  0x4f   : > { %3911 = vmatpush2.bf16.msra.mxu1 %v5704_v9  ;;  %3871 = vmatprep.subr.bf16.mxu0 %v5705_v10  ;;  %v5788_v9 = vld [vmem:[%s6571_s28 + $0x764] ss:$16 sps:$4 sm:$0xff]   ;;  %v5783_v10 = vld [vmem:[%s6571_s28 + $0x560] ss:$16 sps:$4 sm:$0xff]  }
  0x50   : > { %3912 = vmatprep.subr.bf16.mxu1 %v5707_v11  ;;  %v5786_v11 = vld [vmem:[%s6571_s28 + $0x760] ss:$16 sps:$4 sm:$0xff]  }
  0x52   : > { %3872 = vmatpush2.bf16.msra.mxu0 %v5709_v13  ;;  %v5794_v13 = vld [vmem:[%s6571_s28 + $0x744] ss:$16 sps:$4 sm:$0xff]  }
  0x53   : > { %3913 = vmatpush2.bf16.msra.mxu1 %v5710_v15  ;;  %3923 = vmatprep.subr.bf16.mxu0 %v5713_v16  ;;  %v5789_v15 = vld [vmem:[%s6571_s28 + $0x540] ss:$16 sps:$4 sm:$0xff]  }
  0x54   : > { %3964 = vmatprep.subr.bf16.mxu1 %v5716_v17  ;;  %v5792_v16 = vld [vmem:[%s6571_s28 + $0x740] ss:$16 sps:$4 sm:$0xff]   ;;  %v5797_v17 = vld [vmem:[%s6571_s28 + $0x524] ss:$16 sps:$4 sm:$0xff]  }
  0x55   : > { %3874 = vmatmul.mubr.bf16.vlgmr.msra.gmra.mxu0 %v6659_v14 }
  0x56   : > { %3915 = vmatmul.mubr.bf16.vlgmr.msra.gmra.mxu1 %v6669_v19  ;;  %3924 = vmatpush1.bf16.msra.mxu0 %v5711_v20  ;;  %v5800_v20 = vld [vmem:[%s6571_s28 + $0x724] ss:$16 sps:$4 sm:$0xff]  }
  0x57   : > { %3965 = vmatpush1.bf16.msra.mxu1 %v5714_v21  ;;  %3925 = vmatprep.subr.bf16.mxu0 %v5719_v22  ;;  %v5795_v21 = vld [vmem:[%s6571_s28 + $0x520] ss:$16 sps:$4 sm:$0xff]  }
  0x58   : > { %3966 = vmatprep.subr.bf16.mxu1 %v5722_v23  ;;  %3955 = vmatprep.mubr.bf16.mxu0 %v6665_v18  ;;  %v5798_v22 = vld [vmem:[%s6571_s28 + $0x720] ss:$16 sps:$4 sm:$0xff]   ;;  %v5803_v23 = vld [vmem:[%s6571_s28 + $0x504] ss:$16 sps:$4 sm:$0xff]  }
  0x59   : > { %3996 = vmatprep.mubr.bf16.mxu1 %v6677_v24 }
  0x5a   : > { %3926 = vmatpush1.bf16.msra.mxu0 %v5717_v25  ;;  %v5806_v25 = vld [vmem:[%s6571_s28 + $0x704] ss:$16 sps:$4 sm:$0xff]  }
  0x5b   : > { %3967 = vmatpush1.bf16.msra.mxu1 %v5720_v26  ;;  %3927 = vmatprep.subr.bf16.mxu0 %v5725_v27  ;;  %v5801_v26 = vld [vmem:[%s6571_s28 + $0x500] ss:$16 sps:$4 sm:$0xff]   ;;  %v6742_v27 = vrot.slane %v6649_v7, %v6621_v50 }
  0x5c   : > { %3968 = vmatprep.subr.bf16.mxu1 %v5728_v28  ;;  %v5804_v28 = vld [vmem:[%s6571_s28 + $0x700] ss:$16 sps:$4 sm:$0xff]  }
  0x5d   : > { %v5811_v7 = vld [vmem:[%s6571_s28 + $0xae0] ss:$16 sps:$4 sm:$0xff]  }
  0x5e   : > { %3928 = vmatpush1.bf16.msra.mxu0 %v5723_v29  ;;  %v5810_v29 = vld [vmem:[%s6571_s28 + $0x8e4] ss:$16 sps:$4 sm:$0xff]  }
  0x5f   : > { %3969 = vmatpush1.bf16.msra.mxu1 %v5726_v30  ;;  %3929 = vmatprep.subr.bf16.mxu0 %v5731_v31  ;;  %v5813_v30 = vld [vmem:[%s6571_s28 + $0xae4] ss:$16 sps:$4 sm:$0xff]   ;;  %v6749_v31 = vcombine.high %v6742_v27, %v6742_v27 }
  0x60   : > { %3970 = vmatprep.subr.bf16.mxu1 %v5734_v32  ;;  %v5808_v32 = vld [vmem:[%s6571_s28 + $0x8e0] ss:$16 sps:$4 sm:$0xff]  }
  0x62   : > { %3930 = vmatpush1.bf16.msra.mxu0 %v5729_v33  ;;  %v6754_v33 = vld [vmem:[%s6566_s24 + $0x8] sm:$0xff] }
  0x63   : > { %3971 = vmatpush1.bf16.msra.mxu1 %v5732_v34  ;;  %3931 = vmatprep.subr.bf16.mxu0 %v5737_v35  ;;  %v5816_v34 = vld [vmem:[%s6571_s28 + $0x8c4] ss:$16 sps:$4 sm:$0xff]  }
  0x64   : > { %3972 = vmatprep.subr.bf16.mxu1 %v5740_v36  ;;  %v5819_v35 = vld [vmem:[%s6571_s28 + $0xac4] ss:$16 sps:$4 sm:$0xff]   ;;  %v6760_v36 = vrot.slane %v6754_v33, %v6621_v50 }
  0x66   : > { %3932 = vmatpush1.bf16.msra.mxu0 %v5735_v37  ;;  %v887_v37 = vcombine.high %v6760_v36, %v6760_v36 }
  0x67   : > { %3973 = vmatpush1.bf16.msra.mxu1 %v5738_v38  ;;  %3933 = vmatprep.subr.bf16.mxu0 %v5743_v39  ;;  %v5814_v38 = vld [vmem:[%s6571_s28 + $0x8c0] ss:$16 sps:$4 sm:$0xff]  }
  0x68   : > { %3974 = vmatprep.subr.bf16.mxu1 %v5746_v40  ;;  %v5817_v39 = vld [vmem:[%s6571_s28 + $0xac0] ss:$16 sps:$4 sm:$0xff]   ;;  %v5822_v40 = vld [vmem:[%s6571_s28 + $0x8a4] ss:$16 sps:$4 sm:$0xff]  }
  0x6a   : > { %3934 = vmatpush1.bf16.msra.mxu0 %v5741_v41  ;;  %v5825_v41 = vld [vmem:[%s6571_s28 + $0xaa4] ss:$16 sps:$4 sm:$0xff]  }
  0x6b   : > { %3975 = vmatpush1.bf16.msra.mxu1 %v5744_v42  ;;  %3935 = vmatprep.subr.bf16.mxu0 %v5749_v43  ;;  %v6771_v42 = vrot.slane %v887_v37, %v6621_v50  ;;  %v5886_v37 = vld [vmem:[%s6571_s28 + $0x940] ss:$16 sps:$4 sm:$0xff]  }
  0x6c   : > { %3976 = vmatprep.subr.bf16.mxu1 %v5752_v45  ;;  %v5820_v45 = vld [vmem:[%s6571_s28 + $0x8a0] ss:$16 sps:$4 sm:$0xff]  }
  0x6d   : > { %v6776_v43 = vcombine.high %v6771_v42, %v6771_v42 }
  0x6e   : > { %3936 = vmatpush1.bf16.msra.mxu0 %v5747_v46  ;;  %v5823_v46 = vld [vmem:[%s6571_s28 + $0xaa0] ss:$16 sps:$4 sm:$0xff]  }
  0x6f   : > { %3977 = vmatpush1.bf16.msra.mxu1 %v5750_v47  ;;  %3937 = vmatprep.subr.bf16.mxu0 %v5755_v48  ;;  %v5828_v47 = vld [vmem:[%s6571_s28 + $0x884] ss:$16 sps:$4 sm:$0xff]  }
  0x70   : > { %3978 = vmatprep.subr.bf16.mxu1 %v5758_v49  ;;  %v5831_v48 = vld [vmem:[%s6571_s28 + $0xa84] ss:$16 sps:$4 sm:$0xff]   ;;  %v5826_v49 = vld [vmem:[%s6571_s28 + $0x880] ss:$16 sps:$4 sm:$0xff]  }
  0x72   : > { %3938 = vmatpush1.bf16.msra.mxu0 %v5753_v51  ;;  %v5829_v51 = vld [vmem:[%s6571_s28 + $0xa80] ss:$16 sps:$4 sm:$0xff]  }
  0x73   : > { %3979 = vmatpush1.bf16.msra.mxu1 %v5756_v52  ;;  %3939 = vmatprep.subr.bf16.mxu0 %v5761_v53  ;;  %v5834_v52 = vld [vmem:[%s6571_s28 + $0x864] ss:$16 sps:$4 sm:$0xff]  }
  0x74   : > { %3980 = vmatprep.subr.bf16.mxu1 %v5764_v54  ;;  %v5837_v53 = vld [vmem:[%s6571_s28 + $0xa64] ss:$16 sps:$4 sm:$0xff]   ;;  %v5832_v54 = vld [vmem:[%s6571_s28 + $0x860] ss:$16 sps:$4 sm:$0xff]  }
  0x76   : > { %3940 = vmatpush2.bf16.msra.mxu0 %v5759_v55  ;;  %v5835_v55 = vld [vmem:[%s6571_s28 + $0xa60] ss:$16 sps:$4 sm:$0xff]  }
  0x77   : > { %3981 = vmatpush2.bf16.msra.mxu1 %v5762_v56  ;;  %3941 = vmatprep.subr.bf16.mxu0 %v5767_v57  ;;  %v5840_v56 = vld [vmem:[%s6571_s28 + $0x844] ss:$16 sps:$4 sm:$0xff]  }
  0x78   : > { %3982 = vmatprep.subr.bf16.mxu1 %v5770_v58  ;;  %v5843_v57 = vld [vmem:[%s6571_s28 + $0xa44] ss:$16 sps:$4 sm:$0xff]   ;;  %v5838_v58 = vld [vmem:[%s6571_s28 + $0x840] ss:$16 sps:$4 sm:$0xff]  }
  0x7a   : > { %3942 = vmatpush2.bf16.msra.mxu0 %v5765_v59  ;;  %v5841_v59 = vld [vmem:[%s6571_s28 + $0xa40] ss:$16 sps:$4 sm:$0xff]  }
  0x7b   : > { %3983 = vmatpush2.bf16.msra.mxu1 %v5768_v60  ;;  %3943 = vmatprep.subr.bf16.mxu0 %v5773_v62  ;;  %v5846_v60 = vld [vmem:[%s6571_s28 + $0x824] ss:$16 sps:$4 sm:$0xff]  }
  0x7c   : > { %3984 = vmatprep.subr.bf16.mxu1 %v5776_v63  ;;  %v5849_v62 = vld [vmem:[%s6571_s28 + $0xa24] ss:$16 sps:$4 sm:$0xff]   ;;  %v5844_v63 = vld [vmem:[%s6571_s28 + $0x820] ss:$16 sps:$4 sm:$0xff]  }
  0x7e   : > { %3944 = vmatpush2.bf16.msra.mxu0 %v5771_v0  ;;  %v5847_v0 = vld [vmem:[%s6571_s28 + $0xa20] ss:$16 sps:$4 sm:$0xff]  }
  0x7f   : > { %3985 = vmatpush2.bf16.msra.mxu1 %v5774_v2  ;;  %3945 = vmatprep.subr.bf16.mxu0 %v5779_v3  ;;  %v5852_v2 = vld [vmem:[%s6571_s28 + $0x804] ss:$16 sps:$4 sm:$0xff]  }
  0x80   : > { %3986 = vmatprep.subr.bf16.mxu1 %v5782_v4  ;;  %v5855_v3 = vld [vmem:[%s6571_s28 + $0xa04] ss:$16 sps:$4 sm:$0xff]   ;;  %v5850_v4 = vld [vmem:[%s6571_s28 + $0x800] ss:$16 sps:$4 sm:$0xff]  }
  0x82   : > { %3946 = vmatpush2.bf16.msra.mxu0 %v5777_v5  ;;  %v5853_v5 = vld [vmem:[%s6571_s28 + $0xa00] ss:$16 sps:$4 sm:$0xff]  }
  0x83   : > { %3987 = vmatpush2.bf16.msra.mxu1 %v5780_v6  ;;  %3947 = vmatprep.subr.bf16.mxu0 %v5785_v8  ;;  %v5858_v6 = vld [vmem:[%s6571_s28 + $0x9e4] ss:$16 sps:$4 sm:$0xff]  }
  0x84   : > { %3988 = vmatprep.subr.bf16.mxu1 %v5788_v9  ;;  %v5861_v8 = vld [vmem:[%s6571_s28 + $0xbe4] ss:$16 sps:$4 sm:$0xff]   ;;  %v5856_v9 = vld [vmem:[%s6571_s28 + $0x9e0] ss:$16 sps:$4 sm:$0xff]  }
  0x86   : > { %3948 = vmatpush2.bf16.msra.mxu0 %v5783_v10  ;;  %v5859_v10 = vld [vmem:[%s6571_s28 + $0xbe0] ss:$16 sps:$4 sm:$0xff]  }
  0x87   : > { %3989 = vmatpush2.bf16.msra.mxu1 %v5786_v11  ;;  %3949 = vmatprep.subr.bf16.mxu0 %v5791_v12  ;;  %v5864_v11 = vld [vmem:[%s6571_s28 + $0x9c4] ss:$16 sps:$4 sm:$0xff]  }
  0x88   : > { %3990 = vmatprep.subr.bf16.mxu1 %v5794_v13  ;;  %v5867_v12 = vld [vmem:[%s6571_s28 + $0xbc4] ss:$16 sps:$4 sm:$0xff]   ;;  %v5862_v13 = vld [vmem:[%s6571_s28 + $0x9c0] ss:$16 sps:$4 sm:$0xff]  }
  0x8a   : > { %3950 = vmatpush2.bf16.msra.mxu0 %v5789_v15  ;;  %v5865_v15 = vld [vmem:[%s6571_s28 + $0xbc0] ss:$16 sps:$4 sm:$0xff]  }
  0x8b   : > { %3991 = vmatpush2.bf16.msra.mxu1 %v5792_v16  ;;  %3951 = vmatprep.subr.bf16.mxu0 %v5797_v17  ;;  %v5870_v16 = vld [vmem:[%s6571_s28 + $0x9a4] ss:$16 sps:$4 sm:$0xff]  }
  0x8c   : > { %3992 = vmatprep.subr.bf16.mxu1 %v5800_v20  ;;  %v5873_v17 = vld [vmem:[%s6571_s28 + $0xba4] ss:$16 sps:$4 sm:$0xff]   ;;  %v5868_v20 = vld [vmem:[%s6571_s28 + $0x9a0] ss:$16 sps:$4 sm:$0xff]  }
  0x8e   : > { %3952 = vmatpush2.bf16.msra.mxu0 %v5795_v21  ;;  %v5871_v21 = vld [vmem:[%s6571_s28 + $0xba0] ss:$16 sps:$4 sm:$0xff]  }
  0x8f   : > { %3993 = vmatpush2.bf16.msra.mxu1 %v5798_v22  ;;  %3953 = vmatprep.subr.bf16.mxu0 %v5803_v23  ;;  %v5876_v22 = vld [vmem:[%s6571_s28 + $0x984] ss:$16 sps:$4 sm:$0xff]  }
  0x90   : > { %3994 = vmatprep.subr.bf16.mxu1 %v5806_v25  ;;  %v5879_v23 = vld [vmem:[%s6571_s28 + $0xb84] ss:$16 sps:$4 sm:$0xff]   ;;  %v5874_v25 = vld [vmem:[%s6571_s28 + $0x980] ss:$16 sps:$4 sm:$0xff]  }
  0x92   : > { %3954 = vmatpush2.bf16.msra.mxu0 %v5801_v26  ;;  %v5877_v26 = vld [vmem:[%s6571_s28 + $0xb80] ss:$16 sps:$4 sm:$0xff]  }
  0x93   : > { %3995 = vmatpush2.bf16.msra.mxu1 %v5804_v28  ;;  %4005 = vmatprep.subr.bf16.mxu0 %v5810_v29  ;;  %v5882_v28 = vld [vmem:[%s6571_s28 + $0x964] ss:$16 sps:$4 sm:$0xff]  }
  0x94   : > { %4046 = vmatprep.subr.bf16.mxu1 %v5813_v30  ;;  %v5885_v29 = vld [vmem:[%s6571_s28 + $0xb64] ss:$16 sps:$4 sm:$0xff]   ;;  %v5880_v30 = vld [vmem:[%s6571_s28 + $0x960] ss:$16 sps:$4 sm:$0xff]  }
  0x95   : > { %3956 = vmatmul.mubr.bf16.vlgmr.msra.gmra.mxu0 %v6742_v27 }
  0x96   : > { %3997 = vmatmul.mubr.bf16.vlgmr.msra.gmra.mxu1 %v6749_v31  ;;  %4006 = vmatpush1.bf16.msra.mxu0 %v5808_v32  ;;  %v5883_v32 = vld [vmem:[%s6571_s28 + $0xb60] ss:$16 sps:$4 sm:$0xff]  }
  0x97   : > { %4047 = vmatpush1.bf16.msra.mxu1 %v5811_v7  ;;  %4007 = vmatprep.subr.bf16.mxu0 %v5816_v34  ;;  %v5888_v7 = vld [vmem:[%s6571_s28 + $0x944] ss:$16 sps:$4 sm:$0xff]  }
  0x98   : > { %4048 = vmatprep.subr.bf16.mxu1 %v5819_v35  ;;  %4037 = vmatprep.mubr.bf16.mxu0 %v6771_v42  ;;  %v5891_v34 = vld [vmem:[%s6571_s28 + $0xb44] ss:$16 sps:$4 sm:$0xff]   ;;  %v872_v35 = vcombine.high %v6754_v33, %v6754_v33  ;;  %v5892_v33 = vld [vmem:[%s6571_s28 + $0x920] ss:$16 sps:$4 sm:$0xff]  }
  0x99   : > { %4078 = vmatprep.mubr.bf16.mxu1 %v6776_v43 }
  0x9a   : > { %4008 = vmatpush1.bf16.msra.mxu0 %v5814_v38  ;;  %v5889_v38 = vld [vmem:[%s6571_s28 + $0xb40] ss:$16 sps:$4 sm:$0xff]  }
  0x9b   : > { %4049 = vmatpush1.bf16.msra.mxu1 %v5817_v39  ;;  %4009 = vmatprep.subr.bf16.mxu0 %v5822_v40  ;;  %v5894_v39 = vld [vmem:[%s6571_s28 + $0x924] ss:$16 sps:$4 sm:$0xff]  }
  0x9c   : > { %4050 = vmatprep.subr.bf16.mxu1 %v5825_v41  ;;  %v5897_v40 = vld [vmem:[%s6571_s28 + $0xb24] ss:$16 sps:$4 sm:$0xff]   ;;  %v6830_v41 = vrot.slane %v872_v35, %v6621_v50  ;;  %v5955_v35 = vld [vmem:[%s6571_s28 + $0xfe0] ss:$16 sps:$4 sm:$0xff]  }
  0x9e   : > { %4010 = vmatpush1.bf16.msra.mxu0 %v5820_v45  ;;  %v5895_v45 = vld [vmem:[%s6571_s28 + $0xb20] ss:$16 sps:$4 sm:$0xff]  }
  0x9f   : > { %4051 = vmatpush1.bf16.msra.mxu1 %v5823_v46  ;;  %4011 = vmatprep.subr.bf16.mxu0 %v5828_v47  ;;  %v5900_v46 = vld [vmem:[%s6571_s28 + $0x904] ss:$16 sps:$4 sm:$0xff]  }
  0xa0   : > { %4052 = vmatprep.subr.bf16.mxu1 %v5831_v48  ;;  %v5903_v47 = vld [vmem:[%s6571_s28 + $0xb04] ss:$16 sps:$4 sm:$0xff]   ;;  %v888_v48 = vcombine.high %v6830_v41, %v6830_v41 }
  0xa2   : > { %4012 = vmatpush1.bf16.msra.mxu0 %v5826_v49  ;;  %v6840_v49 = vrot.slane %v6760_v36, %v6621_v50  ;;  %v5904_v36 = vld [vmem:[%s6571_s28 + $0xce0] ss:$16 sps:$4 sm:$0xff]  }
  0xa3   : > { %4053 = vmatpush1.bf16.msra.mxu1 %v5829_v51  ;;  %4013 = vmatprep.subr.bf16.mxu0 %v5834_v52  ;;  %v5898_v51 = vld [vmem:[%s6571_s28 + $0x900] ss:$16 sps:$4 sm:$0xff]  }
  0xa4   : > { %4054 = vmatprep.subr.bf16.mxu1 %v5837_v53  ;;  %v5901_v52 = vld [vmem:[%s6571_s28 + $0xb00] ss:$16 sps:$4 sm:$0xff]   ;;  %v5906_v53 = vld [vmem:[%s6571_s28 + $0xce4] ss:$16 sps:$4 sm:$0xff]  }
  0xa6   : > { %4014 = vmatpush1.bf16.msra.mxu0 %v5832_v54  ;;  %v5909_v54 = vld [vmem:[%s6571_s28 + $0xee4] ss:$16 sps:$4 sm:$0xff]  }
  0xa7   : > { %4055 = vmatpush1.bf16.msra.mxu1 %v5835_v55  ;;  %4015 = vmatprep.subr.bf16.mxu0 %v5840_v56  ;;  %v6847_v55 = vrot.slane %v888_v48, %v6621_v50  ;;  %v6851_v56 = vcombine.high %v6840_v49, %v6840_v49  ;;  %v5972_v48 = vld [vmem:[%s6571_s28 + $0xd84] ss:$16 sps:$4 sm:$0xff]  }
  0xa8   : > { %4056 = vmatprep.subr.bf16.mxu1 %v5843_v57  ;;  %v5907_v57 = vld [vmem:[%s6571_s28 + $0xee0] ss:$16 sps:$4 sm:$0xff]  }
  0xaa   : > { %4016 = vmatpush1.bf16.msra.mxu0 %v5838_v58  ;;  %v5912_v58 = vld [vmem:[%s6571_s28 + $0xcc4] ss:$16 sps:$4 sm:$0xff]  }
  0xab   : > { %4057 = vmatpush1.bf16.msra.mxu1 %v5841_v59  ;;  %4017 = vmatprep.subr.bf16.mxu0 %v5846_v60  ;;  %v5915_v59 = vld [vmem:[%s6571_s28 + $0xec4] ss:$16 sps:$4 sm:$0xff]   ;;  %v6859_v60 = vcombine.high %v6847_v55, %v6847_v55 }
  0xac   : > { %4058 = vmatprep.subr.bf16.mxu1 %v5849_v62  ;;  %v5910_v62 = vld [vmem:[%s6571_s28 + $0xcc0] ss:$16 sps:$4 sm:$0xff]  }
  0xae   : > { %4018 = vmatpush1.bf16.msra.mxu0 %v5844_v63  ;;  %v5913_v63 = vld [vmem:[%s6571_s28 + $0xec0] ss:$16 sps:$4 sm:$0xff]  }
  0xaf   : > { %4059 = vmatpush1.bf16.msra.mxu1 %v5847_v0  ;;  %4019 = vmatprep.subr.bf16.mxu0 %v5852_v2  ;;  %v5918_v0 = vld [vmem:[%s6571_s28 + $0xca4] ss:$16 sps:$4 sm:$0xff]  }
  0xb0   : > { %4060 = vmatprep.subr.bf16.mxu1 %v5855_v3  ;;  %v5921_v2 = vld [vmem:[%s6571_s28 + $0xea4] ss:$16 sps:$4 sm:$0xff]   ;;  %v5916_v3 = vld [vmem:[%s6571_s28 + $0xca0] ss:$16 sps:$4 sm:$0xff]  }
  0xb2   : > { %4020 = vmatpush1.bf16.msra.mxu0 %v5850_v4  ;;  %v5919_v4 = vld [vmem:[%s6571_s28 + $0xea0] ss:$16 sps:$4 sm:$0xff]  }
  0xb3   : > { %4061 = vmatpush1.bf16.msra.mxu1 %v5853_v5  ;;  %4021 = vmatprep.subr.bf16.mxu0 %v5858_v6  ;;  %v5924_v5 = vld [vmem:[%s6571_s28 + $0xc84] ss:$16 sps:$4 sm:$0xff]  }
  0xb4   : > { %4062 = vmatprep.subr.bf16.mxu1 %v5861_v8  ;;  %v5927_v6 = vld [vmem:[%s6571_s28 + $0xe84] ss:$16 sps:$4 sm:$0xff]   ;;  %v5922_v8 = vld [vmem:[%s6571_s28 + $0xc80] ss:$16 sps:$4 sm:$0xff]  }
  0xb6   : > { %4022 = vmatpush2.bf16.msra.mxu0 %v5856_v9  ;;  %v5925_v9 = vld [vmem:[%s6571_s28 + $0xe80] ss:$16 sps:$4 sm:$0xff]  }
  0xb7   : > { %4063 = vmatpush2.bf16.msra.mxu1 %v5859_v10  ;;  %4023 = vmatprep.subr.bf16.mxu0 %v5864_v11  ;;  %v5930_v10 = vld [vmem:[%s6571_s28 + $0xc64] ss:$16 sps:$4 sm:$0xff]  }
  0xb8   : > { %4064 = vmatprep.subr.bf16.mxu1 %v5867_v12  ;;  %v5933_v11 = vld [vmem:[%s6571_s28 + $0xe64] ss:$16 sps:$4 sm:$0xff]   ;;  %v5928_v12 = vld [vmem:[%s6571_s28 + $0xc60] ss:$16 sps:$4 sm:$0xff]  }
  0xba   : > { %4024 = vmatpush2.bf16.msra.mxu0 %v5862_v13  ;;  %v5931_v13 = vld [vmem:[%s6571_s28 + $0xe60] ss:$16 sps:$4 sm:$0xff]  }
  0xbb   : > { %4065 = vmatpush2.bf16.msra.mxu1 %v5865_v15  ;;  %4025 = vmatprep.subr.bf16.mxu0 %v5870_v16  ;;  %v5936_v15 = vld [vmem:[%s6571_s28 + $0xc44] ss:$16 sps:$4 sm:$0xff]  }
  0xbc   : > { %4066 = vmatprep.subr.bf16.mxu1 %v5873_v17  ;;  %v5939_v16 = vld [vmem:[%s6571_s28 + $0xe44] ss:$16 sps:$4 sm:$0xff]   ;;  %v5934_v17 = vld [vmem:[%s6571_s28 + $0xc40] ss:$16 sps:$4 sm:$0xff]  }
  0xbe   : > { %4026 = vmatpush2.bf16.msra.mxu0 %v5868_v20  ;;  %v5937_v20 = vld [vmem:[%s6571_s28 + $0xe40] ss:$16 sps:$4 sm:$0xff]  }
  0xbf   : > { %4067 = vmatpush2.bf16.msra.mxu1 %v5871_v21  ;;  %4027 = vmatprep.subr.bf16.mxu0 %v5876_v22  ;;  %v5942_v21 = vld [vmem:[%s6571_s28 + $0xc24] ss:$16 sps:$4 sm:$0xff]  }
  0xc0   : > { %4068 = vmatprep.subr.bf16.mxu1 %v5879_v23  ;;  %v5945_v22 = vld [vmem:[%s6571_s28 + $0xe24] ss:$16 sps:$4 sm:$0xff]   ;;  %v5940_v23 = vld [vmem:[%s6571_s28 + $0xc20] ss:$16 sps:$4 sm:$0xff]  }
  0xc2   : > { %4028 = vmatpush2.bf16.msra.mxu0 %v5874_v25  ;;  %v5943_v25 = vld [vmem:[%s6571_s28 + $0xe20] ss:$16 sps:$4 sm:$0xff]  }
  0xc3   : > { %4069 = vmatpush2.bf16.msra.mxu1 %v5877_v26  ;;  %4029 = vmatprep.subr.bf16.mxu0 %v5882_v28  ;;  %v5948_v26 = vld [vmem:[%s6571_s28 + $0xc04] ss:$16 sps:$4 sm:$0xff]  }
  0xc4   : > { %4070 = vmatprep.subr.bf16.mxu1 %v5885_v29  ;;  %v5951_v28 = vld [vmem:[%s6571_s28 + $0xe04] ss:$16 sps:$4 sm:$0xff]   ;;  %v5946_v29 = vld [vmem:[%s6571_s28 + $0xc00] ss:$16 sps:$4 sm:$0xff]  }
  0xc6   : > { %4030 = vmatpush2.bf16.msra.mxu0 %v5880_v30  ;;  %v5949_v30 = vld [vmem:[%s6571_s28 + $0xe00] ss:$16 sps:$4 sm:$0xff]  }
  0xc7   : > { %4071 = vmatpush2.bf16.msra.mxu1 %v5883_v32  ;;  %4031 = vmatprep.subr.bf16.mxu0 %v5888_v7  ;;  %v5954_v32 = vld [vmem:[%s6571_s28 + $0xde4] ss:$16 sps:$4 sm:$0xff]  }
  0xc8   : > { %4072 = vmatprep.subr.bf16.mxu1 %v5891_v34  ;;  %v5957_v7 = vld [vmem:[%s6571_s28 + $0xfe4] ss:$16 sps:$4 sm:$0xff]   ;;  %v5952_v34 = vld [vmem:[%s6571_s28 + $0xde0] ss:$16 sps:$4 sm:$0xff]  }
  0xca   : > { %4032 = vmatpush2.bf16.msra.mxu0 %v5886_v37  ;;  %v5960_v37 = vld [vmem:[%s6571_s28 + $0xdc4] ss:$16 sps:$4 sm:$0xff]  }
  0xcb   : > { %4073 = vmatpush2.bf16.msra.mxu1 %v5889_v38  ;;  %4033 = vmatprep.subr.bf16.mxu0 %v5894_v39  ;;  %v5963_v38 = vld [vmem:[%s6571_s28 + $0xfc4] ss:$16 sps:$4 sm:$0xff]   ;;  %v5958_v39 = vld [vmem:[%s6571_s28 + $0xdc0] ss:$16 sps:$4 sm:$0xff]  }
  0xcc   : > { %4074 = vmatprep.subr.bf16.mxu1 %v5897_v40  ;;  %v5961_v40 = vld [vmem:[%s6571_s28 + $0xfc0] ss:$16 sps:$4 sm:$0xff]  }
  0xce   : > { %4034 = vmatpush2.bf16.msra.mxu0 %v5892_v33  ;;  %v5966_v33 = vld [vmem:[%s6571_s28 + $0xda4] ss:$16 sps:$4 sm:$0xff]  }
  0xcf   : > { %4075 = vmatpush2.bf16.msra.mxu1 %v5895_v45  ;;  %4035 = vmatprep.subr.bf16.mxu0 %v5900_v46  ;;  %v5969_v45 = vld [vmem:[%s6571_s28 + $0xfa4] ss:$16 sps:$4 sm:$0xff]   ;;  %v5964_v46 = vld [vmem:[%s6571_s28 + $0xda0] ss:$16 sps:$4 sm:$0xff]  }
  0xd0   : > { %4076 = vmatprep.subr.bf16.mxu1 %v5903_v47  ;;  %v5967_v47 = vld [vmem:[%s6571_s28 + $0xfa0] ss:$16 sps:$4 sm:$0xff]  }
  0xd2   : > { %4036 = vmatpush2.bf16.msra.mxu0 %v5898_v51  ;;  %v5975_v51 = vld [vmem:[%s6571_s28 + $0xf84] ss:$16 sps:$4 sm:$0xff]  }
  0xd3   : > { %4077 = vmatpush2.bf16.msra.mxu1 %v5901_v52  ;;  %4087 = vmatprep.subr.bf16.mxu0 %v5906_v53  ;;  %v5970_v52 = vld [vmem:[%s6571_s28 + $0xd80] ss:$16 sps:$4 sm:$0xff]  }
  0xd4   : > { %4128 = vmatprep.subr.bf16.mxu1 %v5909_v54  ;;  %v5973_v53 = vld [vmem:[%s6571_s28 + $0xf80] ss:$16 sps:$4 sm:$0xff]   ;;  %v5978_v54 = vld [vmem:[%s6571_s28 + $0xd64] ss:$16 sps:$4 sm:$0xff]  }
  0xd5   : > { %4038 = vmatmul.mubr.bf16.vlgmr.msra.gmra.mxu0 %v6840_v49 }
  0xd6   : > { %4079 = vmatmul.mubr.bf16.vlgmr.msra.gmra.mxu1 %v6851_v56  ;;  %4088 = vmatpush1.bf16.msra.mxu0 %v5904_v36  ;;  %v5981_v36 = vld [vmem:[%s6571_s28 + $0xf64] ss:$16 sps:$4 sm:$0xff]  }
  0xd7   : > { %4129 = vmatpush1.bf16.msra.mxu1 %v5907_v57  ;;  %4089 = vmatprep.subr.bf16.mxu0 %v5912_v58  ;;  %v5976_v57 = vld [vmem:[%s6571_s28 + $0xd60] ss:$16 sps:$4 sm:$0xff]  }
  0xd8   : > { %4130 = vmatprep.subr.bf16.mxu1 %v5915_v59  ;;  %4119 = vmatprep.mubr.bf16.mxu0 %v6847_v55  ;;  %v5979_v58 = vld [vmem:[%s6571_s28 + $0xf60] ss:$16 sps:$4 sm:$0xff]   ;;  %v5984_v59 = vld [vmem:[%s6571_s28 + $0xd44] ss:$16 sps:$4 sm:$0xff]  }
  0xd9   : > { %4160 = vmatprep.mubr.bf16.mxu1 %v6859_v60 }
  0xda   : > { %4090 = vmatpush1.bf16.msra.mxu0 %v5910_v62  ;;  %v5987_v62 = vld [vmem:[%s6571_s28 + $0xf44] ss:$16 sps:$4 sm:$0xff]  }
  0xdb   : > { %4131 = vmatpush1.bf16.msra.mxu1 %v5913_v63  ;;  %4091 = vmatprep.subr.bf16.mxu0 %v5918_v0  ;;  %v5982_v63 = vld [vmem:[%s6571_s28 + $0xd40] ss:$16 sps:$4 sm:$0xff]  }
  0xdc   : > { %4132 = vmatprep.subr.bf16.mxu1 %v5921_v2  ;;  %v5985_v0 = vld [vmem:[%s6571_s28 + $0xf40] ss:$16 sps:$4 sm:$0xff]   ;;  %v5990_v2 = vld [vmem:[%s6571_s28 + $0xd24] ss:$16 sps:$4 sm:$0xff]  }
  0xde   : > { %4092 = vmatpush1.bf16.msra.mxu0 %v5916_v3  ;;  %v5993_v3 = vld [vmem:[%s6571_s28 + $0xf24] ss:$16 sps:$4 sm:$0xff]  }
  0xdf   : > { %4133 = vmatpush1.bf16.msra.mxu1 %v5919_v4  ;;  %4093 = vmatprep.subr.bf16.mxu0 %v5924_v5  ;;  %v5988_v4 = vld [vmem:[%s6571_s28 + $0xd20] ss:$16 sps:$4 sm:$0xff]  }
  0xe0   : > { %4134 = vmatprep.subr.bf16.mxu1 %v5927_v6  ;;  %v5991_v5 = vld [vmem:[%s6571_s28 + $0xf20] ss:$16 sps:$4 sm:$0xff]   ;;  %v5996_v6 = vld [vmem:[%s6571_s28 + $0xd04] ss:$16 sps:$4 sm:$0xff]  }
  0xe2   : > { %4094 = vmatpush1.bf16.msra.mxu0 %v5922_v8  ;;  %v5999_v8 = vld [vmem:[%s6571_s28 + $0xf04] ss:$16 sps:$4 sm:$0xff]  }
  0xe3   : > { %4135 = vmatpush1.bf16.msra.mxu1 %v5925_v9  ;;  %4095 = vmatprep.subr.bf16.mxu0 %v5930_v10  ;;  %v5994_v9 = vld [vmem:[%s6571_s28 + $0xd00] ss:$16 sps:$4 sm:$0xff]   ;;  %v6924_v10 = vrot.slane %v6830_v41, %v6621_v50 }
  0xe4   : > { %4136 = vmatprep.subr.bf16.mxu1 %v5933_v11  ;;  %v6927_v11 = vld.sshfl [vmem:[%s6566_s24 + $0x10] sm:$0x11 pattern:$0x75316420] }
  0xe5   : > { %v6001_v41 = vld [vmem:[%s6571_s28 + $0x10e0] ss:$16 sps:$4 sm:$0xff]  }
  0xe6   : > { %4096 = vmatpush1.bf16.msra.mxu0 %v5928_v12  ;;  %v5997_v12 = vld [vmem:[%s6571_s28 + $0xf00] ss:$16 sps:$4 sm:$0xff]  }
  0xe7   : > { %4137 = vmatpush1.bf16.msra.mxu1 %v5931_v13  ;;  %4097 = vmatprep.subr.bf16.mxu0 %v5936_v15  ;;  %v6003_v13 = vld [vmem:[%s6571_s28 + $0x10e4] ss:$16 sps:$4 sm:$0xff]   ;;  %v6006_v15 = vld [vmem:[%s6571_s28 + $0xec] ss:$16 sps:$4 sm:$0xff]  }
  0xe8   : > { %4138 = vmatprep.subr.bf16.mxu1 %v5939_v16  ;;  %v928_v16 = vcombine.high %v6927_v11, %v6927_v11 }
  0xea   : > { %4098 = vmatpush1.bf16.msra.mxu0 %v5934_v17  ;;  %v6936_v17 = vcombine.high %v6924_v10, %v6924_v10 }
  0xeb   : > { %4139 = vmatpush1.bf16.msra.mxu1 %v5937_v20  ;;  %4099 = vmatprep.subr.bf16.mxu0 %v5942_v21  ;;  %v6004_v20 = vld [vmem:[%s6571_s28 + $0xe8] ss:$16 sps:$4 sm:$0xff]   ;;  %v6009_v21 = vld [vmem:[%s6571_s28 + $0x10c4] ss:$16 sps:$4 sm:$0xff]  }
  0xec   : > { %4140 = vmatprep.subr.bf16.mxu1 %v5945_v22  ;;  %v6012_v22 = vld [vmem:[%s6571_s28 + $0xcc] ss:$16 sps:$4 sm:$0xff]  }
  0xee   : > { %4100 = vmatpush1.bf16.msra.mxu0 %v5940_v23  ;;  %v6943_v23 = vrot.slane %v928_v16, %v6621_v50  ;;  %v6057_v16 = vld [vmem:[%s6571_s28 + $0x11c4] ss:$16 sps:$4 sm:$0xff]  }
  0xef   : > { %4141 = vmatpush1.bf16.msra.mxu1 %v5943_v25  ;;  %4101 = vmatprep.subr.bf16.mxu0 %v5948_v26 }
  0xf0   : > { %4142 = vmatprep.subr.bf16.mxu1 %v5951_v28  ;;  %v6007_v28 = vld [vmem:[%s6571_s28 + $0x10c0] ss:$16 sps:$4 sm:$0xff]  }
  0xf2   : > { %4102 = vmatpush1.bf16.msra.mxu0 %v5946_v29  ;;  %v6010_v29 = vld [vmem:[%s6571_s28 + $0xc8] ss:$16 sps:$4 sm:$0xff]  }
  0xf3   : > { %4143 = vmatpush1.bf16.msra.mxu1 %v5949_v30  ;;  %4103 = vmatprep.subr.bf16.mxu0 %v5954_v32 }
  0xf4   : > { %4144 = vmatprep.subr.bf16.mxu1 %v5957_v7 }
  0xf6   : > { %4104 = vmatpush2.bf16.msra.mxu0 %v5952_v34  ;;  %v6015_v34 = vld [vmem:[%s6571_s28 + $0x10a4] ss:$16 sps:$4 sm:$0xff]  }
  0xf7   : > { %4145 = vmatpush2.bf16.msra.mxu1 %v5955_v35  ;;  %4105 = vmatprep.subr.bf16.mxu0 %v5960_v37  ;;  %v6018_v35 = vld [vmem:[%s6571_s28 + $0xac] ss:$16 sps:$4 sm:$0xff]  }
  0xf8   : > { %4146 = vmatprep.subr.bf16.mxu1 %v5963_v38  ;;  %v6013_v38 = vld [vmem:[%s6571_s28 + $0x10a0] ss:$16 sps:$4 sm:$0xff]  }
  0xfa   : > { %4106 = vmatpush2.bf16.msra.mxu0 %v5958_v39  ;;  %v6016_v39 = vld [vmem:[%s6571_s28 + $0xa8] ss:$16 sps:$4 sm:$0xff]  }
  0xfb   : > { %4147 = vmatpush2.bf16.msra.mxu1 %v5961_v40  ;;  %4107 = vmatprep.subr.bf16.mxu0 %v5966_v33 }
  0xfc   : > { %4148 = vmatprep.subr.bf16.mxu1 %v5969_v45 }
  0xfe   : > { %4108 = vmatpush2.bf16.msra.mxu0 %v5964_v46 }
  0xff   : > { %4149 = vmatpush2.bf16.msra.mxu1 %v5967_v47  ;;  %4109 = vmatprep.subr.bf16.mxu0 %v5972_v48  ;;  %v6021_v47 = vld [vmem:[%s6571_s28 + $0x1084] ss:$16 sps:$4 sm:$0xff]   ;;  %v6024_v48 = vld [vmem:[%s6571_s28 + $0x8c] ss:$16 sps:$4 sm:$0xff]  }
 0x100   : > { %4150 = vmatprep.subr.bf16.mxu1 %v5975_v51  ;;  %v6019_v51 = vld [vmem:[%s6571_s28 + $0x1080] ss:$16 sps:$4 sm:$0xff]  }
 0x102   : > { %4110 = vmatpush2.bf16.msra.mxu0 %v5970_v52  ;;  %v6027_v52 = vld [vmem:[%s6571_s28 + $0x1064] ss:$16 sps:$4 sm:$0xff]  }
 0x103   : > { %4151 = vmatpush2.bf16.msra.mxu1 %v5973_v53  ;;  %4111 = vmatprep.subr.bf16.mxu0 %v5978_v54  ;;  %v6030_v53 = vld [vmem:[%s6571_s28 + $0x6c] ss:$16 sps:$4 sm:$0xff]   ;;  %v6025_v54 = vld [vmem:[%s6571_s28 + $0x1060] ss:$16 sps:$4 sm:$0xff]  }
 0x104   : > { %4152 = vmatprep.subr.bf16.mxu1 %v5981_v36  ;;  %v6028_v36 = vld [vmem:[%s6571_s28 + $0x68] ss:$16 sps:$4 sm:$0xff]  }
 0x106   : > { %4112 = vmatpush2.bf16.msra.mxu0 %v5976_v57  ;;  %v6033_v57 = vld [vmem:[%s6571_s28 + $0x1044] ss:$16 sps:$4 sm:$0xff]  }
 0x107   : > { %4153 = vmatpush2.bf16.msra.mxu1 %v5979_v58  ;;  %4113 = vmatprep.subr.bf16.mxu0 %v5984_v59  ;;  %v6036_v58 = vld [vmem:[%s6571_s28 + $0x4c] ss:$16 sps:$4 sm:$0xff]   ;;  %v6031_v59 = vld [vmem:[%s6571_s28 + $0x1040] ss:$16 sps:$4 sm:$0xff]  }
 0x108   : > { %4154 = vmatprep.subr.bf16.mxu1 %v5987_v62  ;;  %v6034_v62 = vld [vmem:[%s6571_s28 + $0x48] ss:$16 sps:$4 sm:$0xff]  }
 0x10a   : > { %4114 = vmatpush2.bf16.msra.mxu0 %v5982_v63  ;;  %v6039_v63 = vld [vmem:[%s6571_s28 + $0x1024] ss:$16 sps:$4 sm:$0xff]  }
 0x10b   : > { %4155 = vmatpush2.bf16.msra.mxu1 %v5985_v0  ;;  %4115 = vmatprep.subr.bf16.mxu0 %v5990_v2  ;;  %v6042_v0 = vld [vmem:[%s6571_s28 + $0x2c] ss:$16 sps:$4 sm:$0xff]   ;;  %v6037_v2 = vld [vmem:[%s6571_s28 + $0x1020] ss:$16 sps:$4 sm:$0xff]  }
 0x10c   : > { %4156 = vmatprep.subr.bf16.mxu1 %v5993_v3  ;;  %v6040_v3 = vld [vmem:[%s6571_s28 + $0x28] ss:$16 sps:$4 sm:$0xff]  }
 0x10e   : > { %4116 = vmatpush2.bf16.msra.mxu0 %v5988_v4  ;;  %v6045_v4 = vld [vmem:[%s6571_s28 + $0x1004] ss:$16 sps:$4 sm:$0xff]  }
 0x10f   : > { %4157 = vmatpush2.bf16.msra.mxu1 %v5991_v5  ;;  %4117 = vmatprep.subr.bf16.mxu0 %v5996_v6  ;;  %v6048_v5 = vld [vmem:[%s6571_s28 + $0xc] ss:$16 sps:$4 sm:$0xff]   ;;  %v6043_v6 = vld [vmem:[%s6571_s28 + $0x1000] ss:$16 sps:$4 sm:$0xff]  }
 0x110   : > { %4158 = vmatprep.subr.bf16.mxu1 %v5999_v8  ;;  %v6046_v8 = vld [vmem:[%s6571_s28 + $0x8] ss:$16 sps:$4 sm:$0xff]  }
 0x112   : > { %4118 = vmatpush2.bf16.msra.mxu0 %v5994_v9  ;;  %v6051_v9 = vld [vmem:[%s6571_s28 + $0x11e4] ss:$16 sps:$4 sm:$0xff]  }
 0x113   : > { %4159 = vmatpush2.bf16.msra.mxu1 %v5997_v12  ;;  %4169 = vmatprep.subr.bf16.mxu0 %v6003_v13  ;;  %v6054_v12 = vld [vmem:[%s6571_s28 + $0x1ec] ss:$16 sps:$4 sm:$0xff]   ;;  %v6049_v13 = vld [vmem:[%s6571_s28 + $0x11e0] ss:$16 sps:$4 sm:$0xff]  }
 0x114   : > { %4210 = vmatprep.subr.bf16.mxu1 %v6006_v15  ;;  %v6052_v15 = vld [vmem:[%s6571_s28 + $0x1e8] ss:$16 sps:$4 sm:$0xff]  }
 0x115   : > { %v3875_v25 = vpop.f32.mrf.mxu0  ;;  %4120 = vmatmul.mubr.bf16.vlgmr.msra.gmra.mxu0 %v6924_v10 }
 0x116   : > { %v3916_v26 = vpop.f32.mrf.mxu1  ;;  %4161 = vmatmul.mubr.bf16.vlgmr.msra.gmra.mxu1 %v6936_v17  ;;  %4170 = vmatpush1.bf16.msra.mxu0 %v6001_v41  ;;  %v6060_v41 = vld [vmem:[%s6571_s28 + $0x1cc] ss:$16 sps:$4 sm:$0xff]  }
 0x117   : > { %v6949_v30 = vadd.f32 %v3916_v26, %v3875_v25  ;;  %4211 = vmatpush1.bf16.msra.mxu1 %v6004_v20  ;;  %v3877_v32 = vpop.f32.mrf.mxu0  ;;  %4171 = vmatprep.subr.bf16.mxu0 %v6009_v21  ;;  %v6055_v20 = vld [vmem:[%s6571_s28 + $0x11c0] ss:$16 sps:$4 sm:$0xff]   ;;  %v6058_v21 = vld [vmem:[%s6571_s28 + $0x1c8] ss:$16 sps:$4 sm:$0xff]   ;;  %v6066_v25 = vld [vmem:[%s6571_s28 + $0x1ac] ss:$16 sps:$4 sm:$0xff]  }
 0x118   : > { %v3918_v7 = vpop.f32.mrf.mxu1  ;;  %4212 = vmatprep.subr.bf16.mxu1 %v6012_v22  ;;  %4201 = vmatprep.mubr.bf16.mxu0 %v6943_v23  ;;  %v6063_v22 = vld [vmem:[%s6571_s28 + $0x11a4] ss:$16 sps:$4 sm:$0xff]   ;;  %v6061_v26 = vld [vmem:[%s6571_s28 + $0x11a0] ss:$16 sps:$4 sm:$0xff]  }
 0x119   : > { %v6953_v37 = vadd.f32 %v3918_v7, %v3877_v32  ;;  %4242 = vmatprep.mubr.bf16.mxu1 %v6633_v61  ;;  %v3879_v40 = vpop.f32.mrf.mxu0  ;;  %v6022_v61 = vld [vmem:[%s6571_s28 + $0x88] ss:$16 sps:$4 sm:$0xff]   ;;  %v6072_v32 = vld [vmem:[%s6571_s28 + $0x18c] ss:$16 sps:$4 sm:$0xff]   ;;  %v6067_v7 = vld [vmem:[%s6571_s28 + $0x1180] ss:$16 sps:$4 sm:$0xff]  }
 0x11a   : > { %v3920_v33 = vpop.f32.mrf.mxu1  ;;  %4172 = vmatpush1.bf16.msra.mxu0 %v6007_v28  ;;  %v6064_v28 = vld [vmem:[%s6571_s28 + $0x1a8] ss:$16 sps:$4 sm:$0xff]  }
 0x11b   : > { %4213 = vmatpush1.bf16.msra.mxu1 %v6010_v29  ;;  %v3880_v45 = vpop.f32.mrf.mxu0  ;;  %4173 = vmatprep.subr.bf16.mxu0 %v6015_v34  ;;  %v6069_v29 = vld [vmem:[%s6571_s28 + $0x1184] ss:$16 sps:$4 sm:$0xff]   ;;  %v6070_v34 = vld [vmem:[%s6571_s28 + $0x188] ss:$16 sps:$4 sm:$0xff]  }
 0x11c   : > { %v3921_v46 = vpop.f32.mrf.mxu1  ;;  %4214 = vmatprep.subr.bf16.mxu1 %v6018_v35  ;;  %v6075_v35 = vld [vmem:[%s6571_s28 + $0x1164] ss:$16 sps:$4 sm:$0xff]   ;;  %v6076_v40 = vld [vmem:[%s6571_s28 + $0x168] ss:$16 sps:$4 sm:$0xff]   ;;  %v6084_v45 = vld [vmem:[%s6571_s28 + $0x14c] ss:$16 sps:$4 sm:$0xff]  }
 0x11d   : > { %v6081_v33 = vld [vmem:[%s6571_s28 + $0x1144] ss:$16 sps:$4 sm:$0xff]   ;;  %v6079_v46 = vld [vmem:[%s6571_s28 + $0x1140] ss:$16 sps:$4 sm:$0xff]  }
 0x11e   : > { %4174 = vmatpush1.bf16.msra.mxu0 %v6013_v38  ;;  %v6078_v38 = vld [vmem:[%s6571_s28 + $0x16c] ss:$16 sps:$4 sm:$0xff]  }
 0x11f   : > { %4215 = vmatpush1.bf16.msra.mxu1 %v6016_v39  ;;  %4175 = vmatprep.subr.bf16.mxu0 %v6021_v47  ;;  %v6073_v39 = vld [vmem:[%s6571_s28 + $0x1160] ss:$16 sps:$4 sm:$0xff]   ;;  %v6082_v47 = vld [vmem:[%s6571_s28 + $0x148] ss:$16 sps:$4 sm:$0xff]  }
 0x120   : > { %4216 = vmatprep.subr.bf16.mxu1 %v6024_v48  ;;  %v6087_v48 = vld [vmem:[%s6571_s28 + $0x1124] ss:$16 sps:$4 sm:$0xff]  }
 0x122   : > { %4176 = vmatpush1.bf16.msra.mxu0 %v6019_v51  ;;  %v6090_v51 = vld [vmem:[%s6571_s28 + $0x12c] ss:$16 sps:$4 sm:$0xff]  }
 0x123   : > { %4217 = vmatpush1.bf16.msra.mxu1 %v6022_v61  ;;  %4177 = vmatprep.subr.bf16.mxu0 %v6027_v52  ;;  %v6085_v61 = vld [vmem:[%s6571_s28 + $0x1120] ss:$16 sps:$4 sm:$0xff]   ;;  %v6088_v52 = vld [vmem:[%s6571_s28 + $0x128] ss:$16 sps:$4 sm:$0xff]  }
 0x124   : > { %4218 = vmatprep.subr.bf16.mxu1 %v6030_v53  ;;  %v6093_v53 = vld [vmem:[%s6571_s28 + $0x1104] ss:$16 sps:$4 sm:$0xff]  }
 0x126   : > { %4178 = vmatpush1.bf16.msra.mxu0 %v6025_v54  ;;  %v6096_v54 = vld [vmem:[%s6571_s28 + $0x10c] ss:$16 sps:$4 sm:$0xff]  }
 0x127   : > { %4219 = vmatpush1.bf16.msra.mxu1 %v6028_v36  ;;  %4179 = vmatprep.subr.bf16.mxu0 %v6033_v57  ;;  %v6091_v36 = vld [vmem:[%s6571_s28 + $0x1100] ss:$16 sps:$4 sm:$0xff]   ;;  %v6094_v57 = vld [vmem:[%s6571_s28 + $0x108] ss:$16 sps:$4 sm:$0xff]  }
 0x128   : > { %4220 = vmatprep.subr.bf16.mxu1 %v6036_v58  ;;  %v6099_v58 = vld [vmem:[%s6571_s28 + $0x2ec] ss:$16 sps:$4 sm:$0xff]  }
 0x12a   : > { %4180 = vmatpush1.bf16.msra.mxu0 %v6031_v59  ;;  %v6102_v59 = vld [vmem:[%s6571_s28 + $0x4ec] ss:$16 sps:$4 sm:$0xff]  }
 0x12b   : > { %4221 = vmatpush1.bf16.msra.mxu1 %v6034_v62  ;;  %4181 = vmatprep.subr.bf16.mxu0 %v6039_v63  ;;  %v6097_v62 = vld [vmem:[%s6571_s28 + $0x2e8] ss:$16 sps:$4 sm:$0xff]  }
 0x12c   : > { %4222 = vmatprep.subr.bf16.mxu1 %v6042_v0  ;;  %v6100_v63 = vld [vmem:[%s6571_s28 + $0x4e8] ss:$16 sps:$4 sm:$0xff]   ;;  %v7017_v0 = vrot.slane %v6927_v11, %v6621_v50 }
 0x12e   : > { %4182 = vmatpush1.bf16.msra.mxu0 %v6037_v2  ;;  %v6105_v2 = vld [vmem:[%s6571_s28 + $0x2cc] ss:$16 sps:$4 sm:$0xff]  }
 0x12f   : > { %4223 = vmatpush1.bf16.msra.mxu1 %v6040_v3  ;;  %4183 = vmatprep.subr.bf16.mxu0 %v6045_v4  ;;  %v6108_v3 = vld [vmem:[%s6571_s28 + $0x4cc] ss:$16 sps:$4 sm:$0xff]   ;;  %v6103_v4 = vld [vmem:[%s6571_s28 + $0x2c8] ss:$16 sps:$4 sm:$0xff]  }
 0x130   : > { %4224 = vmatprep.subr.bf16.mxu1 %v6048_v5  ;;  %v6106_v5 = vld [vmem:[%s6571_s28 + $0x4c8] ss:$16 sps:$4 sm:$0xff]  }
 0x132   : > { %4184 = vmatpush1.bf16.msra.mxu0 %v6043_v6 }
 0x133   : > { %4225 = vmatpush1.bf16.msra.mxu1 %v6046_v8  ;;  %4185 = vmatprep.subr.bf16.mxu0 %v6051_v9 }
 0x134   : > { %4226 = vmatprep.subr.bf16.mxu1 %v6054_v12  ;;  %v6111_v12 = vld [vmem:[%s6571_s28 + $0x2ac] ss:$16 sps:$4 sm:$0xff]  }
 0x136   : > { %4186 = vmatpush2.bf16.msra.mxu0 %v6049_v13  ;;  %v6114_v13 = vld [vmem:[%s6571_s28 + $0x4ac] ss:$16 sps:$4 sm:$0xff]  }
 0x137   : > { %4227 = vmatpush2.bf16.msra.mxu1 %v6052_v15  ;;  %4187 = vmatprep.subr.bf16.mxu0 %v6057_v16 }
 0x138   : > { %4228 = vmatprep.subr.bf16.mxu1 %v6060_v41  ;;  %v6109_v41 = vld [vmem:[%s6571_s28 + $0x2a8] ss:$16 sps:$4 sm:$0xff]  }
 0x13a   : > { %4188 = vmatpush2.bf16.msra.mxu0 %v6055_v20  ;;  %v6112_v20 = vld [vmem:[%s6571_s28 + $0x4a8] ss:$16 sps:$4 sm:$0xff]  }
 0x13b   : > { %4229 = vmatpush2.bf16.msra.mxu1 %v6058_v21  ;;  %4189 = vmatprep.subr.bf16.mxu0 %v6063_v22 }
 0x13c   : > { %4230 = vmatprep.subr.bf16.mxu1 %v6066_v25 }
 0x13e   : > { %4190 = vmatpush2.bf16.msra.mxu0 %v6061_v26  ;;  %v6118_v26 = vld [vmem:[%s6571_s28 + $0x488] ss:$16 sps:$4 sm:$0xff]  }
 0x13f   : > { %4231 = vmatpush2.bf16.msra.mxu1 %v6064_v28  ;;  %4191 = vmatprep.subr.bf16.mxu0 %v6069_v29  ;;  %v6123_v28 = vld [vmem:[%s6571_s28 + $0x26c] ss:$16 sps:$4 sm:$0xff]  }
 0x140   : > { %4232 = vmatprep.subr.bf16.mxu1 %v6072_v32  ;;  %v6126_v29 = vld [vmem:[%s6571_s28 + $0x46c] ss:$16 sps:$4 sm:$0xff]   ;;  %v6121_v32 = vld [vmem:[%s6571_s28 + $0x268] ss:$16 sps:$4 sm:$0xff]  }
 0x142   : > { %4192 = vmatpush2.bf16.msra.mxu0 %v6067_v7  ;;  %v6124_v7 = vld [vmem:[%s6571_s28 + $0x468] ss:$16 sps:$4 sm:$0xff]  }
 0x143   : > { %4233 = vmatpush2.bf16.msra.mxu1 %v6070_v34  ;;  %4193 = vmatprep.subr.bf16.mxu0 %v6075_v35  ;;  %v6129_v34 = vld [vmem:[%s6571_s28 + $0x24c] ss:$16 sps:$4 sm:$0xff]  }
 0x144   : > { %4234 = vmatprep.subr.bf16.mxu1 %v6078_v38  ;;  %v6132_v35 = vld [vmem:[%s6571_s28 + $0x44c] ss:$16 sps:$4 sm:$0xff]   ;;  %v6127_v38 = vld [vmem:[%s6571_s28 + $0x248] ss:$16 sps:$4 sm:$0xff]  }
 0x146   : > { %4194 = vmatpush2.bf16.msra.mxu0 %v6073_v39  ;;  %v6130_v39 = vld [vmem:[%s6571_s28 + $0x448] ss:$16 sps:$4 sm:$0xff]  }
 0x147   : > { %4235 = vmatpush2.bf16.msra.mxu1 %v6076_v40  ;;  %4195 = vmatprep.subr.bf16.mxu0 %v6081_v33  ;;  %v6135_v40 = vld [vmem:[%s6571_s28 + $0x22c] ss:$16 sps:$4 sm:$0xff]  }
 0x148   : > { %4236 = vmatprep.subr.bf16.mxu1 %v6084_v45  ;;  %v6138_v33 = vld [vmem:[%s6571_s28 + $0x42c] ss:$16 sps:$4 sm:$0xff]   ;;  %v6133_v45 = vld [vmem:[%s6571_s28 + $0x228] ss:$16 sps:$4 sm:$0xff]  }
 0x14a   : > { %4196 = vmatpush2.bf16.msra.mxu0 %v6079_v46  ;;  %v6136_v46 = vld [vmem:[%s6571_s28 + $0x428] ss:$16 sps:$4 sm:$0xff]  }
 0x14b   : > { %4237 = vmatpush2.bf16.msra.mxu1 %v6082_v47  ;;  %4197 = vmatprep.subr.bf16.mxu0 %v6087_v48  ;;  %v6141_v47 = vld [vmem:[%s6571_s28 + $0x20c] ss:$16 sps:$4 sm:$0xff]  }
 0x14c   : > { %4238 = vmatprep.subr.bf16.mxu1 %v6090_v51  ;;  %v6144_v48 = vld [vmem:[%s6571_s28 + $0x40c] ss:$16 sps:$4 sm:$0xff]   ;;  %v6139_v51 = vld [vmem:[%s6571_s28 + $0x208] ss:$16 sps:$4 sm:$0xff]  }
 0x14e   : > { %4198 = vmatpush2.bf16.msra.mxu0 %v6085_v61  ;;  %v6142_v61 = vld [vmem:[%s6571_s28 + $0x408] ss:$16 sps:$4 sm:$0xff]  }
 0x14f   : > { %4239 = vmatpush2.bf16.msra.mxu1 %v6088_v52  ;;  %4199 = vmatprep.subr.bf16.mxu0 %v6093_v53  ;;  %v6147_v52 = vld [vmem:[%s6571_s28 + $0x3ec] ss:$16 sps:$4 sm:$0xff]  }
 0x150   : > { %4240 = vmatprep.subr.bf16.mxu1 %v6096_v54  ;;  %v6150_v53 = vld [vmem:[%s6571_s28 + $0x5ec] ss:$16 sps:$4 sm:$0xff]   ;;  %v6145_v54 = vld [vmem:[%s6571_s28 + $0x3e8] ss:$16 sps:$4 sm:$0xff]  }
 0x152   : > { %4200 = vmatpush2.bf16.msra.mxu0 %v6091_v36  ;;  %v6148_v36 = vld [vmem:[%s6571_s28 + $0x5e8] ss:$16 sps:$4 sm:$0xff]  }
 0x153   : > { %4241 = vmatpush2.bf16.msra.mxu1 %v6094_v57  ;;  %4251 = vmatprep.subr.bf16.mxu0 %v6099_v58  ;;  %v6153_v57 = vld [vmem:[%s6571_s28 + $0x3cc] ss:$16 sps:$4 sm:$0xff]  }
 0x154   : > { %4292 = vmatprep.subr.bf16.mxu1 %v6102_v59  ;;  %v6156_v58 = vld [vmem:[%s6571_s28 + $0x5cc] ss:$16 sps:$4 sm:$0xff]   ;;  %v6151_v59 = vld [vmem:[%s6571_s28 + $0x3c8] ss:$16 sps:$4 sm:$0xff]  }
 0x155   : > { %v3957_v6 = vpop.f32.mrf.mxu0  ;;  %4202 = vmatmul.mubr.bf16.vlgmr.msra.gmra.mxu0 %v7017_v0 }
 0x156   : > { %v3998_v8 = vpop.f32.mrf.mxu1  ;;  %4243 = vmatmul.mubr.bf16.vlgmr.msra.gmra.mxu1 %v6659_v14  ;;  %v3958_v50 = vadd.f32 %v3957_v6, %v6949_v30  ;;  %4252 = vmatpush1.bf16.msra.mxu0 %v6097_v62  ;;  %v6154_v62 = vld [vmem:[%s6571_s28 + $0x5c8] ss:$16 sps:$4 sm:$0xff]   ;;  %v6168_v6 = vld [vmem:[%s6571_s28 + $0x58c] ss:$16 sps:$4 sm:$0xff]  }
 0x157   : > { %4293 = vmatpush1.bf16.msra.mxu1 %v6100_v63  ;;  %v3959_v11 = vpop.f32.mrf.mxu0  ;;  %4253 = vmatprep.subr.bf16.mxu0 %v6105_v2  ;;  %v6159_v63 = vld [vmem:[%s6571_s28 + $0x3ac] ss:$16 sps:$4 sm:$0xff]  }
 0x158   : > { %v4000_v9 = vpop.f32.mrf.mxu1  ;;  %4294 = vmatprep.subr.bf16.mxu1 %v6108_v3  ;;  %v7028_v15 = vadd.f32 %v3998_v8, %v3958_v50  ;;  %v3960_v16 = vadd.f32 %v3959_v11, %v6953_v37  ;;  %4283 = vmatprep.mubr.bf16.mxu0 %v6640_v1  ;;  %v6117_v37 = vld [vmem:[%s6571_s28 + $0x28c] ss:$16 sps:$4 sm:$0xff]   ;;  %v6157_v3 = vld [vmem:[%s6571_s28 + $0x3a8] ss:$16 sps:$4 sm:$0xff]  }
 0x159   : > { %4324 = vmatprep.mubr.bf16.mxu1 %v6665_v18  ;;  %v3961_v14 = vpop.f32.mrf.mxu0  ;;  %v6120_v1 = vld [vmem:[%s6571_s28 + $0x48c] ss:$16 sps:$4 sm:$0xff]   ;;  %v6115_v18 = vld [vmem:[%s6571_s28 + $0x288] ss:$16 sps:$4 sm:$0xff]  }
 0x15a   : > { %v4002_v30 = vpop.f32.mrf.mxu1  ;;  %v7035_v21 = vadd.f32 %v4000_v9, %v3960_v16  ;;  %4254 = vmatpush1.bf16.msra.mxu0 %v6103_v4  ;;  %v6162_v2 = vld [vmem:[%s6571_s28 + $0x5ac] ss:$16 sps:$4 sm:$0xff]   ;;  %v6160_v4 = vld [vmem:[%s6571_s28 + $0x5a8] ss:$16 sps:$4 sm:$0xff]  }
 0x15b   : > { %4295 = vmatpush1.bf16.msra.mxu1 %v6106_v5  ;;  %v3962_v22 = vpop.f32.mrf.mxu0  ;;  %4255 = vmatprep.subr.bf16.mxu0 %v6111_v12  ;;  %v6165_v5 = vld [vmem:[%s6571_s28 + $0x38c] ss:$16 sps:$4 sm:$0xff]   ;;  %v6163_v8 = vld [vmem:[%s6571_s28 + $0x388] ss:$16 sps:$4 sm:$0xff]  }
 0x15c   : > { %v4003_v25 = vpop.f32.mrf.mxu1  ;;  %4296 = vmatprep.subr.bf16.mxu1 %v6114_v13  ;;  %v6166_v50 = vld [vmem:[%s6571_s28 + $0x588] ss:$16 sps:$4 sm:$0xff]   ;;  %v6171_v11 = vld [vmem:[%s6571_s28 + $0x36c] ss:$16 sps:$4 sm:$0xff]  }
 0x15d   : > { %v6174_v9 = vld [vmem:[%s6571_s28 + $0x56c] ss:$16 sps:$4 sm:$0xff]   ;;  %v6169_v12 = vld [vmem:[%s6571_s28 + $0x368] ss:$16 sps:$4 sm:$0xff]  }
 0x15e   : > { %4256 = vmatpush1.bf16.msra.mxu0 %v6109_v41  ;;  %v6172_v13 = vld [vmem:[%s6571_s28 + $0x568] ss:$16 sps:$4 sm:$0xff]   ;;  %v6177_v16 = vld [vmem:[%s6571_s28 + $0x34c] ss:$16 sps:$4 sm:$0xff]  }
 0x15f   : > { %4297 = vmatpush1.bf16.msra.mxu1 %v6112_v20  ;;  %4257 = vmatprep.subr.bf16.mxu0 %v6117_v37  ;;  %v6180_v41 = vld [vmem:[%s6571_s28 + $0x54c] ss:$16 sps:$4 sm:$0xff]   ;;  %v6175_v20 = vld [vmem:[%s6571_s28 + $0x348] ss:$16 sps:$4 sm:$0xff]  }
 0x160   : > { %4298 = vmatprep.subr.bf16.mxu1 %v6120_v1  ;;  %v6178_v14 = vld [vmem:[%s6571_s28 + $0x548] ss:$16 sps:$4 sm:$0xff]   ;;  %v6183_v30 = vld [vmem:[%s6571_s28 + $0x32c] ss:$16 sps:$4 sm:$0xff]  }
 0x161   : > { %v6186_v22 = vld [vmem:[%s6571_s28 + $0x52c] ss:$16 sps:$4 sm:$0xff]   ;;  %v6181_v25 = vld [vmem:[%s6571_s28 + $0x328] ss:$16 sps:$4 sm:$0xff]  }
 0x162   : > { %4258 = vmatpush1.bf16.msra.mxu0 %v6115_v18  ;;  %v6184_v37 = vld [vmem:[%s6571_s28 + $0x528] ss:$16 sps:$4 sm:$0xff]   ;;  %v6189_v1 = vld [vmem:[%s6571_s28 + $0x30c] ss:$16 sps:$4 sm:$0xff]  }
 0x163   : > { %4299 = vmatpush1.bf16.msra.mxu1 %v6118_v26  ;;  %4259 = vmatprep.subr.bf16.mxu0 %v6123_v28  ;;  %v6192_v18 = vld [vmem:[%s6571_s28 + $0x50c] ss:$16 sps:$4 sm:$0xff]   ;;  %v6187_v26 = vld [vmem:[%s6571_s28 + $0x308] ss:$16 sps:$4 sm:$0xff]  }
 0x164   : > { %4300 = vmatprep.subr.bf16.mxu1 %v6126_v29  ;;  %v6190_v28 = vld [vmem:[%s6571_s28 + $0x508] ss:$16 sps:$4 sm:$0xff]   ;;  %v6195_v29 = vld [vmem:[%s6571_s28 + $0x6ec] ss:$16 sps:$4 sm:$0xff]  }
 0x166   : > { %4260 = vmatpush1.bf16.msra.mxu0 %v6121_v32  ;;  %v6198_v32 = vld [vmem:[%s6571_s28 + $0x8ec] ss:$16 sps:$4 sm:$0xff]  }
 0x167   : > { %4301 = vmatpush1.bf16.msra.mxu1 %v6124_v7  ;;  %4261 = vmatprep.subr.bf16.mxu0 %v6129_v34  ;;  %v6193_v7 = vld [vmem:[%s6571_s28 + $0x6e8] ss:$16 sps:$4 sm:$0xff]  }
 0x168   : > { %4302 = vmatprep.subr.bf16.mxu1 %v6132_v35  ;;  %v6196_v34 = vld [vmem:[%s6571_s28 + $0x8e8] ss:$16 sps:$4 sm:$0xff]   ;;  %v6201_v35 = vld [vmem:[%s6571_s28 + $0x6cc] ss:$16 sps:$4 sm:$0xff]  }
 0x16a   : > { %4262 = vmatpush1.bf16.msra.mxu0 %v6127_v38  ;;  %v6204_v38 = vld [vmem:[%s6571_s28 + $0x8cc] ss:$16 sps:$4 sm:$0xff]  }
 0x16b   : > { %4303 = vmatpush1.bf16.msra.mxu1 %v6130_v39  ;;  %4263 = vmatprep.subr.bf16.mxu0 %v6135_v40 }
 0x16c   : > { %4304 = vmatprep.subr.bf16.mxu1 %v6138_v33 }
 0x16e   : > { %4264 = vmatpush1.bf16.msra.mxu0 %v6133_v45  ;;  %v6199_v45 = vld [vmem:[%s6571_s28 + $0x6c8] ss:$16 sps:$4 sm:$0xff]  }
 0x16f   : > { %4305 = vmatpush1.bf16.msra.mxu1 %v6136_v46  ;;  %4265 = vmatprep.subr.bf16.mxu0 %v6141_v47  ;;  %v6202_v46 = vld [vmem:[%s6571_s28 + $0x8c8] ss:$16 sps:$4 sm:$0xff]  }
 0x170   : > { %4306 = vmatprep.subr.bf16.mxu1 %v6144_v48 }
 0x172   : > { %4266 = vmatpush1.bf16.msra.mxu0 %v6139_v51  ;;  %v6207_v51 = vld [vmem:[%s6571_s28 + $0x6ac] ss:$16 sps:$4 sm:$0xff]  }
 0x173   : > { %4307 = vmatpush1.bf16.msra.mxu1 %v6142_v61  ;;  %4267 = vmatprep.subr.bf16.mxu0 %v6147_v52  ;;  %v6210_v61 = vld [vmem:[%s6571_s28 + $0x8ac] ss:$16 sps:$4 sm:$0xff]  }
 0x174   : > { %4308 = vmatprep.subr.bf16.mxu1 %v6150_v53 }
 0x176   : > { %4268 = vmatpush2.bf16.msra.mxu0 %v6145_v54  ;;  %v6205_v54 = vld [vmem:[%s6571_s28 + $0x6a8] ss:$16 sps:$4 sm:$0xff]  }
 0x177   : > { %4309 = vmatpush2.bf16.msra.mxu1 %v6148_v36  ;;  %4269 = vmatprep.subr.bf16.mxu0 %v6153_v57  ;;  %v6208_v36 = vld [vmem:[%s6571_s28 + $0x8a8] ss:$16 sps:$4 sm:$0xff]  }
 0x178   : > { %4310 = vmatprep.subr.bf16.mxu1 %v6156_v58 }
 0x17a   : > { %4270 = vmatpush2.bf16.msra.mxu0 %v6151_v59  ;;  %v6214_v59 = vld [vmem:[%s6571_s28 + $0x888] ss:$16 sps:$4 sm:$0xff]  }
 0x17b   : > { %4311 = vmatpush2.bf16.msra.mxu1 %v6154_v62  ;;  %4271 = vmatprep.subr.bf16.mxu0 %v6159_v63  ;;  %v6219_v62 = vld [vmem:[%s6571_s28 + $0x66c] ss:$16 sps:$4 sm:$0xff]  }
 0x17c   : > { %4312 = vmatprep.subr.bf16.mxu1 %v6162_v2  ;;  %v6222_v63 = vld [vmem:[%s6571_s28 + $0x86c] ss:$16 sps:$4 sm:$0xff]   ;;  %v6217_v2 = vld [vmem:[%s6571_s28 + $0x668] ss:$16 sps:$4 sm:$0xff]  }
 0x17e   : > { %4272 = vmatpush2.bf16.msra.mxu0 %v6157_v3  ;;  %v6220_v3 = vld [vmem:[%s6571_s28 + $0x868] ss:$16 sps:$4 sm:$0xff]  }
 0x17f   : > { %4313 = vmatpush2.bf16.msra.mxu1 %v6160_v4  ;;  %4273 = vmatprep.subr.bf16.mxu0 %v6165_v5  ;;  %v6225_v4 = vld [vmem:[%s6571_s28 + $0x64c] ss:$16 sps:$4 sm:$0xff]  }
 0x180   : > { %4314 = vmatprep.subr.bf16.mxu1 %v6168_v6  ;;  %v6228_v5 = vld [vmem:[%s6571_s28 + $0x84c] ss:$16 sps:$4 sm:$0xff]   ;;  %v6223_v6 = vld [vmem:[%s6571_s28 + $0x648] ss:$16 sps:$4 sm:$0xff]  }
 0x182   : > { %4274 = vmatpush2.bf16.msra.mxu0 %v6163_v8  ;;  %v6226_v8 = vld [vmem:[%s6571_s28 + $0x848] ss:$16 sps:$4 sm:$0xff]  }
 0x183   : > { %4315 = vmatpush2.bf16.msra.mxu1 %v6166_v50  ;;  %4275 = vmatprep.subr.bf16.mxu0 %v6171_v11  ;;  %v6231_v50 = vld [vmem:[%s6571_s28 + $0x62c] ss:$16 sps:$4 sm:$0xff]  }
 0x184   : > { %4316 = vmatprep.subr.bf16.mxu1 %v6174_v9  ;;  %v6234_v11 = vld [vmem:[%s6571_s28 + $0x82c] ss:$16 sps:$4 sm:$0xff]   ;;  %v6229_v9 = vld [vmem:[%s6571_s28 + $0x628] ss:$16 sps:$4 sm:$0xff]  }
 0x186   : > { %4276 = vmatpush2.bf16.msra.mxu0 %v6169_v12  ;;  %v6232_v12 = vld [vmem:[%s6571_s28 + $0x828] ss:$16 sps:$4 sm:$0xff]  }
 0x187   : > { %4317 = vmatpush2.bf16.msra.mxu1 %v6172_v13  ;;  %4277 = vmatprep.subr.bf16.mxu0 %v6177_v16  ;;  %v6237_v13 = vld [vmem:[%s6571_s28 + $0x60c] ss:$16 sps:$4 sm:$0xff]  }
 0x188   : > { %4318 = vmatprep.subr.bf16.mxu1 %v6180_v41  ;;  %v6240_v16 = vld [vmem:[%s6571_s28 + $0x80c] ss:$16 sps:$4 sm:$0xff]   ;;  %v6235_v41 = vld [vmem:[%s6571_s28 + $0x608] ss:$16 sps:$4 sm:$0xff]  }
 0x18a   : > { %4278 = vmatpush2.bf16.msra.mxu0 %v6175_v20  ;;  %v6238_v20 = vld [vmem:[%s6571_s28 + $0x808] ss:$16 sps:$4 sm:$0xff]  }
 0x18b   : > { %4319 = vmatpush2.bf16.msra.mxu1 %v6178_v14  ;;  %4279 = vmatprep.subr.bf16.mxu0 %v6183_v30  ;;  %v6243_v14 = vld [vmem:[%s6571_s28 + $0x7ec] ss:$16 sps:$4 sm:$0xff]  }
 0x18c   : > { %4320 = vmatprep.subr.bf16.mxu1 %v6186_v22  ;;  %v6246_v30 = vld [vmem:[%s6571_s28 + $0x9ec] ss:$16 sps:$4 sm:$0xff]   ;;  %v6241_v22 = vld [vmem:[%s6571_s28 + $0x7e8] ss:$16 sps:$4 sm:$0xff]  }
 0x18e   : > { %4280 = vmatpush2.bf16.msra.mxu0 %v6181_v25  ;;  %v6244_v25 = vld [vmem:[%s6571_s28 + $0x9e8] ss:$16 sps:$4 sm:$0xff]  }
 0x18f   : > { %4321 = vmatpush2.bf16.msra.mxu1 %v6184_v37  ;;  %4281 = vmatprep.subr.bf16.mxu0 %v6189_v1  ;;  %v6249_v37 = vld [vmem:[%s6571_s28 + $0x7cc] ss:$16 sps:$4 sm:$0xff]  }
 0x190   : > { %4322 = vmatprep.subr.bf16.mxu1 %v6192_v18  ;;  %v6252_v1 = vld [vmem:[%s6571_s28 + $0x9cc] ss:$16 sps:$4 sm:$0xff]   ;;  %v6247_v18 = vld [vmem:[%s6571_s28 + $0x7c8] ss:$16 sps:$4 sm:$0xff]  }
 0x192   : > { %4282 = vmatpush2.bf16.msra.mxu0 %v6187_v26  ;;  %v6250_v26 = vld [vmem:[%s6571_s28 + $0x9c8] ss:$16 sps:$4 sm:$0xff]  }
 0x193   : > { %4323 = vmatpush2.bf16.msra.mxu1 %v6190_v28  ;;  %4333 = vmatprep.subr.bf16.mxu0 %v6195_v29  ;;  %v6255_v28 = vld [vmem:[%s6571_s28 + $0x7ac] ss:$16 sps:$4 sm:$0xff]  }
 0x194   : > { %4374 = vmatprep.subr.bf16.mxu1 %v6198_v32  ;;  %v6258_v29 = vld [vmem:[%s6571_s28 + $0x9ac] ss:$16 sps:$4 sm:$0xff]   ;;  %v6253_v32 = vld [vmem:[%s6571_s28 + $0x7a8] ss:$16 sps:$4 sm:$0xff]  }
 0x195   : > { %v4039_v39 = vpop.f32.mrf.mxu0  ;;  %4284 = vmatmul.mubr.bf16.vlgmr.msra.gmra.mxu0 %v6669_v19 }
 0x196   : > { %v4080_v40 = vpop.f32.mrf.mxu1  ;;  %4325 = vmatmul.mubr.bf16.vlgmr.msra.gmra.mxu1 %v6742_v27  ;;  %v4040_v33 = vadd.f32 %v4039_v39, %v7028_v15  ;;  %4334 = vmatpush1.bf16.msra.mxu0 %v6193_v7  ;;  %v6256_v7 = vld [vmem:[%s6571_s28 + $0x9a8] ss:$16 sps:$4 sm:$0xff]  }
 0x197   : > { %4375 = vmatpush1.bf16.msra.mxu1 %v6196_v34  ;;  %v4041_v47 = vpop.f32.mrf.mxu0  ;;  %4335 = vmatprep.subr.bf16.mxu0 %v6201_v35  ;;  %v6261_v34 = vld [vmem:[%s6571_s28 + $0x78c] ss:$16 sps:$4 sm:$0xff]   ;;  %v6262_v39 = vld [vmem:[%s6571_s28 + $0x988] ss:$16 sps:$4 sm:$0xff]  }
 0x198   : > { %v4082_v48 = vpop.f32.mrf.mxu1  ;;  %4376 = vmatprep.subr.bf16.mxu1 %v6204_v38  ;;  %v7102_v52 = vadd.f32 %v4080_v40, %v4040_v33  ;;  %v4042_v19 = vadd.f32 %v4041_v47, %v7035_v21  ;;  %4365 = vmatprep.mubr.bf16.mxu0 %v6677_v24  ;;  %v6213_v24 = vld [vmem:[%s6571_s28 + $0x68c] ss:$16 sps:$4 sm:$0xff]   ;;  %v6211_v21 = vld [vmem:[%s6571_s28 + $0x688] ss:$16 sps:$4 sm:$0xff]  }
 0x199   : > { %4406 = vmatprep.mubr.bf16.mxu1 %v6771_v42  ;;  %v4043_v27 = vpop.f32.mrf.mxu0  ;;  %v6216_v42 = vld [vmem:[%s6571_s28 + $0x88c] ss:$16 sps:$4 sm:$0xff]   ;;  %v6259_v38 = vld [vmem:[%s6571_s28 + $0x788] ss:$16 sps:$4 sm:$0xff]  }
 0x19a   : > { %v4084_v15 = vpop.f32.mrf.mxu1  ;;  %v7107_v53 = vadd.f32 %v4082_v48, %v4042_v19  ;;  %4336 = vmatpush1.bf16.msra.mxu0 %v6199_v45  ;;  %v6264_v35 = vld [vmem:[%s6571_s28 + $0x98c] ss:$16 sps:$4 sm:$0xff]   ;;  %v6265_v45 = vld [vmem:[%s6571_s28 + $0x768] ss:$16 sps:$4 sm:$0xff]  }
 0x19b   : > { %4377 = vmatpush1.bf16.msra.mxu1 %v6202_v46  ;;  %v4044_v57 = vpop.f32.mrf.mxu0  ;;  %4337 = vmatprep.subr.bf16.mxu0 %v6207_v51  ;;  %v6267_v40 = vld [vmem:[%s6571_s28 + $0x76c] ss:$16 sps:$4 sm:$0xff]   ;;  %v6268_v46 = vld [vmem:[%s6571_s28 + $0x968] ss:$16 sps:$4 sm:$0xff]  }
 0x19c   : > { %v4085_v58 = vpop.f32.mrf.mxu1  ;;  %4378 = vmatprep.subr.bf16.mxu1 %v6210_v61  ;;  %v6270_v33 = vld [vmem:[%s6571_s28 + $0x96c] ss:$16 sps:$4 sm:$0xff]   ;;  %v6271_v51 = vld [vmem:[%s6571_s28 + $0x748] ss:$16 sps:$4 sm:$0xff]  }
 0x19d   : > { %v6273_v47 = vld [vmem:[%s6571_s28 + $0x74c] ss:$16 sps:$4 sm:$0xff]   ;;  %v6274_v61 = vld [vmem:[%s6571_s28 + $0x948] ss:$16 sps:$4 sm:$0xff]  }
 0x19e   : > { %4338 = vmatpush1.bf16.msra.mxu0 %v6205_v54  ;;  %v6276_v48 = vld [vmem:[%s6571_s28 + $0x94c] ss:$16 sps:$4 sm:$0xff]   ;;  %v6277_v15 = vld [vmem:[%s6571_s28 + $0x728] ss:$16 sps:$4 sm:$0xff]  }
 0x19f   : > { %4379 = vmatpush1.bf16.msra.mxu1 %v6208_v36  ;;  %4339 = vmatprep.subr.bf16.mxu0 %v6213_v24  ;;  %v6279_v19 = vld [vmem:[%s6571_s28 + $0x72c] ss:$16 sps:$4 sm:$0xff]   ;;  %v6280_v54 = vld [vmem:[%s6571_s28 + $0x928] ss:$16 sps:$4 sm:$0xff]  }
 0x1a0   : > { %4380 = vmatprep.subr.bf16.mxu1 %v6216_v42  ;;  %v6282_v27 = vld [vmem:[%s6571_s28 + $0x92c] ss:$16 sps:$4 sm:$0xff]   ;;  %v6283_v58 = vld [vmem:[%s6571_s28 + $0x708] ss:$16 sps:$4 sm:$0xff]  }
 0x1a1   : > { %v6285_v36 = vld [vmem:[%s6571_s28 + $0x70c] ss:$16 sps:$4 sm:$0xff]   ;;  %v6286_v24 = vld [vmem:[%s6571_s28 + $0x908] ss:$16 sps:$4 sm:$0xff]  }
 0x1a2   : > { %4340 = vmatpush1.bf16.msra.mxu0 %v6211_v21  ;;  %v6288_v57 = vld [vmem:[%s6571_s28 + $0x90c] ss:$16 sps:$4 sm:$0xff]  }
 0x1a3   : > { %4381 = vmatpush1.bf16.msra.mxu1 %v6214_v59  ;;  %4341 = vmatprep.subr.bf16.mxu0 %v6219_v62  ;;  %v6291_v42 = vld [vmem:[%s6571_s28 + $0xaec] ss:$16 sps:$4 sm:$0xff]   ;;  %v6289_v59 = vld [vmem:[%s6571_s28 + $0xae8] ss:$16 sps:$4 sm:$0xff]  }
 0x1a4   : > { %4382 = vmatprep.subr.bf16.mxu1 %v6222_v63  ;;  %v6294_v21 = vld [vmem:[%s6571_s28 + $0xcec] ss:$16 sps:$4 sm:$0xff]   ;;  %v6292_v62 = vld [vmem:[%s6571_s28 + $0xce8] ss:$16 sps:$4 sm:$0xff]  }
 0x1a5   : > { %v6297_v63 = vld [vmem:[%s6571_s28 + $0xacc] ss:$16 sps:$4 sm:$0xff]  }
 0x1a6   : > { %4342 = vmatpush1.bf16.msra.mxu0 %v6217_v2  ;;  %v6300_v2 = vld [vmem:[%s6571_s28 + $0xccc] ss:$16 sps:$4 sm:$0xff]  }
 0x1a7   : > { %4383 = vmatpush1.bf16.msra.mxu1 %v6220_v3  ;;  %4343 = vmatprep.subr.bf16.mxu0 %v6225_v4 }
 0x1a8   : > { %4384 = vmatprep.subr.bf16.mxu1 %v6228_v5 }
 0x1aa   : > { %4344 = vmatpush1.bf16.msra.mxu0 %v6223_v6  ;;  %v6295_v6 = vld [vmem:[%s6571_s28 + $0xac8] ss:$16 sps:$4 sm:$0xff]  }
 0x1ab   : > { %4385 = vmatpush1.bf16.msra.mxu1 %v6226_v8  ;;  %4345 = vmatprep.subr.bf16.mxu0 %v6231_v50  ;;  %v6298_v8 = vld [vmem:[%s6571_s28 + $0xcc8] ss:$16 sps:$4 sm:$0xff]  }
 0x1ac   : > { %4386 = vmatprep.subr.bf16.mxu1 %v6234_v11 }
 0x1ae   : > { %4346 = vmatpush1.bf16.msra.mxu0 %v6229_v9  ;;  %v6303_v9 = vld [vmem:[%s6571_s28 + $0xaac] ss:$16 sps:$4 sm:$0xff]  }
 0x1af   : > { %4387 = vmatpush1.bf16.msra.mxu1 %v6232_v12  ;;  %4347 = vmatprep.subr.bf16.mxu0 %v6237_v13  ;;  %v6306_v12 = vld [vmem:[%s6571_s28 + $0xcac] ss:$16 sps:$4 sm:$0xff]  }
 0x1b0   : > { %4388 = vmatprep.subr.bf16.mxu1 %v6240_v16 }
 0x1b2   : > { %4348 = vmatpush1.bf16.msra.mxu0 %v6235_v41  ;;  %v6301_v41 = vld [vmem:[%s6571_s28 + $0xaa8] ss:$16 sps:$4 sm:$0xff]  }
 0x1b3   : > { %4389 = vmatpush1.bf16.msra.mxu1 %v6238_v20  ;;  %4349 = vmatprep.subr.bf16.mxu0 %v6243_v14  ;;  %v6304_v20 = vld [vmem:[%s6571_s28 + $0xca8] ss:$16 sps:$4 sm:$0xff]  }
 0x1b4   : > { %4390 = vmatprep.subr.bf16.mxu1 %v6246_v30 }
 0x1b6   : > { %4350 = vmatpush2.bf16.msra.mxu0 %v6241_v22  ;;  %v6310_v22 = vld [vmem:[%s6571_s28 + $0xc88] ss:$16 sps:$4 sm:$0xff]  }
 0x1b7   : > { %4391 = vmatpush2.bf16.msra.mxu1 %v6244_v25  ;;  %4351 = vmatprep.subr.bf16.mxu0 %v6249_v37  ;;  %v6315_v25 = vld [vmem:[%s6571_s28 + $0xa6c] ss:$16 sps:$4 sm:$0xff]  }
 0x1b8   : > { %4392 = vmatprep.subr.bf16.mxu1 %v6252_v1  ;;  %v6318_v37 = vld [vmem:[%s6571_s28 + $0xc6c] ss:$16 sps:$4 sm:$0xff]   ;;  %v6313_v1 = vld [vmem:[%s6571_s28 + $0xa68] ss:$16 sps:$4 sm:$0xff]  }
 0x1ba   : > { %4352 = vmatpush2.bf16.msra.mxu0 %v6247_v18  ;;  %v6316_v18 = vld [vmem:[%s6571_s28 + $0xc68] ss:$16 sps:$4 sm:$0xff]  }
 0x1bb   : > { %4393 = vmatpush2.bf16.msra.mxu1 %v6250_v26  ;;  %4353 = vmatprep.subr.bf16.mxu0 %v6255_v28  ;;  %v6321_v26 = vld [vmem:[%s6571_s28 + $0xa4c] ss:$16 sps:$4 sm:$0xff]  }
 0x1bc   : > { %4394 = vmatprep.subr.bf16.mxu1 %v6258_v29  ;;  %v6324_v28 = vld [vmem:[%s6571_s28 + $0xc4c] ss:$16 sps:$4 sm:$0xff]   ;;  %v6319_v29 = vld [vmem:[%s6571_s28 + $0xa48] ss:$16 sps:$4 sm:$0xff]  }
 0x1be   : > { %4354 = vmatpush2.bf16.msra.mxu0 %v6253_v32  ;;  %v6322_v32 = vld [vmem:[%s6571_s28 + $0xc48] ss:$16 sps:$4 sm:$0xff]  }
 0x1bf   : > { %4395 = vmatpush2.bf16.msra.mxu1 %v6256_v7  ;;  %4355 = vmatprep.subr.bf16.mxu0 %v6261_v34  ;;  %v6327_v7 = vld [vmem:[%s6571_s28 + $0xa2c] ss:$16 sps:$4 sm:$0xff]  }
 0x1c0   : > { %4396 = vmatprep.subr.bf16.mxu1 %v6264_v35  ;;  %v6330_v34 = vld [vmem:[%s6571_s28 + $0xc2c] ss:$16 sps:$4 sm:$0xff]   ;;  %v6325_v35 = vld [vmem:[%s6571_s28 + $0xa28] ss:$16 sps:$4 sm:$0xff]  }
 0x1c2   : > { %4356 = vmatpush2.bf16.msra.mxu0 %v6259_v38  ;;  %v6328_v38 = vld [vmem:[%s6571_s28 + $0xc28] ss:$16 sps:$4 sm:$0xff]  }
 0x1c3   : > { %4397 = vmatpush2.bf16.msra.mxu1 %v6262_v39  ;;  %4357 = vmatprep.subr.bf16.mxu0 %v6267_v40  ;;  %v6333_v39 = vld [vmem:[%s6571_s28 + $0xa0c] ss:$16 sps:$4 sm:$0xff]  }
 0x1c4   : > { %4398 = vmatprep.subr.bf16.mxu1 %v6270_v33  ;;  %v6336_v40 = vld [vmem:[%s6571_s28 + $0xc0c] ss:$16 sps:$4 sm:$0xff]   ;;  %v6331_v33 = vld [vmem:[%s6571_s28 + $0xa08] ss:$16 sps:$4 sm:$0xff]  }
 0x1c6   : > { %4358 = vmatpush2.bf16.msra.mxu0 %v6265_v45  ;;  %v6334_v45 = vld [vmem:[%s6571_s28 + $0xc08] ss:$16 sps:$4 sm:$0xff]  }
 0x1c7   : > { %4399 = vmatpush2.bf16.msra.mxu1 %v6268_v46  ;;  %4359 = vmatprep.subr.bf16.mxu0 %v6273_v47  ;;  %v6339_v46 = vld [vmem:[%s6571_s28 + $0xbec] ss:$16 sps:$4 sm:$0xff]  }
 0x1c8   : > { %4400 = vmatprep.subr.bf16.mxu1 %v6276_v48  ;;  %v6342_v47 = vld [vmem:[%s6571_s28 + $0xdec] ss:$16 sps:$4 sm:$0xff]   ;;  %v6337_v48 = vld [vmem:[%s6571_s28 + $0xbe8] ss:$16 sps:$4 sm:$0xff]  }
 0x1ca   : > { %4360 = vmatpush2.bf16.msra.mxu0 %v6271_v51  ;;  %v6340_v51 = vld [vmem:[%s6571_s28 + $0xde8] ss:$16 sps:$4 sm:$0xff]  }
 0x1cb   : > { %4401 = vmatpush2.bf16.msra.mxu1 %v6274_v61  ;;  %4361 = vmatprep.subr.bf16.mxu0 %v6279_v19  ;;  %v6345_v61 = vld [vmem:[%s6571_s28 + $0xbcc] ss:$16 sps:$4 sm:$0xff]  }
 0x1cc   : > { %4402 = vmatprep.subr.bf16.mxu1 %v6282_v27  ;;  %v6348_v19 = vld [vmem:[%s6571_s28 + $0xdcc] ss:$16 sps:$4 sm:$0xff]   ;;  %v6343_v27 = vld [vmem:[%s6571_s28 + $0xbc8] ss:$16 sps:$4 sm:$0xff]  }
 0x1ce   : > { %4362 = vmatpush2.bf16.msra.mxu0 %v6277_v15  ;;  %v6346_v15 = vld [vmem:[%s6571_s28 + $0xdc8] ss:$16 sps:$4 sm:$0xff]  }
 0x1cf   : > { %4403 = vmatpush2.bf16.msra.mxu1 %v6280_v54  ;;  %4363 = vmatprep.subr.bf16.mxu0 %v6285_v36  ;;  %v6351_v54 = vld [vmem:[%s6571_s28 + $0xbac] ss:$16 sps:$4 sm:$0xff]  }
 0x1d0   : > { %4404 = vmatprep.subr.bf16.mxu1 %v6288_v57  ;;  %v6354_v36 = vld [vmem:[%s6571_s28 + $0xdac] ss:$16 sps:$4 sm:$0xff]   ;;  %v6349_v57 = vld [vmem:[%s6571_s28 + $0xba8] ss:$16 sps:$4 sm:$0xff]  }
 0x1d2   : > { %4364 = vmatpush2.bf16.msra.mxu0 %v6283_v58  ;;  %v6352_v58 = vld [vmem:[%s6571_s28 + $0xda8] ss:$16 sps:$4 sm:$0xff]  }
 0x1d3   : > { %4405 = vmatpush2.bf16.msra.mxu1 %v6286_v24  ;;  %4415 = vmatprep.subr.bf16.mxu0 %v6291_v42  ;;  %v6357_v24 = vld [vmem:[%s6571_s28 + $0xb8c] ss:$16 sps:$4 sm:$0xff]  }
 0x1d4   : > { %4456 = vmatprep.subr.bf16.mxu1 %v6294_v21  ;;  %v6360_v42 = vld [vmem:[%s6571_s28 + $0xd8c] ss:$16 sps:$4 sm:$0xff]   ;;  %v6355_v21 = vld [vmem:[%s6571_s28 + $0xb88] ss:$16 sps:$4 sm:$0xff]  }
 0x1d5   : > { %v4121_v3 = vpop.f32.mrf.mxu0  ;;  %4366 = vmatmul.mubr.bf16.vlgmr.msra.gmra.mxu0 %v6749_v31 }
 0x1d6   : > { %v4162_v4 = vpop.f32.mrf.mxu1  ;;  %4407 = vmatmul.mubr.bf16.vlgmr.msra.gmra.mxu1 %v6840_v49  ;;  %v4122_v5 = vadd.f32 %v4121_v3, %v7102_v52  ;;  %4416 = vmatpush1.bf16.msra.mxu0 %v6289_v59  ;;  %v6358_v59 = vld [vmem:[%s6571_s28 + $0xd88] ss:$16 sps:$4 sm:$0xff]  }
 0x1d7   : > { %4457 = vmatpush1.bf16.msra.mxu1 %v6292_v62  ;;  %v4123_v50 = vpop.f32.mrf.mxu0  ;;  %4417 = vmatprep.subr.bf16.mxu0 %v6297_v63  ;;  %v6363_v62 = vld [vmem:[%s6571_s28 + $0xb6c] ss:$16 sps:$4 sm:$0xff]   ;;  %v6364_v3 = vld [vmem:[%s6571_s28 + $0xd68] ss:$16 sps:$4 sm:$0xff]  }
 0x1d8   : > { %v4164_v11 = vpop.f32.mrf.mxu1  ;;  %4458 = vmatprep.subr.bf16.mxu1 %v6300_v2  ;;  %v7176_v13 = vadd.f32 %v4162_v4, %v4122_v5  ;;  %v4124_v31 = vadd.f32 %v4123_v50, %v7107_v53  ;;  %4447 = vmatprep.mubr.bf16.mxu0 %v6776_v43  ;;  %v6309_v43 = vld [vmem:[%s6571_s28 + $0xa8c] ss:$16 sps:$4 sm:$0xff]   ;;  %v6307_v53 = vld [vmem:[%s6571_s28 + $0xa88] ss:$16 sps:$4 sm:$0xff]  }
 0x1d9   : > { %4488 = vmatprep.mubr.bf16.mxu1 %v6847_v55  ;;  %v4125_v49 = vpop.f32.mrf.mxu0  ;;  %v6312_v55 = vld [vmem:[%s6571_s28 + $0xc8c] ss:$16 sps:$4 sm:$0xff]   ;;  %v6361_v2 = vld [vmem:[%s6571_s28 + $0xb68] ss:$16 sps:$4 sm:$0xff]  }
 0x1da   : > { %v4166_v52 = vpop.f32.mrf.mxu1  ;;  %v7181_v16 = vadd.f32 %v4164_v11, %v4124_v31  ;;  %4418 = vmatpush1.bf16.msra.mxu0 %v6295_v6  ;;  %v6366_v63 = vld [vmem:[%s6571_s28 + $0xd6c] ss:$16 sps:$4 sm:$0xff]   ;;  %v6367_v6 = vld [vmem:[%s6571_s28 + $0xb48] ss:$16 sps:$4 sm:$0xff]  }
 0x1db   : > { %4459 = vmatpush1.bf16.msra.mxu1 %v6298_v8  ;;  %v4126_v14 = vpop.f32.mrf.mxu0  ;;  %4419 = vmatprep.subr.bf16.mxu0 %v6303_v9  ;;  %v6369_v4 = vld [vmem:[%s6571_s28 + $0xb4c] ss:$16 sps:$4 sm:$0xff]   ;;  %v6370_v8 = vld [vmem:[%s6571_s28 + $0xd48] ss:$16 sps:$4 sm:$0xff]  }
 0x1dc   : > { %v4167_v30 = vpop.f32.mrf.mxu1  ;;  %4460 = vmatprep.subr.bf16.mxu1 %v6306_v12  ;;  %v6372_v5 = vld [vmem:[%s6571_s28 + $0xd4c] ss:$16 sps:$4 sm:$0xff]   ;;  %v6373_v9 = vld [vmem:[%s6571_s28 + $0xb28] ss:$16 sps:$4 sm:$0xff]  }
 0x1dd   : > { %v6375_v50 = vld [vmem:[%s6571_s28 + $0xb2c] ss:$16 sps:$4 sm:$0xff]   ;;  %v6376_v12 = vld [vmem:[%s6571_s28 + $0xd28] ss:$16 sps:$4 sm:$0xff]  }
 0x1de   : > { %4420 = vmatpush1.bf16.msra.mxu0 %v6301_v41  ;;  %v6378_v11 = vld [vmem:[%s6571_s28 + $0xd2c] ss:$16 sps:$4 sm:$0xff]   ;;  %v6379_v52 = vld [vmem:[%s6571_s28 + $0xb08] ss:$16 sps:$4 sm:$0xff]  }
 0x1df   : > { %4461 = vmatpush1.bf16.msra.mxu1 %v6304_v20  ;;  %4421 = vmatprep.subr.bf16.mxu0 %v6309_v43  ;;  %v6381_v31 = vld [vmem:[%s6571_s28 + $0xb0c] ss:$16 sps:$4 sm:$0xff]   ;;  %v6382_v41 = vld [vmem:[%s6571_s28 + $0xd08] ss:$16 sps:$4 sm:$0xff]  }
 0x1e0   : > { %4462 = vmatprep.subr.bf16.mxu1 %v6312_v55  ;;  %v6384_v49 = vld [vmem:[%s6571_s28 + $0xd0c] ss:$16 sps:$4 sm:$0xff]   ;;  %v6385_v30 = vld [vmem:[%s6571_s28 + $0xee8] ss:$16 sps:$4 sm:$0xff]  }
 0x1e1   : > { %v6387_v20 = vld [vmem:[%s6571_s28 + $0xeec] ss:$16 sps:$4 sm:$0xff]   ;;  %v6388_v43 = vld [vmem:[%s6571_s28 + $0x10e8] ss:$16 sps:$4 sm:$0xff]  }
 0x1e2   : > { %4422 = vmatpush1.bf16.msra.mxu0 %v6307_v53  ;;  %v6390_v14 = vld [vmem:[%s6571_s28 + $0x10ec] ss:$16 sps:$4 sm:$0xff]  }
 0x1e3   : > { %4463 = vmatpush1.bf16.msra.mxu1 %v6310_v22  ;;  %4423 = vmatprep.subr.bf16.mxu0 %v6315_v25  ;;  %v6393_v55 = vld [vmem:[%s6571_s28 + $0xecc] ss:$16 sps:$4 sm:$0xff]  }
 0x1e4   : > { %4464 = vmatprep.subr.bf16.mxu1 %v6318_v37  ;;  %v6396_v53 = vld [vmem:[%s6571_s28 + $0x10cc] ss:$16 sps:$4 sm:$0xff]  }
 0x1e6   : > { %4424 = vmatpush1.bf16.msra.mxu0 %v6313_v1  ;;  %v6391_v1 = vld [vmem:[%s6571_s28 + $0xec8] ss:$16 sps:$4 sm:$0xff]  }
 0x1e7   : > { %4465 = vmatpush1.bf16.msra.mxu1 %v6316_v18  ;;  %4425 = vmatprep.subr.bf16.mxu0 %v6321_v26  ;;  %v6394_v18 = vld [vmem:[%s6571_s28 + $0x10c8] ss:$16 sps:$4 sm:$0xff]  }
 0x1e8   : > { %4466 = vmatprep.subr.bf16.mxu1 %v6324_v28 }
 0x1ea   : > { %4426 = vmatpush1.bf16.msra.mxu0 %v6319_v29  ;;  %v6399_v29 = vld [vmem:[%s6571_s28 + $0xeac] ss:$16 sps:$4 sm:$0xff]  }
 0x1eb   : > { %4467 = vmatpush1.bf16.msra.mxu1 %v6322_v32  ;;  %4427 = vmatprep.subr.bf16.mxu0 %v6327_v7  ;;  %v6402_v32 = vld [vmem:[%s6571_s28 + $0x10ac] ss:$16 sps:$4 sm:$0xff]  }
 0x1ec   : > { %4468 = vmatprep.subr.bf16.mxu1 %v6330_v34  ;;  %v6397_v34 = vld [vmem:[%s6571_s28 + $0xea8] ss:$16 sps:$4 sm:$0xff]  }
 0x1ee   : > { %4428 = vmatpush1.bf16.msra.mxu0 %v6325_v35  ;;  %v6400_v35 = vld [vmem:[%s6571_s28 + $0x10a8] ss:$16 sps:$4 sm:$0xff]  }
 0x1ef   : > { %4469 = vmatpush1.bf16.msra.mxu1 %v6328_v38  ;;  %4429 = vmatprep.subr.bf16.mxu0 %v6333_v39  ;;  %v6403_v39 = vld [vmem:[%s6571_s28 + $0xe88] ss:$16 sps:$4 sm:$0xff]  }
 0x1f0   : > { %4470 = vmatprep.subr.bf16.mxu1 %v6336_v40  ;;  %v6406_v40 = vld [vmem:[%s6571_s28 + $0x1088] ss:$16 sps:$4 sm:$0xff]  }
 0x1f2   : > { %4430 = vmatpush1.bf16.msra.mxu0 %v6331_v33  ;;  %v6411_v33 = vld [vmem:[%s6571_s28 + $0xe6c] ss:$16 sps:$4 sm:$0xff]  }
 0x1f3   : > { %4471 = vmatpush1.bf16.msra.mxu1 %v6334_v45  ;;  %4431 = vmatprep.subr.bf16.mxu0 %v6339_v46  ;;  %v6414_v45 = vld [vmem:[%s6571_s28 + $0x106c] ss:$16 sps:$4 sm:$0xff]   ;;  %v6409_v46 = vld [vmem:[%s6571_s28 + $0xe68] ss:$16 sps:$4 sm:$0xff]  }
 0x1f4   : > { %4472 = vmatprep.subr.bf16.mxu1 %v6342_v47  ;;  %v6412_v47 = vld [vmem:[%s6571_s28 + $0x1068] ss:$16 sps:$4 sm:$0xff]  }
 0x1f6   : > { %4432 = vmatpush2.bf16.msra.mxu0 %v6337_v48  ;;  %v6417_v48 = vld [vmem:[%s6571_s28 + $0xe4c] ss:$16 sps:$4 sm:$0xff]  }
 0x1f7   : > { %4473 = vmatpush2.bf16.msra.mxu1 %v6340_v51  ;;  %4433 = vmatprep.subr.bf16.mxu0 %v6345_v61  ;;  %v6420_v51 = vld [vmem:[%s6571_s28 + $0x104c] ss:$16 sps:$4 sm:$0xff]   ;;  %v6415_v61 = vld [vmem:[%s6571_s28 + $0xe48] ss:$16 sps:$4 sm:$0xff]  }
 0x1f8   : > { %4474 = vmatprep.subr.bf16.mxu1 %v6348_v19  ;;  %v6418_v19 = vld [vmem:[%s6571_s28 + $0x1048] ss:$16 sps:$4 sm:$0xff]  }
 0x1fa   : > { %4434 = vmatpush2.bf16.msra.mxu0 %v6343_v27  ;;  %v6423_v27 = vld [vmem:[%s6571_s28 + $0xe2c] ss:$16 sps:$4 sm:$0xff]  }
 0x1fb   : > { %4475 = vmatpush2.bf16.msra.mxu1 %v6346_v15  ;;  %4435 = vmatprep.subr.bf16.mxu0 %v6351_v54  ;;  %v6426_v15 = vld [vmem:[%s6571_s28 + $0x102c] ss:$16 sps:$4 sm:$0xff]   ;;  %v6421_v54 = vld [vmem:[%s6571_s28 + $0xe28] ss:$16 sps:$4 sm:$0xff]  }
 0x1fc   : > { %4476 = vmatprep.subr.bf16.mxu1 %v6354_v36  ;;  %v6424_v36 = vld [vmem:[%s6571_s28 + $0x1028] ss:$16 sps:$4 sm:$0xff]  }
 0x1fe   : > { %4436 = vmatpush2.bf16.msra.mxu0 %v6349_v57  ;;  %v6429_v57 = vld [vmem:[%s6571_s28 + $0xe0c] ss:$16 sps:$4 sm:$0xff]  }
 0x1ff   : > { %4477 = vmatpush2.bf16.msra.mxu1 %v6352_v58  ;;  %4437 = vmatprep.subr.bf16.mxu0 %v6357_v24  ;;  %v6432_v58 = vld [vmem:[%s6571_s28 + $0x100c] ss:$16 sps:$4 sm:$0xff]   ;;  %v6427_v24 = vld [vmem:[%s6571_s28 + $0xe08] ss:$16 sps:$4 sm:$0xff]  }
 0x200   : > { %4478 = vmatprep.subr.bf16.mxu1 %v6360_v42  ;;  %v6430_v42 = vld [vmem:[%s6571_s28 + $0x1008] ss:$16 sps:$4 sm:$0xff]  }
 0x202   : > { %4438 = vmatpush2.bf16.msra.mxu0 %v6355_v21  ;;  %v6435_v21 = vld [vmem:[%s6571_s28 + $0xfec] ss:$16 sps:$4 sm:$0xff]  }
 0x203   : > { %4479 = vmatpush2.bf16.msra.mxu1 %v6358_v59  ;;  %4439 = vmatprep.subr.bf16.mxu0 %v6363_v62  ;;  %v6438_v59 = vld [vmem:[%s6571_s28 + $0x11ec] ss:$16 sps:$4 sm:$0xff]   ;;  %v6433_v62 = vld [vmem:[%s6571_s28 + $0xfe8] ss:$16 sps:$4 sm:$0xff]  }
 0x204   : > { %4480 = vmatprep.subr.bf16.mxu1 %v6366_v63  ;;  %v6436_v63 = vld [vmem:[%s6571_s28 + $0x11e8] ss:$16 sps:$4 sm:$0xff]  }
 0x206   : > { %4440 = vmatpush2.bf16.msra.mxu0 %v6361_v2  ;;  %v6441_v2 = vld [vmem:[%s6571_s28 + $0xfcc] ss:$16 sps:$4 sm:$0xff]  }
 0x207   : > { %4481 = vmatpush2.bf16.msra.mxu1 %v6364_v3  ;;  %4441 = vmatprep.subr.bf16.mxu0 %v6369_v4  ;;  %v6444_v3 = vld [vmem:[%s6571_s28 + $0x11cc] ss:$16 sps:$4 sm:$0xff]   ;;  %v6439_v4 = vld [vmem:[%s6571_s28 + $0xfc8] ss:$16 sps:$4 sm:$0xff]  }
 0x208   : > { %4482 = vmatprep.subr.bf16.mxu1 %v6372_v5  ;;  %v6442_v5 = vld [vmem:[%s6571_s28 + $0x11c8] ss:$16 sps:$4 sm:$0xff]  }
 0x20a   : > { %4442 = vmatpush2.bf16.msra.mxu0 %v6367_v6  ;;  %v6447_v6 = vld [vmem:[%s6571_s28 + $0xfac] ss:$16 sps:$4 sm:$0xff]  }
 0x20b   : > { %4483 = vmatpush2.bf16.msra.mxu1 %v6370_v8  ;;  %4443 = vmatprep.subr.bf16.mxu0 %v6375_v50  ;;  %v6450_v8 = vld [vmem:[%s6571_s28 + $0x11ac] ss:$16 sps:$4 sm:$0xff]   ;;  %v6445_v50 = vld [vmem:[%s6571_s28 + $0xfa8] ss:$16 sps:$4 sm:$0xff]  }
 0x20c   : > { %4484 = vmatprep.subr.bf16.mxu1 %v6378_v11  ;;  %v6448_v11 = vld [vmem:[%s6571_s28 + $0x11a8] ss:$16 sps:$4 sm:$0xff]  }
 0x20e   : > { %4444 = vmatpush2.bf16.msra.mxu0 %v6373_v9  ;;  %v6453_v9 = vld [vmem:[%s6571_s28 + $0xf8c] ss:$16 sps:$4 sm:$0xff]  }
 0x20f   : > { %4485 = vmatpush2.bf16.msra.mxu1 %v6376_v12  ;;  %4445 = vmatprep.subr.bf16.mxu0 %v6381_v31  ;;  %v6456_v12 = vld [vmem:[%s6571_s28 + $0x118c] ss:$16 sps:$4 sm:$0xff]   ;;  %v6451_v31 = vld [vmem:[%s6571_s28 + $0xf88] ss:$16 sps:$4 sm:$0xff]  }
 0x210   : > { %4486 = vmatprep.subr.bf16.mxu1 %v6384_v49  ;;  %v6454_v49 = vld [vmem:[%s6571_s28 + $0x1188] ss:$16 sps:$4 sm:$0xff]  }
 0x212   : > { %4446 = vmatpush2.bf16.msra.mxu0 %v6379_v52  ;;  %v6459_v52 = vld [vmem:[%s6571_s28 + $0xf6c] ss:$16 sps:$4 sm:$0xff]  }
 0x213   : > { %4487 = vmatpush2.bf16.msra.mxu1 %v6382_v41  ;;  %4497 = vmatprep.subr.bf16.mxu0 %v6387_v20  ;;  %v6462_v41 = vld [vmem:[%s6571_s28 + $0x116c] ss:$16 sps:$4 sm:$0xff]   ;;  %v6457_v20 = vld [vmem:[%s6571_s28 + $0xf68] ss:$16 sps:$4 sm:$0xff]  }
 0x214   : > { %4538 = vmatprep.subr.bf16.mxu1 %v6390_v14  ;;  %v6460_v14 = vld [vmem:[%s6571_s28 + $0x1168] ss:$16 sps:$4 sm:$0xff]  }
 0x215   : > { %v4203_v22 = vpop.f32.mrf.mxu0  ;;  %4448 = vmatmul.mubr.bf16.vlgmr.msra.gmra.mxu0 %v6851_v56 }
 0x216   : > { %v7243_v25 = vpop.f32.mrf.mxu1  ;;  %4489 = vmatmul.mubr.bf16.vlgmr.msra.gmra.mxu1 %v6924_v10  ;;  %v7248_v37 = vadd.f32 %v4203_v22, %v7176_v13  ;;  %4498 = vmatpush1.bf16.msra.mxu0 %v6385_v30  ;;  %v6465_v30 = vld [vmem:[%s6571_s28 + $0xf4c] ss:$16 sps:$4 sm:$0xff]  }
 0x217   : > { %4539 = vmatpush1.bf16.msra.mxu1 %v6388_v43  ;;  %v4205_v26 = vpop.f32.mrf.mxu0  ;;  %4499 = vmatprep.subr.bf16.mxu0 %v6393_v55  ;;  %v6468_v43 = vld [vmem:[%s6571_s28 + $0x114c] ss:$16 sps:$4 sm:$0xff]   ;;  %v6463_v55 = vld [vmem:[%s6571_s28 + $0xf48] ss:$16 sps:$4 sm:$0xff]  }
 0x218   : > { %v7252_v28 = vpop.f32.mrf.mxu1  ;;  %4540 = vmatprep.subr.bf16.mxu1 %v6396_v53  ;;  %v7257_v56 = vadd.f32 %v4205_v26, %v7181_v16  ;;  %4529 = vmatprep.mubr.bf16.mxu0 %v6859_v60  ;;  %v6405_v60 = vld [vmem:[%s6571_s28 + $0xe8c] ss:$16 sps:$4 sm:$0xff]   ;;  %v6466_v53 = vld [vmem:[%s6571_s28 + $0x1148] ss:$16 sps:$4 sm:$0xff]  }
 0x219   : > { %4570 = vmatprep.mubr.bf16.mxu1 %v6943_v23  ;;  %v4207_v10 = vpop.f32.mrf.mxu0  ;;  %v6408_v23 = vld [vmem:[%s6571_s28 + $0x108c] ss:$16 sps:$4 sm:$0xff]   ;;  %v6472_v26 = vld [vmem:[%s6571_s28 + $0x1128] ss:$16 sps:$4 sm:$0xff]  }
 0x21a   : > { %v4248_v13 = vpop.f32.mrf.mxu1  ;;  %v4583_v7 = vcombine.low %v7248_v37, %v7257_v56  ;;  %4500 = vmatpush1.bf16.msra.mxu0 %v6391_v1  ;;  %v6471_v22 = vld [vmem:[%s6571_s28 + $0xf2c] ss:$16 sps:$4 sm:$0xff]   ;;  %v6475_v10 = vld [vmem:[%s6571_s28 + $0xf08] ss:$16 sps:$4 sm:$0xff]  }
 0x21b   : > { %4541 = vmatpush1.bf16.msra.mxu1 %v6394_v18  ;;  %v4208_v38 = vpop.f32.mrf.mxu0  ;;  %4501 = vmatprep.subr.bf16.mxu0 %v6399_v29  ;;  %v6474_v1 = vld [vmem:[%s6571_s28 + $0x112c] ss:$16 sps:$4 sm:$0xff]   ;;  %v6469_v18 = vld [vmem:[%s6571_s28 + $0xf28] ss:$16 sps:$4 sm:$0xff]  }
 0x21c   : > { %v4249_v16 = vpop.f32.mrf.mxu1  ;;  %4542 = vmatprep.subr.bf16.mxu1 %v6402_v32  ;;  %v6477_v29 = vld [vmem:[%s6571_s28 + $0xf0c] ss:$16 sps:$4 sm:$0xff]   ;;  %v6478_v13 = vld [vmem:[%s6571_s28 + $0x1108] ss:$16 sps:$4 sm:$0xff]  }
 0x21d   : > { %v6480_v32 = vld [vmem:[%s6571_s28 + $0x110c] ss:$16 sps:$4 sm:$0xff]  }
 0x21e   : > { %4502 = vmatpush1.bf16.msra.mxu0 %v6397_v34 }
 0x21f   : > { %4543 = vmatpush1.bf16.msra.mxu1 %v6400_v35  ;;  %4503 = vmatprep.subr.bf16.mxu0 %v6405_v60 }
 0x220   : > { %4544 = vmatprep.subr.bf16.mxu1 %v6408_v23 }
 0x222   : > { %4504 = vmatpush1.bf16.msra.mxu0 %v6403_v39 }
 0x223   : > { %4545 = vmatpush1.bf16.msra.mxu1 %v6406_v40  ;;  %4505 = vmatprep.subr.bf16.mxu0 %v6411_v33 }
 0x224   : > { %4546 = vmatprep.subr.bf16.mxu1 %v6414_v45 }
 0x226   : > { %4506 = vmatpush1.bf16.msra.mxu0 %v6409_v46 }
 0x227   : > { %4547 = vmatpush1.bf16.msra.mxu1 %v6412_v47  ;;  %4507 = vmatprep.subr.bf16.mxu0 %v6417_v48 }
 0x228   : > { %4548 = vmatprep.subr.bf16.mxu1 %v6420_v51 }
 0x22a   : > { %4508 = vmatpush1.bf16.msra.mxu0 %v6415_v61 }
 0x22b   : > { %4549 = vmatpush1.bf16.msra.mxu1 %v6418_v19  ;;  %4509 = vmatprep.subr.bf16.mxu0 %v6423_v27 }
 0x22c   : > { %4550 = vmatprep.subr.bf16.mxu1 %v6426_v15 }
 0x22e   : > { %4510 = vmatpush1.bf16.msra.mxu0 %v6421_v54 }
 0x22f   : > { %4551 = vmatpush1.bf16.msra.mxu1 %v6424_v36  ;;  %4511 = vmatprep.subr.bf16.mxu0 %v6429_v57 }
 0x230   : > { %4552 = vmatprep.subr.bf16.mxu1 %v6432_v58 }
 0x232   : > { %4512 = vmatpush1.bf16.msra.mxu0 %v6427_v24 }
 0x233   : > { %4553 = vmatpush1.bf16.msra.mxu1 %v6430_v42  ;;  %4513 = vmatprep.subr.bf16.mxu0 %v6435_v21 }
 0x234   : > { %4554 = vmatprep.subr.bf16.mxu1 %v6438_v59 }
 0x236   : > { %4514 = vmatpush2.bf16.msra.mxu0 %v6433_v62 }
 0x237   : > { %4555 = vmatpush2.bf16.msra.mxu1 %v6436_v63  ;;  %4515 = vmatprep.subr.bf16.mxu0 %v6441_v2 }
 0x238   : > { %4556 = vmatprep.subr.bf16.mxu1 %v6444_v3 }
 0x23a   : > { %4516 = vmatpush2.bf16.msra.mxu0 %v6439_v4  ;;  %v6519_v4 = vmov 1983009808  }
 0x23b   : > { %4557 = vmatpush2.bf16.msra.mxu1 %v6442_v5  ;;  %4517 = vmatprep.subr.bf16.mxu0 %v6447_v6  ;;  %v4586_v5 = vunpack.c.l.s4 %v6519_v4 }
 0x23c   : > { %4558 = vmatprep.subr.bf16.mxu1 %v6450_v8 }
 0x23e   : > { %4518 = vmatpush2.bf16.msra.mxu0 %v6445_v50 }
 0x23f   : > { %4559 = vmatpush2.bf16.msra.mxu1 %v6448_v11  ;;  %4519 = vmatprep.subr.bf16.mxu0 %v6453_v9  ;;  %v4587_v11 = vunpack.c.0.s8 %v4586_v5 }
 0x240   : > { %4560 = vmatprep.subr.bf16.mxu1 %v6456_v12 }
 0x242   : > { %4520 = vmatpush2.bf16.msra.mxu0 %v6451_v31 }
 0x243   : > { %4561 = vmatpush2.bf16.msra.mxu1 %v6454_v49  ;;  %4521 = vmatprep.subr.bf16.mxu0 %v6459_v52 }
 0x244   : > { %4562 = vmatprep.subr.bf16.mxu1 %v6462_v41 }
 0x246   : > { %4522 = vmatpush2.bf16.msra.mxu0 %v6457_v20 }
 0x247   : > { %4563 = vmatpush2.bf16.msra.mxu1 %v6460_v14  ;;  %4523 = vmatprep.subr.bf16.mxu0 %v6465_v30  ;;  %v7322_v14 = vsub.s32 %v4587_v11, %v6613_v44 }
 0x248   : > { %4564 = vmatprep.subr.bf16.mxu1 %v6468_v43 }
 0x24a   : > { %4524 = vmatpush2.bf16.msra.mxu0 %v6463_v55 }
 0x24b   : > { %4565 = vmatpush2.bf16.msra.mxu1 %v6466_v53  ;;  %4525 = vmatprep.subr.bf16.mxu0 %v6471_v22 }
 0x24c   : > { %4566 = vmatprep.subr.bf16.mxu1 %v6474_v1  ;;  %v4591_v1 = vrot.slane %v4583_v7, %v7322_v14 }
 0x24e   : > { %4526 = vmatpush2.bf16.msra.mxu0 %v6469_v18 }
 0x24f   : > { %4567 = vmatpush2.bf16.msra.mxu1 %v6472_v26  ;;  %4527 = vmatprep.subr.bf16.mxu0 %v6477_v29  ;;  %v240_v26 = vld [vmem:[#allocation2] sm:$0xff] }
 0x250   : > { %4568 = vmatprep.subr.bf16.mxu1 %v6480_v32 }
 0x252   : > { %4528 = vmatpush2.bf16.msra.mxu0 %v6475_v10 }
 0x253   : > { %4569 = vmatpush2.bf16.msra.mxu1 %v6478_v13 }
 0x255   : > { %v4285_v34 = vpop.f32.mrf.mxu0  ;;  %4530 = vmatmul.mubr.bf16.vlgmr.msra.gmra.mxu0 %v6936_v17 }
 0x256   : > { %v4326_v35 = vpop.f32.mrf.mxu1  ;;  %4571 = vmatmul.mubr.bf16.vlgmr.msra.gmra.mxu1 %v7017_v0  ;;  %v4286_v38 = vadd.f32 %v4285_v34, %v7243_v25 }
 0x257   : > { %v4287_v16 = vpop.f32.mrf.mxu0 }
 0x258   : > { %v4328_v60 = vpop.f32.mrf.mxu1  ;;  %v4327_v23 = vadd.f32 %v4326_v35, %v4286_v38  ;;  %v4288_v39 = vadd.f32 %v4287_v16, %v7252_v28 }
 0x259   : > { %v4289_v40 = vpop.f32.mrf.mxu0 }
 0x25a   : > { %v4330_v33 = vpop.f32.mrf.mxu1  ;;  %v4329_v45 = vadd.f32 %v4328_v60, %v4288_v39 }
 0x25b   : > { %v4290_v46 = vpop.f32.mrf.mxu0 }
 0x25c   : > { %v4331_v47 = vpop.f32.mrf.mxu1 }
 0x295   : > { %v4367_v48 = vpop.f32.mrf.mxu0 }
 0x296   : > { %v4408_v51 = vpop.f32.mrf.mxu1  ;;  %v4368_v61 = vadd.f32 %v4367_v48, %v4327_v23 }
 0x297   : > { %v4369_v19 = vpop.f32.mrf.mxu0 }
 0x298   : > { %v4410_v27 = vpop.f32.mrf.mxu1  ;;  %v4409_v17 = vadd.f32 %v4408_v51, %v4368_v61  ;;  %v4370_v15 = vadd.f32 %v4369_v19, %v4329_v45 }
 0x299   : > { %v4371_v0 = vpop.f32.mrf.mxu0 }
 0x29a   : > { %v4412_v54 = vpop.f32.mrf.mxu1  ;;  %v4411_v25 = vadd.f32 %v4410_v27, %v4370_v15 }
 0x29b   : > { %v4372_v36 = vpop.f32.mrf.mxu0 }
 0x29c   : > { %v4413_v57 = vpop.f32.mrf.mxu1 }
 0x2d5   : > { %v4449_v58 = vpop.f32.mrf.mxu0 }
 0x2d6   : > { %v4490_v24 = vpop.f32.mrf.mxu1  ;;  %v4450_v28 = vadd.f32 %v4449_v58, %v4409_v17 }
 0x2d7   : > { %v4451_v42 = vpop.f32.mrf.mxu0 }
 0x2d8   : > { %v4492_v21 = vpop.f32.mrf.mxu1  ;;  %v4491_v59 = vadd.f32 %v4490_v24, %v4450_v28  ;;  %v4452_v6 = vadd.f32 %v4451_v42, %v4411_v25 }
 0x2d9   : > { %v4453_v62 = vpop.f32.mrf.mxu0 }
 0x2da   : > { %v4494_v63 = vpop.f32.mrf.mxu1  ;;  %v4493_v9 = vadd.f32 %v4492_v21, %v4452_v6 }
 0x2db   : > { %v4454_v2 = vpop.f32.mrf.mxu0 }
 0x2dc   : > { %v4495_v3 = vpop.f32.mrf.mxu1 }
 0x315   : > { %v4531_v8 = vpop.f32.mrf.mxu0 }
 0x316   : > { %v4572_v50 = vpop.f32.mrf.mxu1  ;;  %v4532_v12 = vadd.f32 %v4531_v8, %v4491_v59 }
 0x317   : > { %v4533_v31 = vpop.f32.mrf.mxu0 }
 0x318   : > { %v4574_v49 = vpop.f32.mrf.mxu1  ;;  %v4534_v52 = vadd.f32 %v4533_v31, %v4493_v9  ;;  %v4573_v30 = vadd.f32 %v4572_v50, %v4532_v12 }
 0x319   : > { %v4535_v41 = vpop.f32.mrf.mxu0 }
 0x31a   : > { %v4576_v20 = vpop.f32.mrf.mxu1  ;;  %v4575_v43 = vadd.f32 %v4574_v49, %v4534_v52 }
 0x31b   : > { %v4536_v55 = vpop.f32.mrf.mxu0 }
 0x31c   : > { %v4577_v53 = vpop.f32.mrf.mxu1  ;;  %v4584_v22 = vcombine.low %v4573_v30, %v4575_v43 }
 0x31e   : > { %v4598_v18 = vrot.slane %v4584_v22, %v7322_v14 }
 0x320   : > { %v4599_v29 = vcombine.low %v4591_v1, %v4598_v18  ;;  %4606 = sbr.rel (%p5520_p6) target bundleno = 1042 (0x412), region = 48 }
 0x322   : > { %v4601_v32 = vadd.f32 %v4599_v29, %v240_v26 }
 0x324   : > { %4602 = vst [vmem:[#allocation2] sm:$0xff] %v4601_v32 }
 0x325   : > { %v4677_v10 = vld [vmem:[%s7554_s3 + $0xf8] sm:$0xff]  ;;  %v4676_v7 = vld [vmem:[%s7554_s3 + $0xf0] sm:$0xff]  ;;  %v4675_v16 = vld [vmem:[%s7554_s3 + $0xe8] sm:$0xff]  ;;  %v4612_v8 = vsub.s32 0, %v6613_v44  ;;  %v4616_v50 = vsub.s32 1, %v6613_v44  ;;  %v4620_v11 = vsub.s32 2, %v6613_v44 }
 0x326   : > { %v4709_v13 = vld [vmem:[%s7554_s3 + $0x1f8] sm:$0xff]  ;;  %5527 = vmatprep.subr.mxu0 %v4677_v10  ;;  %v4708_v34 = vld [vmem:[%s7554_s3 + $0x1f0] sm:$0xff]  ;;  %v4707_v60 = vld [vmem:[%s7554_s3 + $0x1e8] sm:$0xff]  ;;  %v4624_v31 = vsub.s32 3, %v6613_v44  ;;  %vm4879_vm0 = vcmask 9216  }
 0x327   : > { %v4661_v37 = vld [vmem:[%s7554_s3 + $0x78] sm:$0xff]  ;;  %5562 = vmatprep.subr.mxu1 %v4709_v13  ;;  %v4660_v35 = vld [vmem:[%s7554_s3 + $0x70] sm:$0xff]  ;;  %v4659_v23 = vld [vmem:[%s7554_s3 + $0x68] sm:$0xff] }
 0x328   : > { %v4693_v56 = vld [vmem:[%s7554_s3 + $0x178] sm:$0xff]  ;;  %5528 = vmatpush3.msra.mxu0 %v4661_v37  ;;  %v4692_v38 = vld [vmem:[%s7554_s3 + $0x170] sm:$0xff]  ;;  %v4691_v39 = vld [vmem:[%s7554_s3 + $0x168] sm:$0xff] }
 0x329   : > { %5563 = vmatpush3.msra.mxu1 %v4693_v56  ;;  %5529 = vmatprep.subr.mxu0 %v4676_v7  ;;  %v4674_v40 = vld [vmem:[%s7554_s3 + $0xe0] sm:$0xff]  ;;  %v4673_v47 = vld [vmem:[%s7554_s3 + $0xd8] sm:$0xff]  ;;  %v4672_v19 = vld [vmem:[%s7554_s3 + $0xd0] sm:$0xff] }
 0x32a   : > { %5564 = vmatprep.subr.mxu1 %v4708_v34  ;;  %5530 = vmatpush3.msra.mxu0 %v4660_v35  ;;  %v4706_v33 = vld [vmem:[%s7554_s3 + $0x1e0] sm:$0xff]  ;;  %v4705_v48 = vld [vmem:[%s7554_s3 + $0x1d8] sm:$0xff]  ;;  %v4704_v27 = vld [vmem:[%s7554_s3 + $0x1d0] sm:$0xff] }
 0x32b   : > { %5565 = vmatpush3.msra.mxu1 %v4692_v38  ;;  %5531 = vmatprep.subr.mxu0 %v4675_v16  ;;  %v4658_v45 = vld [vmem:[%s7554_s3 + $0x60] sm:$0xff]  ;;  %v4657_v51 = vld [vmem:[%s7554_s3 + $0x58] sm:$0xff]  ;;  %v4656_v17 = vld [vmem:[%s7554_s3 + $0x50] sm:$0xff] }
 0x32c   : > { %5566 = vmatprep.subr.mxu1 %v4707_v60  ;;  %v4690_v46 = vld [vmem:[%s7554_s3 + $0x160] sm:$0xff]  ;;  %5532 = vmatpush3.msra.mxu0 %v4659_v23  ;;  %v4689_v61 = vld [vmem:[%s7554_s3 + $0x158] sm:$0xff]  ;;  %v4688_v15 = vld [vmem:[%s7554_s3 + $0x150] sm:$0xff] }
 0x32d   : > { %5567 = vmatpush3.msra.mxu1 %v4691_v39  ;;  %5533 = vmatprep.subr.mxu0 %v4674_v40  ;;  %v4671_v0 = vld [vmem:[%s7554_s3 + $0xc8] sm:$0xff]  ;;  %v4670_v57 = vld [vmem:[%s7554_s3 + $0xc0] sm:$0xff]  ;;  %v4669_v42 = vld [vmem:[%s7554_s3 + $0xb8] sm:$0xff] }
 0x32e   : > { %5568 = vmatprep.subr.mxu1 %v4706_v33  ;;  %5534 = vmatpush3.msra.mxu0 %v4658_v45  ;;  %v4703_v54 = vld [vmem:[%s7554_s3 + $0x1c8] sm:$0xff]  ;;  %v4702_v58 = vld [vmem:[%s7554_s3 + $0x1c0] sm:$0xff]  ;;  %v4701_v21 = vld [vmem:[%s7554_s3 + $0x1b8] sm:$0xff] }
 0x32f   : > { %5569 = vmatpush3.msra.mxu1 %v4690_v46  ;;  %5535 = vmatprep.subr.mxu0 %v4673_v47  ;;  %v4655_v25 = vld [vmem:[%s7554_s3 + $0x48] sm:$0xff]  ;;  %v4654_v24 = vld [vmem:[%s7554_s3 + $0x40] sm:$0xff]  ;;  %v4653_v59 = vld [vmem:[%s7554_s3 + $0x38] sm:$0xff] }
 0x330   : > { %5570 = vmatprep.subr.mxu1 %v4705_v48  ;;  %5536 = vmatpush3.msra.mxu0 %v4657_v51  ;;  %v4687_v36 = vld [vmem:[%s7554_s3 + $0x148] sm:$0xff]  ;;  %v4686_v28 = vld [vmem:[%s7554_s3 + $0x140] sm:$0xff]  ;;  %v4685_v62 = vld [vmem:[%s7554_s3 + $0x138] sm:$0xff] }
 0x331   : > { %5571 = vmatpush3.msra.mxu1 %v4689_v61  ;;  %5537 = vmatprep.subr.mxu0 %v4672_v19  ;;  %v4668_v63 = vld [vmem:[%s7554_s3 + $0xb0] sm:$0xff]  ;;  %v4667_v5 = vld [vmem:[%s7554_s3 + $0xa8] sm:$0xff]  ;;  %v4666_v49 = vld [vmem:[%s7554_s3 + $0xa0] sm:$0xff] }
 0x332   : > { %5572 = vmatprep.subr.mxu1 %v4704_v27  ;;  %5538 = vmatpush3.msra.mxu0 %v4656_v17  ;;  %v4700_v2 = vld [vmem:[%s7554_s3 + $0x1b0] sm:$0xff]  ;;  %v4699_v6 = vld [vmem:[%s7554_s3 + $0x1a8] sm:$0xff]  ;;  %v4698_v52 = vld [vmem:[%s7554_s3 + $0x1a0] sm:$0xff] }
 0x333   : > { %5573 = vmatpush3.msra.mxu1 %v4688_v15  ;;  %5539 = vmatprep.subr.mxu0 %v4671_v0  ;;  %v4652_v3 = vld [vmem:[%s7554_s3 + $0x30] sm:$0xff]  ;;  %v4651_v9 = vld [vmem:[%s7554_s3 + $0x28] sm:$0xff]  ;;  %v4650_v41 = vld [vmem:[%s7554_s3 + $0x20] sm:$0xff] }
 0x334   : > { %5574 = vmatprep.subr.mxu1 %v4703_v54  ;;  %5540 = vmatpush3.msra.mxu0 %v4655_v25  ;;  %v4684_v4 = vld [vmem:[%s7554_s3 + $0x130] sm:$0xff]  ;;  %v4683_v12 = vld [vmem:[%s7554_s3 + $0x128] sm:$0xff]  ;;  %v4682_v44 = vld [vmem:[%s7554_s3 + $0x120] sm:$0xff] }
 0x335   : > { %5575 = vmatpush3.msra.mxu1 %v4687_v36  ;;  %5541 = vmatprep.subr.mxu0 %v4670_v57  ;;  %v4608_v20 = vld [vmem:[%s7553_s2] sm:$0xf]  ;;  %v4665_v30 = vld [vmem:[%s7554_s3 + $0x98] sm:$0xff]  ;;  %v4664_v29 = vld [vmem:[%s7554_s3 + $0x90] sm:$0xff] }
 0x336   : > { %5576 = vmatprep.subr.mxu1 %v4702_v58  ;;  %5542 = vmatpush3.msra.mxu0 %v4654_v24  ;;  %v4697_v43 = vld [vmem:[%s7554_s3 + $0x198] sm:$0xff]  ;;  %v4613_v55 = vrot.slane %v4608_v20, %v4612_v8  ;;  %v4617_v53 = vrot.slane %v4608_v20, %v4616_v50  ;;  %v4621_v22 = vrot.slane %v4608_v20, %v4620_v11  ;;  %v4696_v32 = vld [vmem:[%s7554_s3 + $0x190] sm:$0xff]  ;;  %v4663_v7 = vld [vmem:[%s7554_s3 + $0x88] sm:$0xff] }
 0x337   : > { %5577 = vmatpush3.msra.mxu1 %v4686_v28  ;;  %5543 = vmatprep.subr.mxu0 %v4669_v42  ;;  %v4649_v1 = vld [vmem:[%s7554_s3 + $0x18] sm:$0xff]  ;;  %v4625_v26 = vrot.slane %v4608_v20, %v4624_v31  ;;  %v4648_v13 = vld [vmem:[%s7554_s3 + $0x10] sm:$0xff]  ;;  %v4695_v34 = vld [vmem:[%s7554_s3 + $0x188] sm:$0xff] }
 0x338   : > { %5578 = vmatprep.subr.mxu1 %v4701_v21  ;;  %5544 = vmatpush3.msra.mxu0 %v4653_v59  ;;  %v4681_v18 = vld [vmem:[%s7554_s3 + $0x118] sm:$0xff]  ;;  %v4626_v10 = vcombine.low %v4613_v55, %v4617_v53  ;;  %v4680_v37 = vld [vmem:[%s7554_s3 + $0x110] sm:$0xff]  ;;  %v4647_v38 = vld [vmem:[%s7554_s3 + $0x8] sm:$0xff] }
 0x339   : > { %5579 = vmatpush3.msra.mxu1 %v4685_v62  ;;  %5545 = vmatprep.subr.mxu0 %v4668_v63  ;;  %v4627_v56 = vcombine.low %v4621_v22, %v4625_v26  ;;  %v4679_v16 = vld [vmem:[%s7554_s3 + $0x108] sm:$0xff]  ;;  %v4662_v23 = vld [vmem:[%s7554_s3 + $0x80] sm:$0xff] }
 0x33a   : > { %5580 = vmatprep.subr.mxu1 %v4700_v2  ;;  %5546 = vmatpush3.msra.mxu0 %v4652_v3  ;;  %v4634_v35 = vrot.slane %v4626_v10, %v7322_v14  ;;  %v4694_v39 = vld [vmem:[%s7554_s3 + $0x180] sm:$0xff] }
 0x33b   : > { %5581 = vmatpush3.msra.mxu1 %v4684_v4  ;;  %5547 = vmatprep.subr.mxu0 %v4667_v5  ;;  %v4641_v60 = vrot.slane %v4627_v56, %v7322_v14  ;;  %v4607_v40 = vld [vmem:[#allocation2] sm:$0xff] }
 0x33c   : > { %5582 = vmatprep.subr.mxu1 %v4699_v6  ;;  %5548 = vmatpush3.msra.mxu0 %v4651_v9  ;;  %v4646_v33 = vld [vmem:[%s7554_s3] sm:$0xff] }
 0x33d   : > { %5583 = vmatpush3.msra.mxu1 %v4683_v12  ;;  %5549 = vmatprep.subr.mxu0 %v4666_v49  ;;  %v4642_v45 = vcombine.low %v4634_v35, %v4641_v60  ;;  %v4678_v46 = vld [vmem:[%s7554_s3 + $0x100] sm:$0xff] }
 0x33e   : > { %5584 = vmatprep.subr.mxu1 %v4698_v52  ;;  %5550 = vmatpush3.msra.mxu0 %v4650_v41  ;;  %v5521_v54 = vld [vmem:[%s7555_s4] ss:$0 sm:$0xff] }
 0x33f   : > { %5585 = vmatpush3.msra.mxu1 %v4682_v44  ;;  %5551 = vmatprep.subr.mxu0 %v4665_v30  ;;  %v4644_v47 = vadd.f32 %v4642_v45, %v4607_v40 }
 0x340   : > { %5586 = vmatprep.subr.mxu1 %v4697_v43  ;;  %5552 = vmatpush3.msra.mxu0 %v4649_v1 }
 0x341   : > { %5587 = vmatpush3.msra.mxu1 %v4681_v18  ;;  %5553 = vmatprep.subr.mxu0 %v4664_v29  ;;  %v4645_v48 = vmax.f32 %v4644_v47, 0.0 }
 0x342   : > { %5588 = vmatprep.subr.mxu1 %v4696_v32  ;;  %5554 = vmatpush3.msra.mxu0 %v4648_v13 }
 0x343   : > { %5589 = vmatpush3.msra.mxu1 %v4680_v37  ;;  %5555 = vmatprep.subr.mxu0 %v4663_v7  ;;  %v4725_v51 = vrot.slane %v4645_v48, %v7322_v14  ;;  %v4718_v61 = vcombine.high %v4645_v48, %v4645_v48 }
 0x344   : > { %5590 = vmatprep.subr.mxu1 %v4695_v34  ;;  %5556 = vmatpush3.msra.mxu0 %v4647_v38 }
 0x345   : > { %5591 = vmatpush3.msra.mxu1 %v4679_v16  ;;  %5557 = vmatprep.subr.mxu0 %v4662_v23  ;;  %v4733_v19 = vcombine.high %v4725_v51, %v4725_v51  ;;  %v4732_v27 = vrot.slane %v4718_v61, %v7322_v14 }
 0x346   : > { %5592 = vmatprep.subr.mxu1 %v4694_v39  ;;  %5558 = vmatpush3.msra.mxu0 %v4646_v33 }
 0x347   : > { %5593 = vmatpush3.msra.mxu1 %v4678_v46  ;;  %4803 = vmatprep.mubr.f32.mxu0 %v4733_v19  ;;  %v4734_v17 = vcombine.high %v4732_v27, %v4732_v27 }
 0x348   : > { %4804 = vmatmul.mubr.f32.vlgmr.msra.gmra.mxu0 %v4725_v51 }
 0x349   : > { %4873 = vmatprep.mubr.f32.mxu1 %v4734_v17 }
 0x34a   : > { %4874 = vmatmul.mubr.f32.vlgmr.msra.gmra.mxu1 %v4732_v27 }
 0x408   : > { %v5559_v15 = vpop.f32.mrf.mxu0 }
 0x40a   : > { %v5594_v0 = vpop.f32.mrf.mxu1  ;;  %v5560_v25 = vpop.f32.mrf.mxu0 }
 0x40b   : > { %v5561_v36 = vadd.f32 %v5560_v25, %v5559_v15 }
 0x40c   : > { %v5595_v57 = vpop.f32.mrf.mxu1 }
 0x40d   : > { %v4806_v58 = vadd.f32 %v5561_v36, %v5521_v54  ;;  %v5596_v24 = vadd.f32 %v5595_v57, %v5594_v0 }
 0x40f   : > { %v4876_v28 = vadd.f32 %v5596_v24, %v4806_v58 }
 0x411   : > { %4880 = vst.msk [vmem:[#allocation3] sm:$0x3] %vm4879_vm0, %v4876_v28 }
 0x412 PF: > { %p5601_p7 = scmp.eq.s32.totalorder %s6557_s19, 2  ;;  %s6520_s23 = smov [#allocation3]  }
 0x413   : > { %s4888_s24 = sshll.u32 %s6520_s23, 4  ;;  %s4889_s24 = int_to_ptr.vmem [resolvable:$true] %s4888_s24 }
 0x414   : > { %s6481_s25 = scalar_lea.vmem %s4889_s24, 32  ;;  %p6488_p11 = scmp.lt.s32.totalorder %s4889_s24, %s4889_s24 }
 0x415   : > { %p6482_p8 = scmp.ne.s32.totalorder %s4889_s24, %s6481_s25  ;;  %p6489_p12 = scmp.lt.s32.totalorder %s6481_s25, %s6481_s25 }
 0x417   : > { %p6483_p9 = pnand %p6482_p8, %p5601_p7  ;;  %p6490_p13 = por %p6489_p12, %p6488_p11 }
 0x419   : > { %p6484_p10 = pneg %p6483_p9 }
 0x41b   : > { %p6491_p0 = pnand %p6490_p13, %p6484_p10 }
 0x41d   : > { %6494 = shalt.err (!%p6491_p0)
}
 0x41e   : > { %5598 = dma.vmem_to_hbm [thread:$0]  (%p5601_p7), %s4889_s24, 32, %s7556_s5, [#allocation4]  }
 0x41f   : > { %6510 = dma.done.wait (%p5601_p7), [#allocation4], 32  }
 0x420   : > { %6512 = vsyncadd (%p5601_p7), [#allocation4], 4294967264 }
 0x421 PF: > { %s16_s18 = sadd.s32 1, %s6515_s18  }
 0x422   : > { %p13_p1 = scmp.ge.s32.totalorder %s16_s18, 5  }
 0x424   :  { %15 = sbr.rel (!%p13_p1) target bundleno = 1 (0x1), region = 78 }
 0x429   :  { %4901 = vsyncpa [#allocation4], 1 }
 0x42a   :  { %4903 = vsyncpa [#allocation4 + $0x1], 1 }

</bundles_post_ra>
